<compile_context>
chip_gen: v7x
topology: tpu7x:2x2x1
jax: 0.10.0
libtpu: 0.0.40
codegen_flags: <defaults>
</compile_context>

<pallas_src>
import functools

import jax
import jax.numpy as jnp
from jax import lax
from jax.experimental import pallas as pl
from jax.experimental.pallas import tpu as pltpu

HIDDEN = 128     # nn.LSTM(hidden_size=128)
EMB_DIM = 64     # embedding_matrix.shape[1] (synthetic)
VOCAB = 50       # embedding_matrix.shape[0] (synthetic)
BATCH = 2
SEQ = 8
B_PAD = 8        # pad batch to a full sublane tile

_VMEM = pl.BlockSpec(memory_space=pltpu.MemorySpace.VMEM)
_ANY = pl.BlockSpec(memory_space=pl.ANY)


# ----------------------------------------------------------------------------
# Fused Pallas kernel
# ----------------------------------------------------------------------------
def _fused_bilstm_kernel(T, B, H,
                         x_ref,
                         wih0_ref, whh0f_ref, whh0b_ref, b0_ref,
                         wih1_hbm, whh1f_hbm, whh1b_hbm, b1_ref,
                         fc1w_ref, fc1b_ref, outw_ref, outb_ref,
                         o_ref,
                         proj_sc, out0_sc,
                         wih1_sc, whh1f_sc, whh1b_sc, dma_sem):
    """Whole BiLSTM forward.

    x_ref:        (T*B, E)    bf16 time-major flattened embedded input (B padded to 8)
    wih*_ref:     (Din, 8H)   bf16 direction-major gate columns [i,f,g,o]_fwd | [i,f,g,o]_bwd
    whh*f/b_ref:  (H, 4H)     bf16 dense per-direction recurrent weights
    b*_ref:       (1, 8H)     f32 combined biases (b_ih + b_hh), direction-major
    fc1/out:      FC head ((2H,64) bf16, (1,64) f32, (64,2) bf16, (1,2) f32)
    o_ref:        (B, 2)      f32 logits (rows >= real batch are padding)
    proj_sc:      (T*B, 8H)   f32 hoisted input projections (reused by both layers)
    out0_sc:      (T*B, 2H)   f32 layer-0 per-step output [h_fwd | h_bwd]
    wih1/whh1*_sc: VMEM landing buffers for the layer-1 weights (DMA'd in-kernel)
    """
    f32 = jnp.float32
    bf16 = jnp.bfloat16
    H4 = 4 * H

    # -- kick off layer-1 weight DMA; it overlaps with layer-0 compute --------
    cp_wih1 = pltpu.make_async_copy(wih1_hbm, wih1_sc, dma_sem.at[0])
    cp_whh1f = pltpu.make_async_copy(whh1f_hbm, whh1f_sc, dma_sem.at[1])
    cp_whh1b = pltpu.make_async_copy(whh1b_hbm, whh1b_sc, dma_sem.at[2])
    cp_wih1.start()
    cp_whh1f.start()
    cp_whh1b.start()

    def sig(v):
        # sigmoid(x) == 0.5 * (tanh(0.5*x) + 1): one EUP push per gate.
        return 0.5 * (jnp.tanh(0.5 * v) + 1.0)

    def run_layer(whh_f_ref, whh_b_ref, out_sc):
        """Runs one bidirectional layer off proj_sc.  Returns
        (h_fwd at final step, h_bwd at output position T-1)."""
        whh_f = whh_f_ref[...]                 # (H, 4H) bf16, loaded once
        whh_b = whh_b_ref[...]
        h_f = jnp.zeros((B, H), f32)
        c_f = jnp.zeros((B, H), f32)
        h_b = jnp.zeros((B, H), f32)
        c_b = jnp.zeros((B, H), f32)
        h_b_at_last = None
        for t in range(T):                     # fully unrolled (static T)
            tr = T - 1 - t                     # time index for the bwd dir
            # Tile-aligned, select-free per-step loads.
            xp_f = proj_sc[t * B:(t + 1) * B, 0:H4]
            xp_b = proj_sc[tr * B:(tr + 1) * B, H4:2 * H4]
            g_f = xp_f + jnp.dot(h_f.astype(bf16), whh_f,
                                 preferred_element_type=f32)
            g_b = xp_b + jnp.dot(h_b.astype(bf16), whh_b,
                                 preferred_element_type=f32)
            i_f = sig(g_f[:, 0 * H:1 * H])
            f_f = sig(g_f[:, 1 * H:2 * H])
            gg_f = jnp.tanh(g_f[:, 2 * H:3 * H])
            o_f = sig(g_f[:, 3 * H:4 * H])
            i_b = sig(g_b[:, 0 * H:1 * H])
            f_b = sig(g_b[:, 1 * H:2 * H])
            gg_b = jnp.tanh(g_b[:, 2 * H:3 * H])
            o_b = sig(g_b[:, 3 * H:4 * H])
            c_f = f_f * c_f + i_f * gg_f
            c_b = f_b * c_b + i_b * gg_b
            h_f = o_f * jnp.tanh(c_f)
            h_b = o_b * jnp.tanh(c_b)
            if out_sc is not None:
                out_sc[t * B:(t + 1) * B, 0:H] = h_f          # fwd output @ t
                out_sc[tr * B:(tr + 1) * B, H:2 * H] = h_b    # bwd output @ tr
            if t == 0:
                # bwd hidden after processing time T-1 == lstm_out[:, -1, H:]
                h_b_at_last = h_b
        return h_f, h_b_at_last

    # ---- layer 0 -------------------------------------------------------------
    # Hoisted input projection for the whole sequence, both directions.
    proj_sc[...] = (jnp.dot(x_ref[...], wih0_ref[...],
                            preferred_element_type=f32) + b0_ref[...])
    run_layer(whh0f_ref, whh0b_ref, out0_sc)

    # TODO(synk): inter-layer dropout (p=0.3) omitted — identity in eval mode.

    # ---- layer 1 -------------------------------------------------------------
    cp_wih1.wait()
    cp_whh1f.wait()
    cp_whh1b.wait()
    x1 = out0_sc[...].astype(bf16)             # (T*B, 2H)
    proj_sc[...] = (jnp.dot(x1, wih1_sc[...],
                            preferred_element_type=f32) + b1_ref[...])
    h1_f, h1_b = run_layer(whh1f_sc, whh1b_sc, None)

    # lstm_out[:, -1, :] = [h_fwd(T-1) | h_bwd(T-1)]
    last = jnp.concatenate([h1_f, h1_b], axis=1).astype(bf16)   # (B, 2H)

    # FC head: Linear -> ReLU -> (dropout: identity) -> Linear.
    hid = jnp.maximum(jnp.dot(last, fc1w_ref[...],
                              preferred_element_type=f32) + fc1b_ref[...], 0.0)
    o_ref[...] = (jnp.dot(hid.astype(bf16), outw_ref[...],
                          preferred_element_type=f32) + outb_ref[...])


# ----------------------------------------------------------------------------
# Wrapper
# ----------------------------------------------------------------------------
def bilstm_forward(ids, fused):
    B, T = ids.shape
    H = HIDDEN
    # Embedding lookup — plain-JAX glue, produced directly in time-major order,
    # padded to a full sublane tile and pre-cast to bf16 (matmul LHS only).
    x = fused["embedding"][ids.T]                             # (T, B, E) f32
    x = jnp.pad(x, ((0, 0), (0, B_PAD - B), (0, 0)))          # (T, 8, E)
    x = x.reshape(T * B_PAD, EMB_DIM).astype(jnp.bfloat16)    # (T*8, E)

    kernel = functools.partial(_fused_bilstm_kernel, T, B_PAD, H)
    out = pl.pallas_call(
        kernel,
        out_shape=jax.ShapeDtypeStruct((B_PAD, 2), jnp.float32),
        in_specs=[_VMEM,                               # x
                  _VMEM, _VMEM, _VMEM, _VMEM,          # layer-0 wih, whh_f, whh_b, b
                  _ANY, _ANY, _ANY, _VMEM,             # layer-1 wih, whh_f, whh_b (HBM), b
                  _VMEM, _VMEM, _VMEM, _VMEM],         # fc1_w, fc1_b, out_w, out_b
        out_specs=_VMEM,
        scratch_shapes=[
            pltpu.VMEM((T * B_PAD, 8 * H), jnp.float32),   # shared input-projection slab
            pltpu.VMEM((T * B_PAD, 2 * H), jnp.float32),   # layer-0 output slab
            pltpu.VMEM((2 * H, 8 * H), jnp.bfloat16),      # layer-1 W_ih landing buffer
            pltpu.VMEM((H, 4 * H), jnp.bfloat16),          # layer-1 W_hh fwd landing buffer
            pltpu.VMEM((H, 4 * H), jnp.bfloat16),          # layer-1 W_hh bwd landing buffer
            pltpu.SemaphoreType.DMA((3,)),
        ],
        cost_estimate=pl.CostEstimate(flops=76_000_000,
                                      transcendentals=164_000,
                                      bytes_accessed=1_400_000),
    )(x,
      fused["l0_wih"], fused["l0_whh_f"], fused["l0_whh_b"], fused["l0_b"],
      fused["l1_wih"], fused["l1_whh_f"], fused["l1_whh_b"], fused["l1_b"],
      fused["fc1_w"], fused["fc1_b"], fused["out_w"], fused["out_b"])
    return out[:B]


# ----------------------------------------------------------------------------
# Parameter init (PyTorch layout) + fused-layout preparation
# ----------------------------------------------------------------------------
def init_params(key):
    def uni(k, shape, bound):
        return jax.random.uniform(k, shape, jnp.float32, -bound, bound)

    keys = iter(jax.random.split(key, 32))
    params = {}
    params["embedding"] = jax.random.normal(next(keys), (VOCAB, EMB_DIM),
                                            jnp.float32)
    kb = 1.0 / jnp.sqrt(HIDDEN)
    for layer in range(2):
        d_in = EMB_DIM if layer == 0 else 2 * HIDDEN
        for d in range(2):                                  # 0 = fwd, 1 = bwd
            w_ih = uni(next(keys), (4 * HIDDEN, d_in), kb)  # PyTorch layout
            w_hh = uni(next(keys), (4 * HIDDEN, HIDDEN), kb)
            b_ih = uni(next(keys), (4 * HIDDEN,), kb)
            b_hh = uni(next(keys), (4 * HIDDEN,), kb)
            params[f"lstm_l{layer}_d{d}"] = (w_ih, w_hh, b_ih + b_hh)
    k1 = 1.0 / jnp.sqrt(2 * HIDDEN)
    params["fc1_w"] = uni(next(keys), (2 * HIDDEN, 64), k1)
    params["fc1_b"] = uni(next(keys), (64,), k1)
    k2 = 1.0 / jnp.sqrt(64)
    params["out_w"] = uni(next(keys), (64, 2), k2)
    params["out_b"] = uni(next(keys), (2,), k2)
    return params


def prepare_fused_params(params):
    """Direction-major, MXU-friendly (bf16) weight layout.

    Per layer:
      l{L}_wih:   (Din, 8H) bf16, columns [i,f,g,o]_fwd | [i,f,g,o]_bwd
      l{L}_whh_f: (H, 4H)   bf16 dense fwd recurrent matrix
      l{L}_whh_b: (H, 4H)   bf16 dense bwd recurrent matrix
      l{L}_b:     (1, 8H)   f32 combined b_ih + b_hh, same column order
    """
    bf16 = jnp.bfloat16
    fused = {"embedding": params["embedding"],
             "fc1_w": params["fc1_w"].astype(bf16),
             "fc1_b": params["fc1_b"].reshape(1, -1),
             "out_w": params["out_w"].astype(bf16),
             "out_b": params["out_b"].reshape(1, -1)}
    for layer in range(2):
        wf, hf, bf = params[f"lstm_l{layer}_d0"]   # (4H,Din), (4H,H), (4H,)
        wb, hb, bb = params[f"lstm_l{layer}_d1"]
        fused[f"l{layer}_wih"] = jnp.concatenate([wf.T, wb.T],
                                                 axis=1).astype(bf16)
        fused[f"l{layer}_whh_f"] = hf.T.astype(bf16)
        fused[f"l{layer}_whh_b"] = hb.T.astype(bf16)
        fused[f"l{layer}_b"] = jnp.concatenate([bf, bb]).reshape(1, -1)
    return fused


# ----------------------------------------------------------------------------
# Pure-JAX reference (independent check, PyTorch-layout f32 weights)
# ----------------------------------------------------------------------------
def _lstm_dir_ref(x_btd, w_ih, w_hh, b):
    B = x_btd.shape[0]
    H = w_hh.shape[1]

    def step(carry, x_t):
        h, c = carry
        gates = x_t @ w_ih.T + h @ w_hh.T + b
        i = jax.nn.sigmoid(gates[:, :H])
        f = jax.nn.sigmoid(gates[:, H:2 * H])
        g = jnp.tanh(gates[:, 2 * H:3 * H])
        o = jax.nn.sigmoid(gates[:, 3 * H:])
        c = f * c + i * g
        h = o * jnp.tanh(c)
        return (h, c), h

    x_tbd = jnp.transpose(x_btd, (1, 0, 2))
    (_, _), hs = lax.scan(step, (jnp.zeros((B, H)), jnp.zeros((B, H))), x_tbd)
    return jnp.transpose(hs, (1, 0, 2))


def bilstm_forward_ref(ids, params):
    x = params["embedding"][ids]
    for layer in range(2):
        outs = []
        for d in range(2):
            w_ih, w_hh, b = params[f"lstm_l{layer}_d{d}"]
            xs = x if d == 0 else x[:, ::-1, :]
            h = _lstm_dir_ref(xs, w_ih, w_hh, b)
            if d == 1:
                h = h[:, ::-1, :]
            outs.append(h)
        x = jnp.concatenate(outs, axis=-1)
    last = x[:, -1, :]
    h = jnp.maximum(last @ params["fc1_w"] + params["fc1_b"], 0.0)
    return h @ params["out_w"] + params["out_b"]


# ----------------------------------------------------------------------------
if __name__ == "__main__":
    key = jax.random.PRNGKey(0)
    k_param, k_ids = jax.random.split(key)
    params = init_params(k_param)
    fused = prepare_fused_params(params)
    ids = jax.random.randint(k_ids, (BATCH, SEQ), 0, VOCAB, dtype=jnp.int32)

    out = jax.jit(bilstm_forward)(ids, fused)
    out = jax.block_until_ready(out)

    ref = bilstm_forward_ref(ids, params)
    assert out.shape == (BATCH, 2) and out.dtype == jnp.float32
    # bf16 matmul operands (f32 accumulation) vs. all-f32 reference.
    assert jnp.allclose(out, ref, atol=3e-2, rtol=3e-2), (out, ref)

    print("KERNEL_OK")
</pallas_src>

<mosaic_0001>
module attributes {stable_mosaic.version = 11 : i64} {
  func.func @_fused_bilstm_kernel(%arg0: memref<64x64xbf16, #tpu.memory_space<vmem>>, %arg1: memref<64x1024xbf16, #tpu.memory_space<vmem>>, %arg2: memref<128x512xbf16, #tpu.memory_space<vmem>>, %arg3: memref<128x512xbf16, #tpu.memory_space<vmem>>, %arg4: memref<1x1024xf32, #tpu.memory_space<vmem>>, %arg5: memref<256x1024xbf16, #tpu.memory_space<any>>, %arg6: memref<128x512xbf16, #tpu.memory_space<any>>, %arg7: memref<128x512xbf16, #tpu.memory_space<any>>, %arg8: memref<1x1024xf32, #tpu.memory_space<vmem>>, %arg9: memref<256x64xbf16, #tpu.memory_space<vmem>>, %arg10: memref<1x64xf32, #tpu.memory_space<vmem>>, %arg11: memref<64x2xbf16, #tpu.memory_space<vmem>>, %arg12: memref<1x2xf32, #tpu.memory_space<vmem>>, %arg13: memref<8x2xf32, #tpu.memory_space<vmem>>, %arg14: memref<64x1024xf32, #tpu.memory_space<vmem>>, %arg15: memref<64x256xf32, #tpu.memory_space<vmem>>, %arg16: memref<256x1024xbf16, #tpu.memory_space<vmem>>, %arg17: memref<128x512xbf16, #tpu.memory_space<vmem>>, %arg18: memref<128x512xbf16, #tpu.memory_space<vmem>>, %arg19: memref<3x!tpu.dma_semaphore, #tpu.memory_space<semaphore_mem>>) attributes {dimension_semantics = [], scalar_prefetch = 0 : i64, scratch_operands = 6 : i64, tpu.core_type = #tpu.core_type<tc>} {
    %c0_i32 = arith.constant 0 : i32
    %0 = tpu.memref_slice %arg19[%c0_i32] : memref<3x!tpu.dma_semaphore, #tpu.memory_space<semaphore_mem>> -> memref<1x!tpu.dma_semaphore, #tpu.memory_space<semaphore_mem>>
    %1 = tpu.memref_squeeze %0 : memref<1x!tpu.dma_semaphore, #tpu.memory_space<semaphore_mem>> -> memref<!tpu.dma_semaphore, #tpu.memory_space<semaphore_mem>>
    tpu.enqueue_dma source(%arg5 : memref<256x1024xbf16, #tpu.memory_space<any>>) target(%arg16 : memref<256x1024xbf16, #tpu.memory_space<vmem>>) target_semaphore(%1 : memref<!tpu.dma_semaphore, #tpu.memory_space<semaphore_mem>>)
    %c1_i32 = arith.constant 1 : i32
    %2 = tpu.memref_slice %arg19[%c1_i32] : memref<3x!tpu.dma_semaphore, #tpu.memory_space<semaphore_mem>> -> memref<1x!tpu.dma_semaphore, #tpu.memory_space<semaphore_mem>>
    %3 = tpu.memref_squeeze %2 : memref<1x!tpu.dma_semaphore, #tpu.memory_space<semaphore_mem>> -> memref<!tpu.dma_semaphore, #tpu.memory_space<semaphore_mem>>
    tpu.enqueue_dma source(%arg6 : memref<128x512xbf16, #tpu.memory_space<any>>) target(%arg17 : memref<128x512xbf16, #tpu.memory_space<vmem>>) target_semaphore(%3 : memref<!tpu.dma_semaphore, #tpu.memory_space<semaphore_mem>>)
    %c2_i32 = arith.constant 2 : i32
    %4 = tpu.memref_slice %arg19[%c2_i32] : memref<3x!tpu.dma_semaphore, #tpu.memory_space<semaphore_mem>> -> memref<1x!tpu.dma_semaphore, #tpu.memory_space<semaphore_mem>>
    %5 = tpu.memref_squeeze %4 : memref<1x!tpu.dma_semaphore, #tpu.memory_space<semaphore_mem>> -> memref<!tpu.dma_semaphore, #tpu.memory_space<semaphore_mem>>
    tpu.enqueue_dma source(%arg7 : memref<128x512xbf16, #tpu.memory_space<any>>) target(%arg18 : memref<128x512xbf16, #tpu.memory_space<vmem>>) target_semaphore(%5 : memref<!tpu.dma_semaphore, #tpu.memory_space<semaphore_mem>>)
    %c0 = arith.constant 0 : index
    %c0_0 = arith.constant 0 : index
    %6 = vector.load %arg0[%c0, %c0_0] : memref<64x64xbf16, #tpu.memory_space<vmem>>, vector<64x64xbf16>
    %c0_1 = arith.constant 0 : index
    %c0_2 = arith.constant 0 : index
    %7 = vector.load %arg1[%c0_1, %c0_2] : memref<64x1024xbf16, #tpu.memory_space<vmem>>, vector<64x1024xbf16>
    %cst = arith.constant dense<0.000000e+00> : vector<64x1024xf32>
    %8 = tpu.matmul %6, %7, %cst {dimension_numbers = #tpu.dot_dimension_numbers<[1], [0], [0], [1], [0, 0, 1, 1], [], []>} : vector<64x64xbf16>, vector<64x1024xbf16>, vector<64x1024xf32> -> vector<64x1024xf32>
    %c0_3 = arith.constant 0 : index
    %c0_4 = arith.constant 0 : index
    %9 = vector.load %arg4[%c0_3, %c0_4] : memref<1x1024xf32, #tpu.memory_space<vmem>>, vector<1x1024xf32>
    %10 = vector.broadcast %9 : vector<1x1024xf32> to vector<64x1024xf32>
    %11 = arith.addf %8, %10 : vector<64x1024xf32>
    %c0_5 = arith.constant 0 : index
    %c0_6 = arith.constant 0 : index
    %12 = vector.load %arg14[%c0_5, %c0_6] : memref<64x1024xf32, #tpu.memory_space<vmem>>, vector<64x1024xf32>
    tpu.vector_store %arg14[%c0_5, %c0_6], %11 {strides = array<i32>} : memref<64x1024xf32, #tpu.memory_space<vmem>>, vector<64x1024xf32>,
    %c0_7 = arith.constant 0 : index
    %c0_8 = arith.constant 0 : index
    %13 = vector.load %arg2[%c0_7, %c0_8] : memref<128x512xbf16, #tpu.memory_space<vmem>>, vector<128x512xbf16>
    %c0_9 = arith.constant 0 : index
    %c0_10 = arith.constant 0 : index
    %14 = vector.load %arg3[%c0_9, %c0_10] : memref<128x512xbf16, #tpu.memory_space<vmem>>, vector<128x512xbf16>
    %cst_11 = arith.constant 0.000000e+00 : f32
    %15 = vector.broadcast %cst_11 : f32 to vector<8x128xf32>
    %cst_12 = arith.constant 0.000000e+00 : f32
    %16 = vector.broadcast %cst_12 : f32 to vector<8x128xf32>
    %cst_13 = arith.constant 0.000000e+00 : f32
    %17 = vector.broadcast %cst_13 : f32 to vector<8x128xf32>
    %cst_14 = arith.constant 0.000000e+00 : f32
    %18 = vector.broadcast %cst_14 : f32 to vector<8x128xf32>
    %c0_15 = arith.constant 0 : index
    %c0_16 = arith.constant 0 : index
    %19 = vector.load %arg14[%c0_15, %c0_16] : memref<64x1024xf32, #tpu.memory_space<vmem>>, vector<8x512xf32>
    %c56 = arith.constant 56 : index
    %c512 = arith.constant 512 : index
    %20 = vector.load %arg14[%c56, %c512] : memref<64x1024xf32, #tpu.memory_space<vmem>>, vector<8x512xf32>
    %21 = arith.truncf %15 : vector<8x128xf32> to vector<8x128xbf16>
    %cst_17 = arith.constant dense<0.000000e+00> : vector<8x512xf32>
    %22 = tpu.matmul %21, %13, %cst_17 {dimension_numbers = #tpu.dot_dimension_numbers<[1], [0], [0], [1], [0, 0, 1, 1], [], []>} : vector<8x128xbf16>, vector<128x512xbf16>, vector<8x512xf32> -> vector<8x512xf32>
    %23 = arith.addf %19, %22 : vector<8x512xf32>
    %24 = arith.truncf %17 : vector<8x128xf32> to vector<8x128xbf16>
    %cst_18 = arith.constant dense<0.000000e+00> : vector<8x512xf32>
    %25 = tpu.matmul %24, %14, %cst_18 {dimension_numbers = #tpu.dot_dimension_numbers<[1], [0], [0], [1], [0, 0, 1, 1], [], []>} : vector<8x128xbf16>, vector<128x512xbf16>, vector<8x512xf32> -> vector<8x512xf32>
    %26 = arith.addf %20, %25 : vector<8x512xf32>
    %27 = vector.extract_strided_slice %23 {offsets = [0, 0], sizes = [8, 128], strides = [1, 1]} : vector<8x512xf32> to vector<8x128xf32>
    %cst_19 = arith.constant 5.000000e-01 : f32
    %28 = vector.broadcast %cst_19 : f32 to vector<8x128xf32>
    %29 = arith.mulf %28, %27 : vector<8x128xf32>
    %30 = math.tanh %29 : vector<8x128xf32>
    %cst_20 = arith.constant 1.000000e+00 : f32
    %31 = vector.broadcast %cst_20 : f32 to vector<8x128xf32>
    %32 = arith.addf %30, %31 : vector<8x128xf32>
    %cst_21 = arith.constant 5.000000e-01 : f32
    %33 = vector.broadcast %cst_21 : f32 to vector<8x128xf32>
    %34 = arith.mulf %33, %32 : vector<8x128xf32>
    %35 = vector.extract_strided_slice %23 {offsets = [0, 128], sizes = [8, 128], strides = [1, 1]} : vector<8x512xf32> to vector<8x128xf32>
    %cst_22 = arith.constant 5.000000e-01 : f32
    %36 = vector.broadcast %cst_22 : f32 to vector<8x128xf32>
    %37 = arith.mulf %36, %35 : vector<8x128xf32>
    %38 = math.tanh %37 : vector<8x128xf32>
    %cst_23 = arith.constant 1.000000e+00 : f32
    %39 = vector.broadcast %cst_23 : f32 to vector<8x128xf32>
    %40 = arith.addf %38, %39 : vector<8x128xf32>
    %cst_24 = arith.constant 5.000000e-01 : f32
    %41 = vector.broadcast %cst_24 : f32 to vector<8x128xf32>
    %42 = arith.mulf %41, %40 : vector<8x128xf32>
    %43 = vector.extract_strided_slice %23 {offsets = [0, 256], sizes = [8, 128], strides = [1, 1]} : vector<8x512xf32> to vector<8x128xf32>
    %44 = math.tanh %43 : vector<8x128xf32>
    %45 = vector.extract_strided_slice %23 {offsets = [0, 384], sizes = [8, 128], strides = [1, 1]} : vector<8x512xf32> to vector<8x128xf32>
    %cst_25 = arith.constant 5.000000e-01 : f32
    %46 = vector.broadcast %cst_25 : f32 to vector<8x128xf32>
    %47 = arith.mulf %46, %45 : vector<8x128xf32>
    %48 = math.tanh %47 : vector<8x128xf32>
    %cst_26 = arith.constant 1.000000e+00 : f32
    %49 = vector.broadcast %cst_26 : f32 to vector<8x128xf32>
    %50 = arith.addf %48, %49 : vector<8x128xf32>
    %cst_27 = arith.constant 5.000000e-01 : f32
    %51 = vector.broadcast %cst_27 : f32 to vector<8x128xf32>
    %52 = arith.mulf %51, %50 : vector<8x128xf32>
    %53 = vector.extract_strided_slice %26 {offsets = [0, 0], sizes = [8, 128], strides = [1, 1]} : vector<8x512xf32> to vector<8x128xf32>
    %cst_28 = arith.constant 5.000000e-01 : f32
    %54 = vector.broadcast %cst_28 : f32 to vector<8x128xf32>
    %55 = arith.mulf %54, %53 : vector<8x128xf32>
    %56 = math.tanh %55 : vector<8x128xf32>
    %cst_29 = arith.constant 1.000000e+00 : f32
    %57 = vector.broadcast %cst_29 : f32 to vector<8x128xf32>
    %58 = arith.addf %56, %57 : vector<8x128xf32>
    %cst_30 = arith.constant 5.000000e-01 : f32
    %59 = vector.broadcast %cst_30 : f32 to vector<8x128xf32>
    %60 = arith.mulf %59, %58 : vector<8x128xf32>
    %61 = vector.extract_strided_slice %26 {offsets = [0, 128], sizes = [8, 128], strides = [1, 1]} : vector<8x512xf32> to vector<8x128xf32>
    %cst_31 = arith.constant 5.000000e-01 : f32
    %62 = vector.broadcast %cst_31 : f32 to vector<8x128xf32>
    %63 = arith.mulf %62, %61 : vector<8x128xf32>
    %64 = math.tanh %63 : vector<8x128xf32>
    %cst_32 = arith.constant 1.000000e+00 : f32
    %65 = vector.broadcast %cst_32 : f32 to vector<8x128xf32>
    %66 = arith.addf %64, %65 : vector<8x128xf32>
    %cst_33 = arith.constant 5.000000e-01 : f32
    %67 = vector.broadcast %cst_33 : f32 to vector<8x128xf32>
    %68 = arith.mulf %67, %66 : vector<8x128xf32>
    %69 = vector.extract_strided_slice %26 {offsets = [0, 256], sizes = [8, 128], strides = [1, 1]} : vector<8x512xf32> to vector<8x128xf32>
    %70 = math.tanh %69 : vector<8x128xf32>
    %71 = vector.extract_strided_slice %26 {offsets = [0, 384], sizes = [8, 128], strides = [1, 1]} : vector<8x512xf32> to vector<8x128xf32>
    %cst_34 = arith.constant 5.000000e-01 : f32
    %72 = vector.broadcast %cst_34 : f32 to vector<8x128xf32>
    %73 = arith.mulf %72, %71 : vector<8x128xf32>
    %74 = math.tanh %73 : vector<8x128xf32>
    %cst_35 = arith.constant 1.000000e+00 : f32
    %75 = vector.broadcast %cst_35 : f32 to vector<8x128xf32>
    %76 = arith.addf %74, %75 : vector<8x128xf32>
    %cst_36 = arith.constant 5.000000e-01 : f32
    %77 = vector.broadcast %cst_36 : f32 to vector<8x128xf32>
    %78 = arith.mulf %77, %76 : vector<8x128xf32>
    %79 = arith.mulf %42, %16 : vector<8x128xf32>
    %80 = arith.mulf %34, %44 : vector<8x128xf32>
    %81 = arith.addf %79, %80 : vector<8x128xf32>
    %82 = arith.mulf %68, %18 : vector<8x128xf32>
    %83 = arith.mulf %60, %70 : vector<8x128xf32>
    %84 = arith.addf %82, %83 : vector<8x128xf32>
    %85 = math.tanh %81 : vector<8x128xf32>
    %86 = arith.mulf %52, %85 : vector<8x128xf32>
    %87 = math.tanh %84 : vector<8x128xf32>
    %88 = arith.mulf %78, %87 : vector<8x128xf32>
    %c0_37 = arith.constant 0 : index
    %c0_38 = arith.constant 0 : index
    %89 = vector.load %arg15[%c0_37, %c0_38] : memref<64x256xf32, #tpu.memory_space<vmem>>, vector<8x128xf32>
    tpu.vector_store %arg15[%c0_37, %c0_38], %86 {strides = array<i32>} : memref<64x256xf32, #tpu.memory_space<vmem>>, vector<8x128xf32>,
    %c56_39 = arith.constant 56 : index
    %c128 = arith.constant 128 : index
    %90 = vector.load %arg15[%c56_39, %c128] : memref<64x256xf32, #tpu.memory_space<vmem>>, vector<8x128xf32>
    tpu.vector_store %arg15[%c56_39, %c128], %88 {strides = array<i32>} : memref<64x256xf32, #tpu.memory_space<vmem>>, vector<8x128xf32>,
    %c8 = arith.constant 8 : index
    %c0_40 = arith.constant 0 : index
    %91 = vector.load %arg14[%c8, %c0_40] : memref<64x1024xf32, #tpu.memory_space<vmem>>, vector<8x512xf32>
    %c48 = arith.constant 48 : index
    %c512_41 = arith.constant 512 : index
    %92 = vector.load %arg14[%c48, %c512_41] : memref<64x1024xf32, #tpu.memory_space<vmem>>, vector<8x512xf32>
    %93 = arith.truncf %86 : vector<8x128xf32> to vector<8x128xbf16>
    %cst_42 = arith.constant dense<0.000000e+00> : vector<8x512xf32>
    %94 = tpu.matmul %93, %13, %cst_42 {dimension_numbers = #tpu.dot_dimension_numbers<[1], [0], [0], [1], [0, 0, 1, 1], [], []>} : vector<8x128xbf16>, vector<128x512xbf16>, vector<8x512xf32> -> vector<8x512xf32>
    %95 = arith.addf %91, %94 : vector<8x512xf32>
    %96 = arith.truncf %88 : vector<8x128xf32> to vector<8x128xbf16>
    %cst_43 = arith.constant dense<0.000000e+00> : vector<8x512xf32>
    %97 = tpu.matmul %96, %14, %cst_43 {dimension_numbers = #tpu.dot_dimension_numbers<[1], [0], [0], [1], [0, 0, 1, 1], [], []>} : vector<8x128xbf16>, vector<128x512xbf16>, vector<8x512xf32> -> vector<8x512xf32>
    %98 = arith.addf %92, %97 : vector<8x512xf32>
    %99 = vector.extract_strided_slice %95 {offsets = [0, 0], sizes = [8, 128], strides = [1, 1]} : vector<8x512xf32> to vector<8x128xf32>
    %cst_44 = arith.constant 5.000000e-01 : f32
    %100 = vector.broadcast %cst_44 : f32 to vector<8x128xf32>
    %101 = arith.mulf %100, %99 : vector<8x128xf32>
    %102 = math.tanh %101 : vector<8x128xf32>
    %cst_45 = arith.constant 1.000000e+00 : f32
    %103 = vector.broadcast %cst_45 : f32 to vector<8x128xf32>
    %104 = arith.addf %102, %103 : vector<8x128xf32>
    %cst_46 = arith.constant 5.000000e-01 : f32
    %105 = vector.broadcast %cst_46 : f32 to vector<8x128xf32>
    %106 = arith.mulf %105, %104 : vector<8x128xf32>
    %107 = vector.extract_strided_slice %95 {offsets = [0, 128], sizes = [8, 128], strides = [1, 1]} : vector<8x512xf32> to vector<8x128xf32>
    %cst_47 = arith.constant 5.000000e-01 : f32
    %108 = vector.broadcast %cst_47 : f32 to vector<8x128xf32>
    %109 = arith.mulf %108, %107 : vector<8x128xf32>
    %110 = math.tanh %109 : vector<8x128xf32>
    %cst_48 = arith.constant 1.000000e+00 : f32
    %111 = vector.broadcast %cst_48 : f32 to vector<8x128xf32>
    %112 = arith.addf %110, %111 : vector<8x128xf32>
    %cst_49 = arith.constant 5.000000e-01 : f32
    %113 = vector.broadcast %cst_49 : f32 to vector<8x128xf32>
    %114 = arith.mulf %113, %112 : vector<8x128xf32>
    %115 = vector.extract_strided_slice %95 {offsets = [0, 256], sizes = [8, 128], strides = [1, 1]} : vector<8x512xf32> to vector<8x128xf32>
    %116 = math.tanh %115 : vector<8x128xf32>
    %117 = vector.extract_strided_slice %95 {offsets = [0, 384], sizes = [8, 128], strides = [1, 1]} : vector<8x512xf32> to vector<8x128xf32>
    %cst_50 = arith.constant 5.000000e-01 : f32
    %118 = vector.broadcast %cst_50 : f32 to vector<8x128xf32>
    %119 = arith.mulf %118, %117 : vector<8x128xf32>
    %120 = math.tanh %119 : vector<8x128xf32>
    %cst_51 = arith.constant 1.000000e+00 : f32
    %121 = vector.broadcast %cst_51 : f32 to vector<8x128xf32>
    %122 = arith.addf %120, %121 : vector<8x128xf32>
    %cst_52 = arith.constant 5.000000e-01 : f32
    %123 = vector.broadcast %cst_52 : f32 to vector<8x128xf32>
    %124 = arith.mulf %123, %122 : vector<8x128xf32>
    %125 = vector.extract_strided_slice %98 {offsets = [0, 0], sizes = [8, 128], strides = [1, 1]} : vector<8x512xf32> to vector<8x128xf32>
    %cst_53 = arith.constant 5.000000e-01 : f32
    %126 = vector.broadcast %cst_53 : f32 to vector<8x128xf32>
    %127 = arith.mulf %126, %125 : vector<8x128xf32>
    %128 = math.tanh %127 : vector<8x128xf32>
    %cst_54 = arith.constant 1.000000e+00 : f32
    %129 = vector.broadcast %cst_54 : f32 to vector<8x128xf32>
    %130 = arith.addf %128, %129 : vector<8x128xf32>
    %cst_55 = arith.constant 5.000000e-01 : f32
    %131 = vector.broadcast %cst_55 : f32 to vector<8x128xf32>
    %132 = arith.mulf %131, %130 : vector<8x128xf32>
    %133 = vector.extract_strided_slice %98 {offsets = [0, 128], sizes = [8, 128], strides = [1, 1]} : vector<8x512xf32> to vector<8x128xf32>
    %cst_56 = arith.constant 5.000000e-01 : f32
    %134 = vector.broadcast %cst_56 : f32 to vector<8x128xf32>
    %135 = arith.mulf %134, %133 : vector<8x128xf32>
    %136 = math.tanh %135 : vector<8x128xf32>
    %cst_57 = arith.constant 1.000000e+00 : f32
    %137 = vector.broadcast %cst_57 : f32 to vector<8x128xf32>
    %138 = arith.addf %136, %137 : vector<8x128xf32>
    %cst_58 = arith.constant 5.000000e-01 : f32
    %139 = vector.broadcast %cst_58 : f32 to vector<8x128xf32>
    %140 = arith.mulf %139, %138 : vector<8x128xf32>
    %141 = vector.extract_strided_slice %98 {offsets = [0, 256], sizes = [8, 128], strides = [1, 1]} : vector<8x512xf32> to vector<8x128xf32>
    %142 = math.tanh %141 : vector<8x128xf32>
    %143 = vector.extract_strided_slice %98 {offsets = [0, 384], sizes = [8, 128], strides = [1, 1]} : vector<8x512xf32> to vector<8x128xf32>
    %cst_59 = arith.constant 5.000000e-01 : f32
    %144 = vector.broadcast %cst_59 : f32 to vector<8x128xf32>
    %145 = arith.mulf %144, %143 : vector<8x128xf32>
    %146 = math.tanh %145 : vector<8x128xf32>
    %cst_60 = arith.constant 1.000000e+00 : f32
    %147 = vector.broadcast %cst_60 : f32 to vector<8x128xf32>
    %148 = arith.addf %146, %147 : vector<8x128xf32>
    %cst_61 = arith.constant 5.000000e-01 : f32
    %149 = vector.broadcast %cst_61 : f32 to vector<8x128xf32>
    %150 = arith.mulf %149, %148 : vector<8x128xf32>
    %151 = arith.mulf %114, %81 : vector<8x128xf32>
    %152 = arith.mulf %106, %116 : vector<8x128xf32>
    %153 = arith.addf %151, %152 : vector<8x128xf32>
    %154 = arith.mulf %140, %84 : vector<8x128xf32>
    %155 = arith.mulf %132, %142 : vector<8x128xf32>
    %156 = arith.addf %154, %155 : vector<8x128xf32>
    %157 = math.tanh %153 : vector<8x128xf32>
    %158 = arith.mulf %124, %157 : vector<8x128xf32>
    %159 = math.tanh %156 : vector<8x128xf32>
    %160 = arith.mulf %150, %159 : vector<8x128xf32>
    %c8_62 = arith.constant 8 : index
    %c0_63 = arith.constant 0 : index
    %161 = vector.load %arg15[%c8_62, %c0_63] : memref<64x256xf32, #tpu.memory_space<vmem>>, vector<8x128xf32>
    tpu.vector_store %arg15[%c8_62, %c0_63], %158 {strides = array<i32>} : memref<64x256xf32, #tpu.memory_space<vmem>>, vector<8x128xf32>,
    %c48_64 = arith.constant 48 : index
    %c128_65 = arith.constant 128 : index
    %162 = vector.load %arg15[%c48_64, %c128_65] : memref<64x256xf32, #tpu.memory_space<vmem>>, vector<8x128xf32>
    tpu.vector_store %arg15[%c48_64, %c128_65], %160 {strides = array<i32>} : memref<64x256xf32, #tpu.memory_space<vmem>>, vector<8x128xf32>,
    %c16 = arith.constant 16 : index
    %c0_66 = arith.constant 0 : index
    %163 = vector.load %arg14[%c16, %c0_66] : memref<64x1024xf32, #tpu.memory_space<vmem>>, vector<8x512xf32>
    %c40 = arith.constant 40 : index
    %c512_67 = arith.constant 512 : index
    %164 = vector.load %arg14[%c40, %c512_67] : memref<64x1024xf32, #tpu.memory_space<vmem>>, vector<8x512xf32>
    %165 = arith.truncf %158 : vector<8x128xf32> to vector<8x128xbf16>
    %cst_68 = arith.constant dense<0.000000e+00> : vector<8x512xf32>
    %166 = tpu.matmul %165, %13, %cst_68 {dimension_numbers = #tpu.dot_dimension_numbers<[1], [0], [0], [1], [0, 0, 1, 1], [], []>} : vector<8x128xbf16>, vector<128x512xbf16>, vector<8x512xf32> -> vector<8x512xf32>
    %167 = arith.addf %163, %166 : vector<8x512xf32>
    %168 = arith.truncf %160 : vector<8x128xf32> to vector<8x128xbf16>
    %cst_69 = arith.constant dense<0.000000e+00> : vector<8x512xf32>
    %169 = tpu.matmul %168, %14, %cst_69 {dimension_numbers = #tpu.dot_dimension_numbers<[1], [0], [0], [1], [0, 0, 1, 1], [], []>} : vector<8x128xbf16>, vector<128x512xbf16>, vector<8x512xf32> -> vector<8x512xf32>
    %170 = arith.addf %164, %169 : vector<8x512xf32>
    %171 = vector.extract_strided_slice %167 {offsets = [0, 0], sizes = [8, 128], strides = [1, 1]} : vector<8x512xf32> to vector<8x128xf32>
    %cst_70 = arith.constant 5.000000e-01 : f32
    %172 = vector.broadcast %cst_70 : f32 to vector<8x128xf32>
    %173 = arith.mulf %172, %171 : vector<8x128xf32>
    %174 = math.tanh %173 : vector<8x128xf32>
    %cst_71 = arith.constant 1.000000e+00 : f32
    %175 = vector.broadcast %cst_71 : f32 to vector<8x128xf32>
    %176 = arith.addf %174, %175 : vector<8x128xf32>
    %cst_72 = arith.constant 5.000000e-01 : f32
    %177 = vector.broadcast %cst_72 : f32 to vector<8x128xf32>
    %178 = arith.mulf %177, %176 : vector<8x128xf32>
    %179 = vector.extract_strided_slice %167 {offsets = [0, 128], sizes = [8, 128], strides = [1, 1]} : vector<8x512xf32> to vector<8x128xf32>
    %cst_73 = arith.constant 5.000000e-01 : f32
    %180 = vector.broadcast %cst_73 : f32 to vector<8x128xf32>
    %181 = arith.mulf %180, %179 : vector<8x128xf32>
    %182 = math.tanh %181 : vector<8x128xf32>
    %cst_74 = arith.constant 1.000000e+00 : f32
    %183 = vector.broadcast %cst_74 : f32 to vector<8x128xf32>
    %184 = arith.addf %182, %183 : vector<8x128xf32>
    %cst_75 = arith.constant 5.000000e-01 : f32
    %185 = vector.broadcast %cst_75 : f32 to vector<8x128xf32>
    %186 = arith.mulf %185, %184 : vector<8x128xf32>
    %187 = vector.extract_strided_slice %167 {offsets = [0, 256], sizes = [8, 128], strides = [1, 1]} : vector<8x512xf32> to vector<8x128xf32>
    %188 = math.tanh %187 : vector<8x128xf32>
    %189 = vector.extract_strided_slice %167 {offsets = [0, 384], sizes = [8, 128], strides = [1, 1]} : vector<8x512xf32> to vector<8x128xf32>
    %cst_76 = arith.constant 5.000000e-01 : f32
    %190 = vector.broadcast %cst_76 : f32 to vector<8x128xf32>
    %191 = arith.mulf %190, %189 : vector<8x128xf32>
    %192 = math.tanh %191 : vector<8x128xf32>
    %cst_77 = arith.constant 1.000000e+00 : f32
    %193 = vector.broadcast %cst_77 : f32 to vector<8x128xf32>
    %194 = arith.addf %192, %193 : vector<8x128xf32>
    %cst_78 = arith.constant 5.000000e-01 : f32
    %195 = vector.broadcast %cst_78 : f32 to vector<8x128xf32>
    %196 = arith.mulf %195, %194 : vector<8x128xf32>
    %197 = vector.extract_strided_slice %170 {offsets = [0, 0], sizes = [8, 128], strides = [1, 1]} : vector<8x512xf32> to vector<8x128xf32>
    %cst_79 = arith.constant 5.000000e-01 : f32
    %198 = vector.broadcast %cst_79 : f32 to vector<8x128xf32>
    %199 = arith.mulf %198, %197 : vector<8x128xf32>
    %200 = math.tanh %199 : vector<8x128xf32>
    %cst_80 = arith.constant 1.000000e+00 : f32
    %201 = vector.broadcast %cst_80 : f32 to vector<8x128xf32>
    %202 = arith.addf %200, %201 : vector<8x128xf32>
    %cst_81 = arith.constant 5.000000e-01 : f32
    %203 = vector.broadcast %cst_81 : f32 to vector<8x128xf32>
    %204 = arith.mulf %203, %202 : vector<8x128xf32>
    %205 = vector.extract_strided_slice %170 {offsets = [0, 128], sizes = [8, 128], strides = [1, 1]} : vector<8x512xf32> to vector<8x128xf32>
    %cst_82 = arith.constant 5.000000e-01 : f32
    %206 = vector.broadcast %cst_82 : f32 to vector<8x128xf32>
    %207 = arith.mulf %206, %205 : vector<8x128xf32>
    %208 = math.tanh %207 : vector<8x128xf32>
    %cst_83 = arith.constant 1.000000e+00 : f32
    %209 = vector.broadcast %cst_83 : f32 to vector<8x128xf32>
    %210 = arith.addf %208, %209 : vector<8x128xf32>
    %cst_84 = arith.constant 5.000000e-01 : f32
    %211 = vector.broadcast %cst_84 : f32 to vector<8x128xf32>
    %212 = arith.mulf %211, %210 : vector<8x128xf32>
    %213 = vector.extract_strided_slice %170 {offsets = [0, 256], sizes = [8, 128], strides = [1, 1]} : vector<8x512xf32> to vector<8x128xf32>
    %214 = math.tanh %213 : vector<8x128xf32>
    %215 = vector.extract_strided_slice %170 {offsets = [0, 384], sizes = [8, 128], strides = [1, 1]} : vector<8x512xf32> to vector<8x128xf32>
    %cst_85 = arith.constant 5.000000e-01 : f32
    %216 = vector.broadcast %cst_85 : f32 to vector<8x128xf32>
    %217 = arith.mulf %216, %215 : vector<8x128xf32>
    %218 = math.tanh %217 : vector<8x128xf32>
    %cst_86 = arith.constant 1.000000e+00 : f32
    %219 = vector.broadcast %cst_86 : f32 to vector<8x128xf32>
    %220 = arith.addf %218, %219 : vector<8x128xf32>
    %cst_87 = arith.constant 5.000000e-01 : f32
    %221 = vector.broadcast %cst_87 : f32 to vector<8x128xf32>
    %222 = arith.mulf %221, %220 : vector<8x128xf32>
    %223 = arith.mulf %186, %153 : vector<8x128xf32>
    %224 = arith.mulf %178, %188 : vector<8x128xf32>
    %225 = arith.addf %223, %224 : vector<8x128xf32>
    %226 = arith.mulf %212, %156 : vector<8x128xf32>
    %227 = arith.mulf %204, %214 : vector<8x128xf32>
    %228 = arith.addf %226, %227 : vector<8x128xf32>
    %229 = math.tanh %225 : vector<8x128xf32>
    %230 = arith.mulf %196, %229 : vector<8x128xf32>
    %231 = math.tanh %228 : vector<8x128xf32>
    %232 = arith.mulf %222, %231 : vector<8x128xf32>
    %c16_88 = arith.constant 16 : index
    %c0_89 = arith.constant 0 : index
    %233 = vector.load %arg15[%c16_88, %c0_89] : memref<64x256xf32, #tpu.memory_space<vmem>>, vector<8x128xf32>
    tpu.vector_store %arg15[%c16_88, %c0_89], %230 {strides = array<i32>} : memref<64x256xf32, #tpu.memory_space<vmem>>, vector<8x128xf32>,
    %c40_90 = arith.constant 40 : index
    %c128_91 = arith.constant 128 : index
    %234 = vector.load %arg15[%c40_90, %c128_91] : memref<64x256xf32, #tpu.memory_space<vmem>>, vector<8x128xf32>
    tpu.vector_store %arg15[%c40_90, %c128_91], %232 {strides = array<i32>} : memref<64x256xf32, #tpu.memory_space<vmem>>, vector<8x128xf32>,
    %c24 = arith.constant 24 : index
    %c0_92 = arith.constant 0 : index
    %235 = vector.load %arg14[%c24, %c0_92] : memref<64x1024xf32, #tpu.memory_space<vmem>>, vector<8x512xf32>
    %c32 = arith.constant 32 : index
    %c512_93 = arith.constant 512 : index
    %236 = vector.load %arg14[%c32, %c512_93] : memref<64x1024xf32, #tpu.memory_space<vmem>>, vector<8x512xf32>
    %237 = arith.truncf %230 : vector<8x128xf32> to vector<8x128xbf16>
    %cst_94 = arith.constant dense<0.000000e+00> : vector<8x512xf32>
    %238 = tpu.matmul %237, %13, %cst_94 {dimension_numbers = #tpu.dot_dimension_numbers<[1], [0], [0], [1], [0, 0, 1, 1], [], []>} : vector<8x128xbf16>, vector<128x512xbf16>, vector<8x512xf32> -> vector<8x512xf32>
    %239 = arith.addf %235, %238 : vector<8x512xf32>
    %240 = arith.truncf %232 : vector<8x128xf32> to vector<8x128xbf16>
    %cst_95 = arith.constant dense<0.000000e+00> : vector<8x512xf32>
    %241 = tpu.matmul %240, %14, %cst_95 {dimension_numbers = #tpu.dot_dimension_numbers<[1], [0], [0], [1], [0, 0, 1, 1], [], []>} : vector<8x128xbf16>, vector<128x512xbf16>, vector<8x512xf32> -> vector<8x512xf32>
    %242 = arith.addf %236, %241 : vector<8x512xf32>
    %243 = vector.extract_strided_slice %239 {offsets = [0, 0], sizes = [8, 128], strides = [1, 1]} : vector<8x512xf32> to vector<8x128xf32>
    %cst_96 = arith.constant 5.000000e-01 : f32
    %244 = vector.broadcast %cst_96 : f32 to vector<8x128xf32>
    %245 = arith.mulf %244, %243 : vector<8x128xf32>
    %246 = math.tanh %245 : vector<8x128xf32>
    %cst_97 = arith.constant 1.000000e+00 : f32
    %247 = vector.broadcast %cst_97 : f32 to vector<8x128xf32>
    %248 = arith.addf %246, %247 : vector<8x128xf32>
    %cst_98 = arith.constant 5.000000e-01 : f32
    %249 = vector.broadcast %cst_98 : f32 to vector<8x128xf32>
    %250 = arith.mulf %249, %248 : vector<8x128xf32>
    %251 = vector.extract_strided_slice %239 {offsets = [0, 128], sizes = [8, 128], strides = [1, 1]} : vector<8x512xf32> to vector<8x128xf32>
    %cst_99 = arith.constant 5.000000e-01 : f32
    %252 = vector.broadcast %cst_99 : f32 to vector<8x128xf32>
    %253 = arith.mulf %252, %251 : vector<8x128xf32>
    %254 = math.tanh %253 : vector<8x128xf32>
    %cst_100 = arith.constant 1.000000e+00 : f32
    %255 = vector.broadcast %cst_100 : f32 to vector<8x128xf32>
    %256 = arith.addf %254, %255 : vector<8x128xf32>
    %cst_101 = arith.constant 5.000000e-01 : f32
    %257 = vector.broadcast %cst_101 : f32 to vector<8x128xf32>
    %258 = arith.mulf %257, %256 : vector<8x128xf32>
    %259 = vector.extract_strided_slice %239 {offsets = [0, 256], sizes = [8, 128], strides = [1, 1]} : vector<8x512xf32> to vector<8x128xf32>
    %260 = math.tanh %259 : vector<8x128xf32>
    %261 = vector.extract_strided_slice %239 {offsets = [0, 384], sizes = [8, 128], strides = [1, 1]} : vector<8x512xf32> to vector<8x128xf32>
    %cst_102 = arith.constant 5.000000e-01 : f32
    %262 = vector.broadcast %cst_102 : f32 to vector<8x128xf32>
    %263 = arith.mulf %262, %261 : vector<8x128xf32>
    %264 = math.tanh %263 : vector<8x128xf32>
    %cst_103 = arith.constant 1.000000e+00 : f32
    %265 = vector.broadcast %cst_103 : f32 to vector<8x128xf32>
    %266 = arith.addf %264, %265 : vector<8x128xf32>
    %cst_104 = arith.constant 5.000000e-01 : f32
    %267 = vector.broadcast %cst_104 : f32 to vector<8x128xf32>
    %268 = arith.mulf %267, %266 : vector<8x128xf32>
    %269 = vector.extract_strided_slice %242 {offsets = [0, 0], sizes = [8, 128], strides = [1, 1]} : vector<8x512xf32> to vector<8x128xf32>
    %cst_105 = arith.constant 5.000000e-01 : f32
    %270 = vector.broadcast %cst_105 : f32 to vector<8x128xf32>
    %271 = arith.mulf %270, %269 : vector<8x128xf32>
    %272 = math.tanh %271 : vector<8x128xf32>
    %cst_106 = arith.constant 1.000000e+00 : f32
    %273 = vector.broadcast %cst_106 : f32 to vector<8x128xf32>
    %274 = arith.addf %272, %273 : vector<8x128xf32>
    %cst_107 = arith.constant 5.000000e-01 : f32
    %275 = vector.broadcast %cst_107 : f32 to vector<8x128xf32>
    %276 = arith.mulf %275, %274 : vector<8x128xf32>
    %277 = vector.extract_strided_slice %242 {offsets = [0, 128], sizes = [8, 128], strides = [1, 1]} : vector<8x512xf32> to vector<8x128xf32>
    %cst_108 = arith.constant 5.000000e-01 : f32
    %278 = vector.broadcast %cst_108 : f32 to vector<8x128xf32>
    %279 = arith.mulf %278, %277 : vector<8x128xf32>
    %280 = math.tanh %279 : vector<8x128xf32>
    %cst_109 = arith.constant 1.000000e+00 : f32
    %281 = vector.broadcast %cst_109 : f32 to vector<8x128xf32>
    %282 = arith.addf %280, %281 : vector<8x128xf32>
    %cst_110 = arith.constant 5.000000e-01 : f32
    %283 = vector.broadcast %cst_110 : f32 to vector<8x128xf32>
    %284 = arith.mulf %283, %282 : vector<8x128xf32>
    %285 = vector.extract_strided_slice %242 {offsets = [0, 256], sizes = [8, 128], strides = [1, 1]} : vector<8x512xf32> to vector<8x128xf32>
    %286 = math.tanh %285 : vector<8x128xf32>
    %287 = vector.extract_strided_slice %242 {offsets = [0, 384], sizes = [8, 128], strides = [1, 1]} : vector<8x512xf32> to vector<8x128xf32>
    %cst_111 = arith.constant 5.000000e-01 : f32
    %288 = vector.broadcast %cst_111 : f32 to vector<8x128xf32>
    %289 = arith.mulf %288, %287 : vector<8x128xf32>
    %290 = math.tanh %289 : vector<8x128xf32>
    %cst_112 = arith.constant 1.000000e+00 : f32
    %291 = vector.broadcast %cst_112 : f32 to vector<8x128xf32>
    %292 = arith.addf %290, %291 : vector<8x128xf32>
    %cst_113 = arith.constant 5.000000e-01 : f32
    %293 = vector.broadcast %cst_113 : f32 to vector<8x128xf32>
    %294 = arith.mulf %293, %292 : vector<8x128xf32>
    %295 = arith.mulf %258, %225 : vector<8x128xf32>
    %296 = arith.mulf %250, %260 : vector<8x128xf32>
    %297 = arith.addf %295, %296 : vector<8x128xf32>
    %298 = arith.mulf %284, %228 : vector<8x128xf32>
    %299 = arith.mulf %276, %286 : vector<8x128xf32>
    %300 = arith.addf %298, %299 : vector<8x128xf32>
    %301 = math.tanh %297 : vector<8x128xf32>
    %302 = arith.mulf %268, %301 : vector<8x128xf32>
    %303 = math.tanh %300 : vector<8x128xf32>
    %304 = arith.mulf %294, %303 : vector<8x128xf32>
    %c24_114 = arith.constant 24 : index
    %c0_115 = arith.constant 0 : index
    %305 = vector.load %arg15[%c24_114, %c0_115] : memref<64x256xf32, #tpu.memory_space<vmem>>, vector<8x128xf32>
    tpu.vector_store %arg15[%c24_114, %c0_115], %302 {strides = array<i32>} : memref<64x256xf32, #tpu.memory_space<vmem>>, vector<8x128xf32>,
    %c32_116 = arith.constant 32 : index
    %c128_117 = arith.constant 128 : index
    %306 = vector.load %arg15[%c32_116, %c128_117] : memref<64x256xf32, #tpu.memory_space<vmem>>, vector<8x128xf32>
    tpu.vector_store %arg15[%c32_116, %c128_117], %304 {strides = array<i32>} : memref<64x256xf32, #tpu.memory_space<vmem>>, vector<8x128xf32>,
    %c32_118 = arith.constant 32 : index
    %c0_119 = arith.constant 0 : index
    %307 = vector.load %arg14[%c32_118, %c0_119] : memref<64x1024xf32, #tpu.memory_space<vmem>>, vector<8x512xf32>
    %c24_120 = arith.constant 24 : index
    %c512_121 = arith.constant 512 : index
    %308 = vector.load %arg14[%c24_120, %c512_121] : memref<64x1024xf32, #tpu.memory_space<vmem>>, vector<8x512xf32>
    %309 = arith.truncf %302 : vector<8x128xf32> to vector<8x128xbf16>
    %cst_122 = arith.constant dense<0.000000e+00> : vector<8x512xf32>
    %310 = tpu.matmul %309, %13, %cst_122 {dimension_numbers = #tpu.dot_dimension_numbers<[1], [0], [0], [1], [0, 0, 1, 1], [], []>} : vector<8x128xbf16>, vector<128x512xbf16>, vector<8x512xf32> -> vector<8x512xf32>
    %311 = arith.addf %307, %310 : vector<8x512xf32>
    %312 = arith.truncf %304 : vector<8x128xf32> to vector<8x128xbf16>
    %cst_123 = arith.constant dense<0.000000e+00> : vector<8x512xf32>
    %313 = tpu.matmul %312, %14, %cst_123 {dimension_numbers = #tpu.dot_dimension_numbers<[1], [0], [0], [1], [0, 0, 1, 1], [], []>} : vector<8x128xbf16>, vector<128x512xbf16>, vector<8x512xf32> -> vector<8x512xf32>
    %314 = arith.addf %308, %313 : vector<8x512xf32>
    %315 = vector.extract_strided_slice %311 {offsets = [0, 0], sizes = [8, 128], strides = [1, 1]} : vector<8x512xf32> to vector<8x128xf32>
    %cst_124 = arith.constant 5.000000e-01 : f32
    %316 = vector.broadcast %cst_124 : f32 to vector<8x128xf32>
    %317 = arith.mulf %316, %315 : vector<8x128xf32>
    %318 = math.tanh %317 : vector<8x128xf32>
    %cst_125 = arith.constant 1.000000e+00 : f32
    %319 = vector.broadcast %cst_125 : f32 to vector<8x128xf32>
    %320 = arith.addf %318, %319 : vector<8x128xf32>
    %cst_126 = arith.constant 5.000000e-01 : f32
    %321 = vector.broadcast %cst_126 : f32 to vector<8x128xf32>
    %322 = arith.mulf %321, %320 : vector<8x128xf32>
    %323 = vector.extract_strided_slice %311 {offsets = [0, 128], sizes = [8, 128], strides = [1, 1]} : vector<8x512xf32> to vector<8x128xf32>
    %cst_127 = arith.constant 5.000000e-01 : f32
    %324 = vector.broadcast %cst_127 : f32 to vector<8x128xf32>
    %325 = arith.mulf %324, %323 : vector<8x128xf32>
    %326 = math.tanh %325 : vector<8x128xf32>
    %cst_128 = arith.constant 1.000000e+00 : f32
    %327 = vector.broadcast %cst_128 : f32 to vector<8x128xf32>
    %328 = arith.addf %326, %327 : vector<8x128xf32>
    %cst_129 = arith.constant 5.000000e-01 : f32
    %329 = vector.broadcast %cst_129 : f32 to vector<8x128xf32>
    %330 = arith.mulf %329, %328 : vector<8x128xf32>
    %331 = vector.extract_strided_slice %311 {offsets = [0, 256], sizes = [8, 128], strides = [1, 1]} : vector<8x512xf32> to vector<8x128xf32>
    %332 = math.tanh %331 : vector<8x128xf32>
    %333 = vector.extract_strided_slice %311 {offsets = [0, 384], sizes = [8, 128], strides = [1, 1]} : vector<8x512xf32> to vector<8x128xf32>
    %cst_130 = arith.constant 5.000000e-01 : f32
    %334 = vector.broadcast %cst_130 : f32 to vector<8x128xf32>
    %335 = arith.mulf %334, %333 : vector<8x128xf32>
    %336 = math.tanh %335 : vector<8x128xf32>
    %cst_131 = arith.constant 1.000000e+00 : f32
    %337 = vector.broadcast %cst_131 : f32 to vector<8x128xf32>
    %338 = arith.addf %336, %337 : vector<8x128xf32>
    %cst_132 = arith.constant 5.000000e-01 : f32
    %339 = vector.broadcast %cst_132 : f32 to vector<8x128xf32>
    %340 = arith.mulf %339, %338 : vector<8x128xf32>
    %341 = vector.extract_strided_slice %314 {offsets = [0, 0], sizes = [8, 128], strides = [1, 1]} : vector<8x512xf32> to vector<8x128xf32>
    %cst_133 = arith.constant 5.000000e-01 : f32
    %342 = vector.broadcast %cst_133 : f32 to vector<8x128xf32>
    %343 = arith.mulf %342, %341 : vector<8x128xf32>
    %344 = math.tanh %343 : vector<8x128xf32>
    %cst_134 = arith.constant 1.000000e+00 : f32
    %345 = vector.broadcast %cst_134 : f32 to vector<8x128xf32>
    %346 = arith.addf %344, %345 : vector<8x128xf32>
    %cst_135 = arith.constant 5.000000e-01 : f32
    %347 = vector.broadcast %cst_135 : f32 to vector<8x128xf32>
    %348 = arith.mulf %347, %346 : vector<8x128xf32>
    %349 = vector.extract_strided_slice %314 {offsets = [0, 128], sizes = [8, 128], strides = [1, 1]} : vector<8x512xf32> to vector<8x128xf32>
    %cst_136 = arith.constant 5.000000e-01 : f32
    %350 = vector.broadcast %cst_136 : f32 to vector<8x128xf32>
    %351 = arith.mulf %350, %349 : vector<8x128xf32>
    %352 = math.tanh %351 : vector<8x128xf32>
    %cst_137 = arith.constant 1.000000e+00 : f32
    %353 = vector.broadcast %cst_137 : f32 to vector<8x128xf32>
    %354 = arith.addf %352, %353 : vector<8x128xf32>
    %cst_138 = arith.constant 5.000000e-01 : f32
    %355 = vector.broadcast %cst_138 : f32 to vector<8x128xf32>
    %356 = arith.mulf %355, %354 : vector<8x128xf32>
    %357 = vector.extract_strided_slice %314 {offsets = [0, 256], sizes = [8, 128], strides = [1, 1]} : vector<8x512xf32> to vector<8x128xf32>
    %358 = math.tanh %357 : vector<8x128xf32>
    %359 = vector.extract_strided_slice %314 {offsets = [0, 384], sizes = [8, 128], strides = [1, 1]} : vector<8x512xf32> to vector<8x128xf32>
    %cst_139 = arith.constant 5.000000e-01 : f32
    %360 = vector.broadcast %cst_139 : f32 to vector<8x128xf32>
    %361 = arith.mulf %360, %359 : vector<8x128xf32>
    %362 = math.tanh %361 : vector<8x128xf32>
    %cst_140 = arith.constant 1.000000e+00 : f32
    %363 = vector.broadcast %cst_140 : f32 to vector<8x128xf32>
    %364 = arith.addf %362, %363 : vector<8x128xf32>
    %cst_141 = arith.constant 5.000000e-01 : f32
    %365 = vector.broadcast %cst_141 : f32 to vector<8x128xf32>
    %366 = arith.mulf %365, %364 : vector<8x128xf32>
    %367 = arith.mulf %330, %297 : vector<8x128xf32>
    %368 = arith.mulf %322, %332 : vector<8x128xf32>
    %369 = arith.addf %367, %368 : vector<8x128xf32>
    %370 = arith.mulf %356, %300 : vector<8x128xf32>
    %371 = arith.mulf %348, %358 : vector<8x128xf32>
    %372 = arith.addf %370, %371 : vector<8x128xf32>
    %373 = math.tanh %369 : vector<8x128xf32>
    %374 = arith.mulf %340, %373 : vector<8x128xf32>
    %375 = math.tanh %372 : vector<8x128xf32>
    %376 = arith.mulf %366, %375 : vector<8x128xf32>
    %c32_142 = arith.constant 32 : index
    %c0_143 = arith.constant 0 : index
    %377 = vector.load %arg15[%c32_142, %c0_143] : memref<64x256xf32, #tpu.memory_space<vmem>>, vector<8x128xf32>
    tpu.vector_store %arg15[%c32_142, %c0_143], %374 {strides = array<i32>} : memref<64x256xf32, #tpu.memory_space<vmem>>, vector<8x128xf32>,
    %c24_144 = arith.constant 24 : index
    %c128_145 = arith.constant 128 : index
    %378 = vector.load %arg15[%c24_144, %c128_145] : memref<64x256xf32, #tpu.memory_space<vmem>>, vector<8x128xf32>
    tpu.vector_store %arg15[%c24_144, %c128_145], %376 {strides = array<i32>} : memref<64x256xf32, #tpu.memory_space<vmem>>, vector<8x128xf32>,
    %c40_146 = arith.constant 40 : index
    %c0_147 = arith.constant 0 : index
    %379 = vector.load %arg14[%c40_146, %c0_147] : memref<64x1024xf32, #tpu.memory_space<vmem>>, vector<8x512xf32>
    %c16_148 = arith.constant 16 : index
    %c512_149 = arith.constant 512 : index
    %380 = vector.load %arg14[%c16_148, %c512_149] : memref<64x1024xf32, #tpu.memory_space<vmem>>, vector<8x512xf32>
    %381 = arith.truncf %374 : vector<8x128xf32> to vector<8x128xbf16>
    %cst_150 = arith.constant dense<0.000000e+00> : vector<8x512xf32>
    %382 = tpu.matmul %381, %13, %cst_150 {dimension_numbers = #tpu.dot_dimension_numbers<[1], [0], [0], [1], [0, 0, 1, 1], [], []>} : vector<8x128xbf16>, vector<128x512xbf16>, vector<8x512xf32> -> vector<8x512xf32>
    %383 = arith.addf %379, %382 : vector<8x512xf32>
    %384 = arith.truncf %376 : vector<8x128xf32> to vector<8x128xbf16>
    %cst_151 = arith.constant dense<0.000000e+00> : vector<8x512xf32>
    %385 = tpu.matmul %384, %14, %cst_151 {dimension_numbers = #tpu.dot_dimension_numbers<[1], [0], [0], [1], [0, 0, 1, 1], [], []>} : vector<8x128xbf16>, vector<128x512xbf16>, vector<8x512xf32> -> vector<8x512xf32>
    %386 = arith.addf %380, %385 : vector<8x512xf32>
    %387 = vector.extract_strided_slice %383 {offsets = [0, 0], sizes = [8, 128], strides = [1, 1]} : vector<8x512xf32> to vector<8x128xf32>
    %cst_152 = arith.constant 5.000000e-01 : f32
    %388 = vector.broadcast %cst_152 : f32 to vector<8x128xf32>
    %389 = arith.mulf %388, %387 : vector<8x128xf32>
    %390 = math.tanh %389 : vector<8x128xf32>
    %cst_153 = arith.constant 1.000000e+00 : f32
    %391 = vector.broadcast %cst_153 : f32 to vector<8x128xf32>
    %392 = arith.addf %390, %391 : vector<8x128xf32>
    %cst_154 = arith.constant 5.000000e-01 : f32
    %393 = vector.broadcast %cst_154 : f32 to vector<8x128xf32>
    %394 = arith.mulf %393, %392 : vector<8x128xf32>
    %395 = vector.extract_strided_slice %383 {offsets = [0, 128], sizes = [8, 128], strides = [1, 1]} : vector<8x512xf32> to vector<8x128xf32>
    %cst_155 = arith.constant 5.000000e-01 : f32
    %396 = vector.broadcast %cst_155 : f32 to vector<8x128xf32>
    %397 = arith.mulf %396, %395 : vector<8x128xf32>
    %398 = math.tanh %397 : vector<8x128xf32>
    %cst_156 = arith.constant 1.000000e+00 : f32
    %399 = vector.broadcast %cst_156 : f32 to vector<8x128xf32>
    %400 = arith.addf %398, %399 : vector<8x128xf32>
    %cst_157 = arith.constant 5.000000e-01 : f32
    %401 = vector.broadcast %cst_157 : f32 to vector<8x128xf32>
    %402 = arith.mulf %401, %400 : vector<8x128xf32>
    %403 = vector.extract_strided_slice %383 {offsets = [0, 256], sizes = [8, 128], strides = [1, 1]} : vector<8x512xf32> to vector<8x128xf32>
    %404 = math.tanh %403 : vector<8x128xf32>
    %405 = vector.extract_strided_slice %383 {offsets = [0, 384], sizes = [8, 128], strides = [1, 1]} : vector<8x512xf32> to vector<8x128xf32>
    %cst_158 = arith.constant 5.000000e-01 : f32
    %406 = vector.broadcast %cst_158 : f32 to vector<8x128xf32>
    %407 = arith.mulf %406, %405 : vector<8x128xf32>
    %408 = math.tanh %407 : vector<8x128xf32>
    %cst_159 = arith.constant 1.000000e+00 : f32
    %409 = vector.broadcast %cst_159 : f32 to vector<8x128xf32>
    %410 = arith.addf %408, %409 : vector<8x128xf32>
    %cst_160 = arith.constant 5.000000e-01 : f32
    %411 = vector.broadcast %cst_160 : f32 to vector<8x128xf32>
    %412 = arith.mulf %411, %410 : vector<8x128xf32>
    %413 = vector.extract_strided_slice %386 {offsets = [0, 0], sizes = [8, 128], strides = [1, 1]} : vector<8x512xf32> to vector<8x128xf32>
    %cst_161 = arith.constant 5.000000e-01 : f32
    %414 = vector.broadcast %cst_161 : f32 to vector<8x128xf32>
    %415 = arith.mulf %414, %413 : vector<8x128xf32>
    %416 = math.tanh %415 : vector<8x128xf32>
    %cst_162 = arith.constant 1.000000e+00 : f32
    %417 = vector.broadcast %cst_162 : f32 to vector<8x128xf32>
    %418 = arith.addf %416, %417 : vector<8x128xf32>
    %cst_163 = arith.constant 5.000000e-01 : f32
    %419 = vector.broadcast %cst_163 : f32 to vector<8x128xf32>
    %420 = arith.mulf %419, %418 : vector<8x128xf32>
    %421 = vector.extract_strided_slice %386 {offsets = [0, 128], sizes = [8, 128], strides = [1, 1]} : vector<8x512xf32> to vector<8x128xf32>
    %cst_164 = arith.constant 5.000000e-01 : f32
    %422 = vector.broadcast %cst_164 : f32 to vector<8x128xf32>
    %423 = arith.mulf %422, %421 : vector<8x128xf32>
    %424 = math.tanh %423 : vector<8x128xf32>
    %cst_165 = arith.constant 1.000000e+00 : f32
    %425 = vector.broadcast %cst_165 : f32 to vector<8x128xf32>
    %426 = arith.addf %424, %425 : vector<8x128xf32>
    %cst_166 = arith.constant 5.000000e-01 : f32
    %427 = vector.broadcast %cst_166 : f32 to vector<8x128xf32>
    %428 = arith.mulf %427, %426 : vector<8x128xf32>
    %429 = vector.extract_strided_slice %386 {offsets = [0, 256], sizes = [8, 128], strides = [1, 1]} : vector<8x512xf32> to vector<8x128xf32>
    %430 = math.tanh %429 : vector<8x128xf32>
    %431 = vector.extract_strided_slice %386 {offsets = [0, 384], sizes = [8, 128], strides = [1, 1]} : vector<8x512xf32> to vector<8x128xf32>
    %cst_167 = arith.constant 5.000000e-01 : f32
    %432 = vector.broadcast %cst_167 : f32 to vector<8x128xf32>
    %433 = arith.mulf %432, %431 : vector<8x128xf32>
    %434 = math.tanh %433 : vector<8x128xf32>
    %cst_168 = arith.constant 1.000000e+00 : f32
    %435 = vector.broadcast %cst_168 : f32 to vector<8x128xf32>
    %436 = arith.addf %434, %435 : vector<8x128xf32>
    %cst_169 = arith.constant 5.000000e-01 : f32
    %437 = vector.broadcast %cst_169 : f32 to vector<8x128xf32>
    %438 = arith.mulf %437, %436 : vector<8x128xf32>
    %439 = arith.mulf %402, %369 : vector<8x128xf32>
    %440 = arith.mulf %394, %404 : vector<8x128xf32>
    %441 = arith.addf %439, %440 : vector<8x128xf32>
    %442 = arith.mulf %428, %372 : vector<8x128xf32>
    %443 = arith.mulf %420, %430 : vector<8x128xf32>
    %444 = arith.addf %442, %443 : vector<8x128xf32>
    %445 = math.tanh %441 : vector<8x128xf32>
    %446 = arith.mulf %412, %445 : vector<8x128xf32>
    %447 = math.tanh %444 : vector<8x128xf32>
    %448 = arith.mulf %438, %447 : vector<8x128xf32>
    %c40_170 = arith.constant 40 : index
    %c0_171 = arith.constant 0 : index
    %449 = vector.load %arg15[%c40_170, %c0_171] : memref<64x256xf32, #tpu.memory_space<vmem>>, vector<8x128xf32>
    tpu.vector_store %arg15[%c40_170, %c0_171], %446 {strides = array<i32>} : memref<64x256xf32, #tpu.memory_space<vmem>>, vector<8x128xf32>,
    %c16_172 = arith.constant 16 : index
    %c128_173 = arith.constant 128 : index
    %450 = vector.load %arg15[%c16_172, %c128_173] : memref<64x256xf32, #tpu.memory_space<vmem>>, vector<8x128xf32>
    tpu.vector_store %arg15[%c16_172, %c128_173], %448 {strides = array<i32>} : memref<64x256xf32, #tpu.memory_space<vmem>>, vector<8x128xf32>,
    %c48_174 = arith.constant 48 : index
    %c0_175 = arith.constant 0 : index
    %451 = vector.load %arg14[%c48_174, %c0_175] : memref<64x1024xf32, #tpu.memory_space<vmem>>, vector<8x512xf32>
    %c8_176 = arith.constant 8 : index
    %c512_177 = arith.constant 512 : index
    %452 = vector.load %arg14[%c8_176, %c512_177] : memref<64x1024xf32, #tpu.memory_space<vmem>>, vector<8x512xf32>
    %453 = arith.truncf %446 : vector<8x128xf32> to vector<8x128xbf16>
    %cst_178 = arith.constant dense<0.000000e+00> : vector<8x512xf32>
    %454 = tpu.matmul %453, %13, %cst_178 {dimension_numbers = #tpu.dot_dimension_numbers<[1], [0], [0], [1], [0, 0, 1, 1], [], []>} : vector<8x128xbf16>, vector<128x512xbf16>, vector<8x512xf32> -> vector<8x512xf32>
    %455 = arith.addf %451, %454 : vector<8x512xf32>
    %456 = arith.truncf %448 : vector<8x128xf32> to vector<8x128xbf16>
    %cst_179 = arith.constant dense<0.000000e+00> : vector<8x512xf32>
    %457 = tpu.matmul %456, %14, %cst_179 {dimension_numbers = #tpu.dot_dimension_numbers<[1], [0], [0], [1], [0, 0, 1, 1], [], []>} : vector<8x128xbf16>, vector<128x512xbf16>, vector<8x512xf32> -> vector<8x512xf32>
    %458 = arith.addf %452, %457 : vector<8x512xf32>
    %459 = vector.extract_strided_slice %455 {offsets = [0, 0], sizes = [8, 128], strides = [1, 1]} : vector<8x512xf32> to vector<8x128xf32>
    %cst_180 = arith.constant 5.000000e-01 : f32
    %460 = vector.broadcast %cst_180 : f32 to vector<8x128xf32>
    %461 = arith.mulf %460, %459 : vector<8x128xf32>
    %462 = math.tanh %461 : vector<8x128xf32>
    %cst_181 = arith.constant 1.000000e+00 : f32
    %463 = vector.broadcast %cst_181 : f32 to vector<8x128xf32>
    %464 = arith.addf %462, %463 : vector<8x128xf32>
    %cst_182 = arith.constant 5.000000e-01 : f32
    %465 = vector.broadcast %cst_182 : f32 to vector<8x128xf32>
    %466 = arith.mulf %465, %464 : vector<8x128xf32>
    %467 = vector.extract_strided_slice %455 {offsets = [0, 128], sizes = [8, 128], strides = [1, 1]} : vector<8x512xf32> to vector<8x128xf32>
    %cst_183 = arith.constant 5.000000e-01 : f32
    %468 = vector.broadcast %cst_183 : f32 to vector<8x128xf32>
    %469 = arith.mulf %468, %467 : vector<8x128xf32>
    %470 = math.tanh %469 : vector<8x128xf32>
    %cst_184 = arith.constant 1.000000e+00 : f32
    %471 = vector.broadcast %cst_184 : f32 to vector<8x128xf32>
    %472 = arith.addf %470, %471 : vector<8x128xf32>
    %cst_185 = arith.constant 5.000000e-01 : f32
    %473 = vector.broadcast %cst_185 : f32 to vector<8x128xf32>
    %474 = arith.mulf %473, %472 : vector<8x128xf32>
    %475 = vector.extract_strided_slice %455 {offsets = [0, 256], sizes = [8, 128], strides = [1, 1]} : vector<8x512xf32> to vector<8x128xf32>
    %476 = math.tanh %475 : vector<8x128xf32>
    %477 = vector.extract_strided_slice %455 {offsets = [0, 384], sizes = [8, 128], strides = [1, 1]} : vector<8x512xf32> to vector<8x128xf32>
    %cst_186 = arith.constant 5.000000e-01 : f32
    %478 = vector.broadcast %cst_186 : f32 to vector<8x128xf32>
    %479 = arith.mulf %478, %477 : vector<8x128xf32>
    %480 = math.tanh %479 : vector<8x128xf32>
    %cst_187 = arith.constant 1.000000e+00 : f32
    %481 = vector.broadcast %cst_187 : f32 to vector<8x128xf32>
    %482 = arith.addf %480, %481 : vector<8x128xf32>
    %cst_188 = arith.constant 5.000000e-01 : f32
    %483 = vector.broadcast %cst_188 : f32 to vector<8x128xf32>
    %484 = arith.mulf %483, %482 : vector<8x128xf32>
    %485 = vector.extract_strided_slice %458 {offsets = [0, 0], sizes = [8, 128], strides = [1, 1]} : vector<8x512xf32> to vector<8x128xf32>
    %cst_189 = arith.constant 5.000000e-01 : f32
    %486 = vector.broadcast %cst_189 : f32 to vector<8x128xf32>
    %487 = arith.mulf %486, %485 : vector<8x128xf32>
    %488 = math.tanh %487 : vector<8x128xf32>
    %cst_190 = arith.constant 1.000000e+00 : f32
    %489 = vector.broadcast %cst_190 : f32 to vector<8x128xf32>
    %490 = arith.addf %488, %489 : vector<8x128xf32>
    %cst_191 = arith.constant 5.000000e-01 : f32
    %491 = vector.broadcast %cst_191 : f32 to vector<8x128xf32>
    %492 = arith.mulf %491, %490 : vector<8x128xf32>
    %493 = vector.extract_strided_slice %458 {offsets = [0, 128], sizes = [8, 128], strides = [1, 1]} : vector<8x512xf32> to vector<8x128xf32>
    %cst_192 = arith.constant 5.000000e-01 : f32
    %494 = vector.broadcast %cst_192 : f32 to vector<8x128xf32>
    %495 = arith.mulf %494, %493 : vector<8x128xf32>
    %496 = math.tanh %495 : vector<8x128xf32>
    %cst_193 = arith.constant 1.000000e+00 : f32
    %497 = vector.broadcast %cst_193 : f32 to vector<8x128xf32>
    %498 = arith.addf %496, %497 : vector<8x128xf32>
    %cst_194 = arith.constant 5.000000e-01 : f32
    %499 = vector.broadcast %cst_194 : f32 to vector<8x128xf32>
    %500 = arith.mulf %499, %498 : vector<8x128xf32>
    %501 = vector.extract_strided_slice %458 {offsets = [0, 256], sizes = [8, 128], strides = [1, 1]} : vector<8x512xf32> to vector<8x128xf32>
    %502 = math.tanh %501 : vector<8x128xf32>
    %503 = vector.extract_strided_slice %458 {offsets = [0, 384], sizes = [8, 128], strides = [1, 1]} : vector<8x512xf32> to vector<8x128xf32>
    %cst_195 = arith.constant 5.000000e-01 : f32
    %504 = vector.broadcast %cst_195 : f32 to vector<8x128xf32>
    %505 = arith.mulf %504, %503 : vector<8x128xf32>
    %506 = math.tanh %505 : vector<8x128xf32>
    %cst_196 = arith.constant 1.000000e+00 : f32
    %507 = vector.broadcast %cst_196 : f32 to vector<8x128xf32>
    %508 = arith.addf %506, %507 : vector<8x128xf32>
    %cst_197 = arith.constant 5.000000e-01 : f32
    %509 = vector.broadcast %cst_197 : f32 to vector<8x128xf32>
    %510 = arith.mulf %509, %508 : vector<8x128xf32>
    %511 = arith.mulf %474, %441 : vector<8x128xf32>
    %512 = arith.mulf %466, %476 : vector<8x128xf32>
    %513 = arith.addf %511, %512 : vector<8x128xf32>
    %514 = arith.mulf %500, %444 : vector<8x128xf32>
    %515 = arith.mulf %492, %502 : vector<8x128xf32>
    %516 = arith.addf %514, %515 : vector<8x128xf32>
    %517 = math.tanh %513 : vector<8x128xf32>
    %518 = arith.mulf %484, %517 : vector<8x128xf32>
    %519 = math.tanh %516 : vector<8x128xf32>
    %520 = arith.mulf %510, %519 : vector<8x128xf32>
    %c48_198 = arith.constant 48 : index
    %c0_199 = arith.constant 0 : index
    %521 = vector.load %arg15[%c48_198, %c0_199] : memref<64x256xf32, #tpu.memory_space<vmem>>, vector<8x128xf32>
    tpu.vector_store %arg15[%c48_198, %c0_199], %518 {strides = array<i32>} : memref<64x256xf32, #tpu.memory_space<vmem>>, vector<8x128xf32>,
    %c8_200 = arith.constant 8 : index
    %c128_201 = arith.constant 128 : index
    %522 = vector.load %arg15[%c8_200, %c128_201] : memref<64x256xf32, #tpu.memory_space<vmem>>, vector<8x128xf32>
    tpu.vector_store %arg15[%c8_200, %c128_201], %520 {strides = array<i32>} : memref<64x256xf32, #tpu.memory_space<vmem>>, vector<8x128xf32>,
    %c56_202 = arith.constant 56 : index
    %c0_203 = arith.constant 0 : index
    %523 = vector.load %arg14[%c56_202, %c0_203] : memref<64x1024xf32, #tpu.memory_space<vmem>>, vector<8x512xf32>
    %c0_204 = arith.constant 0 : index
    %c512_205 = arith.constant 512 : index
    %524 = vector.load %arg14[%c0_204, %c512_205] : memref<64x1024xf32, #tpu.memory_space<vmem>>, vector<8x512xf32>
    %525 = arith.truncf %518 : vector<8x128xf32> to vector<8x128xbf16>
    %cst_206 = arith.constant dense<0.000000e+00> : vector<8x512xf32>
    %526 = tpu.matmul %525, %13, %cst_206 {dimension_numbers = #tpu.dot_dimension_numbers<[1], [0], [0], [1], [0, 0, 1, 1], [], []>} : vector<8x128xbf16>, vector<128x512xbf16>, vector<8x512xf32> -> vector<8x512xf32>
    %527 = arith.addf %523, %526 : vector<8x512xf32>
    %528 = arith.truncf %520 : vector<8x128xf32> to vector<8x128xbf16>
    %cst_207 = arith.constant dense<0.000000e+00> : vector<8x512xf32>
    %529 = tpu.matmul %528, %14, %cst_207 {dimension_numbers = #tpu.dot_dimension_numbers<[1], [0], [0], [1], [0, 0, 1, 1], [], []>} : vector<8x128xbf16>, vector<128x512xbf16>, vector<8x512xf32> -> vector<8x512xf32>
    %530 = arith.addf %524, %529 : vector<8x512xf32>
    %531 = vector.extract_strided_slice %527 {offsets = [0, 0], sizes = [8, 128], strides = [1, 1]} : vector<8x512xf32> to vector<8x128xf32>
    %cst_208 = arith.constant 5.000000e-01 : f32
    %532 = vector.broadcast %cst_208 : f32 to vector<8x128xf32>
    %533 = arith.mulf %532, %531 : vector<8x128xf32>
    %534 = math.tanh %533 : vector<8x128xf32>
    %cst_209 = arith.constant 1.000000e+00 : f32
    %535 = vector.broadcast %cst_209 : f32 to vector<8x128xf32>
    %536 = arith.addf %534, %535 : vector<8x128xf32>
    %cst_210 = arith.constant 5.000000e-01 : f32
    %537 = vector.broadcast %cst_210 : f32 to vector<8x128xf32>
    %538 = arith.mulf %537, %536 : vector<8x128xf32>
    %539 = vector.extract_strided_slice %527 {offsets = [0, 128], sizes = [8, 128], strides = [1, 1]} : vector<8x512xf32> to vector<8x128xf32>
    %cst_211 = arith.constant 5.000000e-01 : f32
    %540 = vector.broadcast %cst_211 : f32 to vector<8x128xf32>
    %541 = arith.mulf %540, %539 : vector<8x128xf32>
    %542 = math.tanh %541 : vector<8x128xf32>
    %cst_212 = arith.constant 1.000000e+00 : f32
    %543 = vector.broadcast %cst_212 : f32 to vector<8x128xf32>
    %544 = arith.addf %542, %543 : vector<8x128xf32>
    %cst_213 = arith.constant 5.000000e-01 : f32
    %545 = vector.broadcast %cst_213 : f32 to vector<8x128xf32>
    %546 = arith.mulf %545, %544 : vector<8x128xf32>
    %547 = vector.extract_strided_slice %527 {offsets = [0, 256], sizes = [8, 128], strides = [1, 1]} : vector<8x512xf32> to vector<8x128xf32>
    %548 = math.tanh %547 : vector<8x128xf32>
    %549 = vector.extract_strided_slice %527 {offsets = [0, 384], sizes = [8, 128], strides = [1, 1]} : vector<8x512xf32> to vector<8x128xf32>
    %cst_214 = arith.constant 5.000000e-01 : f32
    %550 = vector.broadcast %cst_214 : f32 to vector<8x128xf32>
    %551 = arith.mulf %550, %549 : vector<8x128xf32>
    %552 = math.tanh %551 : vector<8x128xf32>
    %cst_215 = arith.constant 1.000000e+00 : f32
    %553 = vector.broadcast %cst_215 : f32 to vector<8x128xf32>
    %554 = arith.addf %552, %553 : vector<8x128xf32>
    %cst_216 = arith.constant 5.000000e-01 : f32
    %555 = vector.broadcast %cst_216 : f32 to vector<8x128xf32>
    %556 = arith.mulf %555, %554 : vector<8x128xf32>
    %557 = vector.extract_strided_slice %530 {offsets = [0, 0], sizes = [8, 128], strides = [1, 1]} : vector<8x512xf32> to vector<8x128xf32>
    %cst_217 = arith.constant 5.000000e-01 : f32
    %558 = vector.broadcast %cst_217 : f32 to vector<8x128xf32>
    %559 = arith.mulf %558, %557 : vector<8x128xf32>
    %560 = math.tanh %559 : vector<8x128xf32>
    %cst_218 = arith.constant 1.000000e+00 : f32
    %561 = vector.broadcast %cst_218 : f32 to vector<8x128xf32>
    %562 = arith.addf %560, %561 : vector<8x128xf32>
    %cst_219 = arith.constant 5.000000e-01 : f32
    %563 = vector.broadcast %cst_219 : f32 to vector<8x128xf32>
    %564 = arith.mulf %563, %562 : vector<8x128xf32>
    %565 = vector.extract_strided_slice %530 {offsets = [0, 128], sizes = [8, 128], strides = [1, 1]} : vector<8x512xf32> to vector<8x128xf32>
    %cst_220 = arith.constant 5.000000e-01 : f32
    %566 = vector.broadcast %cst_220 : f32 to vector<8x128xf32>
    %567 = arith.mulf %566, %565 : vector<8x128xf32>
    %568 = math.tanh %567 : vector<8x128xf32>
    %cst_221 = arith.constant 1.000000e+00 : f32
    %569 = vector.broadcast %cst_221 : f32 to vector<8x128xf32>
    %570 = arith.addf %568, %569 : vector<8x128xf32>
    %cst_222 = arith.constant 5.000000e-01 : f32
    %571 = vector.broadcast %cst_222 : f32 to vector<8x128xf32>
    %572 = arith.mulf %571, %570 : vector<8x128xf32>
    %573 = vector.extract_strided_slice %530 {offsets = [0, 256], sizes = [8, 128], strides = [1, 1]} : vector<8x512xf32> to vector<8x128xf32>
    %574 = math.tanh %573 : vector<8x128xf32>
    %575 = vector.extract_strided_slice %530 {offsets = [0, 384], sizes = [8, 128], strides = [1, 1]} : vector<8x512xf32> to vector<8x128xf32>
    %cst_223 = arith.constant 5.000000e-01 : f32
    %576 = vector.broadcast %cst_223 : f32 to vector<8x128xf32>
    %577 = arith.mulf %576, %575 : vector<8x128xf32>
    %578 = math.tanh %577 : vector<8x128xf32>
    %cst_224 = arith.constant 1.000000e+00 : f32
    %579 = vector.broadcast %cst_224 : f32 to vector<8x128xf32>
    %580 = arith.addf %578, %579 : vector<8x128xf32>
    %cst_225 = arith.constant 5.000000e-01 : f32
    %581 = vector.broadcast %cst_225 : f32 to vector<8x128xf32>
    %582 = arith.mulf %581, %580 : vector<8x128xf32>
    %583 = arith.mulf %546, %513 : vector<8x128xf32>
    %584 = arith.mulf %538, %548 : vector<8x128xf32>
    %585 = arith.addf %583, %584 : vector<8x128xf32>
    %586 = arith.mulf %572, %516 : vector<8x128xf32>
    %587 = arith.mulf %564, %574 : vector<8x128xf32>
    %588 = arith.addf %586, %587 : vector<8x128xf32>
    %589 = math.tanh %585 : vector<8x128xf32>
    %590 = arith.mulf %556, %589 : vector<8x128xf32>
    %591 = math.tanh %588 : vector<8x128xf32>
    %592 = arith.mulf %582, %591 : vector<8x128xf32>
    %c56_226 = arith.constant 56 : index
    %c0_227 = arith.constant 0 : index
    %593 = vector.load %arg15[%c56_226, %c0_227] : memref<64x256xf32, #tpu.memory_space<vmem>>, vector<8x128xf32>
    tpu.vector_store %arg15[%c56_226, %c0_227], %590 {strides = array<i32>} : memref<64x256xf32, #tpu.memory_space<vmem>>, vector<8x128xf32>,
    %c0_228 = arith.constant 0 : index
    %c128_229 = arith.constant 128 : index
    %594 = vector.load %arg15[%c0_228, %c128_229] : memref<64x256xf32, #tpu.memory_space<vmem>>, vector<8x128xf32>
    tpu.vector_store %arg15[%c0_228, %c128_229], %592 {strides = array<i32>} : memref<64x256xf32, #tpu.memory_space<vmem>>, vector<8x128xf32>,
    %c0_i32_230 = arith.constant 0 : i32
    %595 = tpu.memref_slice %arg19[%c0_i32_230] : memref<3x!tpu.dma_semaphore, #tpu.memory_space<semaphore_mem>> -> memref<1x!tpu.dma_semaphore, #tpu.memory_space<semaphore_mem>>
    %596 = tpu.memref_squeeze %595 : memref<1x!tpu.dma_semaphore, #tpu.memory_space<semaphore_mem>> -> memref<!tpu.dma_semaphore, #tpu.memory_space<semaphore_mem>>
    tpu.wait_dma2 semaphore(%596 : memref<!tpu.dma_semaphore, #tpu.memory_space<semaphore_mem>>) src(%arg5 : memref<256x1024xbf16, #tpu.memory_space<any>>) dst(%arg16 : memref<256x1024xbf16, #tpu.memory_space<vmem>>)
    %c1_i32_231 = arith.constant 1 : i32
    %597 = tpu.memref_slice %arg19[%c1_i32_231] : memref<3x!tpu.dma_semaphore, #tpu.memory_space<semaphore_mem>> -> memref<1x!tpu.dma_semaphore, #tpu.memory_space<semaphore_mem>>
    %598 = tpu.memref_squeeze %597 : memref<1x!tpu.dma_semaphore, #tpu.memory_space<semaphore_mem>> -> memref<!tpu.dma_semaphore, #tpu.memory_space<semaphore_mem>>
    tpu.wait_dma2 semaphore(%598 : memref<!tpu.dma_semaphore, #tpu.memory_space<semaphore_mem>>) src(%arg6 : memref<128x512xbf16, #tpu.memory_space<any>>) dst(%arg17 : memref<128x512xbf16, #tpu.memory_space<vmem>>)
    %c2_i32_232 = arith.constant 2 : i32
    %599 = tpu.memref_slice %arg19[%c2_i32_232] : memref<3x!tpu.dma_semaphore, #tpu.memory_space<semaphore_mem>> -> memref<1x!tpu.dma_semaphore, #tpu.memory_space<semaphore_mem>>
    %600 = tpu.memref_squeeze %599 : memref<1x!tpu.dma_semaphore, #tpu.memory_space<semaphore_mem>> -> memref<!tpu.dma_semaphore, #tpu.memory_space<semaphore_mem>>
    tpu.wait_dma2 semaphore(%600 : memref<!tpu.dma_semaphore, #tpu.memory_space<semaphore_mem>>) src(%arg7 : memref<128x512xbf16, #tpu.memory_space<any>>) dst(%arg18 : memref<128x512xbf16, #tpu.memory_space<vmem>>)
    %c0_233 = arith.constant 0 : index
    %c0_234 = arith.constant 0 : index
    %601 = vector.load %arg15[%c0_233, %c0_234] : memref<64x256xf32, #tpu.memory_space<vmem>>, vector<64x256xf32>
    %602 = arith.truncf %601 : vector<64x256xf32> to vector<64x256xbf16>
    %c0_235 = arith.constant 0 : index
    %c0_236 = arith.constant 0 : index
    %603 = vector.load %arg16[%c0_235, %c0_236] : memref<256x1024xbf16, #tpu.memory_space<vmem>>, vector<256x1024xbf16>
    %cst_237 = arith.constant dense<0.000000e+00> : vector<64x1024xf32>
    %604 = tpu.matmul %602, %603, %cst_237 {dimension_numbers = #tpu.dot_dimension_numbers<[1], [0], [0], [1], [0, 0, 1, 1], [], []>} : vector<64x256xbf16>, vector<256x1024xbf16>, vector<64x1024xf32> -> vector<64x1024xf32>
    %c0_238 = arith.constant 0 : index
    %c0_239 = arith.constant 0 : index
    %605 = vector.load %arg8[%c0_238, %c0_239] : memref<1x1024xf32, #tpu.memory_space<vmem>>, vector<1x1024xf32>
    %606 = vector.broadcast %605 : vector<1x1024xf32> to vector<64x1024xf32>
    %607 = arith.addf %604, %606 : vector<64x1024xf32>
    %c0_240 = arith.constant 0 : index
    %c0_241 = arith.constant 0 : index
    %608 = vector.load %arg14[%c0_240, %c0_241] : memref<64x1024xf32, #tpu.memory_space<vmem>>, vector<64x1024xf32>
    tpu.vector_store %arg14[%c0_240, %c0_241], %607 {strides = array<i32>} : memref<64x1024xf32, #tpu.memory_space<vmem>>, vector<64x1024xf32>,
    %c0_242 = arith.constant 0 : index
    %c0_243 = arith.constant 0 : index
    %609 = vector.load %arg17[%c0_242, %c0_243] : memref<128x512xbf16, #tpu.memory_space<vmem>>, vector<128x512xbf16>
    %c0_244 = arith.constant 0 : index
    %c0_245 = arith.constant 0 : index
    %610 = vector.load %arg18[%c0_244, %c0_245] : memref<128x512xbf16, #tpu.memory_space<vmem>>, vector<128x512xbf16>
    %cst_246 = arith.constant 0.000000e+00 : f32
    %611 = vector.broadcast %cst_246 : f32 to vector<8x128xf32>
    %cst_247 = arith.constant 0.000000e+00 : f32
    %612 = vector.broadcast %cst_247 : f32 to vector<8x128xf32>
    %cst_248 = arith.constant 0.000000e+00 : f32
    %613 = vector.broadcast %cst_248 : f32 to vector<8x128xf32>
    %cst_249 = arith.constant 0.000000e+00 : f32
    %614 = vector.broadcast %cst_249 : f32 to vector<8x128xf32>
    %c0_250 = arith.constant 0 : index
    %c0_251 = arith.constant 0 : index
    %615 = vector.load %arg14[%c0_250, %c0_251] : memref<64x1024xf32, #tpu.memory_space<vmem>>, vector<8x512xf32>
    %c56_252 = arith.constant 56 : index
    %c512_253 = arith.constant 512 : index
    %616 = vector.load %arg14[%c56_252, %c512_253] : memref<64x1024xf32, #tpu.memory_space<vmem>>, vector<8x512xf32>
    %617 = arith.truncf %611 : vector<8x128xf32> to vector<8x128xbf16>
    %cst_254 = arith.constant dense<0.000000e+00> : vector<8x512xf32>
    %618 = tpu.matmul %617, %609, %cst_254 {dimension_numbers = #tpu.dot_dimension_numbers<[1], [0], [0], [1], [0, 0, 1, 1], [], []>} : vector<8x128xbf16>, vector<128x512xbf16>, vector<8x512xf32> -> vector<8x512xf32>
    %619 = arith.addf %615, %618 : vector<8x512xf32>
    %620 = arith.truncf %613 : vector<8x128xf32> to vector<8x128xbf16>
    %cst_255 = arith.constant dense<0.000000e+00> : vector<8x512xf32>
    %621 = tpu.matmul %620, %610, %cst_255 {dimension_numbers = #tpu.dot_dimension_numbers<[1], [0], [0], [1], [0, 0, 1, 1], [], []>} : vector<8x128xbf16>, vector<128x512xbf16>, vector<8x512xf32> -> vector<8x512xf32>
    %622 = arith.addf %616, %621 : vector<8x512xf32>
    %623 = vector.extract_strided_slice %619 {offsets = [0, 0], sizes = [8, 128], strides = [1, 1]} : vector<8x512xf32> to vector<8x128xf32>
    %cst_256 = arith.constant 5.000000e-01 : f32
    %624 = vector.broadcast %cst_256 : f32 to vector<8x128xf32>
    %625 = arith.mulf %624, %623 : vector<8x128xf32>
    %626 = math.tanh %625 : vector<8x128xf32>
    %cst_257 = arith.constant 1.000000e+00 : f32
    %627 = vector.broadcast %cst_257 : f32 to vector<8x128xf32>
    %628 = arith.addf %626, %627 : vector<8x128xf32>
    %cst_258 = arith.constant 5.000000e-01 : f32
    %629 = vector.broadcast %cst_258 : f32 to vector<8x128xf32>
    %630 = arith.mulf %629, %628 : vector<8x128xf32>
    %631 = vector.extract_strided_slice %619 {offsets = [0, 128], sizes = [8, 128], strides = [1, 1]} : vector<8x512xf32> to vector<8x128xf32>
    %cst_259 = arith.constant 5.000000e-01 : f32
    %632 = vector.broadcast %cst_259 : f32 to vector<8x128xf32>
    %633 = arith.mulf %632, %631 : vector<8x128xf32>
    %634 = math.tanh %633 : vector<8x128xf32>
    %cst_260 = arith.constant 1.000000e+00 : f32
    %635 = vector.broadcast %cst_260 : f32 to vector<8x128xf32>
    %636 = arith.addf %634, %635 : vector<8x128xf32>
    %cst_261 = arith.constant 5.000000e-01 : f32
    %637 = vector.broadcast %cst_261 : f32 to vector<8x128xf32>
    %638 = arith.mulf %637, %636 : vector<8x128xf32>
    %639 = vector.extract_strided_slice %619 {offsets = [0, 256], sizes = [8, 128], strides = [1, 1]} : vector<8x512xf32> to vector<8x128xf32>
    %640 = math.tanh %639 : vector<8x128xf32>
    %641 = vector.extract_strided_slice %619 {offsets = [0, 384], sizes = [8, 128], strides = [1, 1]} : vector<8x512xf32> to vector<8x128xf32>
    %cst_262 = arith.constant 5.000000e-01 : f32
    %642 = vector.broadcast %cst_262 : f32 to vector<8x128xf32>
    %643 = arith.mulf %642, %641 : vector<8x128xf32>
    %644 = math.tanh %643 : vector<8x128xf32>
    %cst_263 = arith.constant 1.000000e+00 : f32
    %645 = vector.broadcast %cst_263 : f32 to vector<8x128xf32>
    %646 = arith.addf %644, %645 : vector<8x128xf32>
    %cst_264 = arith.constant 5.000000e-01 : f32
    %647 = vector.broadcast %cst_264 : f32 to vector<8x128xf32>
    %648 = arith.mulf %647, %646 : vector<8x128xf32>
    %649 = vector.extract_strided_slice %622 {offsets = [0, 0], sizes = [8, 128], strides = [1, 1]} : vector<8x512xf32> to vector<8x128xf32>
    %cst_265 = arith.constant 5.000000e-01 : f32
    %650 = vector.broadcast %cst_265 : f32 to vector<8x128xf32>
    %651 = arith.mulf %650, %649 : vector<8x128xf32>
    %652 = math.tanh %651 : vector<8x128xf32>
    %cst_266 = arith.constant 1.000000e+00 : f32
    %653 = vector.broadcast %cst_266 : f32 to vector<8x128xf32>
    %654 = arith.addf %652, %653 : vector<8x128xf32>
    %cst_267 = arith.constant 5.000000e-01 : f32
    %655 = vector.broadcast %cst_267 : f32 to vector<8x128xf32>
    %656 = arith.mulf %655, %654 : vector<8x128xf32>
    %657 = vector.extract_strided_slice %622 {offsets = [0, 128], sizes = [8, 128], strides = [1, 1]} : vector<8x512xf32> to vector<8x128xf32>
    %cst_268 = arith.constant 5.000000e-01 : f32
    %658 = vector.broadcast %cst_268 : f32 to vector<8x128xf32>
    %659 = arith.mulf %658, %657 : vector<8x128xf32>
    %660 = math.tanh %659 : vector<8x128xf32>
    %cst_269 = arith.constant 1.000000e+00 : f32
    %661 = vector.broadcast %cst_269 : f32 to vector<8x128xf32>
    %662 = arith.addf %660, %661 : vector<8x128xf32>
    %cst_270 = arith.constant 5.000000e-01 : f32
    %663 = vector.broadcast %cst_270 : f32 to vector<8x128xf32>
    %664 = arith.mulf %663, %662 : vector<8x128xf32>
    %665 = vector.extract_strided_slice %622 {offsets = [0, 256], sizes = [8, 128], strides = [1, 1]} : vector<8x512xf32> to vector<8x128xf32>
    %666 = math.tanh %665 : vector<8x128xf32>
    %667 = vector.extract_strided_slice %622 {offsets = [0, 384], sizes = [8, 128], strides = [1, 1]} : vector<8x512xf32> to vector<8x128xf32>
    %cst_271 = arith.constant 5.000000e-01 : f32
    %668 = vector.broadcast %cst_271 : f32 to vector<8x128xf32>
    %669 = arith.mulf %668, %667 : vector<8x128xf32>
    %670 = math.tanh %669 : vector<8x128xf32>
    %cst_272 = arith.constant 1.000000e+00 : f32
    %671 = vector.broadcast %cst_272 : f32 to vector<8x128xf32>
    %672 = arith.addf %670, %671 : vector<8x128xf32>
    %cst_273 = arith.constant 5.000000e-01 : f32
    %673 = vector.broadcast %cst_273 : f32 to vector<8x128xf32>
    %674 = arith.mulf %673, %672 : vector<8x128xf32>
    %675 = arith.mulf %638, %612 : vector<8x128xf32>
    %676 = arith.mulf %630, %640 : vector<8x128xf32>
    %677 = arith.addf %675, %676 : vector<8x128xf32>
    %678 = arith.mulf %664, %614 : vector<8x128xf32>
    %679 = arith.mulf %656, %666 : vector<8x128xf32>
    %680 = arith.addf %678, %679 : vector<8x128xf32>
    %681 = math.tanh %677 : vector<8x128xf32>
    %682 = arith.mulf %648, %681 : vector<8x128xf32>
    %683 = math.tanh %680 : vector<8x128xf32>
    %684 = arith.mulf %674, %683 : vector<8x128xf32>
    %c8_274 = arith.constant 8 : index
    %c0_275 = arith.constant 0 : index
    %685 = vector.load %arg14[%c8_274, %c0_275] : memref<64x1024xf32, #tpu.memory_space<vmem>>, vector<8x512xf32>
    %686 = arith.truncf %682 : vector<8x128xf32> to vector<8x128xbf16>
    %cst_276 = arith.constant dense<0.000000e+00> : vector<8x512xf32>
    %687 = tpu.matmul %686, %609, %cst_276 {dimension_numbers = #tpu.dot_dimension_numbers<[1], [0], [0], [1], [0, 0, 1, 1], [], []>} : vector<8x128xbf16>, vector<128x512xbf16>, vector<8x512xf32> -> vector<8x512xf32>
    %688 = arith.addf %685, %687 : vector<8x512xf32>
    %689 = vector.extract_strided_slice %688 {offsets = [0, 0], sizes = [8, 128], strides = [1, 1]} : vector<8x512xf32> to vector<8x128xf32>
    %cst_277 = arith.constant 5.000000e-01 : f32
    %690 = vector.broadcast %cst_277 : f32 to vector<8x128xf32>
    %691 = arith.mulf %690, %689 : vector<8x128xf32>
    %692 = math.tanh %691 : vector<8x128xf32>
    %cst_278 = arith.constant 1.000000e+00 : f32
    %693 = vector.broadcast %cst_278 : f32 to vector<8x128xf32>
    %694 = arith.addf %692, %693 : vector<8x128xf32>
    %cst_279 = arith.constant 5.000000e-01 : f32
    %695 = vector.broadcast %cst_279 : f32 to vector<8x128xf32>
    %696 = arith.mulf %695, %694 : vector<8x128xf32>
    %697 = vector.extract_strided_slice %688 {offsets = [0, 128], sizes = [8, 128], strides = [1, 1]} : vector<8x512xf32> to vector<8x128xf32>
    %cst_280 = arith.constant 5.000000e-01 : f32
    %698 = vector.broadcast %cst_280 : f32 to vector<8x128xf32>
    %699 = arith.mulf %698, %697 : vector<8x128xf32>
    %700 = math.tanh %699 : vector<8x128xf32>
    %cst_281 = arith.constant 1.000000e+00 : f32
    %701 = vector.broadcast %cst_281 : f32 to vector<8x128xf32>
    %702 = arith.addf %700, %701 : vector<8x128xf32>
    %cst_282 = arith.constant 5.000000e-01 : f32
    %703 = vector.broadcast %cst_282 : f32 to vector<8x128xf32>
    %704 = arith.mulf %703, %702 : vector<8x128xf32>
    %705 = vector.extract_strided_slice %688 {offsets = [0, 256], sizes = [8, 128], strides = [1, 1]} : vector<8x512xf32> to vector<8x128xf32>
    %706 = math.tanh %705 : vector<8x128xf32>
    %707 = vector.extract_strided_slice %688 {offsets = [0, 384], sizes = [8, 128], strides = [1, 1]} : vector<8x512xf32> to vector<8x128xf32>
    %cst_283 = arith.constant 5.000000e-01 : f32
    %708 = vector.broadcast %cst_283 : f32 to vector<8x128xf32>
    %709 = arith.mulf %708, %707 : vector<8x128xf32>
    %710 = math.tanh %709 : vector<8x128xf32>
    %cst_284 = arith.constant 1.000000e+00 : f32
    %711 = vector.broadcast %cst_284 : f32 to vector<8x128xf32>
    %712 = arith.addf %710, %711 : vector<8x128xf32>
    %cst_285 = arith.constant 5.000000e-01 : f32
    %713 = vector.broadcast %cst_285 : f32 to vector<8x128xf32>
    %714 = arith.mulf %713, %712 : vector<8x128xf32>
    %715 = arith.mulf %704, %677 : vector<8x128xf32>
    %716 = arith.mulf %696, %706 : vector<8x128xf32>
    %717 = arith.addf %715, %716 : vector<8x128xf32>
    %718 = math.tanh %717 : vector<8x128xf32>
    %719 = arith.mulf %714, %718 : vector<8x128xf32>
    %c16_286 = arith.constant 16 : index
    %c0_287 = arith.constant 0 : index
    %720 = vector.load %arg14[%c16_286, %c0_287] : memref<64x1024xf32, #tpu.memory_space<vmem>>, vector<8x512xf32>
    %721 = arith.truncf %719 : vector<8x128xf32> to vector<8x128xbf16>
    %cst_288 = arith.constant dense<0.000000e+00> : vector<8x512xf32>
    %722 = tpu.matmul %721, %609, %cst_288 {dimension_numbers = #tpu.dot_dimension_numbers<[1], [0], [0], [1], [0, 0, 1, 1], [], []>} : vector<8x128xbf16>, vector<128x512xbf16>, vector<8x512xf32> -> vector<8x512xf32>
    %723 = arith.addf %720, %722 : vector<8x512xf32>
    %724 = vector.extract_strided_slice %723 {offsets = [0, 0], sizes = [8, 128], strides = [1, 1]} : vector<8x512xf32> to vector<8x128xf32>
    %cst_289 = arith.constant 5.000000e-01 : f32
    %725 = vector.broadcast %cst_289 : f32 to vector<8x128xf32>
    %726 = arith.mulf %725, %724 : vector<8x128xf32>
    %727 = math.tanh %726 : vector<8x128xf32>
    %cst_290 = arith.constant 1.000000e+00 : f32
    %728 = vector.broadcast %cst_290 : f32 to vector<8x128xf32>
    %729 = arith.addf %727, %728 : vector<8x128xf32>
    %cst_291 = arith.constant 5.000000e-01 : f32
    %730 = vector.broadcast %cst_291 : f32 to vector<8x128xf32>
    %731 = arith.mulf %730, %729 : vector<8x128xf32>
    %732 = vector.extract_strided_slice %723 {offsets = [0, 128], sizes = [8, 128], strides = [1, 1]} : vector<8x512xf32> to vector<8x128xf32>
    %cst_292 = arith.constant 5.000000e-01 : f32
    %733 = vector.broadcast %cst_292 : f32 to vector<8x128xf32>
    %734 = arith.mulf %733, %732 : vector<8x128xf32>
    %735 = math.tanh %734 : vector<8x128xf32>
    %cst_293 = arith.constant 1.000000e+00 : f32
    %736 = vector.broadcast %cst_293 : f32 to vector<8x128xf32>
    %737 = arith.addf %735, %736 : vector<8x128xf32>
    %cst_294 = arith.constant 5.000000e-01 : f32
    %738 = vector.broadcast %cst_294 : f32 to vector<8x128xf32>
    %739 = arith.mulf %738, %737 : vector<8x128xf32>
    %740 = vector.extract_strided_slice %723 {offsets = [0, 256], sizes = [8, 128], strides = [1, 1]} : vector<8x512xf32> to vector<8x128xf32>
    %741 = math.tanh %740 : vector<8x128xf32>
    %742 = vector.extract_strided_slice %723 {offsets = [0, 384], sizes = [8, 128], strides = [1, 1]} : vector<8x512xf32> to vector<8x128xf32>
    %cst_295 = arith.constant 5.000000e-01 : f32
    %743 = vector.broadcast %cst_295 : f32 to vector<8x128xf32>
    %744 = arith.mulf %743, %742 : vector<8x128xf32>
    %745 = math.tanh %744 : vector<8x128xf32>
    %cst_296 = arith.constant 1.000000e+00 : f32
    %746 = vector.broadcast %cst_296 : f32 to vector<8x128xf32>
    %747 = arith.addf %745, %746 : vector<8x128xf32>
    %cst_297 = arith.constant 5.000000e-01 : f32
    %748 = vector.broadcast %cst_297 : f32 to vector<8x128xf32>
    %749 = arith.mulf %748, %747 : vector<8x128xf32>
    %750 = arith.mulf %739, %717 : vector<8x128xf32>
    %751 = arith.mulf %731, %741 : vector<8x128xf32>
    %752 = arith.addf %750, %751 : vector<8x128xf32>
    %753 = math.tanh %752 : vector<8x128xf32>
    %754 = arith.mulf %749, %753 : vector<8x128xf32>
    %c24_298 = arith.constant 24 : index
    %c0_299 = arith.constant 0 : index
    %755 = vector.load %arg14[%c24_298, %c0_299] : memref<64x1024xf32, #tpu.memory_space<vmem>>, vector<8x512xf32>
    %756 = arith.truncf %754 : vector<8x128xf32> to vector<8x128xbf16>
    %cst_300 = arith.constant dense<0.000000e+00> : vector<8x512xf32>
    %757 = tpu.matmul %756, %609, %cst_300 {dimension_numbers = #tpu.dot_dimension_numbers<[1], [0], [0], [1], [0, 0, 1, 1], [], []>} : vector<8x128xbf16>, vector<128x512xbf16>, vector<8x512xf32> -> vector<8x512xf32>
    %758 = arith.addf %755, %757 : vector<8x512xf32>
    %759 = vector.extract_strided_slice %758 {offsets = [0, 0], sizes = [8, 128], strides = [1, 1]} : vector<8x512xf32> to vector<8x128xf32>
    %cst_301 = arith.constant 5.000000e-01 : f32
    %760 = vector.broadcast %cst_301 : f32 to vector<8x128xf32>
    %761 = arith.mulf %760, %759 : vector<8x128xf32>
    %762 = math.tanh %761 : vector<8x128xf32>
    %cst_302 = arith.constant 1.000000e+00 : f32
    %763 = vector.broadcast %cst_302 : f32 to vector<8x128xf32>
    %764 = arith.addf %762, %763 : vector<8x128xf32>
    %cst_303 = arith.constant 5.000000e-01 : f32
    %765 = vector.broadcast %cst_303 : f32 to vector<8x128xf32>
    %766 = arith.mulf %765, %764 : vector<8x128xf32>
    %767 = vector.extract_strided_slice %758 {offsets = [0, 128], sizes = [8, 128], strides = [1, 1]} : vector<8x512xf32> to vector<8x128xf32>
    %cst_304 = arith.constant 5.000000e-01 : f32
    %768 = vector.broadcast %cst_304 : f32 to vector<8x128xf32>
    %769 = arith.mulf %768, %767 : vector<8x128xf32>
    %770 = math.tanh %769 : vector<8x128xf32>
    %cst_305 = arith.constant 1.000000e+00 : f32
    %771 = vector.broadcast %cst_305 : f32 to vector<8x128xf32>
    %772 = arith.addf %770, %771 : vector<8x128xf32>
    %cst_306 = arith.constant 5.000000e-01 : f32
    %773 = vector.broadcast %cst_306 : f32 to vector<8x128xf32>
    %774 = arith.mulf %773, %772 : vector<8x128xf32>
    %775 = vector.extract_strided_slice %758 {offsets = [0, 256], sizes = [8, 128], strides = [1, 1]} : vector<8x512xf32> to vector<8x128xf32>
    %776 = math.tanh %775 : vector<8x128xf32>
    %777 = vector.extract_strided_slice %758 {offsets = [0, 384], sizes = [8, 128], strides = [1, 1]} : vector<8x512xf32> to vector<8x128xf32>
    %cst_307 = arith.constant 5.000000e-01 : f32
    %778 = vector.broadcast %cst_307 : f32 to vector<8x128xf32>
    %779 = arith.mulf %778, %777 : vector<8x128xf32>
    %780 = math.tanh %779 : vector<8x128xf32>
    %cst_308 = arith.constant 1.000000e+00 : f32
    %781 = vector.broadcast %cst_308 : f32 to vector<8x128xf32>
    %782 = arith.addf %780, %781 : vector<8x128xf32>
    %cst_309 = arith.constant 5.000000e-01 : f32
    %783 = vector.broadcast %cst_309 : f32 to vector<8x128xf32>
    %784 = arith.mulf %783, %782 : vector<8x128xf32>
    %785 = arith.mulf %774, %752 : vector<8x128xf32>
    %786 = arith.mulf %766, %776 : vector<8x128xf32>
    %787 = arith.addf %785, %786 : vector<8x128xf32>
    %788 = math.tanh %787 : vector<8x128xf32>
    %789 = arith.mulf %784, %788 : vector<8x128xf32>
    %c32_310 = arith.constant 32 : index
    %c0_311 = arith.constant 0 : index
    %790 = vector.load %arg14[%c32_310, %c0_311] : memref<64x1024xf32, #tpu.memory_space<vmem>>, vector<8x512xf32>
    %791 = arith.truncf %789 : vector<8x128xf32> to vector<8x128xbf16>
    %cst_312 = arith.constant dense<0.000000e+00> : vector<8x512xf32>
    %792 = tpu.matmul %791, %609, %cst_312 {dimension_numbers = #tpu.dot_dimension_numbers<[1], [0], [0], [1], [0, 0, 1, 1], [], []>} : vector<8x128xbf16>, vector<128x512xbf16>, vector<8x512xf32> -> vector<8x512xf32>
    %793 = arith.addf %790, %792 : vector<8x512xf32>
    %794 = vector.extract_strided_slice %793 {offsets = [0, 0], sizes = [8, 128], strides = [1, 1]} : vector<8x512xf32> to vector<8x128xf32>
    %cst_313 = arith.constant 5.000000e-01 : f32
    %795 = vector.broadcast %cst_313 : f32 to vector<8x128xf32>
    %796 = arith.mulf %795, %794 : vector<8x128xf32>
    %797 = math.tanh %796 : vector<8x128xf32>
    %cst_314 = arith.constant 1.000000e+00 : f32
    %798 = vector.broadcast %cst_314 : f32 to vector<8x128xf32>
    %799 = arith.addf %797, %798 : vector<8x128xf32>
    %cst_315 = arith.constant 5.000000e-01 : f32
    %800 = vector.broadcast %cst_315 : f32 to vector<8x128xf32>
    %801 = arith.mulf %800, %799 : vector<8x128xf32>
    %802 = vector.extract_strided_slice %793 {offsets = [0, 128], sizes = [8, 128], strides = [1, 1]} : vector<8x512xf32> to vector<8x128xf32>
    %cst_316 = arith.constant 5.000000e-01 : f32
    %803 = vector.broadcast %cst_316 : f32 to vector<8x128xf32>
    %804 = arith.mulf %803, %802 : vector<8x128xf32>
    %805 = math.tanh %804 : vector<8x128xf32>
    %cst_317 = arith.constant 1.000000e+00 : f32
    %806 = vector.broadcast %cst_317 : f32 to vector<8x128xf32>
    %807 = arith.addf %805, %806 : vector<8x128xf32>
    %cst_318 = arith.constant 5.000000e-01 : f32
    %808 = vector.broadcast %cst_318 : f32 to vector<8x128xf32>
    %809 = arith.mulf %808, %807 : vector<8x128xf32>
    %810 = vector.extract_strided_slice %793 {offsets = [0, 256], sizes = [8, 128], strides = [1, 1]} : vector<8x512xf32> to vector<8x128xf32>
    %811 = math.tanh %810 : vector<8x128xf32>
    %812 = vector.extract_strided_slice %793 {offsets = [0, 384], sizes = [8, 128], strides = [1, 1]} : vector<8x512xf32> to vector<8x128xf32>
    %cst_319 = arith.constant 5.000000e-01 : f32
    %813 = vector.broadcast %cst_319 : f32 to vector<8x128xf32>
    %814 = arith.mulf %813, %812 : vector<8x128xf32>
    %815 = math.tanh %814 : vector<8x128xf32>
    %cst_320 = arith.constant 1.000000e+00 : f32
    %816 = vector.broadcast %cst_320 : f32 to vector<8x128xf32>
    %817 = arith.addf %815, %816 : vector<8x128xf32>
    %cst_321 = arith.constant 5.000000e-01 : f32
    %818 = vector.broadcast %cst_321 : f32 to vector<8x128xf32>
    %819 = arith.mulf %818, %817 : vector<8x128xf32>
    %820 = arith.mulf %809, %787 : vector<8x128xf32>
    %821 = arith.mulf %801, %811 : vector<8x128xf32>
    %822 = arith.addf %820, %821 : vector<8x128xf32>
    %823 = math.tanh %822 : vector<8x128xf32>
    %824 = arith.mulf %819, %823 : vector<8x128xf32>
    %c40_322 = arith.constant 40 : index
    %c0_323 = arith.constant 0 : index
    %825 = vector.load %arg14[%c40_322, %c0_323] : memref<64x1024xf32, #tpu.memory_space<vmem>>, vector<8x512xf32>
    %826 = arith.truncf %824 : vector<8x128xf32> to vector<8x128xbf16>
    %cst_324 = arith.constant dense<0.000000e+00> : vector<8x512xf32>
    %827 = tpu.matmul %826, %609, %cst_324 {dimension_numbers = #tpu.dot_dimension_numbers<[1], [0], [0], [1], [0, 0, 1, 1], [], []>} : vector<8x128xbf16>, vector<128x512xbf16>, vector<8x512xf32> -> vector<8x512xf32>
    %828 = arith.addf %825, %827 : vector<8x512xf32>
    %829 = vector.extract_strided_slice %828 {offsets = [0, 0], sizes = [8, 128], strides = [1, 1]} : vector<8x512xf32> to vector<8x128xf32>
    %cst_325 = arith.constant 5.000000e-01 : f32
    %830 = vector.broadcast %cst_325 : f32 to vector<8x128xf32>
    %831 = arith.mulf %830, %829 : vector<8x128xf32>
    %832 = math.tanh %831 : vector<8x128xf32>
    %cst_326 = arith.constant 1.000000e+00 : f32
    %833 = vector.broadcast %cst_326 : f32 to vector<8x128xf32>
    %834 = arith.addf %832, %833 : vector<8x128xf32>
    %cst_327 = arith.constant 5.000000e-01 : f32
    %835 = vector.broadcast %cst_327 : f32 to vector<8x128xf32>
    %836 = arith.mulf %835, %834 : vector<8x128xf32>
    %837 = vector.extract_strided_slice %828 {offsets = [0, 128], sizes = [8, 128], strides = [1, 1]} : vector<8x512xf32> to vector<8x128xf32>
    %cst_328 = arith.constant 5.000000e-01 : f32
    %838 = vector.broadcast %cst_328 : f32 to vector<8x128xf32>
    %839 = arith.mulf %838, %837 : vector<8x128xf32>
    %840 = math.tanh %839 : vector<8x128xf32>
    %cst_329 = arith.constant 1.000000e+00 : f32
    %841 = vector.broadcast %cst_329 : f32 to vector<8x128xf32>
    %842 = arith.addf %840, %841 : vector<8x128xf32>
    %cst_330 = arith.constant 5.000000e-01 : f32
    %843 = vector.broadcast %cst_330 : f32 to vector<8x128xf32>
    %844 = arith.mulf %843, %842 : vector<8x128xf32>
    %845 = vector.extract_strided_slice %828 {offsets = [0, 256], sizes = [8, 128], strides = [1, 1]} : vector<8x512xf32> to vector<8x128xf32>
    %846 = math.tanh %845 : vector<8x128xf32>
    %847 = vector.extract_strided_slice %828 {offsets = [0, 384], sizes = [8, 128], strides = [1, 1]} : vector<8x512xf32> to vector<8x128xf32>
    %cst_331 = arith.constant 5.000000e-01 : f32
    %848 = vector.broadcast %cst_331 : f32 to vector<8x128xf32>
    %849 = arith.mulf %848, %847 : vector<8x128xf32>
    %850 = math.tanh %849 : vector<8x128xf32>
    %cst_332 = arith.constant 1.000000e+00 : f32
    %851 = vector.broadcast %cst_332 : f32 to vector<8x128xf32>
    %852 = arith.addf %850, %851 : vector<8x128xf32>
    %cst_333 = arith.constant 5.000000e-01 : f32
    %853 = vector.broadcast %cst_333 : f32 to vector<8x128xf32>
    %854 = arith.mulf %853, %852 : vector<8x128xf32>
    %855 = arith.mulf %844, %822 : vector<8x128xf32>
    %856 = arith.mulf %836, %846 : vector<8x128xf32>
    %857 = arith.addf %855, %856 : vector<8x128xf32>
    %858 = math.tanh %857 : vector<8x128xf32>
    %859 = arith.mulf %854, %858 : vector<8x128xf32>
    %c48_334 = arith.constant 48 : index
    %c0_335 = arith.constant 0 : index
    %860 = vector.load %arg14[%c48_334, %c0_335] : memref<64x1024xf32, #tpu.memory_space<vmem>>, vector<8x512xf32>
    %861 = arith.truncf %859 : vector<8x128xf32> to vector<8x128xbf16>
    %cst_336 = arith.constant dense<0.000000e+00> : vector<8x512xf32>
    %862 = tpu.matmul %861, %609, %cst_336 {dimension_numbers = #tpu.dot_dimension_numbers<[1], [0], [0], [1], [0, 0, 1, 1], [], []>} : vector<8x128xbf16>, vector<128x512xbf16>, vector<8x512xf32> -> vector<8x512xf32>
    %863 = arith.addf %860, %862 : vector<8x512xf32>
    %864 = vector.extract_strided_slice %863 {offsets = [0, 0], sizes = [8, 128], strides = [1, 1]} : vector<8x512xf32> to vector<8x128xf32>
    %cst_337 = arith.constant 5.000000e-01 : f32
    %865 = vector.broadcast %cst_337 : f32 to vector<8x128xf32>
    %866 = arith.mulf %865, %864 : vector<8x128xf32>
    %867 = math.tanh %866 : vector<8x128xf32>
    %cst_338 = arith.constant 1.000000e+00 : f32
    %868 = vector.broadcast %cst_338 : f32 to vector<8x128xf32>
    %869 = arith.addf %867, %868 : vector<8x128xf32>
    %cst_339 = arith.constant 5.000000e-01 : f32
    %870 = vector.broadcast %cst_339 : f32 to vector<8x128xf32>
    %871 = arith.mulf %870, %869 : vector<8x128xf32>
    %872 = vector.extract_strided_slice %863 {offsets = [0, 128], sizes = [8, 128], strides = [1, 1]} : vector<8x512xf32> to vector<8x128xf32>
    %cst_340 = arith.constant 5.000000e-01 : f32
    %873 = vector.broadcast %cst_340 : f32 to vector<8x128xf32>
    %874 = arith.mulf %873, %872 : vector<8x128xf32>
    %875 = math.tanh %874 : vector<8x128xf32>
    %cst_341 = arith.constant 1.000000e+00 : f32
    %876 = vector.broadcast %cst_341 : f32 to vector<8x128xf32>
    %877 = arith.addf %875, %876 : vector<8x128xf32>
    %cst_342 = arith.constant 5.000000e-01 : f32
    %878 = vector.broadcast %cst_342 : f32 to vector<8x128xf32>
    %879 = arith.mulf %878, %877 : vector<8x128xf32>
    %880 = vector.extract_strided_slice %863 {offsets = [0, 256], sizes = [8, 128], strides = [1, 1]} : vector<8x512xf32> to vector<8x128xf32>
    %881 = math.tanh %880 : vector<8x128xf32>
    %882 = vector.extract_strided_slice %863 {offsets = [0, 384], sizes = [8, 128], strides = [1, 1]} : vector<8x512xf32> to vector<8x128xf32>
    %cst_343 = arith.constant 5.000000e-01 : f32
    %883 = vector.broadcast %cst_343 : f32 to vector<8x128xf32>
    %884 = arith.mulf %883, %882 : vector<8x128xf32>
    %885 = math.tanh %884 : vector<8x128xf32>
    %cst_344 = arith.constant 1.000000e+00 : f32
    %886 = vector.broadcast %cst_344 : f32 to vector<8x128xf32>
    %887 = arith.addf %885, %886 : vector<8x128xf32>
    %cst_345 = arith.constant 5.000000e-01 : f32
    %888 = vector.broadcast %cst_345 : f32 to vector<8x128xf32>
    %889 = arith.mulf %888, %887 : vector<8x128xf32>
    %890 = arith.mulf %879, %857 : vector<8x128xf32>
    %891 = arith.mulf %871, %881 : vector<8x128xf32>
    %892 = arith.addf %890, %891 : vector<8x128xf32>
    %893 = math.tanh %892 : vector<8x128xf32>
    %894 = arith.mulf %889, %893 : vector<8x128xf32>
    %c56_346 = arith.constant 56 : index
    %c0_347 = arith.constant 0 : index
    %895 = vector.load %arg14[%c56_346, %c0_347] : memref<64x1024xf32, #tpu.memory_space<vmem>>, vector<8x512xf32>
    %896 = arith.truncf %894 : vector<8x128xf32> to vector<8x128xbf16>
    %cst_348 = arith.constant dense<0.000000e+00> : vector<8x512xf32>
    %897 = tpu.matmul %896, %609, %cst_348 {dimension_numbers = #tpu.dot_dimension_numbers<[1], [0], [0], [1], [0, 0, 1, 1], [], []>} : vector<8x128xbf16>, vector<128x512xbf16>, vector<8x512xf32> -> vector<8x512xf32>
    %898 = arith.addf %895, %897 : vector<8x512xf32>
    %899 = vector.extract_strided_slice %898 {offsets = [0, 0], sizes = [8, 128], strides = [1, 1]} : vector<8x512xf32> to vector<8x128xf32>
    %cst_349 = arith.constant 5.000000e-01 : f32
    %900 = vector.broadcast %cst_349 : f32 to vector<8x128xf32>
    %901 = arith.mulf %900, %899 : vector<8x128xf32>
    %902 = math.tanh %901 : vector<8x128xf32>
    %cst_350 = arith.constant 1.000000e+00 : f32
    %903 = vector.broadcast %cst_350 : f32 to vector<8x128xf32>
    %904 = arith.addf %902, %903 : vector<8x128xf32>
    %cst_351 = arith.constant 5.000000e-01 : f32
    %905 = vector.broadcast %cst_351 : f32 to vector<8x128xf32>
    %906 = arith.mulf %905, %904 : vector<8x128xf32>
    %907 = vector.extract_strided_slice %898 {offsets = [0, 128], sizes = [8, 128], strides = [1, 1]} : vector<8x512xf32> to vector<8x128xf32>
    %cst_352 = arith.constant 5.000000e-01 : f32
    %908 = vector.broadcast %cst_352 : f32 to vector<8x128xf32>
    %909 = arith.mulf %908, %907 : vector<8x128xf32>
    %910 = math.tanh %909 : vector<8x128xf32>
    %cst_353 = arith.constant 1.000000e+00 : f32
    %911 = vector.broadcast %cst_353 : f32 to vector<8x128xf32>
    %912 = arith.addf %910, %911 : vector<8x128xf32>
    %cst_354 = arith.constant 5.000000e-01 : f32
    %913 = vector.broadcast %cst_354 : f32 to vector<8x128xf32>
    %914 = arith.mulf %913, %912 : vector<8x128xf32>
    %915 = vector.extract_strided_slice %898 {offsets = [0, 256], sizes = [8, 128], strides = [1, 1]} : vector<8x512xf32> to vector<8x128xf32>
    %916 = math.tanh %915 : vector<8x128xf32>
    %917 = vector.extract_strided_slice %898 {offsets = [0, 384], sizes = [8, 128], strides = [1, 1]} : vector<8x512xf32> to vector<8x128xf32>
    %cst_355 = arith.constant 5.000000e-01 : f32
    %918 = vector.broadcast %cst_355 : f32 to vector<8x128xf32>
    %919 = arith.mulf %918, %917 : vector<8x128xf32>
    %920 = math.tanh %919 : vector<8x128xf32>
    %cst_356 = arith.constant 1.000000e+00 : f32
    %921 = vector.broadcast %cst_356 : f32 to vector<8x128xf32>
    %922 = arith.addf %920, %921 : vector<8x128xf32>
    %cst_357 = arith.constant 5.000000e-01 : f32
    %923 = vector.broadcast %cst_357 : f32 to vector<8x128xf32>
    %924 = arith.mulf %923, %922 : vector<8x128xf32>
    %925 = arith.mulf %914, %892 : vector<8x128xf32>
    %926 = arith.mulf %906, %916 : vector<8x128xf32>
    %927 = arith.addf %925, %926 : vector<8x128xf32>
    %928 = math.tanh %927 : vector<8x128xf32>
    %929 = arith.mulf %924, %928 : vector<8x128xf32>
    %930 = tpu.concatenate %929, %684 in 1 : vector<8x128xf32>, vector<8x128xf32> -> vector<8x256xf32>
    %931 = arith.truncf %930 : vector<8x256xf32> to vector<8x256xbf16>
    %c0_358 = arith.constant 0 : index
    %c0_359 = arith.constant 0 : index
    %932 = vector.load %arg9[%c0_358, %c0_359] : memref<256x64xbf16, #tpu.memory_space<vmem>>, vector<256x64xbf16>
    %cst_360 = arith.constant dense<0.000000e+00> : vector<8x64xf32>
    %933 = tpu.matmul %931, %932, %cst_360 {dimension_numbers = #tpu.dot_dimension_numbers<[1], [0], [0], [1], [0, 0, 1, 1], [], []>} : vector<8x256xbf16>, vector<256x64xbf16>, vector<8x64xf32> -> vector<8x64xf32>
    %c0_361 = arith.constant 0 : index
    %c0_362 = arith.constant 0 : index
    %934 = vector.load %arg10[%c0_361, %c0_362] : memref<1x64xf32, #tpu.memory_space<vmem>>, vector<1x64xf32>
    %935 = vector.broadcast %934 : vector<1x64xf32> to vector<8x64xf32>
    %936 = arith.addf %933, %935 : vector<8x64xf32>
    %cst_363 = arith.constant 0.000000e+00 : f32
    %937 = vector.broadcast %cst_363 : f32 to vector<8x64xf32>
    %938 = arith.maximumf %936, %937 : vector<8x64xf32>
    %939 = arith.truncf %938 : vector<8x64xf32> to vector<8x64xbf16>
    %c0_364 = arith.constant 0 : index
    %c0_365 = arith.constant 0 : index
    %940 = vector.load %arg11[%c0_364, %c0_365] : memref<64x2xbf16, #tpu.memory_space<vmem>>, vector<64x2xbf16>
    %cst_366 = arith.constant dense<0.000000e+00> : vector<8x2xf32>
    %941 = tpu.matmul %939, %940, %cst_366 {dimension_numbers = #tpu.dot_dimension_numbers<[1], [0], [0], [1], [0, 0, 1, 1], [], []>} : vector<8x64xbf16>, vector<64x2xbf16>, vector<8x2xf32> -> vector<8x2xf32>
    %c0_367 = arith.constant 0 : index
    %c0_368 = arith.constant 0 : index
    %942 = vector.load %arg12[%c0_367, %c0_368] : memref<1x2xf32, #tpu.memory_space<vmem>>, vector<1x2xf32>
    %943 = vector.broadcast %942 : vector<1x2xf32> to vector<8x2xf32>
    %944 = arith.addf %941, %943 : vector<8x2xf32>
    %c0_369 = arith.constant 0 : index
    %c0_370 = arith.constant 0 : index
    %945 = vector.load %arg13[%c0_369, %c0_370] : memref<8x2xf32, #tpu.memory_space<vmem>>, vector<8x2xf32>
    tpu.vector_store %arg13[%c0_369, %c0_370], %944 {strides = array<i32>} : memref<8x2xf32, #tpu.memory_space<vmem>>, vector<8x2xf32>,
    return
  }
}

</mosaic_0001>

<bundles_post_ra>
// kernel: bilstm_forward.1
= control target key start
LH: loop header
LB: loop body
LE: loop exit
PB: predicated region body
PF: predicated region fallthrough
CT: control target
= control target key end

     0   :  { %18 = vsyncpa [#allocation9], 0  ;;  %s7837_s0 = inlined_call_operand.vmem [shape: bf16[64,64], index: 0, kind: input, shape index: {}]   ;;  %s7838_s1 = inlined_call_operand.vmem [shape: bf16[64,1024], index: 1, kind: input, shape index: {}]   ;;  %s7839_s2 = inlined_call_operand.hbm [shape: bf16[128,512], index: 2, kind: input, shape index: {}]   ;;  %s7840_s3 = inlined_call_operand.hbm [shape: bf16[128,512], index: 3, kind: input, shape index: {}]   ;;  %s7841_s4 = inlined_call_operand.vmem [shape: f32[1,1024], index: 4, kind: input, shape index: {}]   ;;  %s7842_s5 = inlined_call_operand.hbm [shape: bf16[256,1024], index: 5, kind: input, shape index: {}]   ;;  %s7843_s6 = inlined_call_operand.hbm [shape: bf16[128,512], index: 6, kind: input, shape index: {}]   ;;  %s7844_s7 = inlined_call_operand.hbm [shape: bf16[128,512], index: 7, kind: input, shape index: {}]   ;;  %s7845_s8 = inlined_call_operand.vmem [shape: f32[1,1024], index: 8, kind: input, shape index: {}]   ;;  %s7846_s9 = inlined_call_operand.vmem [shape: bf16[256,64], index: 9, kind: input, shape index: {}]   ;;  %s7847_s10 = inlined_call_operand.vmem [shape: f32[1,64], index: 10, kind: input, shape index: {}]   ;;  %s7848_s11 = inlined_call_operand.vmem [shape: bf16[64,2], index: 11, kind: input, shape index: {}]   ;;  %s7849_s12 = inlined_call_operand.vmem [shape: f32[1,2], index: 12, kind: input, shape index: {}]   ;;  %s7850_s13 = inlined_call_operand.vmem [shape: f32[8,2], index: 13, kind: output, shape index: {}]  }
   0x1   :  { %19 = vsyncpa [#allocation11], 0  ;;  %s5631_s25 = smov [#allocation8]   ;;  %s5577_s29 = scalar_lea.hbm %s7839_s2, 4096 }
   0x2   :  { %s29_s26 = sshll.u32 %s5631_s25, 4  ;;  %p5578_p0 = scmp.ne.s32.totalorder %s7839_s2, %s5577_s29  ;;  %s30_s26 = int_to_ptr.vmem [resolvable:$true] %s29_s26 }
   0x3   :  { %p5581_p1 = scmp.lt.u32.totalorder %s5577_s29, %s7839_s2 }
   0x5   :  { %p5583_p2 = pnand %p5581_p1, %p5578_p0 }
   0x7   :  { %5586 = shalt.err (!%p5583_p2)
}
   0x8   :  { %s5587_s17 = scalar_lea.vmem %s30_s26, 4096  ;;  %p5592_p4 = scmp.lt.s32.totalorder %s30_s26, %s30_s26 }
   0x9   :  { %p5588_p3 = scmp.ne.s32.totalorder %s30_s26, %s5587_s17  ;;  %p5593_p5 = scmp.lt.s32.totalorder %s5587_s17, %s5587_s17 }
   0xb   :  { %p5594_p6 = por %p5593_p5, %p5592_p4 }
   0xd   :  { %p5595_p7 = pnand %p5594_p6, %p5588_p3 }
   0xf   :  { %5598 = shalt.err (!%p5595_p7)
}
  0x10   :  { %s5632_s18 = smov 256   ;;  %s5633_s19 = smov 16  }
  0x11   :  { %35 = dma.hbm_to_vmem [thread:$0]  %s7839_s2, 4096, %s30_s26, [#allocation9], %s5632_s18, %s5632_s18, %s5633_s19  }
  0x12   :  { %s5634_s22 = smov [#allocation10]   ;;  %s5599_s27 = scalar_lea.hbm %s7840_s3, 4096 }
  0x13   :  { %s41_s23 = sshll.u32 %s5634_s22, 4  ;;  %p5600_p8 = scmp.ne.s32.totalorder %s7840_s3, %s5599_s27  ;;  %s42_s23 = int_to_ptr.vmem [resolvable:$true] %s41_s23 }
  0x14   :  { %p5603_p9 = scmp.lt.u32.totalorder %s5599_s27, %s7840_s3 }
  0x16   :  { %p5605_p10 = pnand %p5603_p9, %p5600_p8 }
  0x18   :  { %5608 = shalt.err (!%p5605_p10)
}
  0x19   :  { %s5609_s15 = scalar_lea.vmem %s42_s23, 4096  ;;  %p5614_p12 = scmp.lt.s32.totalorder %s42_s23, %s42_s23 }
  0x1a   :  { %p5610_p11 = scmp.ne.s32.totalorder %s42_s23, %s5609_s15  ;;  %p5615_p13 = scmp.lt.s32.totalorder %s5609_s15, %s5609_s15 }
  0x1c   :  { %p5616_p0 = por %p5615_p13, %p5614_p12 }
  0x1e   :  { %p5617_p1 = pnand %p5616_p0, %p5610_p11 }
  0x20   :  { %5620 = shalt.err (!%p5617_p1)
}
  0x21   :  { %47 = dma.hbm_to_vmem [thread:$0]  %s7840_s3, 4096, %s42_s23, [#allocation11], %s5632_s18, %s5632_s18, %s5633_s19  }
  0x22   :  { %5621 = dma.done.wait [#allocation9], 4096  }
  0x23   :  { %5622 = vsyncadd [#allocation9], 4294963200 }
  0x24   :  { %5623 = dma.done.wait [#allocation11], 4096  }
  0x25   :  { %5624 = vsyncadd [#allocation11], 4294963200  ;;  %s71_s16 = sld [smem:[#allocation0]]   ;;  %s5635_s17 = smov 1024   ;;  %v7851_v0 = vmov 0   ;;  %vm434_vm0 = vcmask 523264  }
  0x26   :  { %83 = sst [smem:[#allocation13]] %s5635_s17  ;;  %479 = vmatprep.mubr.bf16.mxu0 %v7851_v0  ;;  %552 = vmatprep.mubr.bf16.mxu1 %v7851_v0  ;;  %s5637_s20 = smov 8  }
  0x27   :  { %85 = sst [smem:[#allocation13 + $0x1]] %s5635_s17  ;;  %s5638_s21 = smov 64  }
  0x28   :  { %87 = sst [smem:[#allocation13 + $0x2]] %s5637_s20  ;;  %s5639_s22 = smov 512  }
  0x29   :  { %89 = sst [smem:[#allocation13 + $0x3]] %s5638_s21  ;;  %s5640_s3 = smov [#allocation4]  }
  0x2a   :  { %95 = sst [smem:[#allocation13 + $0x6]] %s5639_s22  ;;  %s79_s19 = sshll.u32 %s5640_s3, 4  ;;  %s80_s19 = int_to_ptr.vmem [resolvable:$true] %s79_s19 }
  0x2b   :  { %97 = sst [smem:[#allocation13 + $0x7]] %s5638_s21  ;;  %s4837_s23 = sshll.u32 %s71_s16, 26 }
  0x2c   :  { %s5641_s24 = smov 4   ;;  %s5758_s25 = sadd.s32 134217728, %s4837_s23 }
  0x2d   :  { %99 = sst [smem:[#allocation13 + $0x8]] %s5641_s24  ;;  %s5642_s27 = smov 128  }
  0x2e   :  { %91 = sst [smem:[#allocation13 + $0x4]] %s5642_s27  ;;  %s5643_s28 = smov 2  }
  0x2f   :  { %93 = sst [smem:[#allocation13 + $0x5]] %s5643_s28  ;;  %s5644_s29 = smov [#allocation7]  }
  0x30   :  { %s5645_s30 = smov [#allocation12]   ;;  %s5646_s2 = smov [#allocation5]  }
  0x31   :  { %101 = dma.general %s7842_s5, 16384, %s80_s19, %s5644_s29, %s5645_s30, [#allocation13], %s5758_s25, 0  }
  0x32   :  { %118 = sst [smem:[#allocation15]] %s5639_s22  ;;  %s114_s26 = sshll.u32 %s5646_s2, 4  ;;  %s115_s26 = int_to_ptr.vmem [resolvable:$true] %s114_s26 }
  0x33   :  { %120 = sst [smem:[#allocation15 + $0x1]] %s5639_s22  ;;  %s5647_s5 = smov [#allocation7 + $0x1]  }
  0x34   :  { %122 = sst [smem:[#allocation15 + $0x2]] %s5641_s24  ;;  %s5648_s16 = smov [#allocation14]  }
  0x35   :  { %124 = sst [smem:[#allocation15 + $0x3]] %s5638_s21  ;;  %s5649_s3 = smov [#allocation6]  }
  0x36   :  { %126 = sst [smem:[#allocation15 + $0x4]] %s5642_s27  ;;  %s149_s19 = sshll.u32 %s5649_s3, 4  ;;  %s150_s19 = int_to_ptr.vmem [resolvable:$true] %s149_s19 }
  0x37   :  { %128 = sst [smem:[#allocation15 + $0x5]] %s5643_s28  ;;  %s5651_s23 = smov [#allocation16]  }
  0x38   :  { %130 = sst [smem:[#allocation15 + $0x6]] %s5632_s18 }
  0x39   :  { %132 = sst [smem:[#allocation15 + $0x7]] %s5638_s21 }
  0x3a   :  { %134 = sst [smem:[#allocation15 + $0x8]] %s5641_s24 }
  0x3b   :  { %136 = dma.general %s7843_s6, 4096, %s115_s26, %s5647_s5, %s5648_s16, [#allocation15], %s5758_s25, 0  }
  0x3c   :  { %153 = sst [smem:[#allocation17]] %s5639_s22  ;;  %s5650_s6 = smov [#allocation7 + $0x2]  }
  0x3d   :  { %155 = sst [smem:[#allocation17 + $0x1]] %s5639_s22 }
  0x3e   :  { %157 = sst [smem:[#allocation17 + $0x2]] %s5641_s24 }
  0x3f   :  { %159 = sst [smem:[#allocation17 + $0x3]] %s5638_s21 }
  0x40   :  { %161 = sst [smem:[#allocation17 + $0x4]] %s5642_s27 }
  0x41   :  { %163 = sst [smem:[#allocation17 + $0x5]] %s5643_s28 }
  0x42   :  { %165 = sst [smem:[#allocation17 + $0x6]] %s5632_s18 }
  0x43   :  { %167 = sst [smem:[#allocation17 + $0x7]] %s5638_s21 }
  0x44   :  { %169 = sst [smem:[#allocation17 + $0x8]] %s5641_s24 }
  0x45   :  { %171 = dma.general %s7844_s7, 4096, %s150_s19, %s5650_s6, %s5651_s23, [#allocation17], %s5758_s25, 0  }
  0x46   :  { %v180_v1 = vld [vmem:[%s7838_s1] sm:$0xff]  ;;  %v181_v3 = vld [vmem:[%s7838_s1 + $0x8] sm:$0xff]  ;;  %v182_v30 = vld [vmem:[%s7838_s1 + $0x10] sm:$0xff] }
  0x47   :  { %v184_v2 = vld [vmem:[%s7838_s1 + $0x20] sm:$0xff]  ;;  %v185_v5 = vld [vmem:[%s7838_s1 + $0x28] sm:$0xff]  ;;  %v186_v32 = vld [vmem:[%s7838_s1 + $0x30] sm:$0xff] }
  0x48   :  { %v4848_v4 = vcombine.high %v180_v1, %v184_v2  ;;  %v4847_v6 = vcombine.low %v180_v1, %v184_v2  ;;  %v188_v7 = vld [vmem:[%s7838_s1 + $0x40] sm:$0xff]  ;;  %v4850_v9 = vcombine.high %v181_v3, %v185_v5  ;;  %v4849_v10 = vcombine.low %v181_v3, %v185_v5  ;;  %v189_v12 = vld [vmem:[%s7838_s1 + $0x48] sm:$0xff]  ;;  %v183_v33 = vld [vmem:[%s7838_s1 + $0x18] sm:$0xff] }
  0x49   :  { %v192_v8 = vld [vmem:[%s7838_s1 + $0x60] sm:$0xff]  ;;  %v193_v13 = vld [vmem:[%s7838_s1 + $0x68] sm:$0xff]  ;;  %v187_v34 = vld [vmem:[%s7838_s1 + $0x38] sm:$0xff]  ;;  %v4852_v37 = vcombine.high %v182_v30, %v186_v32  ;;  %v4851_v42 = vcombine.low %v182_v30, %v186_v32 }
  0x4a   :  { %v4856_v11 = vcombine.high %v188_v7, %v192_v8  ;;  %v196_v14 = vld [vmem:[%s7838_s1 + $0x80] sm:$0xff]  ;;  %447 = vmatprep.subr.bf16.mxu0 %v4848_v4  ;;  %v4858_v15 = vcombine.high %v189_v12, %v193_v13  ;;  %v197_v17 = vld [vmem:[%s7838_s1 + $0x88] sm:$0xff]  ;;  %520 = vmatprep.subr.bf16.mxu1 %v4850_v9  ;;  %v4855_v19 = vcombine.low %v188_v7, %v192_v8  ;;  %v190_v40 = vld [vmem:[%s7838_s1 + $0x50] sm:$0xff] }
  0x4b   :  { %v200_v16 = vld [vmem:[%s7838_s1 + $0xa0] sm:$0xff]  ;;  %v201_v18 = vld [vmem:[%s7838_s1 + $0xa8] sm:$0xff]  ;;  %448 = vmatpush1.bf16.msra.mxu0 %v4847_v6  ;;  %521 = vmatpush1.bf16.msra.mxu1 %v4849_v10  ;;  %v4857_v20 = vcombine.low %v189_v12, %v193_v13  ;;  %v4854_v39 = vcombine.high %v183_v33, %v187_v34  ;;  %v194_v41 = vld [vmem:[%s7838_s1 + $0x70] sm:$0xff]  ;;  %v4853_v46 = vcombine.low %v183_v33, %v187_v34 }
  0x4c   :  { %449 = vmatprep.subr.bf16.mxu0 %v4856_v11  ;;  %v4864_v21 = vcombine.high %v196_v14, %v200_v16  ;;  %522 = vmatprep.subr.bf16.mxu1 %v4858_v15  ;;  %v4866_v22 = vcombine.high %v197_v17, %v201_v18  ;;  %v204_v23 = vld [vmem:[%s7838_s1 + $0xc0] sm:$0xff]  ;;  %v205_v25 = vld [vmem:[%s7838_s1 + $0xc8] sm:$0xff]  ;;  %v4863_v27 = vcombine.low %v196_v14, %v200_v16  ;;  %v191_v43 = vld [vmem:[%s7838_s1 + $0x58] sm:$0xff] }
  0x4d   :  { %v208_v24 = vld [vmem:[%s7838_s1 + $0xe0] sm:$0xff]  ;;  %v209_v26 = vld [vmem:[%s7838_s1 + $0xe8] sm:$0xff]  ;;  %v4865_v28 = vcombine.low %v197_v17, %v201_v18  ;;  %v195_v44 = vld [vmem:[%s7838_s1 + $0x78] sm:$0xff]  ;;  %v4860_v47 = vcombine.high %v190_v40, %v194_v41  ;;  %v4859_v51 = vcombine.low %v190_v40, %v194_v41 }
  0x4e   :  { %v4872_v29 = vcombine.high %v204_v23, %v208_v24  ;;  %v4874_v31 = vcombine.high %v205_v25, %v209_v26  ;;  %v4871_v35 = vcombine.low %v204_v23, %v208_v24  ;;  %v4873_v36 = vcombine.low %v205_v25, %v209_v26  ;;  %v5849_v38 = vld [vmem:[%s7837_s0] sm:$0xff]   ;;  %v198_v45 = vld [vmem:[%s7838_s1 + $0x90] sm:$0xff]  ;;  %v199_v50 = vld [vmem:[%s7838_s1 + $0x98] sm:$0xff] }
  0x4f   :  { %450 = vmatpush1.bf16.msra.mxu0 %v4855_v19  ;;  %523 = vmatpush1.bf16.msra.mxu1 %v4857_v20  ;;  %v202_v48 = vld [vmem:[%s7838_s1 + $0xb0] sm:$0xff]  ;;  %v4862_v49 = vcombine.high %v191_v43, %v195_v44  ;;  %v203_v52 = vld [vmem:[%s7838_s1 + $0xb8] sm:$0xff]  ;;  %v5884_v54 = vld [vmem:[%s7837_s0 + $0x8] sm:$0xff]   ;;  %v4861_v55 = vcombine.low %v191_v43, %v195_v44 }
  0x50   :  { %451 = vmatprep.subr.bf16.mxu0 %v4864_v21  ;;  %524 = vmatprep.subr.bf16.mxu1 %v4866_v22  ;;  %v4868_v53 = vcombine.high %v198_v45, %v202_v48  ;;  %v206_v56 = vld [vmem:[%s7838_s1 + $0xd0] sm:$0xff]  ;;  %v4870_v57 = vcombine.high %v199_v50, %v203_v52  ;;  %v207_v59 = vld [vmem:[%s7838_s1 + $0xd8] sm:$0xff]  ;;  %v4867_v61 = vcombine.low %v198_v45, %v202_v48 }
  0x51   :  { %v210_v58 = vld [vmem:[%s7838_s1 + $0xf0] sm:$0xff]  ;;  %v211_v60 = vld [vmem:[%s7838_s1 + $0xf8] sm:$0xff]  ;;  %v4869_v62 = vcombine.low %v199_v50, %v203_v52 }
  0x52   :  { %v4876_v63 = vcombine.high %v206_v56, %v210_v58  ;;  %v4878_v1 = vcombine.high %v207_v59, %v211_v60  ;;  %v4875_v2 = vcombine.low %v206_v56, %v210_v58  ;;  %v5907_v3 = vld [vmem:[%s7837_s0 + $0x10] sm:$0xff]   ;;  %v4877_v4 = vcombine.low %v207_v59, %v211_v60  ;;  %v5909_v5 = vld [vmem:[#allocation8 + $0x4] ss:$16 sps:$4 sm:$0xff]   ;;  %v5932_v8 = vld [vmem:[#allocation8] ss:$16 sps:$4 sm:$0xff]  }
  0x53   :  { %452 = vmatpush1.bf16.msra.mxu0 %v4863_v27  ;;  %525 = vmatpush1.bf16.msra.mxu1 %v4865_v28  ;;  %v5911_v6 = vld [vmem:[#allocation8 + $0xc] ss:$16 sps:$4 sm:$0xff]   ;;  %v5924_v7 = vld [vmem:[%s7837_s0 + $0x18] sm:$0xff]   ;;  %v5934_v9 = vld [vmem:[#allocation8 + $0x8] ss:$16 sps:$4 sm:$0xff]  }
  0x54   :  { %453 = vmatprep.subr.bf16.mxu0 %v4872_v29  ;;  %526 = vmatprep.subr.bf16.mxu1 %v4874_v31  ;;  %7956 = vst [vmem:[#allocation23_spill] sm:$0xff] %v5934_v9  ;;  %v5936_v10 = vld [vmem:[#allocation8 + $0x24] ss:$16 sps:$4 sm:$0xff]   ;;  %v5938_v11 = vld [vmem:[#allocation8 + $0x2c] ss:$16 sps:$4 sm:$0xff]  }
  0x55   :  { %7957 = vst [vmem:[#allocation24_spill] sm:$0xff] %v5936_v10  ;;  %7958 = vst [vmem:[#allocation25_spill] sm:$0xff] %v5938_v11  ;;  %v5942_v12 = vld [vmem:[#allocation8 + $0x20] ss:$16 sps:$4 sm:$0xff]   ;;  %v5947_v13 = vld [vmem:[#allocation8 + $0x28] ss:$16 sps:$4 sm:$0xff]  }
  0x56   :  { %7959 = vst [vmem:[#allocation26_spill] sm:$0xff] %v5942_v12  ;;  %7960 = vst [vmem:[#allocation27_spill] sm:$0xff] %v5947_v13  ;;  %v5951_v14 = vld [vmem:[#allocation8 + $0x44] ss:$16 sps:$4 sm:$0xff]   ;;  %v5955_v15 = vld [vmem:[#allocation8 + $0x4c] ss:$16 sps:$4 sm:$0xff]  }
  0x57   :  { %454 = vmatpush1.bf16.msra.mxu0 %v4871_v35  ;;  %527 = vmatpush1.bf16.msra.mxu1 %v4873_v36  ;;  %7961 = vst [vmem:[#allocation28_spill] sm:$0xff] %v5951_v14  ;;  %7962 = vst [vmem:[#allocation29_spill] sm:$0xff] %v5955_v15  ;;  %v5959_v16 = vld [vmem:[#allocation8 + $0x40] ss:$16 sps:$4 sm:$0xff]   ;;  %v5963_v17 = vld [vmem:[#allocation8 + $0x48] ss:$16 sps:$4 sm:$0xff]  }
  0x58   :  { %593 = vmatprep.subr.bf16.mxu0 %v4852_v37  ;;  %666 = vmatprep.subr.bf16.mxu1 %v4854_v39  ;;  %7963 = vst [vmem:[#allocation30_spill] sm:$0xff] %v5959_v16  ;;  %7964 = vst [vmem:[#allocation31_spill] sm:$0xff] %v5963_v17  ;;  %v5965_v18 = vld [vmem:[#allocation8 + $0x64] ss:$16 sps:$4 sm:$0xff]   ;;  %v5968_v19 = vld [vmem:[#allocation8 + $0x6c] ss:$16 sps:$4 sm:$0xff]  }
  0x59   :  { %7965 = vst [vmem:[#allocation32_spill] sm:$0xff] %v5965_v18  ;;  %7966 = vst [vmem:[#allocation33_spill] sm:$0xff] %v5968_v19  ;;  %v5975_v20 = vld [vmem:[#allocation8 + $0x60] ss:$16 sps:$4 sm:$0xff]   ;;  %v5979_v21 = vld [vmem:[#allocation8 + $0x68] ss:$16 sps:$4 sm:$0xff]  }
  0x5a   :  { %4879 = vmatmul.mubr.msk.bf16.vlgmr.msra.gmra.mrb[0].mxu0 %vm434_vm0, %v5849_v38  ;;  %4883 = vmatmul.mubr.msk.bf16.vlgmr.msra.gmra.mrb[0].mxu1 %vm434_vm0, %v5849_v38  ;;  %7967 = vst [vmem:[#allocation34_spill] sm:$0xff] %v5975_v20  ;;  %7968 = vst [vmem:[#allocation35_spill] sm:$0xff] %v5979_v21  ;;  %v5981_v22 = vld [vmem:[#allocation8 + $0x84] ss:$16 sps:$4 sm:$0xff]   ;;  %v5985_v23 = vld [vmem:[#allocation8 + $0x8c] ss:$16 sps:$4 sm:$0xff]  }
  0x5b   :  { %594 = vmatpush1.bf16.msra.mxu0 %v4851_v42  ;;  %489 = vmatprep.mubr.bf16.mxu0 %v7851_v0  ;;  %7969 = vst [vmem:[#allocation36_spill] sm:$0xff] %v5981_v22  ;;  %7970 = vst [vmem:[#allocation37_spill] sm:$0xff] %v5985_v23  ;;  %v5989_v24 = vld [vmem:[#allocation8 + $0x80] ss:$16 sps:$4 sm:$0xff]   ;;  %v5993_v25 = vld [vmem:[#allocation8 + $0x88] ss:$16 sps:$4 sm:$0xff]  }
  0x5c   :  { %562 = vmatprep.mubr.bf16.mxu1 %v7851_v0  ;;  %595 = vmatprep.subr.bf16.mxu0 %v4860_v47  ;;  %7971 = vst [vmem:[#allocation38_spill] sm:$0xff] %v5989_v24  ;;  %7972 = vst [vmem:[#allocation39_spill] sm:$0xff] %v5993_v25  ;;  %v5995_v26 = vld [vmem:[#allocation8 + $0xa4] ss:$16 sps:$4 sm:$0xff]   ;;  %v5998_v27 = vld [vmem:[#allocation8 + $0xac] ss:$16 sps:$4 sm:$0xff]  }
  0x5d   :  { %667 = vmatpush1.bf16.msra.mxu1 %v4853_v46  ;;  %7973 = vst [vmem:[#allocation40_spill] sm:$0xff] %v5995_v26  ;;  %7974 = vst [vmem:[#allocation41_spill] sm:$0xff] %v5998_v27  ;;  %v6005_v28 = vld [vmem:[#allocation8 + $0xa0] ss:$16 sps:$4 sm:$0xff]   ;;  %v6009_v29 = vld [vmem:[#allocation8 + $0xa8] ss:$16 sps:$4 sm:$0xff]  }
  0x5e   :  { %668 = vmatprep.subr.bf16.mxu1 %v4862_v49  ;;  %7975 = vst [vmem:[#allocation42_spill] sm:$0xff] %v6005_v28  ;;  %7976 = vst [vmem:[#allocation43_spill] sm:$0xff] %v6009_v29  ;;  %v6011_v30 = vld [vmem:[#allocation8 + $0xc4] ss:$16 sps:$4 sm:$0xff]   ;;  %v6015_v31 = vld [vmem:[#allocation8 + $0xcc] ss:$16 sps:$4 sm:$0xff]  }
  0x5f   :  { %596 = vmatpush1.bf16.msra.mxu0 %v4859_v51  ;;  %7977 = vst [vmem:[#allocation44_spill] sm:$0xff] %v6011_v30  ;;  %7978 = vst [vmem:[#allocation45_spill] sm:$0xff] %v6015_v31  ;;  %v6019_v32 = vld [vmem:[#allocation8 + $0xc0] ss:$16 sps:$4 sm:$0xff]   ;;  %v6023_v33 = vld [vmem:[#allocation8 + $0xc8] ss:$16 sps:$4 sm:$0xff]  }
  0x60   :  { %597 = vmatprep.subr.bf16.mxu0 %v4868_v53  ;;  %7979 = vst [vmem:[#allocation46_spill] sm:$0xff] %v6019_v32  ;;  %7980 = vst [vmem:[#allocation47_spill] sm:$0xff] %v6023_v33  ;;  %v6025_v34 = vld [vmem:[#allocation8 + $0xe4] ss:$16 sps:$4 sm:$0xff]   ;;  %v6028_v35 = vld [vmem:[#allocation8 + $0xec] ss:$16 sps:$4 sm:$0xff]  }
  0x61   :  { %669 = vmatpush1.bf16.msra.mxu1 %v4861_v55  ;;  %7981 = vst [vmem:[#allocation48_spill] sm:$0xff] %v6025_v34  ;;  %7982 = vst [vmem:[#allocation49_spill] sm:$0xff] %v6028_v35  ;;  %v6035_v36 = vld [vmem:[#allocation8 + $0xe0] ss:$16 sps:$4 sm:$0xff]   ;;  %v6039_v37 = vld [vmem:[#allocation8 + $0xe8] ss:$16 sps:$4 sm:$0xff]  }
  0x62   :  { %4880 = vmatmul.mubr.msk.bf16.gmra.mrb[4].mxu0 %vm434_vm0, %v5884_v54  ;;  %670 = vmatprep.subr.bf16.mxu1 %v4870_v57  ;;  %7983 = vst [vmem:[#allocation50_spill] sm:$0xff] %v6035_v36  ;;  %7984 = vst [vmem:[#allocation51_spill] sm:$0xff] %v6039_v37  ;;  %v6045_v39 = vld [vmem:[#allocation10 + $0xc] ss:$16 sps:$4 sm:$0xff]   ;;  %v6049_v40 = vld [vmem:[#allocation10] ss:$16 sps:$4 sm:$0xff]  }
  0x63   :  { %4884 = vmatmul.mubr.msk.bf16.gmra.mrb[4].mxu1 %vm434_vm0, %v5884_v54  ;;  %499 = vmatprep.mubr.bf16.mxu0 %v7851_v0  ;;  %7986 = vst [vmem:[#allocation53_spill] sm:$0xff] %v6045_v39  ;;  %v6053_v41 = vld [vmem:[#allocation10 + $0x8] ss:$16 sps:$4 sm:$0xff]   ;;  %v6055_v42 = vld [vmem:[#allocation10 + $0x24] ss:$16 sps:$4 sm:$0xff]  }
  0x64   :  { %572 = vmatprep.mubr.bf16.mxu1 %v7851_v0  ;;  %598 = vmatpush1.bf16.msra.mxu0 %v4867_v61  ;;  %v6058_v43 = vld [vmem:[#allocation10 + $0x2c] ss:$16 sps:$4 sm:$0xff]   ;;  %v6063_v44 = vld [vmem:[#allocation10 + $0x20] ss:$16 sps:$4 sm:$0xff]   ;;  %v6067_v45 = vld [vmem:[#allocation10 + $0x28] ss:$16 sps:$4 sm:$0xff]  }
  0x65   :  { %599 = vmatprep.subr.bf16.mxu0 %v4876_v63  ;;  %671 = vmatpush1.bf16.msra.mxu1 %v4869_v62  ;;  %v6069_v46 = vld [vmem:[#allocation10 + $0x44] ss:$16 sps:$4 sm:$0xff]   ;;  %v6072_v47 = vld [vmem:[#allocation10 + $0x4c] ss:$16 sps:$4 sm:$0xff]   ;;  %v6077_v48 = vld [vmem:[#allocation10 + $0x40] ss:$16 sps:$4 sm:$0xff]  }
  0x66   :  { %672 = vmatprep.subr.bf16.mxu1 %v4878_v1  ;;  %v6081_v49 = vld [vmem:[#allocation10 + $0x48] ss:$16 sps:$4 sm:$0xff]   ;;  %v6083_v50 = vld [vmem:[#allocation10 + $0x64] ss:$16 sps:$4 sm:$0xff]   ;;  %v6086_v51 = vld [vmem:[#allocation10 + $0x6c] ss:$16 sps:$4 sm:$0xff]  }
  0x67   :  { %v6089_v52 = vld [vmem:[#allocation10 + $0x60] ss:$16 sps:$4 sm:$0xff]   ;;  %v6093_v53 = vld [vmem:[#allocation10 + $0x68] ss:$16 sps:$4 sm:$0xff]   ;;  %v6098_v55 = vld [vmem:[#allocation10 + $0x8c] ss:$16 sps:$4 sm:$0xff]  }
  0x68   :  { %600 = vmatpush1.bf16.msra.mxu0 %v4875_v2  ;;  %v6101_v56 = vld [vmem:[#allocation10 + $0x80] ss:$16 sps:$4 sm:$0xff]   ;;  %v6105_v57 = vld [vmem:[#allocation10 + $0x88] ss:$16 sps:$4 sm:$0xff]   ;;  %v6107_v58 = vld [vmem:[#allocation10 + $0xa4] ss:$16 sps:$4 sm:$0xff]  }
  0x69   :  { %673 = vmatpush1.bf16.msra.mxu1 %v4877_v4  ;;  %1035 = vmatprep.subr.bf16.mxu0 %v5909_v5  ;;  %v6110_v59 = vld [vmem:[#allocation10 + $0xac] ss:$16 sps:$4 sm:$0xff]   ;;  %v6113_v60 = vld [vmem:[#allocation10 + $0xa0] ss:$16 sps:$4 sm:$0xff]   ;;  %v6117_v61 = vld [vmem:[#allocation10 + $0xa8] ss:$16 sps:$4 sm:$0xff]  }
  0x6a   :  { %4881 = vmatmul.mubr.msk.bf16.gmra.mrb[8].mxu0 %vm434_vm0, %v5907_v3  ;;  %1076 = vmatprep.subr.bf16.mxu1 %v5911_v6  ;;  %v6119_v62 = vld [vmem:[#allocation10 + $0xc4] ss:$16 sps:$4 sm:$0xff]   ;;  %v6122_v63 = vld [vmem:[#allocation10 + $0xcc] ss:$16 sps:$4 sm:$0xff]   ;;  %v6125_v1 = vld [vmem:[#allocation10 + $0xc0] ss:$16 sps:$4 sm:$0xff]  }
  0x6b   :  { %4885 = vmatmul.mubr.msk.bf16.gmra.mrb[8].mxu1 %vm434_vm0, %v5907_v3  ;;  %509 = vmatprep.mubr.bf16.mxu0 %v7851_v0  ;;  %7987 = vst [vmem:[#allocation54_spill] sm:$0xff] %v6122_v63  ;;  %v6129_v2 = vld [vmem:[#allocation10 + $0xc8] ss:$16 sps:$4 sm:$0xff]   ;;  %v6134_v4 = vld [vmem:[#allocation10 + $0xec] ss:$16 sps:$4 sm:$0xff]  }
  0x6c   :  { %582 = vmatprep.mubr.bf16.mxu1 %v7851_v0 }
  0x72   :  { %4882 = vmatmul.mubr.msk.bf16.gmra.mrb[12].mxu0 %vm434_vm0, %v5924_v7 }
  0x73   :  { %4886 = vmatmul.mubr.msk.bf16.gmra.mrb[12].mxu1 %vm434_vm0, %v5924_v7  ;;  %625 = vmatprep.mubr.bf16.mxu0 %v7851_v0 }
  0x74   :  { %698 = vmatprep.mubr.bf16.mxu1 %v7851_v0 }
  0x7a   :  { %4887 = vmatmul.mubr.msk.bf16.vlgmr.msra.gmra.mrb[16].mxu0 %vm434_vm0, %v5849_v38 }
  0x7b   :  { %4891 = vmatmul.mubr.msk.bf16.vlgmr.msra.gmra.mrb[16].mxu1 %vm434_vm0, %v5849_v38  ;;  %1036 = vmatpush1.bf16.msra.mxu0 %v5932_v8  ;;  %v6041_v38 = vld [vmem:[#allocation10 + $0x4] ss:$16 sps:$4 sm:$0xff]  }
  0x7c   :  { %1077 = vmatpush1.bf16.msra.mxu1 %v5934_v9  ;;  %1037 = vmatprep.subr.bf16.mxu0 %v5936_v10  ;;  %7985 = vst [vmem:[#allocation52_spill] sm:$0xff] %v6041_v38 }
  0x7d   :  { %1078 = vmatprep.subr.bf16.mxu1 %v5938_v11  ;;  %635 = vmatprep.mubr.bf16.mxu0 %v7851_v0 }
  0x7e   :  { %708 = vmatprep.mubr.bf16.mxu1 %v7851_v0 }
  0x7f   :  { %1038 = vmatpush1.bf16.msra.mxu0 %v5942_v12 }
  0x80   :  { %1079 = vmatpush1.bf16.msra.mxu1 %v5947_v13  ;;  %1039 = vmatprep.subr.bf16.mxu0 %v5951_v14 }
  0x81   :  { %1080 = vmatprep.subr.bf16.mxu1 %v5955_v15 }
  0x82   :  { %4888 = vmatmul.mubr.msk.bf16.gmra.mrb[20].mxu0 %vm434_vm0, %v5884_v54 }
  0x83   :  { %4892 = vmatmul.mubr.msk.bf16.gmra.mrb[20].mxu1 %vm434_vm0, %v5884_v54  ;;  %1040 = vmatpush1.bf16.msra.mxu0 %v5959_v16  ;;  %v6095_v54 = vld [vmem:[#allocation10 + $0x84] ss:$16 sps:$4 sm:$0xff]  }
  0x84   :  { %1081 = vmatpush1.bf16.msra.mxu1 %v5963_v17  ;;  %1041 = vmatprep.subr.bf16.mxu0 %v5965_v18 }
  0x85   :  { %1082 = vmatprep.subr.bf16.mxu1 %v5968_v19  ;;  %645 = vmatprep.mubr.bf16.mxu0 %v7851_v0 }
  0x86   :  { %718 = vmatprep.mubr.bf16.mxu1 %v7851_v0 }
  0x87   :  { %1042 = vmatpush1.bf16.msra.mxu0 %v5975_v20 }
  0x88   :  { %1083 = vmatpush1.bf16.msra.mxu1 %v5979_v21  ;;  %1043 = vmatprep.subr.bf16.mxu0 %v5981_v22 }
  0x89   :  { %1084 = vmatprep.subr.bf16.mxu1 %v5985_v23 }
  0x8a   :  { %4889 = vmatmul.mubr.msk.bf16.gmra.mrb[24].mxu0 %vm434_vm0, %v5907_v3 }
  0x8b   :  { %4893 = vmatmul.mubr.msk.bf16.gmra.mrb[24].mxu1 %vm434_vm0, %v5907_v3  ;;  %1044 = vmatpush1.bf16.msra.mxu0 %v5989_v24  ;;  %v6131_v3 = vld [vmem:[#allocation10 + $0xe4] ss:$16 sps:$4 sm:$0xff]  }
  0x8c   :  { %1085 = vmatpush1.bf16.msra.mxu1 %v5993_v25  ;;  %1045 = vmatprep.subr.bf16.mxu0 %v5995_v26 }
  0x8d   :  { %1086 = vmatprep.subr.bf16.mxu1 %v5998_v27  ;;  %655 = vmatprep.mubr.bf16.mxu0 %v7851_v0 }
  0x8e   :  { %728 = vmatprep.mubr.bf16.mxu1 %v7851_v0 }
  0x8f   :  { %1046 = vmatpush1.bf16.msra.mxu0 %v6005_v28 }
  0x90   :  { %1087 = vmatpush1.bf16.msra.mxu1 %v6009_v29  ;;  %1047 = vmatprep.subr.bf16.mxu0 %v6011_v30 }
  0x91   :  { %1088 = vmatprep.subr.bf16.mxu1 %v6015_v31 }
  0x92   :  { %4890 = vmatmul.mubr.msk.bf16.gmra.mrb[28].mxu0 %vm434_vm0, %v5924_v7 }
  0x93   :  { %4894 = vmatmul.mubr.msk.bf16.gmra.mrb[28].mxu1 %vm434_vm0, %v5924_v7  ;;  %1048 = vmatpush1.bf16.msra.mxu0 %v6019_v32  ;;  %v6137_v7 = vld [vmem:[#allocation10 + $0xe0] ss:$16 sps:$4 sm:$0xff]  }
  0x94   :  { %1089 = vmatpush1.bf16.msra.mxu1 %v6023_v33  ;;  %1049 = vmatprep.subr.bf16.mxu0 %v6025_v34 }
  0x95   :  { %1090 = vmatprep.subr.bf16.mxu1 %v6028_v35  ;;  %1067 = vmatprep.mubr.bf16.mxu0 %v7851_v0 }
  0x96   :  { %1108 = vmatprep.mubr.bf16.mxu1 %v7851_v0 }
  0x97   :  { %1050 = vmatpush1.bf16.msra.mxu0 %v6035_v36 }
  0x98   :  { %1091 = vmatpush1.bf16.msra.mxu1 %v6039_v37  ;;  %1281 = vmatprep.subr.bf16.mxu0 %v6041_v38 }
  0x99   :  { %1322 = vmatprep.subr.bf16.mxu1 %v6045_v39 }
  0x9a   :  { %1068 = vmatmul.mubr.bf16.vlgmr.msra.gmra.mrb[32].mxu0 %v7851_v0 }
  0x9b   :  { %1109 = vmatmul.mubr.bf16.vlgmr.msra.gmra.mrb[32].mxu1 %v7851_v0  ;;  %1282 = vmatpush1.bf16.msra.mxu0 %v6049_v40 }
  0x9c   :  { %1323 = vmatpush1.bf16.msra.mxu1 %v6053_v41  ;;  %1283 = vmatprep.subr.bf16.mxu0 %v6055_v42 }
  0x9d   :  { %1324 = vmatprep.subr.bf16.mxu1 %v6058_v43  ;;  %1313 = vmatprep.mubr.bf16.mxu0 %v7851_v0 }
  0x9e   :  { %1354 = vmatprep.mubr.bf16.mxu1 %v7851_v0  ;;  %v6141_v0 = vld [vmem:[#allocation10 + $0xe8] ss:$16 sps:$4 sm:$0xff]  }
  0x9f   :  { %1284 = vmatpush1.bf16.msra.mxu0 %v6063_v44 }
  0xa0   :  { %1325 = vmatpush1.bf16.msra.mxu1 %v6067_v45  ;;  %1285 = vmatprep.subr.bf16.mxu0 %v6069_v46 }
  0xa1   :  { %1326 = vmatprep.subr.bf16.mxu1 %v6072_v47 }
  0xa3   :  { %1286 = vmatpush1.bf16.msra.mxu0 %v6077_v48 }
  0xa4   :  { %1327 = vmatpush1.bf16.msra.mxu1 %v6081_v49  ;;  %1287 = vmatprep.subr.bf16.mxu0 %v6083_v50 }
  0xa5   :  { %1328 = vmatprep.subr.bf16.mxu1 %v6086_v51 }
  0xa7   :  { %1288 = vmatpush1.bf16.msra.mxu0 %v6089_v52 }
  0xa8   :  { %1329 = vmatpush1.bf16.msra.mxu1 %v6093_v53  ;;  %1289 = vmatprep.subr.bf16.mxu0 %v6095_v54 }
  0xa9   :  { %1330 = vmatprep.subr.bf16.mxu1 %v6098_v55 }
  0xab   :  { %1290 = vmatpush1.bf16.msra.mxu0 %v6101_v56 }
  0xac   :  { %1331 = vmatpush1.bf16.msra.mxu1 %v6105_v57  ;;  %1291 = vmatprep.subr.bf16.mxu0 %v6107_v58 }
  0xad   :  { %1332 = vmatprep.subr.bf16.mxu1 %v6110_v59 }
  0xaf   :  { %1292 = vmatpush1.bf16.msra.mxu0 %v6113_v60 }
  0xb0   :  { %1333 = vmatpush1.bf16.msra.mxu1 %v6117_v61  ;;  %1293 = vmatprep.subr.bf16.mxu0 %v6119_v62 }
  0xb1   :  { %1334 = vmatprep.subr.bf16.mxu1 %v6122_v63  ;;  %v7988_v63 = vmov 0  }
  0xb3   :  { %1294 = vmatpush1.bf16.msra.mxu0 %v6125_v1 }
  0xb4   :  { %1335 = vmatpush1.bf16.msra.mxu1 %v6129_v2  ;;  %1295 = vmatprep.subr.bf16.mxu0 %v6131_v3 }
  0xb5   :  { %1336 = vmatprep.subr.bf16.mxu1 %v6134_v4 }
  0xb7   :  { %1296 = vmatpush1.bf16.msra.mxu0 %v6137_v7 }
  0xb8   :  { %1337 = vmatpush1.bf16.msra.mxu1 %v6141_v0  ;;  %1414 = vmatprep.subr.bf16.mxu0 %v5909_v5 }
  0xb9   :  { %1455 = vmatprep.subr.bf16.mxu1 %v5911_v6 }
  0xba   :  { %1314 = vmatmul.mubr.bf16.vlgmr.msra.gmra.mrb[36].mxu0 %v7988_v63 }
  0xbb   :  { %1355 = vmatmul.mubr.bf16.vlgmr.msra.gmra.mrb[36].mxu1 %v7988_v63  ;;  %1415 = vmatpush1.bf16.msra.mxu0 %v5932_v8 }
  0xbc   :  { %1456 = vmatpush1.bf16.msra.mxu1 %v5934_v9  ;;  %1416 = vmatprep.subr.bf16.mxu0 %v5936_v10 }
  0xbd   :  { %1457 = vmatprep.subr.bf16.mxu1 %v5938_v11  ;;  %1446 = vmatprep.mubr.bf16.mxu0 %v7988_v63 }
  0xbe   :  { %1487 = vmatprep.mubr.bf16.mxu1 %v7988_v63 }
  0xbf   :  { %1417 = vmatpush1.bf16.msra.mxu0 %v5942_v12 }
  0xc0   :  { %1458 = vmatpush1.bf16.msra.mxu1 %v5947_v13  ;;  %1418 = vmatprep.subr.bf16.mxu0 %v5951_v14 }
  0xc1   :  { %1459 = vmatprep.subr.bf16.mxu1 %v5955_v15 }
  0xc3   :  { %1419 = vmatpush1.bf16.msra.mxu0 %v5959_v16 }
  0xc4   :  { %1460 = vmatpush1.bf16.msra.mxu1 %v5963_v17  ;;  %1420 = vmatprep.subr.bf16.mxu0 %v5965_v18 }
  0xc5   :  { %1461 = vmatprep.subr.bf16.mxu1 %v5968_v19 }
  0xc7   :  { %1421 = vmatpush1.bf16.msra.mxu0 %v5975_v20 }
  0xc8   :  { %1462 = vmatpush1.bf16.msra.mxu1 %v5979_v21  ;;  %1422 = vmatprep.subr.bf16.mxu0 %v5981_v22 }
  0xc9   :  { %1463 = vmatprep.subr.bf16.mxu1 %v5985_v23 }
  0xcb   :  { %1423 = vmatpush1.bf16.msra.mxu0 %v5989_v24 }
  0xcc   :  { %1464 = vmatpush1.bf16.msra.mxu1 %v5993_v25  ;;  %1424 = vmatprep.subr.bf16.mxu0 %v5995_v26 }
  0xcd   :  { %1465 = vmatprep.subr.bf16.mxu1 %v5998_v27 }
  0xcf   :  { %1425 = vmatpush1.bf16.msra.mxu0 %v6005_v28 }
  0xd0   :  { %1466 = vmatpush1.bf16.msra.mxu1 %v6009_v29  ;;  %1426 = vmatprep.subr.bf16.mxu0 %v6011_v30  ;;  %v214_v29 = vlaneseq }
  0xd1   :  { %1467 = vmatprep.subr.bf16.mxu1 %v6015_v31 }
  0xd2   :  { %v6184_v30 = vshrl.u32 %v214_v29, 7 }
  0xd3   :  { %1427 = vmatpush1.bf16.msra.mxu0 %v6019_v32 }
  0xd4   :  { %1468 = vmatpush1.bf16.msra.mxu1 %v6023_v33  ;;  %1428 = vmatprep.subr.bf16.mxu0 %v6025_v34  ;;  %7989 = vst [vmem:[#allocation55_spill] sm:$0xff] %v6184_v30  ;;  %v7868_v31 = vsub.s32 2, %v6184_v30  ;;  %v7870_v32 = vsub.s32 0, %v6184_v30  ;;  %v7990_v34 = vsub.s32 3, %v6184_v30  ;;  %v7991_v28 = vsub.s32 1, %v6184_v30 }
  0xd5   :  { %1469 = vmatprep.subr.bf16.mxu1 %v6028_v35  ;;  %v6192_v35 = vld [vmem:[%s7841_s4] sm:$0xff] }
  0xd6   :  { %v6200_v29 = vrot.slane %v6192_v35, %v7868_v31  ;;  %v6219_v27 = vrot.slane %v6192_v35, %v7991_v28 }
  0xd7   :  { %1429 = vmatpush1.bf16.msra.mxu0 %v6035_v36 }
  0xd8   :  { %1470 = vmatpush1.bf16.msra.mxu1 %v6039_v37  ;;  %1501 = vmatprep.subr.bf16.mxu0 %v6041_v38  ;;  %v6214_v37 = vrot.slane %v6192_v35, %v7990_v34 }
  0xd9   :  { %1542 = vmatprep.subr.bf16.mxu1 %v6045_v39  ;;  %v6205_v39 = vrot.slane %v6192_v35, %v7870_v32 }
 0x12d   :  { %v6195_v36 = vpop.f32.mrb[0].mxu0  ;;  %v6209_v38 = vpop.f32.mrb[0].mxu1 }
 0x12e   :  { %v6207_v33 = vpop.f32.mrb[1].mxu0  ;;  %v6221_v26 = vpop.f32.mrb[1].mxu1 }
 0x12f   :  { %v485_v31 = vpop.f32.mrb[2].mxu0  ;;  %v558_v24 = vpop.f32.mrb[2].mxu1 }
 0x130   :  { %v6224_v32 = vadd.f32 %v485_v31, %v6205_v39  ;;  %v487_v25 = vpop.f32.mrb[3].mxu0  ;;  %v6230_v22 = vadd.f32 %v558_v24, %v6200_v29  ;;  %v560_v34 = vpop.f32.mrb[3].mxu1 }
 0x131   :  { %v6227_v23 = vadd.f32 %v487_v25, %v6219_v27  ;;  %v6233_v21 = vadd.f32 %v560_v34, %v6214_v37 }
 0x132   :  { %7992 = vst [vmem:[#allocation56_spill] sm:$0xff] %v6224_v32  ;;  %7994 = vst [vmem:[#allocation58_spill] sm:$0xff] %v6230_v22 }
 0x133   :  { %7993 = vst [vmem:[#allocation57_spill] sm:$0xff] %v6227_v23  ;;  %7995 = vst [vmem:[#allocation59_spill] sm:$0xff] %v6233_v21 }
 0x135   :  { %v491_v28 = vpop.f32.mrb[4].mxu0 }
 0x136   :  { %v6236_v20 = vadd.f32 %v491_v28, %v6205_v39  ;;  %v493_v19 = vpop.f32.mrb[5].mxu0  ;;  %v564_v18 = vpop.f32.mrb[4].mxu1 }
 0x137   :  { %v6239_v31 = vadd.f32 %v493_v19, %v6219_v27  ;;  %v495_v32 = vpop.f32.mrb[6].mxu0  ;;  %v6242_v25 = vadd.f32 %v564_v18, %v6200_v29  ;;  %v566_v23 = vpop.f32.mrb[5].mxu1 }
 0x138   :  { %7996 = vst [vmem:[#allocation60_spill] sm:$0xff] %v6236_v20  ;;  %v6245_v24 = vadd.f32 %v495_v32, %v6205_v39  ;;  %v497_v22 = vpop.f32.mrb[7].mxu0  ;;  %v6248_v34 = vadd.f32 %v566_v23, %v6214_v37  ;;  %v568_v21 = vpop.f32.mrb[6].mxu1 }
 0x139   :  { %7997 = vst [vmem:[#allocation61_spill] sm:$0xff] %v6239_v31  ;;  %7998 = vst [vmem:[#allocation62_spill] sm:$0xff] %v6242_v25  ;;  %v6251_v28 = vadd.f32 %v497_v22, %v6219_v27  ;;  %v6254_v20 = vadd.f32 %v568_v21, %v6200_v29  ;;  %v570_v19 = vpop.f32.mrb[7].mxu1 }
 0x13a   :  { %7999 = vst [vmem:[#allocation63_spill] sm:$0xff] %v6245_v24  ;;  %8000 = vst [vmem:[#allocation64_spill] sm:$0xff] %v6248_v34  ;;  %v6257_v31 = vadd.f32 %v570_v19, %v6214_v37 }
 0x13b   :  { %8001 = vst [vmem:[#allocation65_spill] sm:$0xff] %v6251_v28  ;;  %8002 = vst [vmem:[#allocation66_spill] sm:$0xff] %v6254_v20 }
 0x13c   :  { %8003 = vst [vmem:[#allocation67_spill] sm:$0xff] %v6257_v31 }
 0x13d   :  { %v501_v18 = vpop.f32.mrb[8].mxu0 }
 0x13e   :  { %v6260_v25 = vadd.f32 %v501_v18, %v6205_v39  ;;  %v503_v32 = vpop.f32.mrb[9].mxu0  ;;  %v574_v24 = vpop.f32.mrb[8].mxu1 }
 0x13f   :  { %v6263_v23 = vadd.f32 %v503_v32, %v6219_v27  ;;  %v505_v34 = vpop.f32.mrb[10].mxu0  ;;  %v6266_v22 = vadd.f32 %v574_v24, %v6200_v29  ;;  %v576_v28 = vpop.f32.mrb[9].mxu1 }
 0x140   :  { %8004 = vst [vmem:[#allocation68_spill] sm:$0xff] %v6260_v25  ;;  %v6269_v21 = vadd.f32 %v505_v34, %v6205_v39  ;;  %v507_v20 = vpop.f32.mrb[11].mxu0  ;;  %v6272_v19 = vadd.f32 %v576_v28, %v6214_v37  ;;  %v578_v31 = vpop.f32.mrb[10].mxu1 }
 0x141   :  { %8005 = vst [vmem:[#allocation69_spill] sm:$0xff] %v6263_v23  ;;  %8006 = vst [vmem:[#allocation70_spill] sm:$0xff] %v6266_v22  ;;  %v6275_v18 = vadd.f32 %v507_v20, %v6219_v27  ;;  %v6278_v25 = vadd.f32 %v578_v31, %v6200_v29  ;;  %v580_v32 = vpop.f32.mrb[11].mxu1 }
 0x142   :  { %8007 = vst [vmem:[#allocation71_spill] sm:$0xff] %v6269_v21  ;;  %8008 = vst [vmem:[#allocation72_spill] sm:$0xff] %v6272_v19  ;;  %v6281_v23 = vadd.f32 %v580_v32, %v6214_v37 }
 0x143   :  { %8009 = vst [vmem:[#allocation73_spill] sm:$0xff] %v6275_v18  ;;  %8010 = vst [vmem:[#allocation74_spill] sm:$0xff] %v6278_v25 }
 0x144   :  { %8011 = vst [vmem:[#allocation75_spill] sm:$0xff] %v6281_v23 }
 0x145   :  { %v511_v24 = vpop.f32.mrb[12].mxu0 }
 0x146   :  { %v6284_v22 = vadd.f32 %v511_v24, %v6205_v39  ;;  %v513_v34 = vpop.f32.mrb[13].mxu0  ;;  %v584_v21 = vpop.f32.mrb[12].mxu1 }
 0x147   :  { %v6288_v19 = vadd.f32 %v513_v34, %v6219_v27  ;;  %v515_v20 = vpop.f32.mrb[14].mxu0  ;;  %v6291_v18 = vadd.f32 %v584_v21, %v6200_v29  ;;  %v586_v31 = vpop.f32.mrb[13].mxu1 }
 0x148   :  { %8012 = vst [vmem:[#allocation76_spill] sm:$0xff] %v6284_v22  ;;  %v6296_v23 = vadd.f32 %v515_v20, %v6205_v39  ;;  %v517_v24 = vpop.f32.mrb[15].mxu0  ;;  %v6299_v22 = vadd.f32 %v586_v31, %v6214_v37  ;;  %v588_v28 = vpop.f32.mrb[14].mxu1  ;;  %v8020_v20 = vsub.s32 4, %v6184_v30  ;;  %v8021_v31 = vsub.s32 5, %v6184_v30 }
 0x149   :  { %8013 = vst [vmem:[#allocation77_spill] sm:$0xff] %v6288_v19  ;;  %8014 = vst [vmem:[#allocation78_spill] sm:$0xff] %v6291_v18  ;;  %v6303_v19 = vadd.f32 %v517_v24, %v6219_v27  ;;  %v6306_v21 = vadd.f32 %v588_v28, %v6200_v29  ;;  %v590_v18 = vpop.f32.mrb[15].mxu1  ;;  %v8022_v24 = vsub.s32 6, %v6184_v30  ;;  %v8023_v28 = vsub.s32 7, %v6184_v30 }
 0x14a   :  { %8015 = vst [vmem:[#allocation79_spill] sm:$0xff] %v6296_v23  ;;  %8016 = vst [vmem:[#allocation80_spill] sm:$0xff] %v6299_v22  ;;  %v6309_v25 = vadd.f32 %v590_v18, %v6214_v37  ;;  %v6314_v32 = vrot.slane %v6192_v35, %v8020_v20  ;;  %v6319_v23 = vrot.slane %v6192_v35, %v8021_v31 }
 0x14b   :  { %8017 = vst [vmem:[#allocation81_spill] sm:$0xff] %v6303_v19  ;;  %8018 = vst [vmem:[#allocation82_spill] sm:$0xff] %v6306_v21  ;;  %v6324_v34 = vrot.slane %v6192_v35, %v8022_v24  ;;  %v6329_v18 = vrot.slane %v6192_v35, %v8023_v28 }
 0x14c   :  { %8019 = vst [vmem:[#allocation83_spill] sm:$0xff] %v6309_v25 }
 0x14d   :  { %v627_v25 = vpop.f32.mrb[16].mxu0 }
 0x14e   :  { %v6332_v19 = vadd.f32 %v627_v25, %v6314_v32  ;;  %v629_v20 = vpop.f32.mrb[17].mxu0  ;;  %v700_v21 = vpop.f32.mrb[16].mxu1 }
 0x14f   :  { %v6335_v22 = vadd.f32 %v629_v20, %v6319_v23  ;;  %v631_v31 = vpop.f32.mrb[18].mxu0  ;;  %v6338_v17 = vadd.f32 %v700_v21, %v6324_v34  ;;  %v702_v24 = vpop.f32.mrb[17].mxu1 }
 0x150   :  { %8024 = vst [vmem:[#allocation84_spill] sm:$0xff] %v6332_v19  ;;  %v6341_v16 = vadd.f32 %v631_v31, %v6314_v32  ;;  %v633_v30 = vpop.f32.mrb[19].mxu0  ;;  %v6344_v35 = vadd.f32 %v702_v24, %v6329_v18  ;;  %v704_v28 = vpop.f32.mrb[18].mxu1 }
 0x151   :  { %8025 = vst [vmem:[#allocation85_spill] sm:$0xff] %v6335_v22  ;;  %8026 = vst [vmem:[#allocation86_spill] sm:$0xff] %v6338_v17  ;;  %v6347_v25 = vadd.f32 %v633_v30, %v6319_v23  ;;  %v6350_v19 = vadd.f32 %v704_v28, %v6324_v34  ;;  %v706_v20 = vpop.f32.mrb[19].mxu1 }
 0x152   :  { %8027 = vst [vmem:[#allocation87_spill] sm:$0xff] %v6341_v16  ;;  %8028 = vst [vmem:[#allocation88_spill] sm:$0xff] %v6344_v35  ;;  %v6353_v22 = vadd.f32 %v706_v20, %v6329_v18 }
 0x153   :  { %8029 = vst [vmem:[#allocation89_spill] sm:$0xff] %v6347_v25  ;;  %8030 = vst [vmem:[#allocation90_spill] sm:$0xff] %v6350_v19 }
 0x154   :  { %8031 = vst [vmem:[#allocation91_spill] sm:$0xff] %v6353_v22 }
 0x155   :  { %v637_v21 = vpop.f32.mrb[20].mxu0 }
 0x156   :  { %v6356_v17 = vadd.f32 %v637_v21, %v6314_v32  ;;  %v639_v31 = vpop.f32.mrb[21].mxu0  ;;  %v710_v16 = vpop.f32.mrb[20].mxu1 }
 0x157   :  { %v6359_v24 = vadd.f32 %v639_v31, %v6319_v23  ;;  %v641_v35 = vpop.f32.mrb[22].mxu0  ;;  %v6362_v30 = vadd.f32 %v710_v16, %v6324_v34  ;;  %v712_v25 = vpop.f32.mrb[21].mxu1 }
 0x158   :  { %8032 = vst [vmem:[#allocation92_spill] sm:$0xff] %v6356_v17  ;;  %v6365_v28 = vadd.f32 %v641_v35, %v6314_v32  ;;  %v643_v19 = vpop.f32.mrb[23].mxu0  ;;  %v6368_v20 = vadd.f32 %v712_v25, %v6329_v18  ;;  %v714_v22 = vpop.f32.mrb[22].mxu1 }
 0x159   :  { %8033 = vst [vmem:[#allocation93_spill] sm:$0xff] %v6359_v24  ;;  %8034 = vst [vmem:[#allocation94_spill] sm:$0xff] %v6362_v30  ;;  %v6371_v21 = vadd.f32 %v643_v19, %v6319_v23  ;;  %v6374_v17 = vadd.f32 %v714_v22, %v6324_v34  ;;  %v716_v31 = vpop.f32.mrb[23].mxu1 }
 0x15a   :  { %8035 = vst [vmem:[#allocation95_spill] sm:$0xff] %v6365_v28  ;;  %8036 = vst [vmem:[#allocation96_spill] sm:$0xff] %v6368_v20  ;;  %v6377_v24 = vadd.f32 %v716_v31, %v6329_v18 }
 0x15b   :  { %8037 = vst [vmem:[#allocation97_spill] sm:$0xff] %v6371_v21  ;;  %8038 = vst [vmem:[#allocation98_spill] sm:$0xff] %v6374_v17 }
 0x15c   :  { %8039 = vst [vmem:[#allocation99_spill] sm:$0xff] %v6377_v24 }
 0x15d   :  { %v647_v16 = vpop.f32.mrb[24].mxu0 }
 0x15e   :  { %v6380_v30 = vadd.f32 %v647_v16, %v6314_v32  ;;  %v649_v35 = vpop.f32.mrb[25].mxu0  ;;  %v720_v28 = vpop.f32.mrb[24].mxu1 }
 0x15f   :  { %v6383_v25 = vadd.f32 %v649_v35, %v6319_v23  ;;  %v651_v20 = vpop.f32.mrb[26].mxu0  ;;  %v6386_v19 = vadd.f32 %v720_v28, %v6324_v34  ;;  %v722_v21 = vpop.f32.mrb[25].mxu1 }
 0x160   :  { %8040 = vst [vmem:[#allocation100_spill] sm:$0xff] %v6380_v30  ;;  %v6389_v22 = vadd.f32 %v651_v20, %v6314_v32  ;;  %v653_v17 = vpop.f32.mrb[27].mxu0  ;;  %v6392_v31 = vadd.f32 %v722_v21, %v6329_v18  ;;  %v724_v24 = vpop.f32.mrb[26].mxu1 }
 0x161   :  { %8041 = vst [vmem:[#allocation101_spill] sm:$0xff] %v6383_v25  ;;  %8042 = vst [vmem:[#allocation102_spill] sm:$0xff] %v6386_v19  ;;  %v6395_v16 = vadd.f32 %v653_v17, %v6319_v23  ;;  %v6398_v30 = vadd.f32 %v724_v24, %v6324_v34  ;;  %v726_v35 = vpop.f32.mrb[27].mxu1 }
 0x162   :  { %8043 = vst [vmem:[#allocation103_spill] sm:$0xff] %v6389_v22  ;;  %8044 = vst [vmem:[#allocation104_spill] sm:$0xff] %v6392_v31  ;;  %v6401_v25 = vadd.f32 %v726_v35, %v6329_v18 }
 0x163   :  { %8045 = vst [vmem:[#allocation105_spill] sm:$0xff] %v6395_v16  ;;  %8046 = vst [vmem:[#allocation106_spill] sm:$0xff] %v6398_v30 }
 0x164   :  { %8047 = vst [vmem:[#allocation107_spill] sm:$0xff] %v6401_v25 }
 0x165   :  { %v657_v28 = vpop.f32.mrb[28].mxu0 }
 0x166   :  { %v6404_v19 = vadd.f32 %v657_v28, %v6314_v32  ;;  %v659_v20 = vpop.f32.mrb[29].mxu0  ;;  %v730_v22 = vpop.f32.mrb[28].mxu1  ;;  %v482_v28 = vadd.f32 %v6195_v36, %v6205_v39 }
 0x167   :  { %v6407_v21 = vadd.f32 %v659_v20, %v6319_v23  ;;  %v661_v31 = vpop.f32.mrb[30].mxu0  ;;  %v6410_v17 = vadd.f32 %v730_v22, %v6324_v34  ;;  %v732_v16 = vpop.f32.mrb[29].mxu1  ;;  %v555_v20 = vadd.f32 %v6209_v38, %v6200_v29  ;;  %v557_v22 = vadd.f32 %v6221_v26, %v6214_v37 }
 0x168   :  { %8048 = vst [vmem:[#allocation108_spill] sm:$0xff] %v6404_v19  ;;  %v663_v24 = vpop.f32.mrb[31].mxu0  ;;  %v6413_v30 = vadd.f32 %v732_v16, %v6329_v18  ;;  %v734_v35 = vpop.f32.mrb[30].mxu1  ;;  %v484_v19 = vadd.f32 %v6207_v33, %v6219_v27 }
 0x169   :  { %8049 = vst [vmem:[#allocation109_spill] sm:$0xff] %v6407_v21  ;;  %8050 = vst [vmem:[#allocation110_spill] sm:$0xff] %v6410_v17  ;;  %v736_v25 = vpop.f32.mrb[31].mxu1 }
 0x16a   :  { %8051 = vst [vmem:[#allocation111_spill] sm:$0xff] %v6413_v30 }
 0x16d   :  { %v1069_v21 = vpop.f32.mrb[32].mxu0 }
 0x16e   :  { %v1117_v17 = vadd.f32 %v1069_v21, %v482_v28  ;;  %v1110_v15 = vpop.f32.mrb[32].mxu1  ;;  %v1071_v14 = vpop.f32.mrb[33].mxu0 }
 0x16f   :  { %v1119_v16 = vadd.f32 %v1110_v15, %v555_v20  ;;  %v1118_v30 = vadd.f32 %v1071_v14, %v484_v19  ;;  %v1112_v13 = vpop.f32.mrb[33].mxu1  ;;  %v1073_v12 = vpop.f32.mrb[34].mxu0  ;;  %v737_v20 = vadd.f32 %v736_v25, %v6329_v18 }
 0x170   :  { %v1367_v11 = vmul.f32 0.5, %v1117_v17  ;;  %v1120_v10 = vadd.f32 %v1112_v13, %v557_v22  ;;  %v1074_v36 = vpop.f32.mrb[35].mxu0  ;;  %v1114_v39 = vpop.f32.mrb[34].mxu1 }
 0x171   :  { %v1371_v9 = vmul.f32 0.5, %v1118_v30  ;;  %v1115_v27 = vpop.f32.mrb[35].mxu1 }
 0x172   :  { %5147 = vtanh.f32 %v1367_v11  ;;  %v1376_v33 = vmul.f32 0.5, %v1120_v10  ;;  %v664_v10 = vadd.f32 %v663_v24, %v6319_v23  ;;  %v735_v11 = vadd.f32 %v734_v35, %v6324_v34 }
 0x173   :  { %5149 = vtanh.f32 %v1371_v9  ;;  %v662_v9 = vadd.f32 %v661_v31, %v6314_v32 }
 0x174   :  { %5151 = vtanh.f32 %v1119_v16 }
 0x175   :  { %5153 = vtanh.f32 %v1376_v33 }
 0x17c   :  { %v5148_v38 = vpop.eup %5147 }
 0x17d   :  { %v5150_v29 = vpop.eup %5149  ;;  %v1369_v26 = vadd.f32 1.0, %v5148_v38 }
 0x17e   :  { %v1373_v37 = vadd.f32 1.0, %v5150_v29  ;;  %v5152_v15 = vpop.eup %5151 }
 0x17f   :  { %v1370_v21 = vmul.f32 0.5, %v1369_v26  ;;  %v5154_v13 = vpop.eup %5153 }
 0x180   :  { %v1374_v14 = vmul.f32 0.5, %v1373_v37  ;;  %v1378_v30 = vadd.f32 1.0, %v5154_v13 }
 0x181   :  { %v1394_v19 = vmul.f32 %v5152_v15, %v1370_v21 }
 0x182   :  { %v1393_v12 = vmul.f32 0.0, %v1374_v14  ;;  %v1379_v39 = vmul.f32 0.5, %v1378_v30 }
 0x184   :  { %v6423_v17 = vadd.f32 %v1394_v19, %v1393_v12 }
 0x186   :  { %5155 = vtanh.f32 %v6423_v17 }
 0x18d   :  { %v1315_v28 = vpop.f32.mrb[36].mxu0 }
 0x18e   :  { %v1363_v22 = vadd.f32 %v1315_v28, %v662_v9  ;;  %v1356_v16 = vpop.f32.mrb[36].mxu1  ;;  %v1317_v36 = vpop.f32.mrb[37].mxu0 }
 0x18f   :  { %v1365_v27 = vadd.f32 %v1356_v16, %v735_v11  ;;  %v1364_v33 = vadd.f32 %v1317_v36, %v664_v10  ;;  %v1358_v38 = vpop.f32.mrb[37].mxu1  ;;  %v1319_v29 = vpop.f32.mrb[38].mxu0 }
 0x190   :  { %v5156_v26 = vpop.eup %5155  ;;  %v1380_v37 = vmul.f32 0.5, %v1363_v22  ;;  %v1366_v21 = vadd.f32 %v1358_v38, %v737_v20  ;;  %v1320_v15 = vpop.f32.mrb[39].mxu0  ;;  %v8053_v22 = vld [vmem:[#allocation54_spill] sm:$0xff]  ;;  %v8056_v38 = vld [vmem:[#allocation24_spill] sm:$0xff]  ;;  %v8057_v29 = vld [vmem:[#allocation25_spill] sm:$0xff] }
 0x191   :  { %v1360_v32 = vpop.f32.mrb[38].mxu1  ;;  %v6430_v31 = vmul.f32 %v5156_v26, %v1379_v39  ;;  %v1384_v23 = vmul.f32 0.5, %v1364_v33  ;;  %v8055_v33 = vld [vmem:[#allocation23_spill] sm:$0xff]  ;;  %v8058_v26 = vld [vmem:[#allocation26_spill] sm:$0xff]  ;;  %v8064_v15 = vld [vmem:[#allocation32_spill] sm:$0xff] }
 0x192   :  { %v1361_v34 = vpop.f32.mrb[39].mxu1  ;;  %5157 = vtanh.f32 %v1380_v37  ;;  %v1389_v25 = vmul.f32 0.5, %v1366_v21  ;;  %v8059_v37 = vld [vmem:[#allocation27_spill] sm:$0xff]  ;;  %v8062_v21 = vld [vmem:[#allocation30_spill] sm:$0xff]  ;;  %v8065_v32 = vld [vmem:[#allocation33_spill] sm:$0xff] }
 0x193   :  { %8052 = vst [vmem:[#allocation112_spill] sm:$0xff] %v6430_v31  ;;  %v1413_v18 = vpack.c.bf16 %v6430_v31, %v6430_v31  ;;  %5159 = vtanh.f32 %v1384_v23  ;;  %v8066_v23 = vld [vmem:[#allocation34_spill] sm:$0xff]  ;;  %v8067_v34 = vld [vmem:[#allocation35_spill] sm:$0xff] }
 0x194   :  { %5161 = vtanh.f32 %v1365_v27  ;;  %v6763_v31 = vld [vmem:[#allocation10 + $0xc0] ss:$16 sps:$4 sm:$0xff]  }
 0x195   :  { %1447 = vmatmul.mubr.bf16.vlgmr.msra.gmra.mrb[40].mxu0 %v1413_v18  ;;  %1488 = vmatmul.mubr.bf16.vlgmr.msra.gmra.mrb[40].mxu1 %v1413_v18  ;;  %5163 = vtanh.f32 %v1389_v25  ;;  %v8068_v18 = vld [vmem:[#allocation36_spill] sm:$0xff]  ;;  %v8069_v25 = vld [vmem:[#allocation37_spill] sm:$0xff] }
 0x196   :  { %1502 = vmatpush1.bf16.msra.mxu0 %v6049_v40  ;;  %1543 = vmatpush1.bf16.msra.mxu1 %v6053_v41 }
 0x197   :  { %1503 = vmatprep.subr.bf16.mxu0 %v6055_v42  ;;  %1544 = vmatprep.subr.bf16.mxu1 %v6058_v43 }
 0x198   :  { %1533 = vmatprep.mubr.bf16.mxu0 %v7988_v63  ;;  %1574 = vmatprep.mubr.bf16.mxu1 %v7988_v63 }
 0x19a   :  { %1504 = vmatpush1.bf16.msra.mxu0 %v6063_v44  ;;  %1545 = vmatpush1.bf16.msra.mxu1 %v6067_v45 }
 0x19b   :  { %1505 = vmatprep.subr.bf16.mxu0 %v6069_v46  ;;  %1546 = vmatprep.subr.bf16.mxu1 %v6072_v47 }
 0x19c   :  { %v5158_v24 = vpop.eup %5157 }
 0x19d   :  { %v5160_v35 = vpop.eup %5159  ;;  %v1382_v14 = vadd.f32 1.0, %v5158_v24  ;;  %v8070_v24 = vld [vmem:[#allocation38_spill] sm:$0xff] }
 0x19e   :  { %v1386_v19 = vadd.f32 1.0, %v5160_v35  ;;  %1506 = vmatpush1.bf16.msra.mxu0 %v6077_v48  ;;  %1547 = vmatpush1.bf16.msra.mxu1 %v6081_v49  ;;  %v5162_v13 = vpop.eup %5161  ;;  %v8071_v35 = vld [vmem:[#allocation39_spill] sm:$0xff] }
 0x19f   :  { %v1383_v12 = vmul.f32 0.5, %v1382_v14  ;;  %1507 = vmatprep.subr.bf16.mxu0 %v6083_v50  ;;  %1548 = vmatprep.subr.bf16.mxu1 %v6086_v51  ;;  %v5164_v28 = vpop.eup %5163  ;;  %v8072_v14 = vld [vmem:[#allocation40_spill] sm:$0xff] }
 0x1a0   :  { %v1387_v30 = vmul.f32 0.5, %v1386_v19  ;;  %v1391_v20 = vadd.f32 1.0, %v5164_v28  ;;  %v8073_v19 = vld [vmem:[#allocation41_spill] sm:$0xff]  ;;  %v8079_v28 = vld [vmem:[#allocation47_spill] sm:$0xff] }
 0x1a1   :  { %v1397_v9 = vmul.f32 %v5162_v13, %v1383_v12  ;;  %v8074_v12 = vld [vmem:[#allocation42_spill] sm:$0xff]  ;;  %v8075_v13 = vld [vmem:[#allocation43_spill] sm:$0xff] }
 0x1a2   :  { %v1396_v10 = vmul.f32 0.0, %v1387_v30  ;;  %1508 = vmatpush1.bf16.msra.mxu0 %v6089_v52  ;;  %1549 = vmatpush1.bf16.msra.mxu1 %v6093_v53  ;;  %v1392_v16 = vmul.f32 0.5, %v1391_v20  ;;  %v8076_v30 = vld [vmem:[#allocation44_spill] sm:$0xff] }
 0x1a3   :  { %1509 = vmatprep.subr.bf16.mxu0 %v6095_v54  ;;  %1550 = vmatprep.subr.bf16.mxu1 %v6098_v55  ;;  %v8080_v20 = vld [vmem:[#allocation48_spill] sm:$0xff] }
 0x1a4   :  { %v6452_v11 = vadd.f32 %v1397_v9, %v1396_v10  ;;  %v8077_v9 = vld [vmem:[#allocation45_spill] sm:$0xff]  ;;  %v8078_v10 = vld [vmem:[#allocation46_spill] sm:$0xff] }
 0x1a6   :  { %5165 = vtanh.f32 %v6452_v11  ;;  %1510 = vmatpush1.bf16.msra.mxu0 %v6101_v56  ;;  %1551 = vmatpush1.bf16.msra.mxu1 %v6105_v57 }
 0x1a7   :  { %1511 = vmatprep.subr.bf16.mxu0 %v6107_v58  ;;  %1552 = vmatprep.subr.bf16.mxu1 %v6110_v59 }
 0x1aa   :  { %1512 = vmatpush1.bf16.msra.mxu0 %v6113_v60  ;;  %1553 = vmatpush1.bf16.msra.mxu1 %v6117_v61 }
 0x1ab   :  { %1513 = vmatprep.subr.bf16.mxu0 %v6119_v62  ;;  %1554 = vmatprep.subr.bf16.mxu1 %v8053_v22 }
 0x1ae   :  { %1514 = vmatpush1.bf16.msra.mxu0 %v6125_v1  ;;  %1555 = vmatpush1.bf16.msra.mxu1 %v6129_v2 }
 0x1af   :  { %1515 = vmatprep.subr.bf16.mxu0 %v6131_v3  ;;  %1556 = vmatprep.subr.bf16.mxu1 %v6134_v4 }
 0x1b0   :  { %v5166_v36 = vpop.eup %5165 }
 0x1b1   :  { %v6467_v39 = vmul.f32 %v5166_v36, %v1392_v16  ;;  %v8081_v16 = vld [vmem:[#allocation49_spill] sm:$0xff]  ;;  %v8082_v36 = vld [vmem:[#allocation50_spill] sm:$0xff] }
 0x1b2   :  { %1516 = vmatpush1.bf16.msra.mxu0 %v6137_v7  ;;  %1557 = vmatpush1.bf16.msra.mxu1 %v6141_v0 }
 0x1b3   :  { %8054 = vst [vmem:[#allocation54_spill] sm:$0xff] %v6467_v39  ;;  %v1500_v27 = vpack.c.bf16 %v6467_v39, %v6467_v39  ;;  %1634 = vmatprep.subr.bf16.mxu0 %v5909_v5  ;;  %1675 = vmatprep.subr.bf16.mxu1 %v5911_v6  ;;  %v8060_v5 = vld [vmem:[#allocation28_spill] sm:$0xff]  ;;  %v8061_v6 = vld [vmem:[#allocation29_spill] sm:$0xff] }
 0x1b4   :  { %v6754_v39 = vld [vmem:[#allocation10 + $0xa8] ss:$16 sps:$4 sm:$0xff]  }
 0x1b5   :  { %1534 = vmatmul.mubr.bf16.vlgmr.msra.gmra.mrb[44].mxu0 %v1500_v27  ;;  %1575 = vmatmul.mubr.bf16.vlgmr.msra.gmra.mrb[44].mxu1 %v1500_v27  ;;  %v8083_v27 = vld [vmem:[#allocation51_spill] sm:$0xff] }
 0x1b6   :  { %1635 = vmatpush1.bf16.msra.mxu0 %v5932_v8  ;;  %1676 = vmatpush1.bf16.msra.mxu1 %v8055_v33  ;;  %v8063_v8 = vld [vmem:[#allocation31_spill] sm:$0xff]  ;;  %v8084_v33 = vld [vmem:[#allocation52_spill] sm:$0xff] }
 0x1b7   :  { %1636 = vmatprep.subr.bf16.mxu0 %v8056_v38  ;;  %1677 = vmatprep.subr.bf16.mxu1 %v8057_v29  ;;  %v8085_v38 = vld [vmem:[#allocation53_spill] sm:$0xff] }
 0x1b8   :  { %1666 = vmatprep.mubr.bf16.mxu0 %v7988_v63  ;;  %1707 = vmatprep.mubr.bf16.mxu1 %v7988_v63  ;;  %8132 = vst [vmem:[#allocation53_spill] sm:$0xff] %v6754_v39 }
 0x1ba   :  { %1637 = vmatpush1.bf16.msra.mxu0 %v8058_v26  ;;  %1678 = vmatpush1.bf16.msra.mxu1 %v8059_v37  ;;  %v8086_v37 = vld [vmem:[#allocation56_spill] sm:$0xff] }
 0x1bb   :  { %1638 = vmatprep.subr.bf16.mxu0 %v8060_v5  ;;  %1679 = vmatprep.subr.bf16.mxu1 %v8061_v6  ;;  %v8087_v6 = vld [vmem:[#allocation58_spill] sm:$0xff] }
 0x1be   :  { %1639 = vmatpush1.bf16.msra.mxu0 %v8062_v21  ;;  %1680 = vmatpush1.bf16.msra.mxu1 %v8063_v8 }
 0x1bf   :  { %1640 = vmatprep.subr.bf16.mxu0 %v8064_v15  ;;  %1681 = vmatprep.subr.bf16.mxu1 %v8065_v32  ;;  %v8088_v32 = vld [vmem:[#allocation57_spill] sm:$0xff] }
 0x1c0   :  { %8135 = vst [vmem:[#allocation57_spill] sm:$0xff] %v6763_v31 }
 0x1c2   :  { %1641 = vmatpush1.bf16.msra.mxu0 %v8066_v23  ;;  %1682 = vmatpush1.bf16.msra.mxu1 %v8067_v34  ;;  %v8089_v34 = vld [vmem:[#allocation59_spill] sm:$0xff] }
 0x1c3   :  { %1642 = vmatprep.subr.bf16.mxu0 %v8068_v18  ;;  %1683 = vmatprep.subr.bf16.mxu1 %v8069_v25 }
 0x1c6   :  { %1643 = vmatpush1.bf16.msra.mxu0 %v8070_v24  ;;  %1684 = vmatpush1.bf16.msra.mxu1 %v8071_v35 }
 0x1c7   :  { %1644 = vmatprep.subr.bf16.mxu0 %v8072_v14  ;;  %1685 = vmatprep.subr.bf16.mxu1 %v8073_v19 }
 0x1ca   :  { %1645 = vmatpush1.bf16.msra.mxu0 %v8074_v12  ;;  %1686 = vmatpush1.bf16.msra.mxu1 %v8075_v13 }
 0x1cb   :  { %1646 = vmatprep.subr.bf16.mxu0 %v8076_v30  ;;  %1687 = vmatprep.subr.bf16.mxu1 %v8077_v9 }
 0x1ce   :  { %1647 = vmatpush1.bf16.msra.mxu0 %v8078_v10  ;;  %1688 = vmatpush1.bf16.msra.mxu1 %v8079_v28 }
 0x1cf   :  { %1648 = vmatprep.subr.bf16.mxu0 %v8080_v20  ;;  %1689 = vmatprep.subr.bf16.mxu1 %v8081_v16 }
 0x1d2   :  { %1649 = vmatpush1.bf16.msra.mxu0 %v8082_v36  ;;  %1690 = vmatpush1.bf16.msra.mxu1 %v8083_v27 }
 0x1d3   :  { %1721 = vmatprep.subr.bf16.mxu0 %v8084_v33  ;;  %1762 = vmatprep.subr.bf16.mxu1 %v8085_v38 }
 0x268   :  { %v1448_v29 = vpop.f32.mrb[40].mxu0  ;;  %v1489_v26 = vpop.f32.mrb[40].mxu1 }
 0x269   :  { %v1496_v5 = vadd.f32 %v1448_v29, %v8086_v37  ;;  %v1498_v21 = vadd.f32 %v1489_v26, %v8087_v6  ;;  %v1450_v8 = vpop.f32.mrb[41].mxu0  ;;  %v1491_v15 = vpop.f32.mrb[41].mxu1  ;;  %v8090_v6 = vld [vmem:[#allocation108_spill] sm:$0xff] }
 0x26a   :  { %v1497_v23 = vadd.f32 %v1450_v8, %v8088_v32  ;;  %v1499_v18 = vadd.f32 %v1491_v15, %v8089_v34  ;;  %v1452_v25 = vpop.f32.mrb[42].mxu0  ;;  %v1493_v24 = vpop.f32.mrb[42].mxu1  ;;  %v8091_v8 = vld [vmem:[#allocation110_spill] sm:$0xff] }
 0x26b   :  { %v1587_v35 = vmul.f32 0.5, %v1496_v5  ;;  %v1453_v14 = vpop.f32.mrb[43].mxu0  ;;  %v1494_v19 = vpop.f32.mrb[43].mxu1  ;;  %v8093_v24 = vld [vmem:[#allocation111_spill] sm:$0xff] }
 0x26c   :  { %v1591_v12 = vmul.f32 0.5, %v1497_v23  ;;  %v1596_v13 = vmul.f32 0.5, %v1499_v18  ;;  %v8092_v18 = vld [vmem:[#allocation109_spill] sm:$0xff] }
 0x26d   :  { %5167 = vtanh.f32 %v1587_v35 }
 0x26e   :  { %5169 = vtanh.f32 %v1591_v12 }
 0x26f   :  { %5171 = vtanh.f32 %v1498_v21 }
 0x270   :  { %5173 = vtanh.f32 %v1596_v13 }
 0x277   :  { %v5168_v30 = vpop.eup %5167 }
 0x278   :  { %v5170_v9 = vpop.eup %5169  ;;  %v1589_v10 = vadd.f32 1.0, %v5168_v30 }
 0x279   :  { %v1593_v28 = vadd.f32 1.0, %v5170_v9  ;;  %v5172_v16 = vpop.eup %5171 }
 0x27a   :  { %v1590_v20 = vmul.f32 0.5, %v1589_v10  ;;  %v5174_v29 = vpop.eup %5173 }
 0x27b   :  { %v1594_v36 = vmul.f32 0.5, %v1593_v28  ;;  %v1598_v26 = vadd.f32 1.0, %v5174_v29  ;;  %v6624_v29 = vld [vmem:[#allocation8 + $0x88] ss:$16 sps:$4 sm:$0xff]  }
 0x27c   :  { %v1614_v27 = vmul.f32 %v5172_v16, %v1590_v20  ;;  %8105 = vst [vmem:[#allocation34_spill] sm:$0xff] %v6624_v29 }
 0x27d   :  { %v1613_v33 = vmul.f32 %v1594_v36, %v6423_v17  ;;  %v1599_v34 = vmul.f32 0.5, %v1598_v26  ;;  %v6627_v26 = vld [vmem:[#allocation8 + $0xa4] ss:$16 sps:$4 sm:$0xff]  }
 0x27e   :  { %8106 = vst [vmem:[#allocation35_spill] sm:$0xff] %v6627_v26 }
 0x27f   :  { %v6514_v38 = vadd.f32 %v1614_v27, %v1613_v33  ;;  %v6618_v27 = vld [vmem:[#allocation8 + $0x8c] ss:$16 sps:$4 sm:$0xff]   ;;  %v6621_v33 = vld [vmem:[#allocation8 + $0x80] ss:$16 sps:$4 sm:$0xff]  }
 0x280   :  { %8103 = vst [vmem:[#allocation32_spill] sm:$0xff] %v6618_v27  ;;  %8104 = vst [vmem:[#allocation33_spill] sm:$0xff] %v6621_v33 }
 0x281   :  { %5175 = vtanh.f32 %v6514_v38 }
 0x288   :  { %v1535_v37 = vpop.f32.mrb[44].mxu0  ;;  %v1576_v5 = vpop.f32.mrb[44].mxu1 }
 0x289   :  { %v1583_v21 = vadd.f32 %v1535_v37, %v8090_v6  ;;  %v1585_v15 = vadd.f32 %v1576_v5, %v8091_v8  ;;  %v1537_v32 = vpop.f32.mrb[45].mxu0  ;;  %v1578_v23 = vpop.f32.mrb[45].mxu1  ;;  %v6630_v37 = vld [vmem:[#allocation8 + $0xac] ss:$16 sps:$4 sm:$0xff]   ;;  %v6633_v5 = vld [vmem:[#allocation8 + $0xa0] ss:$16 sps:$4 sm:$0xff]  }
 0x28a   :  { %v1584_v25 = vadd.f32 %v1537_v32, %v8092_v18  ;;  %v1586_v35 = vadd.f32 %v1578_v23, %v8093_v24  ;;  %v1539_v17 = vpop.f32.mrb[46].mxu0  ;;  %v1580_v14 = vpop.f32.mrb[46].mxu1  ;;  %8107 = vst [vmem:[#allocation36_spill] sm:$0xff] %v6630_v37  ;;  %8108 = vst [vmem:[#allocation37_spill] sm:$0xff] %v6633_v5  ;;  %v6636_v6 = vld [vmem:[#allocation8 + $0xa8] ss:$16 sps:$4 sm:$0xff]  }
 0x28b   :  { %v5176_v19 = vpop.eup %5175  ;;  %v1600_v12 = vmul.f32 0.5, %v1583_v21  ;;  %v1540_v13 = vpop.f32.mrb[47].mxu0  ;;  %8109 = vst [vmem:[#allocation38_spill] sm:$0xff] %v6636_v6  ;;  %v6639_v21 = vld [vmem:[#allocation8 + $0xc4] ss:$16 sps:$4 sm:$0xff]  }
 0x28c   :  { %v1581_v30 = vpop.f32.mrb[47].mxu1  ;;  %v6521_v9 = vmul.f32 %v5176_v19, %v1599_v34  ;;  %v1604_v10 = vmul.f32 0.5, %v1584_v25  ;;  %v1609_v20 = vmul.f32 0.5, %v1586_v35  ;;  %8110 = vst [vmem:[#allocation39_spill] sm:$0xff] %v6639_v21  ;;  %v6642_v8 = vld [vmem:[#allocation8 + $0xcc] ss:$16 sps:$4 sm:$0xff]  }
 0x28d   :  { %5177 = vtanh.f32 %v1600_v12  ;;  %8111 = vst [vmem:[#allocation40_spill] sm:$0xff] %v6642_v8  ;;  %v6648_v32 = vld [vmem:[#allocation8 + $0xc8] ss:$16 sps:$4 sm:$0xff]   ;;  %v6651_v23 = vld [vmem:[#allocation8 + $0xe4] ss:$16 sps:$4 sm:$0xff]  }
 0x28e   :  { %8094 = vst [vmem:[#allocation23_spill] sm:$0xff] %v6521_v9  ;;  %v1633_v28 = vpack.c.bf16 %v6521_v9, %v6521_v9  ;;  %5179 = vtanh.f32 %v1604_v10  ;;  %8113 = vst [vmem:[#allocation42_spill] sm:$0xff] %v6648_v32  ;;  %v6654_v34 = vld [vmem:[#allocation8 + $0xec] ss:$16 sps:$4 sm:$0xff]   ;;  %v6657_v18 = vld [vmem:[#allocation8 + $0xe0] ss:$16 sps:$4 sm:$0xff]  }
 0x28f   :  { %5181 = vtanh.f32 %v1585_v15  ;;  %v6645_v15 = vld [vmem:[#allocation8 + $0xc0] ss:$16 sps:$4 sm:$0xff]   ;;  %8114 = vst [vmem:[#allocation43_spill] sm:$0xff] %v6651_v23  ;;  %8115 = vst [vmem:[#allocation44_spill] sm:$0xff] %v6654_v34  ;;  %v6660_v25 = vld [vmem:[#allocation8 + $0xe8] ss:$16 sps:$4 sm:$0xff]  }
 0x290   :  { %1667 = vmatmul.mubr.bf16.vlgmr.msra.gmra.mrb[48].mxu0 %v1633_v28  ;;  %1708 = vmatmul.mubr.bf16.vlgmr.msra.gmra.mrb[48].mxu1 %v1633_v28  ;;  %5183 = vtanh.f32 %v1609_v20  ;;  %8112 = vst [vmem:[#allocation41_spill] sm:$0xff] %v6645_v15  ;;  %8116 = vst [vmem:[#allocation45_spill] sm:$0xff] %v6657_v18  ;;  %v6663_v24 = vld [vmem:[#allocation10 + $0x4] ss:$16 sps:$4 sm:$0xff]   ;;  %v6666_v35 = vld [vmem:[#allocation10 + $0xc] ss:$16 sps:$4 sm:$0xff]  }
 0x291   :  { %1722 = vmatpush1.bf16.msra.mxu0 %v6049_v40  ;;  %1763 = vmatpush1.bf16.msra.mxu1 %v6053_v41  ;;  %8117 = vst [vmem:[#allocation46_spill] sm:$0xff] %v6660_v25  ;;  %8118 = vst [vmem:[#allocation47_spill] sm:$0xff] %v6663_v24  ;;  %v8120_v19 = vld [vmem:[#allocation60_spill] sm:$0xff]  ;;  %v8121_v13 = vld [vmem:[#allocation62_spill] sm:$0xff] }
 0x292   :  { %1723 = vmatprep.subr.bf16.mxu0 %v6055_v42  ;;  %1764 = vmatprep.subr.bf16.mxu1 %v6058_v43  ;;  %8119 = vst [vmem:[#allocation48_spill] sm:$0xff] %v6666_v35  ;;  %v8122_v20 = vld [vmem:[#allocation61_spill] sm:$0xff]  ;;  %v6760_v9 = vld [vmem:[#allocation10 + $0xcc] ss:$16 sps:$4 sm:$0xff]  }
 0x293   :  { %1753 = vmatprep.mubr.bf16.mxu0 %v7988_v63  ;;  %1794 = vmatprep.mubr.bf16.mxu1 %v7988_v63  ;;  %8134 = vst [vmem:[#allocation58_spill] sm:$0xff] %v6760_v9 }
 0x295   :  { %1724 = vmatpush1.bf16.msra.mxu0 %v6063_v44  ;;  %1765 = vmatpush1.bf16.msra.mxu1 %v6067_v45 }
 0x296   :  { %1725 = vmatprep.subr.bf16.mxu0 %v6069_v46  ;;  %1766 = vmatprep.subr.bf16.mxu1 %v6072_v47 }
 0x297   :  { %v5178_v40 = vpop.eup %5177 }
 0x298   :  { %v5180_v16 = vpop.eup %5179  ;;  %v1602_v41 = vadd.f32 1.0, %v5178_v40 }
 0x299   :  { %v1606_v36 = vadd.f32 1.0, %v5180_v16  ;;  %1726 = vmatpush1.bf16.msra.mxu0 %v6077_v48  ;;  %1767 = vmatpush1.bf16.msra.mxu1 %v6081_v49  ;;  %v5182_v43 = vpop.eup %5181  ;;  %v8123_v16 = vld [vmem:[#allocation64_spill] sm:$0xff] }
 0x29a   :  { %v1603_v42 = vmul.f32 0.5, %v1602_v41  ;;  %1727 = vmatprep.subr.bf16.mxu0 %v6083_v50  ;;  %1768 = vmatprep.subr.bf16.mxu1 %v6086_v51  ;;  %v5184_v48 = vpop.eup %5183 }
 0x29b   :  { %v1607_v44 = vmul.f32 0.5, %v1606_v36  ;;  %v1611_v49 = vadd.f32 1.0, %v5184_v48 }
 0x29c   :  { %v1617_v45 = vmul.f32 %v5182_v43, %v1603_v42 }
 0x29d   :  { %v1616_v46 = vmul.f32 %v1607_v44, %v6452_v11  ;;  %1728 = vmatpush1.bf16.msra.mxu0 %v6089_v52  ;;  %1769 = vmatpush1.bf16.msra.mxu1 %v6093_v53  ;;  %v1612_v50 = vmul.f32 0.5, %v1611_v49  ;;  %v6612_v11 = vld [vmem:[#allocation8 + $0x68] ss:$16 sps:$4 sm:$0xff]  }
 0x29e   :  { %1729 = vmatprep.subr.bf16.mxu0 %v6095_v54  ;;  %1770 = vmatprep.subr.bf16.mxu1 %v6098_v55  ;;  %v6565_v54 = vld [vmem:[#allocation8 + $0x4] ss:$16 sps:$4 sm:$0xff]   ;;  %v6568_v55 = vld [vmem:[#allocation8 + $0xc] ss:$16 sps:$4 sm:$0xff]   ;;  %8101 = vst [vmem:[#allocation30_spill] sm:$0xff] %v6612_v11 }
 0x29f   :  { %v6544_v47 = vadd.f32 %v1617_v45, %v1616_v46 }
 0x2a1   :  { %5185 = vtanh.f32 %v6544_v47  ;;  %1730 = vmatpush1.bf16.msra.mxu0 %v6101_v56  ;;  %1771 = vmatpush1.bf16.msra.mxu1 %v6105_v57  ;;  %v6571_v56 = vld [vmem:[#allocation8] ss:$16 sps:$4 sm:$0xff]   ;;  %v6574_v57 = vld [vmem:[#allocation8 + $0x8] ss:$16 sps:$4 sm:$0xff]  }
 0x2a2   :  { %1731 = vmatprep.subr.bf16.mxu0 %v6107_v58  ;;  %1772 = vmatprep.subr.bf16.mxu1 %v6110_v59  ;;  %v6580_v58 = vld [vmem:[#allocation8 + $0x2c] ss:$16 sps:$4 sm:$0xff]   ;;  %v6585_v59 = vld [vmem:[#allocation8 + $0x20] ss:$16 sps:$4 sm:$0xff]  }
 0x2a5   :  { %1732 = vmatpush1.bf16.msra.mxu0 %v6113_v60  ;;  %1773 = vmatpush1.bf16.msra.mxu1 %v6117_v61  ;;  %v6588_v60 = vld [vmem:[#allocation8 + $0x28] ss:$16 sps:$4 sm:$0xff]   ;;  %v6591_v61 = vld [vmem:[#allocation8 + $0x44] ss:$16 sps:$4 sm:$0xff]  }
 0x2a6   :  { %1733 = vmatprep.subr.bf16.mxu0 %v6119_v62  ;;  %1774 = vmatprep.subr.bf16.mxu1 %v8053_v22  ;;  %v6594_v62 = vld [vmem:[#allocation8 + $0x4c] ss:$16 sps:$4 sm:$0xff]   ;;  %v6615_v22 = vld [vmem:[#allocation8 + $0x84] ss:$16 sps:$4 sm:$0xff]  }
 0x2a7   :  { %8102 = vst [vmem:[#allocation31_spill] sm:$0xff] %v6615_v22 }
 0x2a9   :  { %1734 = vmatpush1.bf16.msra.mxu0 %v6125_v1  ;;  %1775 = vmatpush1.bf16.msra.mxu1 %v6129_v2  ;;  %v6597_v1 = vld [vmem:[#allocation8 + $0x40] ss:$16 sps:$4 sm:$0xff]   ;;  %v6600_v2 = vld [vmem:[#allocation8 + $0x48] ss:$16 sps:$4 sm:$0xff]  }
 0x2aa   :  { %1735 = vmatprep.subr.bf16.mxu0 %v6131_v3  ;;  %1776 = vmatprep.subr.bf16.mxu1 %v6134_v4  ;;  %8096 = vst [vmem:[#allocation25_spill] sm:$0xff] %v6597_v1  ;;  %8097 = vst [vmem:[#allocation26_spill] sm:$0xff] %v6600_v2  ;;  %v6603_v3 = vld [vmem:[#allocation8 + $0x64] ss:$16 sps:$4 sm:$0xff]   ;;  %v6606_v4 = vld [vmem:[#allocation8 + $0x6c] ss:$16 sps:$4 sm:$0xff]  }
 0x2ab   :  { %v5186_v51 = vpop.eup %5185  ;;  %8098 = vst [vmem:[#allocation27_spill] sm:$0xff] %v6603_v3  ;;  %8099 = vst [vmem:[#allocation28_spill] sm:$0xff] %v6606_v4 }
 0x2ac   :  { %v6559_v52 = vmul.f32 %v5186_v51, %v1612_v50 }
 0x2ad   :  { %1736 = vmatpush1.bf16.msra.mxu0 %v6137_v7  ;;  %1777 = vmatpush1.bf16.msra.mxu1 %v6141_v0  ;;  %v6577_v0 = vld [vmem:[#allocation8 + $0x24] ss:$16 sps:$4 sm:$0xff]   ;;  %v6609_v7 = vld [vmem:[#allocation8 + $0x60] ss:$16 sps:$4 sm:$0xff]  }
 0x2ae   :  { %8095 = vst [vmem:[#allocation24_spill] sm:$0xff] %v6559_v52  ;;  %v1720_v53 = vpack.c.bf16 %v6559_v52, %v6559_v52  ;;  %1854 = vmatprep.subr.bf16.mxu0 %v6565_v54  ;;  %1895 = vmatprep.subr.bf16.mxu1 %v6568_v55  ;;  %8100 = vst [vmem:[#allocation29_spill] sm:$0xff] %v6609_v7 }
 0x2b0   :  { %1754 = vmatmul.mubr.bf16.vlgmr.msra.gmra.mrb[52].mxu0 %v1720_v53  ;;  %1795 = vmatmul.mubr.bf16.vlgmr.msra.gmra.mrb[52].mxu1 %v1720_v53 }
 0x2b1   :  { %1855 = vmatpush1.bf16.msra.mxu0 %v6571_v56  ;;  %1896 = vmatpush1.bf16.msra.mxu1 %v6574_v57 }
 0x2b2   :  { %1856 = vmatprep.subr.bf16.mxu0 %v6577_v0  ;;  %1897 = vmatprep.subr.bf16.mxu1 %v6580_v58 }
 0x2b3   :  { %1886 = vmatprep.mubr.bf16.mxu0 %v7988_v63  ;;  %1927 = vmatprep.mubr.bf16.mxu1 %v7988_v63 }
 0x2b5   :  { %1857 = vmatpush1.bf16.msra.mxu0 %v6585_v59  ;;  %1898 = vmatpush1.bf16.msra.mxu1 %v6588_v60 }
 0x2b6   :  { %1858 = vmatprep.subr.bf16.mxu0 %v6591_v61  ;;  %1899 = vmatprep.subr.bf16.mxu1 %v6594_v62 }
 0x2b9   :  { %1859 = vmatpush1.bf16.msra.mxu0 %v6597_v1  ;;  %1900 = vmatpush1.bf16.msra.mxu1 %v6600_v2 }
 0x2ba   :  { %1860 = vmatprep.subr.bf16.mxu0 %v6603_v3  ;;  %1901 = vmatprep.subr.bf16.mxu1 %v6606_v4 }
 0x2bd   :  { %1861 = vmatpush1.bf16.msra.mxu0 %v6609_v7  ;;  %1902 = vmatpush1.bf16.msra.mxu1 %v6612_v11 }
 0x2be   :  { %1862 = vmatprep.subr.bf16.mxu0 %v6615_v22  ;;  %1903 = vmatprep.subr.bf16.mxu1 %v6618_v27 }
 0x2c1   :  { %1863 = vmatpush1.bf16.msra.mxu0 %v6621_v33  ;;  %1904 = vmatpush1.bf16.msra.mxu1 %v6624_v29 }
 0x2c2   :  { %1864 = vmatprep.subr.bf16.mxu0 %v6627_v26  ;;  %1905 = vmatprep.subr.bf16.mxu1 %v6630_v37 }
 0x2c5   :  { %1865 = vmatpush1.bf16.msra.mxu0 %v6633_v5  ;;  %1906 = vmatpush1.bf16.msra.mxu1 %v6636_v6 }
 0x2c6   :  { %1866 = vmatprep.subr.bf16.mxu0 %v6639_v21  ;;  %1907 = vmatprep.subr.bf16.mxu1 %v6642_v8 }
 0x2c9   :  { %1867 = vmatpush1.bf16.msra.mxu0 %v6645_v15  ;;  %1908 = vmatpush1.bf16.msra.mxu1 %v6648_v32 }
 0x2ca   :  { %1868 = vmatprep.subr.bf16.mxu0 %v6651_v23  ;;  %1909 = vmatprep.subr.bf16.mxu1 %v6654_v34 }
 0x2cd   :  { %1869 = vmatpush1.bf16.msra.mxu0 %v6657_v18  ;;  %1910 = vmatpush1.bf16.msra.mxu1 %v6660_v25 }
 0x2ce   :  { %1941 = vmatprep.subr.bf16.mxu0 %v6663_v24  ;;  %1982 = vmatprep.subr.bf16.mxu1 %v6666_v35 }
 0x363   :  { %v1668_v17 = vpop.f32.mrb[48].mxu0  ;;  %v1709_v14 = vpop.f32.mrb[48].mxu1 }
 0x364   :  { %v1716_v12 = vadd.f32 %v1668_v17, %v8120_v19  ;;  %v1718_v30 = vadd.f32 %v1709_v14, %v8121_v13  ;;  %v1670_v10 = vpop.f32.mrb[49].mxu0  ;;  %v1711_v28 = vpop.f32.mrb[49].mxu1 }
 0x365   :  { %v1717_v40 = vadd.f32 %v1670_v10, %v8122_v20  ;;  %v1719_v41 = vadd.f32 %v1711_v28, %v8123_v16  ;;  %v1672_v36 = vpop.f32.mrb[50].mxu0  ;;  %v1713_v42 = vpop.f32.mrb[50].mxu1  ;;  %v8124_v16 = vld [vmem:[#allocation103_spill] sm:$0xff] }
 0x366   :  { %v1807_v43 = vmul.f32 0.5, %v1716_v12  ;;  %v1673_v44 = vpop.f32.mrb[51].mxu0  ;;  %v1714_v45 = vpop.f32.mrb[51].mxu1  ;;  %v8125_v36 = vld [vmem:[#allocation106_spill] sm:$0xff] }
 0x367   :  { %v1811_v46 = vmul.f32 0.5, %v1717_v40  ;;  %v1816_v48 = vmul.f32 0.5, %v1719_v41 }
 0x368   :  { %5187 = vtanh.f32 %v1807_v43 }
 0x369   :  { %5189 = vtanh.f32 %v1811_v46  ;;  %v8126_v46 = vld [vmem:[#allocation105_spill] sm:$0xff] }
 0x36a   :  { %5191 = vtanh.f32 %v1718_v30 }
 0x36b   :  { %5193 = vtanh.f32 %v1816_v48 }
 0x372   :  { %v5188_v49 = vpop.eup %5187 }
 0x373   :  { %v5190_v50 = vpop.eup %5189  ;;  %v1809_v51 = vadd.f32 1.0, %v5188_v49  ;;  %v8127_v49 = vld [vmem:[#allocation107_spill] sm:$0xff] }
 0x374   :  { %v1813_v53 = vadd.f32 1.0, %v5190_v50  ;;  %v5192_v14 = vpop.eup %5191 }
 0x375   :  { %v1810_v17 = vmul.f32 0.5, %v1809_v51  ;;  %v5194_v12 = vpop.eup %5193 }
 0x376   :  { %v1814_v19 = vmul.f32 0.5, %v1813_v53  ;;  %v1818_v20 = vadd.f32 1.0, %v5194_v12 }
 0x377   :  { %v1834_v13 = vmul.f32 %v5192_v14, %v1810_v17 }
 0x378   :  { %v1833_v10 = vmul.f32 %v1814_v19, %v6514_v38  ;;  %v1819_v45 = vmul.f32 0.5, %v1818_v20  ;;  %v6685_v20 = vld [vmem:[#allocation10] ss:$16 sps:$4 sm:$0xff]  }
 0x37a   :  { %v6674_v28 = vadd.f32 %v1834_v13, %v1833_v10 }
 0x37c   :  { %5195 = vtanh.f32 %v6674_v28 }
 0x383   :  { %v1755_v40 = vpop.f32.mrb[52].mxu0  ;;  %v1796_v30 = vpop.f32.mrb[52].mxu1 }
 0x384   :  { %v1803_v41 = vadd.f32 %v1755_v40, %v8124_v16  ;;  %v1805_v42 = vadd.f32 %v1796_v30, %v8125_v36  ;;  %v1757_v43 = vpop.f32.mrb[53].mxu0  ;;  %v1798_v44 = vpop.f32.mrb[53].mxu1  ;;  %v6688_v40 = vld [vmem:[#allocation10 + $0x8] ss:$16 sps:$4 sm:$0xff]   ;;  %v6691_v30 = vld [vmem:[#allocation10 + $0x24] ss:$16 sps:$4 sm:$0xff]  }
 0x385   :  { %v1804_v48 = vadd.f32 %v1757_v43, %v8126_v46  ;;  %v1806_v50 = vadd.f32 %v1798_v44, %v8127_v49  ;;  %v1759_v38 = vpop.f32.mrb[54].mxu0  ;;  %v1800_v51 = vpop.f32.mrb[54].mxu1  ;;  %v6694_v16 = vld [vmem:[#allocation10 + $0x2c] ss:$16 sps:$4 sm:$0xff]   ;;  %v6699_v36 = vld [vmem:[#allocation10 + $0x20] ss:$16 sps:$4 sm:$0xff]  }
 0x386   :  { %v5196_v53 = vpop.eup %5195  ;;  %v1820_v17 = vmul.f32 0.5, %v1803_v41  ;;  %v1760_v14 = vpop.f32.mrb[55].mxu0  ;;  %v6705_v43 = vld [vmem:[#allocation10 + $0x44] ss:$16 sps:$4 sm:$0xff]   ;;  %v6708_v44 = vld [vmem:[#allocation10 + $0x4c] ss:$16 sps:$4 sm:$0xff]  }
 0x387   :  { %v1801_v19 = vpop.f32.mrb[55].mxu1  ;;  %v6681_v13 = vmul.f32 %v5196_v53, %v1819_v45  ;;  %v1824_v10 = vmul.f32 0.5, %v1804_v48  ;;  %v1829_v41 = vmul.f32 0.5, %v1806_v50  ;;  %v6711_v50 = vld [vmem:[#allocation10 + $0x40] ss:$16 sps:$4 sm:$0xff]  }
 0x388   :  { %5197 = vtanh.f32 %v1820_v17  ;;  %v6714_v38 = vld [vmem:[#allocation10 + $0x48] ss:$16 sps:$4 sm:$0xff]   ;;  %v6717_v53 = vld [vmem:[#allocation10 + $0x64] ss:$16 sps:$4 sm:$0xff]   ;;  %v6720_v17 = vld [vmem:[#allocation10 + $0x6c] ss:$16 sps:$4 sm:$0xff]  }
 0x389   :  { %8128 = vst [vmem:[#allocation49_spill] sm:$0xff] %v6681_v13  ;;  %v1853_v12 = vpack.c.bf16 %v6681_v13, %v6681_v13  ;;  %5199 = vtanh.f32 %v1824_v10  ;;  %v6757_v13 = vld [vmem:[#allocation10 + $0xc4] ss:$16 sps:$4 sm:$0xff]  }
 0x38a   :  { %5201 = vtanh.f32 %v1805_v42  ;;  %v6702_v42 = vld [vmem:[#allocation10 + $0x28] ss:$16 sps:$4 sm:$0xff]   ;;  %8133 = vst [vmem:[#allocation56_spill] sm:$0xff] %v6757_v13 }
 0x38b   :  { %1887 = vmatmul.mubr.bf16.vlgmr.msra.gmra.mrb[56].mxu0 %v1853_v12  ;;  %1928 = vmatmul.mubr.bf16.vlgmr.msra.gmra.mrb[56].mxu1 %v1853_v12  ;;  %5203 = vtanh.f32 %v1829_v41  ;;  %v6724_v41 = vld [vmem:[#allocation10 + $0x60] ss:$16 sps:$4 sm:$0xff]  }
 0x38c   :  { %1942 = vmatpush1.bf16.msra.mxu0 %v6685_v20  ;;  %1983 = vmatpush1.bf16.msra.mxu1 %v6688_v40 }
 0x38d   :  { %1943 = vmatprep.subr.bf16.mxu0 %v6691_v30  ;;  %1984 = vmatprep.subr.bf16.mxu1 %v6694_v16 }
 0x38e   :  { %1973 = vmatprep.mubr.bf16.mxu0 %v7988_v63  ;;  %2014 = vmatprep.mubr.bf16.mxu1 %v7988_v63 }
 0x390   :  { %1944 = vmatpush1.bf16.msra.mxu0 %v6699_v36  ;;  %1985 = vmatpush1.bf16.msra.mxu1 %v6702_v42 }
 0x391   :  { %1945 = vmatprep.subr.bf16.mxu0 %v6705_v43  ;;  %1986 = vmatprep.subr.bf16.mxu1 %v6708_v44 }
 0x392   :  { %v5198_v45 = vpop.eup %5197 }
 0x393   :  { %v5200_v46 = vpop.eup %5199  ;;  %v1822_v48 = vadd.f32 1.0, %v5198_v45  ;;  %v6727_v45 = vld [vmem:[#allocation10 + $0x68] ss:$16 sps:$4 sm:$0xff]  }
 0x394   :  { %v1826_v49 = vadd.f32 1.0, %v5200_v46  ;;  %1946 = vmatpush1.bf16.msra.mxu0 %v6711_v50  ;;  %1987 = vmatpush1.bf16.msra.mxu1 %v6714_v38  ;;  %v5202_v14 = vpop.eup %5201  ;;  %v6730_v46 = vld [vmem:[#allocation10 + $0x84] ss:$16 sps:$4 sm:$0xff]  }
 0x395   :  { %v1823_v51 = vmul.f32 0.5, %v1822_v48  ;;  %1947 = vmatprep.subr.bf16.mxu0 %v6717_v53  ;;  %1988 = vmatprep.subr.bf16.mxu1 %v6720_v17  ;;  %v6733_v48 = vld [vmem:[#allocation10 + $0x8c] ss:$16 sps:$4 sm:$0xff]  }
 0x396   :  { %v1827_v19 = vmul.f32 0.5, %v1826_v49 }
 0x397   :  { %v1837_v10 = vmul.f32 %v5202_v14, %v1823_v51  ;;  %v6742_v51 = vld [vmem:[#allocation10 + $0x88] ss:$16 sps:$4 sm:$0xff]   ;;  %v6745_v14 = vld [vmem:[#allocation10 + $0xa4] ss:$16 sps:$4 sm:$0xff]  }
 0x398   :  { %v1836_v12 = vmul.f32 %v1827_v19, %v6544_v47  ;;  %1948 = vmatpush1.bf16.msra.mxu0 %v6724_v41  ;;  %1989 = vmatpush1.bf16.msra.mxu1 %v6727_v45  ;;  %v6739_v47 = vld [vmem:[#allocation10 + $0x80] ss:$16 sps:$4 sm:$0xff]   ;;  %8129 = vst [vmem:[#allocation50_spill] sm:$0xff] %v6745_v14  ;;  %v6748_v19 = vld [vmem:[#allocation10 + $0xac] ss:$16 sps:$4 sm:$0xff]  }
 0x399   :  { %1949 = vmatprep.subr.bf16.mxu0 %v6730_v46  ;;  %1990 = vmatprep.subr.bf16.mxu1 %v6733_v48  ;;  %8130 = vst [vmem:[#allocation51_spill] sm:$0xff] %v6748_v19 }
 0x39a   :  { %v6736_v49 = vadd.f32 %v1837_v10, %v1836_v12  ;;  %v5204_v10 = vpop.eup %5203  ;;  %v6751_v12 = vld [vmem:[#allocation10 + $0xa0] ss:$16 sps:$4 sm:$0xff]  }
 0x39b   :  { %8131 = vst [vmem:[#allocation52_spill] sm:$0xff] %v6751_v12  ;;  %v1831_v52 = vadd.f32 1.0, %v5204_v10  ;;  %v6772_v10 = vld [vmem:[#allocation10 + $0xec] ss:$16 sps:$4 sm:$0xff]  }
 0x39c   :  { %5205 = vtanh.f32 %v6736_v49  ;;  %1950 = vmatpush1.bf16.msra.mxu0 %v6739_v47  ;;  %1991 = vmatpush1.bf16.msra.mxu1 %v6742_v51 }
 0x39d   :  { %1951 = vmatprep.subr.bf16.mxu0 %v6745_v14  ;;  %1992 = vmatprep.subr.bf16.mxu1 %v6748_v19  ;;  %v6766_v19 = vld [vmem:[#allocation10 + $0xc8] ss:$16 sps:$4 sm:$0xff]   ;;  %v6769_v14 = vld [vmem:[#allocation10 + $0xe4] ss:$16 sps:$4 sm:$0xff]  }
 0x3a0   :  { %1952 = vmatpush1.bf16.msra.mxu0 %v6751_v12  ;;  %1993 = vmatpush1.bf16.msra.mxu1 %v6754_v39  ;;  %v1832_v12 = vmul.f32 0.5, %v1831_v52 }
 0x3a1   :  { %1953 = vmatprep.subr.bf16.mxu0 %v6757_v13  ;;  %1994 = vmatprep.subr.bf16.mxu1 %v6760_v9  ;;  %v6777_v9 = vld [vmem:[#allocation10 + $0xe0] ss:$16 sps:$4 sm:$0xff]  }
 0x3a4   :  { %1954 = vmatpush1.bf16.msra.mxu0 %v6763_v31  ;;  %1995 = vmatpush1.bf16.msra.mxu1 %v6766_v19  ;;  %v6780_v31 = vld [vmem:[#allocation10 + $0xe8] ss:$16 sps:$4 sm:$0xff]  }
 0x3a5   :  { %1955 = vmatprep.subr.bf16.mxu0 %v6769_v14  ;;  %1996 = vmatprep.subr.bf16.mxu1 %v6772_v10 }
 0x3a6   :  { %v5206_v13 = vpop.eup %5205 }
 0x3a7   :  { %v6775_v39 = vmul.f32 %v5206_v13, %v1832_v12 }
 0x3a8   :  { %1956 = vmatpush1.bf16.msra.mxu0 %v6777_v9  ;;  %1997 = vmatpush1.bf16.msra.mxu1 %v6780_v31 }
 0x3a9   :  { %8136 = vst [vmem:[#allocation59_spill] sm:$0xff] %v6775_v39  ;;  %v1940_v52 = vpack.c.bf16 %v6775_v39, %v6775_v39  ;;  %2074 = vmatprep.subr.bf16.mxu0 %v6565_v54  ;;  %2115 = vmatprep.subr.bf16.mxu1 %v6568_v55 }
 0x3ab   :  { %1974 = vmatmul.mubr.bf16.vlgmr.msra.gmra.mrb[60].mxu0 %v1940_v52  ;;  %2015 = vmatmul.mubr.bf16.vlgmr.msra.gmra.mrb[60].mxu1 %v1940_v52  ;;  %v8137_v52 = vld [vmem:[#allocation63_spill] sm:$0xff] }
 0x3ac   :  { %2075 = vmatpush1.bf16.msra.mxu0 %v6571_v56  ;;  %2116 = vmatpush1.bf16.msra.mxu1 %v6574_v57 }
 0x3ad   :  { %2076 = vmatprep.subr.bf16.mxu0 %v6577_v0  ;;  %2117 = vmatprep.subr.bf16.mxu1 %v6580_v58 }
 0x3ae   :  { %2106 = vmatprep.mubr.bf16.mxu0 %v7988_v63  ;;  %2147 = vmatprep.mubr.bf16.mxu1 %v7988_v63 }
 0x3b0   :  { %2077 = vmatpush1.bf16.msra.mxu0 %v6585_v59  ;;  %2118 = vmatpush1.bf16.msra.mxu1 %v6588_v60 }
 0x3b1   :  { %2078 = vmatprep.subr.bf16.mxu0 %v6591_v61  ;;  %2119 = vmatprep.subr.bf16.mxu1 %v6594_v62 }
 0x3b4   :  { %2079 = vmatpush1.bf16.msra.mxu0 %v6597_v1  ;;  %2120 = vmatpush1.bf16.msra.mxu1 %v6600_v2 }
 0x3b5   :  { %2080 = vmatprep.subr.bf16.mxu0 %v6603_v3  ;;  %2121 = vmatprep.subr.bf16.mxu1 %v6606_v4 }
 0x3b8   :  { %2081 = vmatpush1.bf16.msra.mxu0 %v6609_v7  ;;  %2122 = vmatpush1.bf16.msra.mxu1 %v6612_v11 }
 0x3b9   :  { %2082 = vmatprep.subr.bf16.mxu0 %v6615_v22  ;;  %2123 = vmatprep.subr.bf16.mxu1 %v6618_v27 }
 0x3bc   :  { %2083 = vmatpush1.bf16.msra.mxu0 %v6621_v33  ;;  %2124 = vmatpush1.bf16.msra.mxu1 %v6624_v29 }
 0x3bd   :  { %2084 = vmatprep.subr.bf16.mxu0 %v6627_v26  ;;  %2125 = vmatprep.subr.bf16.mxu1 %v6630_v37 }
 0x3c0   :  { %2085 = vmatpush1.bf16.msra.mxu0 %v6633_v5  ;;  %2126 = vmatpush1.bf16.msra.mxu1 %v6636_v6  ;;  %v8139_v6 = vld [vmem:[#allocation65_spill] sm:$0xff]  ;;  %v8140_v5 = vld [vmem:[#allocation67_spill] sm:$0xff] }
 0x3c1   :  { %2086 = vmatprep.subr.bf16.mxu0 %v6639_v21  ;;  %2127 = vmatprep.subr.bf16.mxu1 %v6642_v8  ;;  %v8138_v8 = vld [vmem:[#allocation66_spill] sm:$0xff] }
 0x3c4   :  { %2087 = vmatpush1.bf16.msra.mxu0 %v6645_v15  ;;  %2128 = vmatpush1.bf16.msra.mxu1 %v6648_v32 }
 0x3c5   :  { %2088 = vmatprep.subr.bf16.mxu0 %v6651_v23  ;;  %2129 = vmatprep.subr.bf16.mxu1 %v6654_v34 }
 0x3c8   :  { %2089 = vmatpush1.bf16.msra.mxu0 %v6657_v18  ;;  %2130 = vmatpush1.bf16.msra.mxu1 %v6660_v25 }
 0x3c9   :  { %2161 = vmatprep.subr.bf16.mxu0 %v6663_v24  ;;  %2202 = vmatprep.subr.bf16.mxu1 %v6666_v35 }
 0x45e   :  { %v1888_v13 = vpop.f32.mrb[56].mxu0  ;;  %v1929_v12 = vpop.f32.mrb[56].mxu1 }
 0x45f   :  { %v1936_v39 = vadd.f32 %v1888_v13, %v8137_v52  ;;  %v1938_v15 = vadd.f32 %v1929_v12, %v8138_v8  ;;  %v1890_v21 = vpop.f32.mrb[57].mxu0  ;;  %v1931_v32 = vpop.f32.mrb[57].mxu1 }
 0x460   :  { %v1937_v23 = vadd.f32 %v1890_v21, %v8139_v6  ;;  %v1939_v34 = vadd.f32 %v1931_v32, %v8140_v5  ;;  %v1892_v37 = vpop.f32.mrb[58].mxu0  ;;  %v1933_v18 = vpop.f32.mrb[58].mxu1  ;;  %v8142_v32 = vld [vmem:[#allocation100_spill] sm:$0xff] }
 0x461   :  { %v2027_v26 = vmul.f32 0.5, %v1936_v39  ;;  %v1893_v25 = vpop.f32.mrb[59].mxu0  ;;  %v1934_v29 = vpop.f32.mrb[59].mxu1 }
 0x462   :  { %v2031_v24 = vmul.f32 0.5, %v1937_v23  ;;  %v2036_v35 = vmul.f32 0.5, %v1939_v34  ;;  %v8143_v34 = vld [vmem:[#allocation102_spill] sm:$0xff] }
 0x463   :  { %5207 = vtanh.f32 %v2027_v26 }
 0x464   :  { %5209 = vtanh.f32 %v2031_v24 }
 0x465   :  { %5211 = vtanh.f32 %v1938_v15 }
 0x466   :  { %5213 = vtanh.f32 %v2036_v35  ;;  %v8144_v35 = vld [vmem:[#allocation101_spill] sm:$0xff] }
 0x46d   :  { %v5208_v33 = vpop.eup %5207 }
 0x46e   :  { %v5210_v13 = vpop.eup %5209  ;;  %v2029_v52 = vadd.f32 1.0, %v5208_v33 }
 0x46f   :  { %v2033_v8 = vadd.f32 1.0, %v5210_v13  ;;  %v5212_v27 = vpop.eup %5211 }
 0x470   :  { %v2030_v12 = vmul.f32 0.5, %v2029_v52  ;;  %v5214_v39 = vpop.eup %5213 }
 0x471   :  { %v2034_v6 = vmul.f32 0.5, %v2033_v8  ;;  %v2038_v29 = vadd.f32 1.0, %v5214_v39 }
 0x472   :  { %v2054_v21 = vmul.f32 %v5212_v27, %v2030_v12  ;;  %v8145_v27 = vld [vmem:[#allocation104_spill] sm:$0xff] }
 0x473   :  { %v2053_v37 = vmul.f32 %v2034_v6, %v6674_v28  ;;  %v2039_v24 = vmul.f32 0.5, %v2038_v29 }
 0x475   :  { %v6826_v5 = vadd.f32 %v2054_v21, %v2053_v37 }
 0x477   :  { %8141 = vst [vmem:[#allocation108_spill] sm:$0xff] %v6826_v5  ;;  %5215 = vtanh.f32 %v6826_v5 }
 0x47e   :  { %v1975_v26 = vpop.f32.mrb[60].mxu0  ;;  %v2016_v15 = vpop.f32.mrb[60].mxu1 }
 0x47f   :  { %v2023_v23 = vadd.f32 %v1975_v26, %v8142_v32  ;;  %v2025_v33 = vadd.f32 %v2016_v15, %v8143_v34  ;;  %v1977_v18 = vpop.f32.mrb[61].mxu0  ;;  %v2018_v25 = vpop.f32.mrb[61].mxu1 }
 0x480   :  { %v2024_v13 = vadd.f32 %v1977_v18, %v8144_v35  ;;  %v2026_v52 = vadd.f32 %v2018_v25, %v8145_v27  ;;  %v1979_v28 = vpop.f32.mrb[62].mxu0  ;;  %v2020_v8 = vpop.f32.mrb[62].mxu1  ;;  %v8148_v27 = vld [vmem:[#allocation51_spill] sm:$0xff] }
 0x481   :  { %v5216_v12 = vpop.eup %5215  ;;  %v2040_v6 = vmul.f32 0.5, %v2023_v23  ;;  %v1980_v21 = vpop.f32.mrb[63].mxu0  ;;  %v8150_v28 = vld [vmem:[#allocation53_spill] sm:$0xff] }
 0x482   :  { %v2021_v37 = vpop.f32.mrb[63].mxu1  ;;  %v6833_v39 = vmul.f32 %v5216_v12, %v2039_v24  ;;  %v2044_v5 = vmul.f32 0.5, %v2024_v13  ;;  %v2049_v29 = vmul.f32 0.5, %v2026_v52  ;;  %v8147_v13 = vld [vmem:[#allocation50_spill] sm:$0xff]  ;;  %v8149_v52 = vld [vmem:[#allocation52_spill] sm:$0xff]  ;;  %v8153_v21 = vld [vmem:[#allocation57_spill] sm:$0xff] }
 0x483   :  { %5217 = vtanh.f32 %v2040_v6  ;;  %v8151_v12 = vld [vmem:[#allocation56_spill] sm:$0xff]  ;;  %v8152_v6 = vld [vmem:[#allocation58_spill] sm:$0xff] }
 0x484   :  { %8146 = vst [vmem:[#allocation110_spill] sm:$0xff] %v6833_v39  ;;  %v2073_v26 = vpack.c.bf16 %v6833_v39, %v6833_v39  ;;  %5219 = vtanh.f32 %v2044_v5  ;;  %v8169_v39 = vld [vmem:[#allocation46_spill] sm:$0xff] }
 0x485   :  { %5221 = vtanh.f32 %v2025_v33 }
 0x486   :  { %2107 = vmatmul.mubr.bf16.vlgmr.msra.gmra.mrb[64].mxu0 %v2073_v26  ;;  %2148 = vmatmul.mubr.bf16.vlgmr.msra.gmra.mrb[64].mxu1 %v2073_v26  ;;  %5223 = vtanh.f32 %v2049_v29 }
 0x487   :  { %2162 = vmatpush1.bf16.msra.mxu0 %v6685_v20  ;;  %2203 = vmatpush1.bf16.msra.mxu1 %v6688_v40 }
 0x488   :  { %2163 = vmatprep.subr.bf16.mxu0 %v6691_v30  ;;  %2204 = vmatprep.subr.bf16.mxu1 %v6694_v16 }
 0x489   :  { %2193 = vmatprep.mubr.bf16.mxu0 %v7988_v63  ;;  %2234 = vmatprep.mubr.bf16.mxu1 %v7988_v63 }
 0x48b   :  { %2164 = vmatpush1.bf16.msra.mxu0 %v6699_v36  ;;  %2205 = vmatpush1.bf16.msra.mxu1 %v6702_v42 }
 0x48c   :  { %2165 = vmatprep.subr.bf16.mxu0 %v6705_v43  ;;  %2206 = vmatprep.subr.bf16.mxu1 %v6708_v44 }
 0x48d   :  { %v5218_v5 = vpop.eup %5217 }
 0x48e   :  { %v5220_v15 = vpop.eup %5219  ;;  %v2042_v32 = vadd.f32 1.0, %v5218_v5 }
 0x48f   :  { %v2046_v23 = vadd.f32 1.0, %v5220_v15  ;;  %2166 = vmatpush1.bf16.msra.mxu0 %v6711_v50  ;;  %2207 = vmatpush1.bf16.msra.mxu1 %v6714_v38  ;;  %v5222_v33 = vpop.eup %5221  ;;  %v8155_v15 = vld [vmem:[#allocation32_spill] sm:$0xff] }
 0x490   :  { %v2043_v34 = vmul.f32 0.5, %v2042_v32  ;;  %2167 = vmatprep.subr.bf16.mxu0 %v6717_v53  ;;  %2208 = vmatprep.subr.bf16.mxu1 %v6720_v17  ;;  %v8156_v32 = vld [vmem:[#allocation33_spill] sm:$0xff] }
 0x491   :  { %v2047_v18 = vmul.f32 0.5, %v2046_v23  ;;  %v8157_v23 = vld [vmem:[#allocation34_spill] sm:$0xff] }
 0x492   :  { %v2057_v25 = vmul.f32 %v5222_v33, %v2043_v34  ;;  %v8158_v34 = vld [vmem:[#allocation35_spill] sm:$0xff]  ;;  %v8159_v33 = vld [vmem:[#allocation36_spill] sm:$0xff] }
 0x493   :  { %v2056_v24 = vmul.f32 %v2047_v18, %v6736_v49  ;;  %2168 = vmatpush1.bf16.msra.mxu0 %v6724_v41  ;;  %2209 = vmatpush1.bf16.msra.mxu1 %v6727_v45  ;;  %v5224_v49 = vpop.eup %5223  ;;  %v8160_v18 = vld [vmem:[#allocation37_spill] sm:$0xff] }
 0x494   :  { %2169 = vmatprep.subr.bf16.mxu0 %v6730_v46  ;;  %2210 = vmatprep.subr.bf16.mxu1 %v6733_v48  ;;  %v2051_v8 = vadd.f32 1.0, %v5224_v49  ;;  %v8163_v49 = vld [vmem:[#allocation40_spill] sm:$0xff] }
 0x495   :  { %v6856_v35 = vadd.f32 %v2057_v25, %v2056_v24  ;;  %v8161_v25 = vld [vmem:[#allocation38_spill] sm:$0xff]  ;;  %v8162_v24 = vld [vmem:[#allocation39_spill] sm:$0xff] }
 0x496   :  { %v2052_v37 = vmul.f32 0.5, %v2051_v8  ;;  %v8164_v8 = vld [vmem:[#allocation41_spill] sm:$0xff] }
 0x497   :  { %5225 = vtanh.f32 %v6856_v35  ;;  %2170 = vmatpush1.bf16.msra.mxu0 %v6739_v47  ;;  %2211 = vmatpush1.bf16.msra.mxu1 %v6742_v51 }
 0x498   :  { %2171 = vmatprep.subr.bf16.mxu0 %v8147_v13  ;;  %2212 = vmatprep.subr.bf16.mxu1 %v8148_v27 }
 0x49b   :  { %2172 = vmatpush1.bf16.msra.mxu0 %v8149_v52  ;;  %2213 = vmatpush1.bf16.msra.mxu1 %v8150_v28 }
 0x49c   :  { %2173 = vmatprep.subr.bf16.mxu0 %v8151_v12  ;;  %2214 = vmatprep.subr.bf16.mxu1 %v8152_v6 }
 0x49f   :  { %2174 = vmatpush1.bf16.msra.mxu0 %v8153_v21  ;;  %2215 = vmatpush1.bf16.msra.mxu1 %v6766_v19 }
 0x4a0   :  { %2175 = vmatprep.subr.bf16.mxu0 %v6769_v14  ;;  %2216 = vmatprep.subr.bf16.mxu1 %v6772_v10 }
 0x4a1   :  { %v5226_v26 = vpop.eup %5225 }
 0x4a2   :  { %v6871_v29 = vmul.f32 %v5226_v26, %v2052_v37  ;;  %v8165_v37 = vld [vmem:[#allocation42_spill] sm:$0xff]  ;;  %v8166_v26 = vld [vmem:[#allocation43_spill] sm:$0xff] }
 0x4a3   :  { %2176 = vmatpush1.bf16.msra.mxu0 %v6777_v9  ;;  %2217 = vmatpush1.bf16.msra.mxu1 %v6780_v31 }
 0x4a4   :  { %8154 = vst [vmem:[#allocation109_spill] sm:$0xff] %v6871_v29  ;;  %v2160_v5 = vpack.c.bf16 %v6871_v29, %v6871_v29  ;;  %2294 = vmatprep.subr.bf16.mxu0 %v6565_v54  ;;  %2335 = vmatprep.subr.bf16.mxu1 %v6568_v55  ;;  %v8168_v29 = vld [vmem:[#allocation45_spill] sm:$0xff] }
 0x4a6   :  { %2194 = vmatmul.mubr.bf16.vlgmr.msra.gmra.mrb[68].mxu0 %v2160_v5  ;;  %2235 = vmatmul.mubr.bf16.vlgmr.msra.gmra.mrb[68].mxu1 %v2160_v5  ;;  %v8167_v5 = vld [vmem:[#allocation44_spill] sm:$0xff] }
 0x4a7   :  { %2295 = vmatpush1.bf16.msra.mxu0 %v6571_v56  ;;  %2336 = vmatpush1.bf16.msra.mxu1 %v6574_v57 }
 0x4a8   :  { %2296 = vmatprep.subr.bf16.mxu0 %v6577_v0  ;;  %2337 = vmatprep.subr.bf16.mxu1 %v6580_v58 }
 0x4a9   :  { %2326 = vmatprep.mubr.bf16.mxu0 %v7988_v63  ;;  %2367 = vmatprep.mubr.bf16.mxu1 %v7988_v63 }
 0x4ab   :  { %2297 = vmatpush1.bf16.msra.mxu0 %v6585_v59  ;;  %2338 = vmatpush1.bf16.msra.mxu1 %v6588_v60 }
 0x4ac   :  { %2298 = vmatprep.subr.bf16.mxu0 %v6591_v61  ;;  %2339 = vmatprep.subr.bf16.mxu1 %v6594_v62 }
 0x4af   :  { %2299 = vmatpush1.bf16.msra.mxu0 %v6597_v1  ;;  %2340 = vmatpush1.bf16.msra.mxu1 %v6600_v2 }
 0x4b0   :  { %2300 = vmatprep.subr.bf16.mxu0 %v6603_v3  ;;  %2341 = vmatprep.subr.bf16.mxu1 %v6606_v4 }
 0x4b3   :  { %2301 = vmatpush1.bf16.msra.mxu0 %v6609_v7  ;;  %2342 = vmatpush1.bf16.msra.mxu1 %v6612_v11 }
 0x4b4   :  { %2302 = vmatprep.subr.bf16.mxu0 %v6615_v22  ;;  %2343 = vmatprep.subr.bf16.mxu1 %v8155_v15  ;;  %v8174_v15 = vld [vmem:[#allocation69_spill] sm:$0xff]  ;;  %v8175_v22 = vld [vmem:[#allocation72_spill] sm:$0xff] }
 0x4b7   :  { %2303 = vmatpush1.bf16.msra.mxu0 %v8156_v32  ;;  %2344 = vmatpush1.bf16.msra.mxu1 %v8157_v23  ;;  %v8173_v23 = vld [vmem:[#allocation70_spill] sm:$0xff] }
 0x4b8   :  { %2304 = vmatprep.subr.bf16.mxu0 %v8158_v34  ;;  %2345 = vmatprep.subr.bf16.mxu1 %v8159_v33  ;;  %v8170_v33 = vld [vmem:[#allocation47_spill] sm:$0xff]  ;;  %v8172_v34 = vld [vmem:[#allocation68_spill] sm:$0xff] }
 0x4bb   :  { %2305 = vmatpush1.bf16.msra.mxu0 %v8160_v18  ;;  %2346 = vmatpush1.bf16.msra.mxu1 %v8161_v25  ;;  %v8171_v18 = vld [vmem:[#allocation48_spill] sm:$0xff] }
 0x4bc   :  { %2306 = vmatprep.subr.bf16.mxu0 %v8162_v24  ;;  %2347 = vmatprep.subr.bf16.mxu1 %v8163_v49 }
 0x4bf   :  { %2307 = vmatpush1.bf16.msra.mxu0 %v8164_v8  ;;  %2348 = vmatpush1.bf16.msra.mxu1 %v8165_v37 }
 0x4c0   :  { %2308 = vmatprep.subr.bf16.mxu0 %v8166_v26  ;;  %2349 = vmatprep.subr.bf16.mxu1 %v8167_v5 }
 0x4c3   :  { %2309 = vmatpush1.bf16.msra.mxu0 %v8168_v29  ;;  %2350 = vmatpush1.bf16.msra.mxu1 %v8169_v39 }
 0x4c4   :  { %2381 = vmatprep.subr.bf16.mxu0 %v8170_v33  ;;  %2422 = vmatprep.subr.bf16.mxu1 %v8171_v18 }
 0x559   :  { %v2108_v25 = vpop.f32.mrb[64].mxu0  ;;  %v2149_v24 = vpop.f32.mrb[64].mxu1 }
 0x55a   :  { %v2156_v49 = vadd.f32 %v2108_v25, %v8172_v34  ;;  %v2158_v8 = vadd.f32 %v2149_v24, %v8173_v23  ;;  %v2110_v32 = vpop.f32.mrb[65].mxu0  ;;  %v2151_v37 = vpop.f32.mrb[65].mxu1 }
 0x55b   :  { %v2157_v26 = vadd.f32 %v2110_v32, %v8174_v15  ;;  %v2159_v5 = vadd.f32 %v2151_v37, %v8175_v22  ;;  %v2112_v11 = vpop.f32.mrb[66].mxu0  ;;  %v2153_v29 = vpop.f32.mrb[66].mxu1  ;;  %v8176_v22 = vld [vmem:[#allocation108_spill] sm:$0xff]  ;;  %v8179_v37 = vld [vmem:[#allocation98_spill] sm:$0xff] }
 0x55c   :  { %v2247_v7 = vmul.f32 0.5, %v2156_v49  ;;  %v2113_v39 = vpop.f32.mrb[67].mxu0  ;;  %v2154_v4 = vpop.f32.mrb[67].mxu1  ;;  %v8178_v49 = vld [vmem:[#allocation95_spill] sm:$0xff] }
 0x55d   :  { %v2251_v33 = vmul.f32 0.5, %v2157_v26  ;;  %v2256_v18 = vmul.f32 0.5, %v2159_v5 }
 0x55e   :  { %5227 = vtanh.f32 %v2247_v7 }
 0x55f   :  { %5229 = vtanh.f32 %v2251_v33 }
 0x560   :  { %5231 = vtanh.f32 %v2158_v8 }
 0x561   :  { %5233 = vtanh.f32 %v2256_v18 }
 0x568   :  { %v5228_v3 = vpop.eup %5227 }
 0x569   :  { %v5230_v34 = vpop.eup %5229  ;;  %v2249_v25 = vadd.f32 1.0, %v5228_v3 }
 0x56a   :  { %v2253_v23 = vadd.f32 1.0, %v5230_v34  ;;  %v5232_v2 = vpop.eup %5231  ;;  %v8180_v34 = vld [vmem:[#allocation97_spill] sm:$0xff] }
 0x56b   :  { %v2250_v24 = vmul.f32 0.5, %v2249_v25  ;;  %v5234_v4 = vpop.eup %5233 }
 0x56c   :  { %v2254_v15 = vmul.f32 0.5, %v2253_v23  ;;  %v2258_v7 = vadd.f32 1.0, %v5234_v4 }
 0x56d   :  { %v2274_v32 = vmul.f32 %v5232_v2, %v2250_v24  ;;  %v8181_v2 = vld [vmem:[#allocation99_spill] sm:$0xff] }
 0x56e   :  { %v2273_v11 = vmul.f32 %v2254_v15, %v8176_v22  ;;  %v2259_v5 = vmul.f32 0.5, %v2258_v7 }
 0x570   :  { %v6918_v29 = vadd.f32 %v2274_v32, %v2273_v11 }
 0x572   :  { %8177 = vst [vmem:[#allocation111_spill] sm:$0xff] %v6918_v29  ;;  %5235 = vtanh.f32 %v6918_v29 }
 0x579   :  { %v2195_v39 = vpop.f32.mrb[68].mxu0  ;;  %v2236_v33 = vpop.f32.mrb[68].mxu1 }
 0x57a   :  { %v2243_v8 = vadd.f32 %v2195_v39, %v8178_v49  ;;  %v2245_v3 = vadd.f32 %v2236_v33, %v8179_v37  ;;  %v2197_v26 = vpop.f32.mrb[69].mxu0  ;;  %v2238_v18 = vpop.f32.mrb[69].mxu1 }
 0x57b   :  { %v2244_v25 = vadd.f32 %v2197_v26, %v8180_v34  ;;  %v2246_v23 = vadd.f32 %v2238_v18, %v8181_v2  ;;  %v2199_v24 = vpop.f32.mrb[70].mxu0  ;;  %v2240_v15 = vpop.f32.mrb[70].mxu1 }
 0x57c   :  { %v5236_v32 = vpop.eup %5235  ;;  %v2260_v22 = vmul.f32 0.5, %v2243_v8  ;;  %v2200_v11 = vpop.f32.mrb[71].mxu0  ;;  %v8188_v15 = vld [vmem:[#allocation31_spill] sm:$0xff] }
 0x57d   :  { %v2241_v29 = vpop.f32.mrb[71].mxu1  ;;  %v6925_v4 = vmul.f32 %v5236_v32, %v2259_v5  ;;  %v2264_v1 = vmul.f32 0.5, %v2244_v25  ;;  %v8193_v32 = vld [vmem:[#allocation36_spill] sm:$0xff]  ;;  %v8195_v11 = vld [vmem:[#allocation38_spill] sm:$0xff] }
 0x57e   :  { %5237 = vtanh.f32 %v2260_v22  ;;  %v2269_v29 = vmul.f32 0.5, %v2246_v23  ;;  %v8194_v22 = vld [vmem:[#allocation37_spill] sm:$0xff] }
 0x57f   :  { %v2293_v39 = vpack.c.bf16 %v6925_v4, %v6925_v4  ;;  %5239 = vtanh.f32 %v2264_v1 }
 0x580   :  { %5241 = vtanh.f32 %v2245_v3 }
 0x581   :  { %2327 = vmatmul.mubr.bf16.vlgmr.msra.gmra.mrb[72].mxu0 %v2293_v39  ;;  %2368 = vmatmul.mubr.bf16.vlgmr.msra.gmra.mrb[72].mxu1 %v2293_v39  ;;  %5243 = vtanh.f32 %v2269_v29  ;;  %v8196_v39 = vld [vmem:[#allocation39_spill] sm:$0xff]  ;;  %v8197_v29 = vld [vmem:[#allocation40_spill] sm:$0xff] }
 0x582   :  { %2382 = vmatpush1.bf16.msra.mxu0 %v6685_v20  ;;  %2423 = vmatpush1.bf16.msra.mxu1 %v6688_v40 }
 0x583   :  { %2383 = vmatprep.subr.bf16.mxu0 %v6691_v30  ;;  %2424 = vmatprep.subr.bf16.mxu1 %v6694_v16 }
 0x584   :  { %2413 = vmatprep.mubr.bf16.mxu0 %v7988_v63  ;;  %2454 = vmatprep.mubr.bf16.mxu1 %v7988_v63 }
 0x586   :  { %2384 = vmatpush1.bf16.msra.mxu0 %v6699_v36  ;;  %2425 = vmatpush1.bf16.msra.mxu1 %v6702_v42 }
 0x587   :  { %2385 = vmatprep.subr.bf16.mxu0 %v6705_v43  ;;  %2426 = vmatprep.subr.bf16.mxu1 %v6708_v44 }
 0x588   :  { %v5238_v1 = vpop.eup %5237 }
 0x589   :  { %v5240_v7 = vpop.eup %5239  ;;  %v2262_v33 = vadd.f32 1.0, %v5238_v1  ;;  %v8198_v1 = vld [vmem:[#allocation41_spill] sm:$0xff] }
 0x58a   :  { %v2266_v49 = vadd.f32 1.0, %v5240_v7  ;;  %2386 = vmatpush1.bf16.msra.mxu0 %v6711_v50  ;;  %2427 = vmatpush1.bf16.msra.mxu1 %v6714_v38  ;;  %v5242_v37 = vpop.eup %5241  ;;  %v8199_v7 = vld [vmem:[#allocation42_spill] sm:$0xff] }
 0x58b   :  { %v2263_v8 = vmul.f32 0.5, %v2262_v33  ;;  %2387 = vmatprep.subr.bf16.mxu0 %v6717_v53  ;;  %2428 = vmatprep.subr.bf16.mxu1 %v6720_v17  ;;  %v8200_v33 = vld [vmem:[#allocation43_spill] sm:$0xff] }
 0x58c   :  { %v2267_v3 = vmul.f32 0.5, %v2266_v49  ;;  %v8201_v49 = vld [vmem:[#allocation44_spill] sm:$0xff] }
 0x58d   :  { %v2277_v26 = vmul.f32 %v5242_v37, %v2263_v8  ;;  %v8202_v8 = vld [vmem:[#allocation45_spill] sm:$0xff]  ;;  %v8203_v37 = vld [vmem:[#allocation46_spill] sm:$0xff] }
 0x58e   :  { %v2276_v18 = vmul.f32 %v2267_v3, %v6856_v35  ;;  %2388 = vmatpush1.bf16.msra.mxu0 %v6724_v41  ;;  %2429 = vmatpush1.bf16.msra.mxu1 %v6727_v45  ;;  %v5244_v35 = vpop.eup %5243  ;;  %v8204_v3 = vld [vmem:[#allocation47_spill] sm:$0xff] }
 0x58f   :  { %2389 = vmatprep.subr.bf16.mxu0 %v6730_v46  ;;  %2430 = vmatprep.subr.bf16.mxu1 %v6733_v48  ;;  %v2271_v34 = vadd.f32 1.0, %v5244_v35 }
 0x590   :  { %v6948_v5 = vadd.f32 %v2277_v26, %v2276_v18  ;;  %v8205_v26 = vld [vmem:[#allocation48_spill] sm:$0xff] }
 0x591   :  { %v2272_v25 = vmul.f32 0.5, %v2271_v34  ;;  %v8206_v34 = vld [vmem:[#allocation71_spill] sm:$0xff] }
 0x592   :  { %5245 = vtanh.f32 %v6948_v5  ;;  %2390 = vmatpush1.bf16.msra.mxu0 %v6739_v47  ;;  %2431 = vmatpush1.bf16.msra.mxu1 %v6742_v51 }
 0x593   :  { %2391 = vmatprep.subr.bf16.mxu0 %v8147_v13  ;;  %2432 = vmatprep.subr.bf16.mxu1 %v8148_v27 }
 0x596   :  { %2392 = vmatpush1.bf16.msra.mxu0 %v8149_v52  ;;  %2433 = vmatpush1.bf16.msra.mxu1 %v8150_v28 }
 0x597   :  { %2393 = vmatprep.subr.bf16.mxu0 %v8151_v12  ;;  %2434 = vmatprep.subr.bf16.mxu1 %v8152_v6 }
 0x59a   :  { %2394 = vmatpush1.bf16.msra.mxu0 %v8153_v21  ;;  %2435 = vmatpush1.bf16.msra.mxu1 %v6766_v19 }
 0x59b   :  { %2395 = vmatprep.subr.bf16.mxu0 %v6769_v14  ;;  %2436 = vmatprep.subr.bf16.mxu1 %v6772_v10 }
 0x59c   :  { %v5246_v2 = vpop.eup %5245 }
 0x59d   :  { %v6963_v23 = vmul.f32 %v5246_v2, %v2272_v25  ;;  %v8207_v2 = vld [vmem:[#allocation74_spill] sm:$0xff] }
 0x59e   :  { %2396 = vmatpush1.bf16.msra.mxu0 %v6777_v9  ;;  %2437 = vmatpush1.bf16.msra.mxu1 %v6780_v31 }
 0x59f   :  { %v2380_v24 = vpack.c.bf16 %v6963_v23, %v6963_v23  ;;  %2514 = vmatprep.subr.bf16.mxu0 %v6565_v54  ;;  %2555 = vmatprep.subr.bf16.mxu1 %v6568_v55  ;;  %v8182_v54 = vld [vmem:[#allocation25_spill] sm:$0xff]  ;;  %v8183_v55 = vld [vmem:[#allocation26_spill] sm:$0xff] }
 0x5a1   :  { %2414 = vmatmul.mubr.bf16.vlgmr.msra.gmra.mrb[76].mxu0 %v2380_v24  ;;  %2455 = vmatmul.mubr.bf16.vlgmr.msra.gmra.mrb[76].mxu1 %v2380_v24 }
 0x5a2   :  { %2515 = vmatpush1.bf16.msra.mxu0 %v6571_v56  ;;  %2556 = vmatpush1.bf16.msra.mxu1 %v6574_v57  ;;  %v8184_v56 = vld [vmem:[#allocation27_spill] sm:$0xff]  ;;  %v8185_v57 = vld [vmem:[#allocation28_spill] sm:$0xff] }
 0x5a3   :  { %2516 = vmatprep.subr.bf16.mxu0 %v6577_v0  ;;  %2557 = vmatprep.subr.bf16.mxu1 %v6580_v58  ;;  %v8186_v0 = vld [vmem:[#allocation29_spill] sm:$0xff]  ;;  %v8187_v58 = vld [vmem:[#allocation30_spill] sm:$0xff] }
 0x5a4   :  { %2546 = vmatprep.mubr.bf16.mxu0 %v7988_v63  ;;  %2587 = vmatprep.mubr.bf16.mxu1 %v7988_v63 }
 0x5a6   :  { %2517 = vmatpush1.bf16.msra.mxu0 %v6585_v59  ;;  %2558 = vmatpush1.bf16.msra.mxu1 %v6588_v60  ;;  %v8189_v59 = vld [vmem:[#allocation32_spill] sm:$0xff]  ;;  %v8190_v60 = vld [vmem:[#allocation33_spill] sm:$0xff] }
 0x5a7   :  { %2518 = vmatprep.subr.bf16.mxu0 %v6591_v61  ;;  %2559 = vmatprep.subr.bf16.mxu1 %v6594_v62  ;;  %v8191_v61 = vld [vmem:[#allocation34_spill] sm:$0xff]  ;;  %v8192_v62 = vld [vmem:[#allocation35_spill] sm:$0xff] }
 0x5aa   :  { %2519 = vmatpush1.bf16.msra.mxu0 %v8182_v54  ;;  %2560 = vmatpush1.bf16.msra.mxu1 %v8183_v55 }
 0x5ab   :  { %2520 = vmatprep.subr.bf16.mxu0 %v8184_v56  ;;  %2561 = vmatprep.subr.bf16.mxu1 %v8185_v57  ;;  %v8208_v56 = vld [vmem:[#allocation73_spill] sm:$0xff] }
 0x5ae   :  { %2521 = vmatpush1.bf16.msra.mxu0 %v8186_v0  ;;  %2562 = vmatpush1.bf16.msra.mxu1 %v8187_v58  ;;  %v8209_v0 = vld [vmem:[#allocation75_spill] sm:$0xff] }
 0x5af   :  { %2522 = vmatprep.subr.bf16.mxu0 %v8188_v15  ;;  %2563 = vmatprep.subr.bf16.mxu1 %v8189_v59 }
 0x5b2   :  { %2523 = vmatpush1.bf16.msra.mxu0 %v8190_v60  ;;  %2564 = vmatpush1.bf16.msra.mxu1 %v8191_v61 }
 0x5b3   :  { %2524 = vmatprep.subr.bf16.mxu0 %v8192_v62  ;;  %2565 = vmatprep.subr.bf16.mxu1 %v8193_v32 }
 0x5b6   :  { %2525 = vmatpush1.bf16.msra.mxu0 %v8194_v22  ;;  %2566 = vmatpush1.bf16.msra.mxu1 %v8195_v11 }
 0x5b7   :  { %2526 = vmatprep.subr.bf16.mxu0 %v8196_v39  ;;  %2567 = vmatprep.subr.bf16.mxu1 %v8197_v29 }
 0x5ba   :  { %2527 = vmatpush1.bf16.msra.mxu0 %v8198_v1  ;;  %2568 = vmatpush1.bf16.msra.mxu1 %v8199_v7 }
 0x5bb   :  { %2528 = vmatprep.subr.bf16.mxu0 %v8200_v33  ;;  %2569 = vmatprep.subr.bf16.mxu1 %v8201_v49 }
 0x5be   :  { %2529 = vmatpush1.bf16.msra.mxu0 %v8202_v8  ;;  %2570 = vmatpush1.bf16.msra.mxu1 %v8203_v37  ;;  %v8210_v37 = vld [vmem:[#allocation111_spill] sm:$0xff] }
 0x5bf   :  { %2601 = vmatprep.subr.bf16.mxu0 %v8204_v3  ;;  %2642 = vmatprep.subr.bf16.mxu1 %v8205_v26 }
 0x654   :  { %v2328_v18 = vpop.f32.mrb[72].mxu0  ;;  %v2369_v35 = vpop.f32.mrb[72].mxu1 }
 0x655   :  { %v2376_v25 = vadd.f32 %v2328_v18, %v8206_v34  ;;  %v2378_v24 = vadd.f32 %v2369_v35, %v8207_v2  ;;  %v2330_v54 = vpop.f32.mrb[73].mxu0  ;;  %v2371_v55 = vpop.f32.mrb[73].mxu1  ;;  %v8211_v2 = vld [vmem:[#allocation92_spill] sm:$0xff] }
 0x656   :  { %v2377_v57 = vadd.f32 %v2330_v54, %v8208_v56  ;;  %v2379_v58 = vadd.f32 %v2371_v55, %v8209_v0  ;;  %v2332_v15 = vpop.f32.mrb[74].mxu0  ;;  %v2373_v59 = vpop.f32.mrb[74].mxu1  ;;  %v8212_v54 = vld [vmem:[#allocation94_spill] sm:$0xff] }
 0x657   :  { %v2467_v60 = vmul.f32 0.5, %v2376_v25  ;;  %v2333_v61 = vpop.f32.mrb[75].mxu0  ;;  %v2374_v62 = vpop.f32.mrb[75].mxu1  ;;  %v8214_v59 = vld [vmem:[#allocation96_spill] sm:$0xff] }
 0x658   :  { %v2471_v32 = vmul.f32 0.5, %v2377_v57  ;;  %v2476_v22 = vmul.f32 0.5, %v2379_v58  ;;  %v8213_v58 = vld [vmem:[#allocation93_spill] sm:$0xff] }
 0x659   :  { %5247 = vtanh.f32 %v2467_v60 }
 0x65a   :  { %5249 = vtanh.f32 %v2471_v32 }
 0x65b   :  { %5251 = vtanh.f32 %v2378_v24 }
 0x65c   :  { %5253 = vtanh.f32 %v2476_v22 }
 0x663   :  { %v5248_v11 = vpop.eup %5247 }
 0x664   :  { %v5250_v39 = vpop.eup %5249  ;;  %v2469_v29 = vadd.f32 1.0, %v5248_v11 }
 0x665   :  { %v2473_v1 = vadd.f32 1.0, %v5250_v39  ;;  %v5252_v33 = vpop.eup %5251 }
 0x666   :  { %v2470_v7 = vmul.f32 0.5, %v2469_v29  ;;  %v5254_v18 = vpop.eup %5253 }
 0x667   :  { %v2474_v49 = vmul.f32 0.5, %v2473_v1  ;;  %v2478_v35 = vadd.f32 1.0, %v5254_v18  ;;  %v5390_v18 = vld [vmem:[#allocation8 + $0x88] ss:$16 sps:$4 sm:$0xff]  }
 0x668   :  { %v2494_v8 = vmul.f32 %v5252_v33, %v2470_v7 }
 0x669   :  { %v2493_v3 = vmul.f32 %v2474_v49, %v8210_v37  ;;  %v2479_v0 = vmul.f32 0.5, %v2478_v35  ;;  %v5388_v37 = vld [vmem:[#allocation8 + $0x8c] ss:$16 sps:$4 sm:$0xff]   ;;  %v5391_v35 = vld [vmem:[#allocation8 + $0xa4] ss:$16 sps:$4 sm:$0xff]  }
 0x66b   :  { %v7010_v26 = vadd.f32 %v2494_v8, %v2493_v3  ;;  %v5389_v3 = vld [vmem:[#allocation8 + $0x80] ss:$16 sps:$4 sm:$0xff]  }
 0x66d   :  { %5255 = vtanh.f32 %v7010_v26 }
 0x674   :  { %v2415_v34 = vpop.f32.mrb[76].mxu0  ;;  %v2456_v25 = vpop.f32.mrb[76].mxu1 }
 0x675   :  { %v2463_v24 = vadd.f32 %v2415_v34, %v8211_v2  ;;  %v2465_v55 = vadd.f32 %v2456_v25, %v8212_v54  ;;  %v2417_v56 = vpop.f32.mrb[77].mxu0  ;;  %v2458_v57 = vpop.f32.mrb[77].mxu1  ;;  %v5392_v34 = vld [vmem:[#allocation8 + $0xac] ss:$16 sps:$4 sm:$0xff]   ;;  %v5393_v25 = vld [vmem:[#allocation8 + $0xa0] ss:$16 sps:$4 sm:$0xff]  }
 0x676   :  { %v2464_v15 = vadd.f32 %v2417_v56, %v8213_v58  ;;  %v2466_v60 = vadd.f32 %v2458_v57, %v8214_v59  ;;  %v2419_v61 = vpop.f32.mrb[78].mxu0  ;;  %v2460_v62 = vpop.f32.mrb[78].mxu1  ;;  %v5394_v2 = vld [vmem:[#allocation8 + $0xa8] ss:$16 sps:$4 sm:$0xff]   ;;  %v5396_v54 = vld [vmem:[#allocation8 + $0xcc] ss:$16 sps:$4 sm:$0xff]  }
 0x677   :  { %v5256_v32 = vpop.eup %5255  ;;  %v2480_v22 = vmul.f32 0.5, %v2463_v24  ;;  %v2420_v11 = vpop.f32.mrb[79].mxu0  ;;  %v5395_v24 = vld [vmem:[#allocation8 + $0xc4] ss:$16 sps:$4 sm:$0xff]   ;;  %v5398_v56 = vld [vmem:[#allocation8 + $0xc8] ss:$16 sps:$4 sm:$0xff]  }
 0x678   :  { %v2461_v39 = vpop.f32.mrb[79].mxu1  ;;  %v7017_v29 = vmul.f32 %v5256_v32, %v2479_v0  ;;  %v2484_v1 = vmul.f32 0.5, %v2464_v15  ;;  %v2489_v33 = vmul.f32 0.5, %v2466_v60  ;;  %v5399_v57 = vld [vmem:[#allocation8 + $0xe4] ss:$16 sps:$4 sm:$0xff]   ;;  %v8215_v32 = vld [vmem:[#allocation76_spill] sm:$0xff] }
 0x679   :  { %5257 = vtanh.f32 %v2480_v22  ;;  %v5400_v0 = vld [vmem:[#allocation8 + $0xec] ss:$16 sps:$4 sm:$0xff]   ;;  %v5401_v58 = vld [vmem:[#allocation8 + $0xe0] ss:$16 sps:$4 sm:$0xff]   ;;  %v5402_v15 = vld [vmem:[#allocation8 + $0xe8] ss:$16 sps:$4 sm:$0xff]  }
 0x67a   :  { %v2513_v7 = vpack.c.bf16 %v7017_v29, %v7017_v29  ;;  %5259 = vtanh.f32 %v2484_v1  ;;  %v5403_v59 = vld [vmem:[#allocation10 + $0x4] ss:$16 sps:$4 sm:$0xff]   ;;  %v5404_v60 = vld [vmem:[#allocation10 + $0xc] ss:$16 sps:$4 sm:$0xff]  }
 0x67b   :  { %5261 = vtanh.f32 %v2465_v55  ;;  %v5397_v55 = vld [vmem:[#allocation8 + $0xc0] ss:$16 sps:$4 sm:$0xff]   ;;  %v8216_v11 = vld [vmem:[#allocation78_spill] sm:$0xff] }
 0x67c   :  { %2547 = vmatmul.mubr.bf16.vlgmr.msra.gmra.mrb[80].mxu0 %v2513_v7  ;;  %2588 = vmatmul.mubr.bf16.vlgmr.msra.gmra.mrb[80].mxu1 %v2513_v7  ;;  %5263 = vtanh.f32 %v2489_v33  ;;  %v8217_v33 = vld [vmem:[#allocation77_spill] sm:$0xff] }
 0x67d   :  { %2602 = vmatpush1.bf16.msra.mxu0 %v6685_v20  ;;  %2643 = vmatpush1.bf16.msra.mxu1 %v6688_v40 }
 0x67e   :  { %2603 = vmatprep.subr.bf16.mxu0 %v6691_v30  ;;  %2644 = vmatprep.subr.bf16.mxu1 %v6694_v16 }
 0x67f   :  { %2633 = vmatprep.mubr.bf16.mxu0 %v7988_v63  ;;  %2674 = vmatprep.mubr.bf16.mxu1 %v7988_v63 }
 0x681   :  { %2604 = vmatpush1.bf16.msra.mxu0 %v6699_v36  ;;  %2645 = vmatpush1.bf16.msra.mxu1 %v6702_v42 }
 0x682   :  { %2605 = vmatprep.subr.bf16.mxu0 %v6705_v43  ;;  %2646 = vmatprep.subr.bf16.mxu1 %v6708_v44 }
 0x683   :  { %v5258_v20 = vpop.eup %5257 }
 0x684   :  { %v5260_v49 = vpop.eup %5259  ;;  %v2482_v40 = vadd.f32 1.0, %v5258_v20 }
 0x685   :  { %v2486_v8 = vadd.f32 1.0, %v5260_v49  ;;  %2606 = vmatpush1.bf16.msra.mxu0 %v6711_v50  ;;  %2647 = vmatpush1.bf16.msra.mxu1 %v6714_v38  ;;  %v5262_v16 = vpop.eup %5261  ;;  %v8218_v49 = vld [vmem:[#allocation80_spill] sm:$0xff] }
 0x686   :  { %v2483_v30 = vmul.f32 0.5, %v2482_v40  ;;  %2607 = vmatprep.subr.bf16.mxu0 %v6717_v53  ;;  %2648 = vmatprep.subr.bf16.mxu1 %v6720_v17  ;;  %v5264_v50 = vpop.eup %5263 }
 0x687   :  { %v2487_v36 = vmul.f32 0.5, %v2486_v8  ;;  %v2491_v38 = vadd.f32 1.0, %v5264_v50 }
 0x688   :  { %v2497_v42 = vmul.f32 %v5262_v16, %v2483_v30 }
 0x689   :  { %v2496_v43 = vmul.f32 %v2487_v36, %v6948_v5  ;;  %2608 = vmatpush1.bf16.msra.mxu0 %v6724_v41  ;;  %2649 = vmatpush1.bf16.msra.mxu1 %v6727_v45  ;;  %v2492_v53 = vmul.f32 0.5, %v2491_v38  ;;  %v5387_v5 = vld [vmem:[#allocation8 + $0x84] ss:$16 sps:$4 sm:$0xff]  }
 0x68a   :  { %2609 = vmatprep.subr.bf16.mxu0 %v6730_v46  ;;  %2650 = vmatprep.subr.bf16.mxu1 %v6733_v48  ;;  %v5371_v46 = vld [vmem:[#allocation8 + $0x4] ss:$16 sps:$4 sm:$0xff]   ;;  %v5372_v48 = vld [vmem:[#allocation8 + $0xc] ss:$16 sps:$4 sm:$0xff]  }
 0x68b   :  { %v7040_v44 = vadd.f32 %v2497_v42, %v2496_v43 }
 0x68d   :  { %5265 = vtanh.f32 %v7040_v44  ;;  %2610 = vmatpush1.bf16.msra.mxu0 %v6739_v47  ;;  %2651 = vmatpush1.bf16.msra.mxu1 %v6742_v51  ;;  %v5373_v47 = vld [vmem:[#allocation8] ss:$16 sps:$4 sm:$0xff]   ;;  %v5374_v51 = vld [vmem:[#allocation8 + $0x8] ss:$16 sps:$4 sm:$0xff]  }
 0x68e   :  { %2611 = vmatprep.subr.bf16.mxu0 %v8147_v13  ;;  %2652 = vmatprep.subr.bf16.mxu1 %v8148_v27  ;;  %v5380_v13 = vld [vmem:[#allocation8 + $0x4c] ss:$16 sps:$4 sm:$0xff]   ;;  %v5381_v27 = vld [vmem:[#allocation8 + $0x40] ss:$16 sps:$4 sm:$0xff]  }
 0x691   :  { %2612 = vmatpush1.bf16.msra.mxu0 %v8149_v52  ;;  %2653 = vmatpush1.bf16.msra.mxu1 %v8150_v28  ;;  %v5382_v52 = vld [vmem:[#allocation8 + $0x48] ss:$16 sps:$4 sm:$0xff]   ;;  %v5383_v28 = vld [vmem:[#allocation8 + $0x64] ss:$16 sps:$4 sm:$0xff]  }
 0x692   :  { %2613 = vmatprep.subr.bf16.mxu0 %v8151_v12  ;;  %2654 = vmatprep.subr.bf16.mxu1 %v8152_v6  ;;  %v5384_v12 = vld [vmem:[#allocation8 + $0x6c] ss:$16 sps:$4 sm:$0xff]   ;;  %v5385_v6 = vld [vmem:[#allocation8 + $0x60] ss:$16 sps:$4 sm:$0xff]  }
 0x695   :  { %2614 = vmatpush1.bf16.msra.mxu0 %v8153_v21  ;;  %2655 = vmatpush1.bf16.msra.mxu1 %v6766_v19  ;;  %v5376_v19 = vld [vmem:[#allocation8 + $0x2c] ss:$16 sps:$4 sm:$0xff]   ;;  %v5386_v21 = vld [vmem:[#allocation8 + $0x68] ss:$16 sps:$4 sm:$0xff]  }
 0x696   :  { %2615 = vmatprep.subr.bf16.mxu0 %v6769_v14  ;;  %2656 = vmatprep.subr.bf16.mxu1 %v6772_v10  ;;  %v5375_v14 = vld [vmem:[#allocation8 + $0x24] ss:$16 sps:$4 sm:$0xff]  }
 0x697   :  { %v5266_v17 = vpop.eup %5265  ;;  %v5379_v10 = vld [vmem:[#allocation8 + $0x44] ss:$16 sps:$4 sm:$0xff]  }
 0x698   :  { %v7055_v41 = vmul.f32 %v5266_v17, %v2492_v53 }
 0x699   :  { %2616 = vmatpush1.bf16.msra.mxu0 %v6777_v9  ;;  %2657 = vmatpush1.bf16.msra.mxu1 %v6780_v31  ;;  %v5377_v31 = vld [vmem:[#allocation8 + $0x20] ss:$16 sps:$4 sm:$0xff]   ;;  %v5378_v9 = vld [vmem:[#allocation8 + $0x28] ss:$16 sps:$4 sm:$0xff]  }
 0x69a   :  { %v2600_v45 = vpack.c.bf16 %v7055_v41, %v7055_v41  ;;  %2734 = vmatprep.subr.bf16.mxu0 %v5371_v46  ;;  %2775 = vmatprep.subr.bf16.mxu1 %v5372_v48 }
 0x69c   :  { %2634 = vmatmul.mubr.bf16.vlgmr.msra.gmra.mrb[84].mxu0 %v2600_v45  ;;  %2675 = vmatmul.mubr.bf16.vlgmr.msra.gmra.mrb[84].mxu1 %v2600_v45 }
 0x69d   :  { %2735 = vmatpush1.bf16.msra.mxu0 %v5373_v47  ;;  %2776 = vmatpush1.bf16.msra.mxu1 %v5374_v51 }
 0x69e   :  { %2736 = vmatprep.subr.bf16.mxu0 %v5375_v14  ;;  %2777 = vmatprep.subr.bf16.mxu1 %v5376_v19 }
 0x69f   :  { %2766 = vmatprep.mubr.bf16.mxu0 %v7988_v63  ;;  %2807 = vmatprep.mubr.bf16.mxu1 %v7988_v63 }
 0x6a1   :  { %2737 = vmatpush1.bf16.msra.mxu0 %v5377_v31  ;;  %2778 = vmatpush1.bf16.msra.mxu1 %v5378_v9 }
 0x6a2   :  { %2738 = vmatprep.subr.bf16.mxu0 %v5379_v10  ;;  %2779 = vmatprep.subr.bf16.mxu1 %v5380_v13 }
 0x6a5   :  { %2739 = vmatpush1.bf16.msra.mxu0 %v5381_v27  ;;  %2780 = vmatpush1.bf16.msra.mxu1 %v5382_v52  ;;  %v8219_v27 = vld [vmem:[#allocation87_spill] sm:$0xff] }
 0x6a6   :  { %2740 = vmatprep.subr.bf16.mxu0 %v5383_v28  ;;  %2781 = vmatprep.subr.bf16.mxu1 %v5384_v12  ;;  %v8220_v28 = vld [vmem:[#allocation90_spill] sm:$0xff] }
 0x6a9   :  { %2741 = vmatpush1.bf16.msra.mxu0 %v5385_v6  ;;  %2782 = vmatpush1.bf16.msra.mxu1 %v5386_v21 }
 0x6aa   :  { %2742 = vmatprep.subr.bf16.mxu0 %v5387_v5  ;;  %2783 = vmatprep.subr.bf16.mxu1 %v5388_v37  ;;  %v8221_v37 = vld [vmem:[#allocation89_spill] sm:$0xff] }
 0x6ad   :  { %2743 = vmatpush1.bf16.msra.mxu0 %v5389_v3  ;;  %2784 = vmatpush1.bf16.msra.mxu1 %v5390_v18  ;;  %v8222_v18 = vld [vmem:[#allocation91_spill] sm:$0xff] }
 0x6ae   :  { %2744 = vmatprep.subr.bf16.mxu0 %v5391_v35  ;;  %2785 = vmatprep.subr.bf16.mxu1 %v5392_v34 }
 0x6b1   :  { %2745 = vmatpush1.bf16.msra.mxu0 %v5393_v25  ;;  %2786 = vmatpush1.bf16.msra.mxu1 %v5394_v2 }
 0x6b2   :  { %2746 = vmatprep.subr.bf16.mxu0 %v5395_v24  ;;  %2787 = vmatprep.subr.bf16.mxu1 %v5396_v54 }
 0x6b5   :  { %2747 = vmatpush1.bf16.msra.mxu0 %v5397_v55  ;;  %2788 = vmatpush1.bf16.msra.mxu1 %v5398_v56 }
 0x6b6   :  { %2748 = vmatprep.subr.bf16.mxu0 %v5399_v57  ;;  %2789 = vmatprep.subr.bf16.mxu1 %v5400_v0  ;;  %v5405_v0 = vld [vmem:[#allocation10] ss:$16 sps:$4 sm:$0xff]  }
 0x6b9   :  { %2749 = vmatpush1.bf16.msra.mxu0 %v5401_v58  ;;  %2790 = vmatpush1.bf16.msra.mxu1 %v5402_v15  ;;  %v5406_v58 = vld [vmem:[#allocation10 + $0x8] ss:$16 sps:$4 sm:$0xff]   ;;  %v5407_v15 = vld [vmem:[#allocation10 + $0x24] ss:$16 sps:$4 sm:$0xff]  }
 0x6ba   :  { %2821 = vmatprep.subr.bf16.mxu0 %v5403_v59  ;;  %2862 = vmatprep.subr.bf16.mxu1 %v5404_v60  ;;  %v5408_v59 = vld [vmem:[#allocation10 + $0x2c] ss:$16 sps:$4 sm:$0xff]  }
 0x74f   :  { %v2548_v61 = vpop.f32.mrb[80].mxu0  ;;  %v2589_v62 = vpop.f32.mrb[80].mxu1 }
 0x750   :  { %v2596_v22 = vadd.f32 %v2548_v61, %v8215_v32  ;;  %v2598_v39 = vadd.f32 %v2589_v62, %v8216_v11  ;;  %v2550_v1 = vpop.f32.mrb[81].mxu0  ;;  %v2591_v7 = vpop.f32.mrb[81].mxu1  ;;  %v5409_v61 = vld [vmem:[#allocation10 + $0x20] ss:$16 sps:$4 sm:$0xff]   ;;  %v5410_v62 = vld [vmem:[#allocation10 + $0x28] ss:$16 sps:$4 sm:$0xff]  }
 0x751   :  { %v2597_v20 = vadd.f32 %v2550_v1, %v8217_v33  ;;  %v2599_v40 = vadd.f32 %v2591_v7, %v8218_v49  ;;  %v2552_v8 = vpop.f32.mrb[82].mxu0  ;;  %v2593_v30 = vpop.f32.mrb[82].mxu1  ;;  %v5411_v32 = vld [vmem:[#allocation10 + $0x44] ss:$16 sps:$4 sm:$0xff]   ;;  %v5413_v33 = vld [vmem:[#allocation10 + $0x40] ss:$16 sps:$4 sm:$0xff]  }
 0x752   :  { %v2687_v16 = vmul.f32 0.5, %v2596_v22  ;;  %v2553_v36 = vpop.f32.mrb[83].mxu0  ;;  %v2594_v42 = vpop.f32.mrb[83].mxu1  ;;  %v5412_v22 = vld [vmem:[#allocation10 + $0x4c] ss:$16 sps:$4 sm:$0xff]  }
 0x753   :  { %v2691_v43 = vmul.f32 0.5, %v2597_v20  ;;  %v2696_v50 = vmul.f32 0.5, %v2599_v40  ;;  %v5414_v20 = vld [vmem:[#allocation10 + $0x48] ss:$16 sps:$4 sm:$0xff]   ;;  %v5415_v40 = vld [vmem:[#allocation10 + $0x64] ss:$16 sps:$4 sm:$0xff]  }
 0x754   :  { %5267 = vtanh.f32 %v2687_v16  ;;  %v5416_v8 = vld [vmem:[#allocation10 + $0x6c] ss:$16 sps:$4 sm:$0xff]  }
 0x755   :  { %5269 = vtanh.f32 %v2691_v43  ;;  %v5417_v43 = vld [vmem:[#allocation10 + $0x60] ss:$16 sps:$4 sm:$0xff]  }
 0x756   :  { %5271 = vtanh.f32 %v2598_v39 }
 0x757   :  { %5273 = vtanh.f32 %v2696_v50  ;;  %v5418_v50 = vld [vmem:[#allocation10 + $0x68] ss:$16 sps:$4 sm:$0xff]  }
 0x75e   :  { %v5268_v38 = vpop.eup %5267 }
 0x75f   :  { %v5270_v53 = vpop.eup %5269  ;;  %v2689_v17 = vadd.f32 1.0, %v5268_v38  ;;  %v5419_v38 = vld [vmem:[#allocation10 + $0x84] ss:$16 sps:$4 sm:$0xff]  }
 0x760   :  { %v2693_v45 = vadd.f32 1.0, %v5270_v53  ;;  %v5272_v48 = vpop.eup %5271  ;;  %v5420_v53 = vld [vmem:[#allocation10 + $0x8c] ss:$16 sps:$4 sm:$0xff]  }
 0x761   :  { %v2690_v46 = vmul.f32 0.5, %v2689_v17  ;;  %v5274_v31 = vpop.eup %5273 }
 0x762   :  { %v2694_v47 = vmul.f32 0.5, %v2693_v45  ;;  %v2698_v9 = vadd.f32 1.0, %v5274_v31  ;;  %v5421_v45 = vld [vmem:[#allocation10 + $0x80] ss:$16 sps:$4 sm:$0xff]  }
 0x763   :  { %v2714_v51 = vmul.f32 %v5272_v48, %v2690_v46  ;;  %v5422_v46 = vld [vmem:[#allocation10 + $0x88] ss:$16 sps:$4 sm:$0xff]   ;;  %v5423_v48 = vld [vmem:[#allocation10 + $0xa4] ss:$16 sps:$4 sm:$0xff]  }
 0x764   :  { %v2713_v14 = vmul.f32 %v2694_v47, %v7010_v26  ;;  %v2699_v5 = vmul.f32 0.5, %v2698_v9  ;;  %v5424_v47 = vld [vmem:[#allocation10 + $0xac] ss:$16 sps:$4 sm:$0xff]   ;;  %v5427_v9 = vld [vmem:[#allocation10 + $0xc4] ss:$16 sps:$4 sm:$0xff]  }
 0x766   :  { %v7068_v19 = vadd.f32 %v2714_v51, %v2713_v14  ;;  %v5425_v51 = vld [vmem:[#allocation10 + $0xa0] ss:$16 sps:$4 sm:$0xff]   ;;  %v5426_v14 = vld [vmem:[#allocation10 + $0xa8] ss:$16 sps:$4 sm:$0xff]  }
 0x768   :  { %5275 = vtanh.f32 %v7068_v19 }
 0x76f   :  { %v2635_v10 = vpop.f32.mrb[84].mxu0  ;;  %v2676_v13 = vpop.f32.mrb[84].mxu1 }
 0x770   :  { %v2683_v52 = vadd.f32 %v2635_v10, %v8219_v27  ;;  %v2685_v12 = vadd.f32 %v2676_v13, %v8220_v28  ;;  %v2637_v6 = vpop.f32.mrb[85].mxu0  ;;  %v2678_v21 = vpop.f32.mrb[85].mxu1  ;;  %v5428_v10 = vld [vmem:[#allocation10 + $0xcc] ss:$16 sps:$4 sm:$0xff]   ;;  %v5429_v13 = vld [vmem:[#allocation10 + $0xc0] ss:$16 sps:$4 sm:$0xff]  }
 0x771   :  { %v2684_v3 = vadd.f32 %v2637_v6, %v8221_v37  ;;  %v2686_v35 = vadd.f32 %v2678_v21, %v8222_v18  ;;  %v2639_v26 = vpop.f32.mrb[86].mxu0  ;;  %v2680_v34 = vpop.f32.mrb[86].mxu1  ;;  %v5430_v27 = vld [vmem:[#allocation10 + $0xc8] ss:$16 sps:$4 sm:$0xff]   ;;  %v5431_v28 = vld [vmem:[#allocation10 + $0xe4] ss:$16 sps:$4 sm:$0xff]  }
 0x772   :  { %v5276_v25 = vpop.eup %5275  ;;  %v2700_v2 = vmul.f32 0.5, %v2683_v52  ;;  %v2640_v24 = vpop.f32.mrb[87].mxu0  ;;  %v5434_v37 = vld [vmem:[#allocation10 + $0xe8] ss:$16 sps:$4 sm:$0xff]   ;;  %v8223_v26 = vld [vmem:[#allocation79_spill] sm:$0xff] }
 0x773   :  { %v2681_v54 = vpop.f32.mrb[87].mxu1  ;;  %v7075_v55 = vmul.f32 %v5276_v25, %v2699_v5  ;;  %v2704_v56 = vmul.f32 0.5, %v2684_v3  ;;  %v2709_v60 = vmul.f32 0.5, %v2686_v35  ;;  %v5433_v5 = vld [vmem:[#allocation10 + $0xe0] ss:$16 sps:$4 sm:$0xff]   ;;  %v8224_v25 = vld [vmem:[#allocation82_spill] sm:$0xff] }
 0x774   :  { %5277 = vtanh.f32 %v2700_v2 }
 0x775   :  { %v2733_v57 = vpack.c.bf16 %v7075_v55, %v7075_v55  ;;  %5279 = vtanh.f32 %v2704_v56  ;;  %v8225_v56 = vld [vmem:[#allocation81_spill] sm:$0xff] }
 0x776   :  { %5281 = vtanh.f32 %v2685_v12  ;;  %v5432_v12 = vld [vmem:[#allocation10 + $0xec] ss:$16 sps:$4 sm:$0xff]  }
 0x777   :  { %2767 = vmatmul.mubr.bf16.vlgmr.msra.gmra.mrb[88].mxu0 %v2733_v57  ;;  %2808 = vmatmul.mubr.bf16.vlgmr.msra.gmra.mrb[88].mxu1 %v2733_v57  ;;  %5283 = vtanh.f32 %v2709_v60 }
 0x778   :  { %2822 = vmatpush1.bf16.msra.mxu0 %v5405_v0  ;;  %2863 = vmatpush1.bf16.msra.mxu1 %v5406_v58  ;;  %v8226_v0 = vld [vmem:[#allocation83_spill] sm:$0xff] }
 0x779   :  { %2823 = vmatprep.subr.bf16.mxu0 %v5407_v15  ;;  %2864 = vmatprep.subr.bf16.mxu1 %v5408_v59 }
 0x77a   :  { %2853 = vmatprep.mubr.bf16.mxu0 %v7988_v63  ;;  %2894 = vmatprep.mubr.bf16.mxu1 %v7988_v63 }
 0x77c   :  { %2824 = vmatpush1.bf16.msra.mxu0 %v5409_v61  ;;  %2865 = vmatpush1.bf16.msra.mxu1 %v5410_v62 }
 0x77d   :  { %2825 = vmatprep.subr.bf16.mxu0 %v5411_v32  ;;  %2866 = vmatprep.subr.bf16.mxu1 %v5412_v22 }
 0x77e   :  { %v5278_v11 = vpop.eup %5277 }
 0x77f   :  { %v5280_v39 = vpop.eup %5279  ;;  %v2702_v1 = vadd.f32 1.0, %v5278_v11 }
 0x780   :  { %v2706_v7 = vadd.f32 1.0, %v5280_v39  ;;  %2826 = vmatpush1.bf16.msra.mxu0 %v5413_v33  ;;  %2867 = vmatpush1.bf16.msra.mxu1 %v5414_v20  ;;  %v5282_v30 = vpop.eup %5281 }
 0x781   :  { %v2703_v49 = vmul.f32 0.5, %v2702_v1  ;;  %2827 = vmatprep.subr.bf16.mxu0 %v5415_v40  ;;  %2868 = vmatprep.subr.bf16.mxu1 %v5416_v8 }
 0x782   :  { %v2707_v16 = vmul.f32 0.5, %v2706_v7 }
 0x783   :  { %v2717_v36 = vmul.f32 %v5282_v30, %v2703_v49 }
 0x784   :  { %v2716_v42 = vmul.f32 %v2707_v16, %v7040_v44  ;;  %2828 = vmatpush1.bf16.msra.mxu0 %v5417_v43  ;;  %2869 = vmatpush1.bf16.msra.mxu1 %v5418_v50  ;;  %v5284_v44 = vpop.eup %5283  ;;  %v8227_v50 = vld [vmem:[#allocation84_spill] sm:$0xff] }
 0x785   :  { %2829 = vmatprep.subr.bf16.mxu0 %v5419_v38  ;;  %2870 = vmatprep.subr.bf16.mxu1 %v5420_v53  ;;  %v2711_v31 = vadd.f32 1.0, %v5284_v44  ;;  %v8228_v53 = vld [vmem:[#allocation86_spill] sm:$0xff]  ;;  %v8229_v44 = vld [vmem:[#allocation85_spill] sm:$0xff] }
 0x786   :  { %v7082_v17 = vadd.f32 %v2717_v36, %v2716_v42 }
 0x787   :  { %v2712_v52 = vmul.f32 0.5, %v2711_v31 }
 0x788   :  { %5285 = vtanh.f32 %v7082_v17  ;;  %2830 = vmatpush1.bf16.msra.mxu0 %v5421_v45  ;;  %2871 = vmatpush1.bf16.msra.mxu1 %v5422_v46 }
 0x789   :  { %2831 = vmatprep.subr.bf16.mxu0 %v5423_v48  ;;  %2872 = vmatprep.subr.bf16.mxu1 %v5424_v47 }
 0x78c   :  { %2832 = vmatpush1.bf16.msra.mxu0 %v5425_v51  ;;  %2873 = vmatpush1.bf16.msra.mxu1 %v5426_v14  ;;  %v8230_v14 = vld [vmem:[#allocation88_spill] sm:$0xff] }
 0x78d   :  { %2833 = vmatprep.subr.bf16.mxu0 %v5427_v9  ;;  %2874 = vmatprep.subr.bf16.mxu1 %v5428_v10 }
 0x790   :  { %2834 = vmatpush1.bf16.msra.mxu0 %v5429_v13  ;;  %2875 = vmatpush1.bf16.msra.mxu1 %v5430_v27 }
 0x791   :  { %2835 = vmatprep.subr.bf16.mxu0 %v5431_v28  ;;  %2876 = vmatprep.subr.bf16.mxu1 %v5432_v12 }
 0x792   :  { %v5286_v6 = vpop.eup %5285 }
 0x793   :  { %v7085_v21 = vmul.f32 %v5286_v6, %v2712_v52 }
 0x794   :  { %2836 = vmatpush1.bf16.msra.mxu0 %v5433_v5  ;;  %2877 = vmatpush1.bf16.msra.mxu1 %v5434_v37 }
 0x795   :  { %v2820_v3 = vpack.c.bf16 %v7085_v21, %v7085_v21 }
 0x797   :  { %2854 = vmatmul.mubr.bf16.vlgmr.msra.gmra.mrb[92].mxu0 %v2820_v3  ;;  %2895 = vmatmul.mubr.bf16.vlgmr.msra.gmra.mrb[92].mxu1 %v2820_v3 }
 0x84a   :  { %v2768_v18 = vpop.f32.mrb[88].mxu0  ;;  %v2809_v35 = vpop.f32.mrb[88].mxu1 }
 0x84b   :  { %v2816_v34 = vadd.f32 %v2768_v18, %v8223_v26  ;;  %v2818_v2 = vadd.f32 %v2809_v35, %v8224_v25  ;;  %v2770_v24 = vpop.f32.mrb[89].mxu0  ;;  %v2811_v54 = vpop.f32.mrb[89].mxu1 }
 0x84c   :  { %v2817_v57 = vadd.f32 %v2770_v24, %v8225_v56  ;;  %v2819_v58 = vadd.f32 %v2811_v54, %v8226_v0  ;;  %v2772_v15 = vpop.f32.mrb[90].mxu0  ;;  %v2813_v59 = vpop.f32.mrb[90].mxu1 }
 0x84d   :  { %v2907_v60 = vmul.f32 0.5, %v2816_v34  ;;  %v2773_v61 = vpop.f32.mrb[91].mxu0  ;;  %v2814_v62 = vpop.f32.mrb[91].mxu1 }
 0x84e   :  { %v2911_v32 = vmul.f32 0.5, %v2817_v57  ;;  %v2916_v22 = vmul.f32 0.5, %v2819_v58 }
 0x84f   :  { %5287 = vtanh.f32 %v2907_v60 }
 0x850   :  { %5289 = vtanh.f32 %v2911_v32 }
 0x851   :  { %5291 = vtanh.f32 %v2818_v2 }
 0x852   :  { %5293 = vtanh.f32 %v2916_v22 }
 0x859   :  { %v5288_v11 = vpop.eup %5287 }
 0x85a   :  { %v5290_v39 = vpop.eup %5289  ;;  %v2909_v1 = vadd.f32 1.0, %v5288_v11 }
 0x85b   :  { %v2913_v7 = vadd.f32 1.0, %v5290_v39  ;;  %v5292_v20 = vpop.eup %5291 }
 0x85c   :  { %v2910_v33 = vmul.f32 0.5, %v2909_v1  ;;  %v5294_v16 = vpop.eup %5293 }
 0x85d   :  { %v2914_v49 = vmul.f32 0.5, %v2913_v7  ;;  %v2918_v36 = vadd.f32 1.0, %v5294_v16 }
 0x85e   :  { %v2934_v40 = vmul.f32 %v5292_v20, %v2910_v33 }
 0x85f   :  { %v2933_v8 = vmul.f32 %v2914_v49, %v7068_v19  ;;  %v2919_v47 = vmul.f32 0.5, %v2918_v36 }
 0x861   :  { %v2935_v30 = vadd.f32 %v2934_v40, %v2933_v8 }
 0x863   :  { %5295 = vtanh.f32 %v2935_v30 }
 0x86a   :  { %v2855_v42 = vpop.f32.mrb[92].mxu0  ;;  %v2896_v43 = vpop.f32.mrb[92].mxu1 }
 0x86b   :  { %v2903_v38 = vadd.f32 %v2855_v42, %v8227_v50  ;;  %v2905_v45 = vadd.f32 %v2896_v43, %v8228_v53  ;;  %v2857_v46 = vpop.f32.mrb[93].mxu0  ;;  %v2898_v48 = vpop.f32.mrb[93].mxu1 }
 0x86c   :  { %v2904_v51 = vadd.f32 %v2857_v46, %v8229_v44  ;;  %v2906_v31 = vadd.f32 %v2898_v48, %v8230_v14  ;;  %v2859_v9 = vpop.f32.mrb[94].mxu0  ;;  %v2900_v10 = vpop.f32.mrb[94].mxu1 }
 0x86d   :  { %v5296_v19 = vpop.eup %5295  ;;  %v2920_v13 = vmul.f32 0.5, %v2903_v38  ;;  %v2860_v27 = vpop.f32.mrb[95].mxu0 }
 0x86e   :  { %v2901_v52 = vpop.f32.mrb[95].mxu1  ;;  %v7098_v28 = vmul.f32 %v5296_v19, %v2919_v47  ;;  %v2924_v12 = vmul.f32 0.5, %v2904_v51  ;;  %v2929_v6 = vmul.f32 0.5, %v2906_v31 }
 0x86f   :  { %5297 = vtanh.f32 %v2920_v13 }
 0x870   :  { %5299 = vtanh.f32 %v2924_v12 }
 0x871   :  { %5301 = vtanh.f32 %v2905_v45 }
 0x872   :  { %5303 = vtanh.f32 %v2929_v6 }
 0x879   :  { %v5298_v5 = vpop.eup %5297 }
 0x87a   :  { %v5300_v37 = vpop.eup %5299  ;;  %v2922_v3 = vadd.f32 1.0, %v5298_v5 }
 0x87b   :  { %v2926_v18 = vadd.f32 1.0, %v5300_v37  ;;  %v5302_v26 = vpop.eup %5301 }
 0x87c   :  { %v2923_v35 = vmul.f32 0.5, %v2922_v3  ;;  %v5304_v54 = vpop.eup %5303 }
 0x87d   :  { %v2927_v34 = vmul.f32 0.5, %v2926_v18  ;;  %v2931_v56 = vadd.f32 1.0, %v5304_v54 }
 0x87e   :  { %v2937_v25 = vmul.f32 %v5302_v26, %v2923_v35 }
 0x87f   :  { %v2936_v2 = vmul.f32 %v2927_v34, %v7082_v17  ;;  %v2932_v57 = vmul.f32 0.5, %v2931_v56 }
 0x881   :  { %v2938_v24 = vadd.f32 %v2937_v25, %v2936_v2 }
 0x883   :  { %5305 = vtanh.f32 %v2938_v24 }
 0x88d   :  { %v5306_v0 = vpop.eup %5305 }
 0x88e   :  { %v2942_v58 = vmul.f32 %v5306_v0, %v2932_v57 }
 0x88f   :  { %5625 = dma.done.wait [#allocation7], 16384 }
 0x890   :  { %5626 = vsyncadd [#allocation7], 4294950912 }
 0x891   :  { %5627 = dma.done.wait [#allocation7 + $0x1], 4096 }
 0x892   :  { %5628 = vsyncadd [#allocation7 + $0x1], 4294963200 }
 0x893   :  { %5629 = dma.done.wait [#allocation7 + $0x2], 4096 }
 0x894   :  { %5630 = vsyncadd [#allocation7 + $0x2], 4294963200  ;;  %v7102_v15 = vpack.c.bf16 %v7085_v21, %v2942_v58  ;;  %v2980_v17 = vld [vmem:[#allocation4 + $0x8] sm:$0xff]  ;;  %v2982_v59 = vld [vmem:[#allocation4 + $0x18] sm:$0xff]  ;;  %vm5653_vm1 = vmmov 0   ;;  %vm4809_vm2 = vcmask 15360  }
 0x895   :  { %v2979_v60 = vld [vmem:[#allocation4] sm:$0xff]  ;;  %3149 = vmatprep.subr.bf16.mxu0 %v2980_v17  ;;  %3222 = vmatprep.subr.bf16.mxu1 %v2982_v59  ;;  %v2981_v61 = vld [vmem:[#allocation4 + $0x10] sm:$0xff]  ;;  %v2988_v62 = vld [vmem:[#allocation4 + $0x48] sm:$0xff] }
 0x896   :  { %3181 = vmatprep.mubr.bf16.mxu0 %v7102_v15  ;;  %3254 = vmatprep.mubr.bf16.mxu1 %v7102_v15  ;;  %v2990_v32 = vld [vmem:[#allocation4 + $0x58] sm:$0xff]  ;;  %v2987_v22 = vld [vmem:[#allocation4 + $0x40] sm:$0xff]  ;;  %v2989_v11 = vld [vmem:[#allocation4 + $0x50] sm:$0xff] }
 0x897   :  { %3150 = vmatpush1.bf16.msra.mxu0 %v2979_v60  ;;  %3223 = vmatpush1.bf16.msra.mxu1 %v2981_v61  ;;  %v2996_v21 = vld [vmem:[#allocation4 + $0x88] sm:$0xff]  ;;  %v2998_v39 = vld [vmem:[#allocation4 + $0x98] sm:$0xff]  ;;  %v2995_v1 = vld [vmem:[#allocation4 + $0x80] sm:$0xff] }
 0x898   :  { %3151 = vmatprep.subr.bf16.mxu0 %v2988_v62  ;;  %3224 = vmatprep.subr.bf16.mxu1 %v2990_v32  ;;  %v2997_v7 = vld [vmem:[#allocation4 + $0x90] sm:$0xff]  ;;  %v3004_v33 = vld [vmem:[#allocation4 + $0xc8] sm:$0xff]  ;;  %v3006_v20 = vld [vmem:[#allocation4 + $0xd8] sm:$0xff] }
 0x899   :  { %v3003_v49 = vld [vmem:[#allocation4 + $0xc0] sm:$0xff]  ;;  %v3005_v40 = vld [vmem:[#allocation4 + $0xd0] sm:$0xff]  ;;  %v3012_v8 = vld [vmem:[#allocation4 + $0x108] sm:$0xff] }
 0x89a   :  { %v3014_v30 = vld [vmem:[#allocation4 + $0x118] sm:$0xff]  ;;  %v3011_v16 = vld [vmem:[#allocation4 + $0x100] sm:$0xff]  ;;  %v3013_v36 = vld [vmem:[#allocation4 + $0x110] sm:$0xff] }
 0x89b   :  { %3152 = vmatpush1.bf16.msra.mxu0 %v2987_v22  ;;  %3225 = vmatpush1.bf16.msra.mxu1 %v2989_v11  ;;  %v3020_v42 = vld [vmem:[#allocation4 + $0x148] sm:$0xff]  ;;  %v3022_v43 = vld [vmem:[#allocation4 + $0x158] sm:$0xff]  ;;  %v3019_v50 = vld [vmem:[#allocation4 + $0x140] sm:$0xff] }
 0x89c   :  { %3153 = vmatprep.subr.bf16.mxu0 %v2996_v21  ;;  %3226 = vmatprep.subr.bf16.mxu1 %v2998_v39  ;;  %v3021_v38 = vld [vmem:[#allocation4 + $0x150] sm:$0xff]  ;;  %v3028_v53 = vld [vmem:[#allocation4 + $0x188] sm:$0xff]  ;;  %v3030_v45 = vld [vmem:[#allocation4 + $0x198] sm:$0xff] }
 0x89d   :  { %v3027_v46 = vld [vmem:[#allocation4 + $0x180] sm:$0xff]  ;;  %v3029_v48 = vld [vmem:[#allocation4 + $0x190] sm:$0xff]  ;;  %v3036_v47 = vld [vmem:[#allocation4 + $0x1c8] sm:$0xff] }
 0x89e   :  { %v3038_v44 = vld [vmem:[#allocation4 + $0x1d8] sm:$0xff]  ;;  %v3035_v51 = vld [vmem:[#allocation4 + $0x1c0] sm:$0xff]  ;;  %v3037_v14 = vld [vmem:[#allocation4 + $0x1d0] sm:$0xff] }
 0x89f   :  { %3154 = vmatpush1.bf16.msra.mxu0 %v2995_v1  ;;  %3227 = vmatpush1.bf16.msra.mxu1 %v2997_v7  ;;  %v3044_v31 = vld [vmem:[#allocation4 + $0x208] sm:$0xff]  ;;  %v3046_v9 = vld [vmem:[#allocation4 + $0x218] sm:$0xff]  ;;  %v3043_v10 = vld [vmem:[#allocation4 + $0x200] sm:$0xff] }
 0x8a0   :  { %3155 = vmatprep.subr.bf16.mxu0 %v3004_v33  ;;  %3228 = vmatprep.subr.bf16.mxu1 %v3006_v20  ;;  %v3045_v19 = vld [vmem:[#allocation4 + $0x210] sm:$0xff]  ;;  %v3052_v13 = vld [vmem:[#allocation4 + $0x248] sm:$0xff]  ;;  %v3054_v27 = vld [vmem:[#allocation4 + $0x258] sm:$0xff] }
 0x8a1   :  { %v3051_v52 = vld [vmem:[#allocation4 + $0x240] sm:$0xff]  ;;  %v3053_v12 = vld [vmem:[#allocation4 + $0x250] sm:$0xff]  ;;  %v3060_v6 = vld [vmem:[#allocation4 + $0x288] sm:$0xff] }
 0x8a2   :  { %v3062_v5 = vld [vmem:[#allocation4 + $0x298] sm:$0xff]  ;;  %v3059_v37 = vld [vmem:[#allocation4 + $0x280] sm:$0xff]  ;;  %v3061_v3 = vld [vmem:[#allocation4 + $0x290] sm:$0xff] }
 0x8a3   :  { %3156 = vmatpush1.bf16.msra.mxu0 %v3003_v49  ;;  %3229 = vmatpush1.bf16.msra.mxu1 %v3005_v40  ;;  %v3068_v18 = vld [vmem:[#allocation4 + $0x2c8] sm:$0xff]  ;;  %v3070_v35 = vld [vmem:[#allocation4 + $0x2d8] sm:$0xff]  ;;  %v3067_v26 = vld [vmem:[#allocation4 + $0x2c0] sm:$0xff] }
 0x8a4   :  { %3157 = vmatprep.subr.bf16.mxu0 %v3012_v8  ;;  %3230 = vmatprep.subr.bf16.mxu1 %v3014_v30  ;;  %v3069_v34 = vld [vmem:[#allocation4 + $0x2d0] sm:$0xff]  ;;  %v3076_v25 = vld [vmem:[#allocation4 + $0x308] sm:$0xff]  ;;  %v3078_v2 = vld [vmem:[#allocation4 + $0x318] sm:$0xff]  ;;  %v7112_v30 = vpack.c.bf16 %v6963_v23, %v7055_v41 }
 0x8a5   :  { %v3075_v24 = vld [vmem:[#allocation4 + $0x300] sm:$0xff]  ;;  %v3077_v54 = vld [vmem:[#allocation4 + $0x310] sm:$0xff]  ;;  %v3084_v56 = vld [vmem:[#allocation4 + $0x348] sm:$0xff] }
 0x8a6   :  { %v3086_v57 = vld [vmem:[#allocation4 + $0x358] sm:$0xff]  ;;  %v3083_v0 = vld [vmem:[#allocation4 + $0x340] sm:$0xff]  ;;  %v3085_v58 = vld [vmem:[#allocation4 + $0x350] sm:$0xff] }
 0x8a7   :  { %3158 = vmatpush1.bf16.msra.mxu0 %v3011_v16  ;;  %3231 = vmatpush1.bf16.msra.mxu1 %v3013_v36  ;;  %v3092_v17 = vld [vmem:[#allocation4 + $0x388] sm:$0xff]  ;;  %v3094_v59 = vld [vmem:[#allocation4 + $0x398] sm:$0xff]  ;;  %v3091_v60 = vld [vmem:[#allocation4 + $0x380] sm:$0xff] }
 0x8a8   :  { %3159 = vmatprep.subr.bf16.mxu0 %v3020_v42  ;;  %3232 = vmatprep.subr.bf16.mxu1 %v3022_v43  ;;  %v3093_v61 = vld [vmem:[#allocation4 + $0x390] sm:$0xff]  ;;  %v3100_v62 = vld [vmem:[#allocation4 + $0x3c8] sm:$0xff]  ;;  %v3102_v32 = vld [vmem:[#allocation4 + $0x3d8] sm:$0xff] }
 0x8a9   :  { %v3099_v22 = vld [vmem:[#allocation4 + $0x3c0] sm:$0xff]  ;;  %v3101_v11 = vld [vmem:[#allocation4 + $0x3d0] sm:$0xff]  ;;  %v2984_v21 = vld [vmem:[#allocation4 + $0x28] sm:$0xff] }
 0x8aa   :  { %v2986_v39 = vld [vmem:[#allocation4 + $0x38] sm:$0xff]  ;;  %v8231_v1 = vld [vmem:[#allocation112_spill] sm:$0xff]  ;;  %v8232_v7 = vld [vmem:[#allocation23_spill] sm:$0xff] }
 0x8ab   :  { %3160 = vmatpush1.bf16.msra.mxu0 %v3019_v50  ;;  %3233 = vmatpush1.bf16.msra.mxu1 %v3021_v38  ;;  %v7108_v33 = vpack.c.bf16 %v8232_v7, %v8231_v1  ;;  %v2983_v20 = vld [vmem:[#allocation4 + $0x20] sm:$0xff]  ;;  %v2985_v49 = vld [vmem:[#allocation4 + $0x30] sm:$0xff]  ;;  %v2992_v40 = vld [vmem:[#allocation4 + $0x68] sm:$0xff] }
 0x8ac   :  { %3161 = vmatprep.subr.bf16.mxu0 %v3028_v53  ;;  %3234 = vmatprep.subr.bf16.mxu1 %v3030_v45  ;;  %v2994_v8 = vld [vmem:[#allocation4 + $0x78] sm:$0xff]  ;;  %v2991_v16 = vld [vmem:[#allocation4 + $0x60] sm:$0xff]  ;;  %v2993_v36 = vld [vmem:[#allocation4 + $0x70] sm:$0xff] }
 0x8ad   :  { %v3000_v42 = vld [vmem:[#allocation4 + $0xa8] sm:$0xff]  ;;  %v3002_v43 = vld [vmem:[#allocation4 + $0xb8] sm:$0xff]  ;;  %v2999_v50 = vld [vmem:[#allocation4 + $0xa0] sm:$0xff] }
 0x8ae   :  { %v3001_v38 = vld [vmem:[#allocation4 + $0xb0] sm:$0xff]  ;;  %v8234_v41 = vld [vmem:[#allocation110_spill] sm:$0xff]  ;;  %v3008_v45 = vld [vmem:[#allocation4 + $0xe8] sm:$0xff] }
 0x8af   :  { %3162 = vmatpush1.bf16.msra.mxu0 %v3027_v46  ;;  %3235 = vmatpush1.bf16.msra.mxu1 %v3029_v48  ;;  %v8233_v23 = vld [vmem:[#allocation49_spill] sm:$0xff]  ;;  %v3010_v46 = vld [vmem:[#allocation4 + $0xf8] sm:$0xff]  ;;  %v3079_v1 = vld [vmem:[#allocation4 + $0x320] sm:$0xff] }
 0x8b0   :  { %3163 = vmatprep.subr.bf16.mxu0 %v3036_v47  ;;  %3236 = vmatprep.subr.bf16.mxu1 %v3038_v44  ;;  %v7120_v53 = vpack.c.bf16 %v8234_v41, %v8233_v23  ;;  %v8235_v48 = vld [vmem:[#allocation109_spill] sm:$0xff]  ;;  %v8236_v47 = vld [vmem:[#allocation59_spill] sm:$0xff] }
 0x8b1   :  { %v7124_v44 = vpack.c.bf16 %v8236_v47, %v8235_v48  ;;  %v3081_v7 = vld [vmem:[#allocation4 + $0x330] sm:$0xff]  ;;  %v3103_v23 = vld [vmem:[#allocation4 + $0x3e0] sm:$0xff] }
 0x8b2   :  { %v3105_v41 = vld [vmem:[#allocation4 + $0x3f0] sm:$0xff]  ;;  %v7156_v48 = vld [vmem:[#allocation5] sm:$0xff] }
 0x8b3   :  { %3164 = vmatpush1.bf16.msra.mxu0 %v3035_v51  ;;  %3237 = vmatpush1.bf16.msra.mxu1 %v3037_v14  ;;  %v3007_v51 = vld [vmem:[#allocation4 + $0xe0] sm:$0xff]  ;;  %v3009_v14 = vld [vmem:[#allocation4 + $0xf0] sm:$0xff] }
 0x8b4   :  { %3165 = vmatprep.subr.bf16.mxu0 %v3044_v31  ;;  %3238 = vmatprep.subr.bf16.mxu1 %v3046_v9  ;;  %v3016_v31 = vld [vmem:[#allocation4 + $0x128] sm:$0xff]  ;;  %v3018_v9 = vld [vmem:[#allocation4 + $0x138] sm:$0xff]  ;;  %v7158_v47 = vld [vmem:[#allocation5 + $0x10] sm:$0xff] }
 0x8b7   :  { %3166 = vmatpush1.bf16.msra.mxu0 %v3043_v10  ;;  %3239 = vmatpush1.bf16.msra.mxu1 %v3045_v19  ;;  %v7132_v10 = vpack.c.bf16 %v7017_v29, %v6925_v4  ;;  %v3015_v19 = vld [vmem:[#allocation4 + $0x120] sm:$0xff]  ;;  %v3025_v29 = vld [vmem:[#allocation4 + $0x170] sm:$0xff] }
 0x8b8   :  { %3167 = vmatprep.subr.bf16.mxu0 %v3052_v13  ;;  %3240 = vmatprep.subr.bf16.mxu1 %v3054_v27  ;;  %v3017_v13 = vld [vmem:[#allocation4 + $0x130] sm:$0xff]  ;;  %v3024_v27 = vld [vmem:[#allocation4 + $0x168] sm:$0xff]  ;;  %v3023_v4 = vld [vmem:[#allocation4 + $0x160] sm:$0xff] }
 0x8bb   :  { %3168 = vmatpush1.bf16.msra.mxu0 %v3051_v52  ;;  %3241 = vmatpush1.bf16.msra.mxu1 %v3053_v12  ;;  %v3026_v52 = vld [vmem:[#allocation4 + $0x178] sm:$0xff]  ;;  %v8237_v12 = vld [vmem:[#allocation24_spill] sm:$0xff] }
 0x8bc   :  { %3169 = vmatprep.subr.bf16.mxu0 %v3060_v6  ;;  %3242 = vmatprep.subr.bf16.mxu1 %v3062_v5  ;;  %v8238_v6 = vld [vmem:[#allocation54_spill] sm:$0xff] }
 0x8bd   :  { %v7136_v5 = vpack.c.bf16 %v8238_v6, %v8237_v12  ;;  %v7190_v12 = vld [vmem:[#allocation5 + $0x78] sm:$0xff]  ;;  %v7200_v6 = vld [vmem:[#allocation5 + $0x70] sm:$0xff] }
 0x8bf   :  { %3170 = vmatpush1.bf16.msra.mxu0 %v3059_v37  ;;  %3243 = vmatpush1.bf16.msra.mxu1 %v3061_v3  ;;  %v3032_v37 = vld [vmem:[#allocation4 + $0x1a8] sm:$0xff]  ;;  %v3034_v3 = vld [vmem:[#allocation4 + $0x1b8] sm:$0xff] }
 0x8c0   :  { %3171 = vmatprep.subr.bf16.mxu0 %v3068_v18  ;;  %3244 = vmatprep.subr.bf16.mxu1 %v3070_v35  ;;  %v7144_v18 = vpack.c.bf16 %v7098_v28, %v7075_v55  ;;  %v3031_v35 = vld [vmem:[#allocation4 + $0x1a0] sm:$0xff]  ;;  %v3048_v55 = vld [vmem:[#allocation4 + $0x228] sm:$0xff]  ;;  %v3050_v28 = vld [vmem:[#allocation4 + $0x238] sm:$0xff] }
 0x8c3   :  { %3172 = vmatpush1.bf16.msra.mxu0 %v3067_v26  ;;  %3245 = vmatpush1.bf16.msra.mxu1 %v3069_v34  ;;  %v3033_v26 = vld [vmem:[#allocation4 + $0x1b0] sm:$0xff]  ;;  %v3040_v34 = vld [vmem:[#allocation4 + $0x1e8] sm:$0xff] }
 0x8c4   :  { %3173 = vmatprep.subr.bf16.mxu0 %v3076_v25  ;;  %3246 = vmatprep.subr.bf16.mxu1 %v3078_v2  ;;  %v3042_v25 = vld [vmem:[#allocation4 + $0x1f8] sm:$0xff]  ;;  %v3039_v2 = vld [vmem:[#allocation4 + $0x1e0] sm:$0xff] }
 0x8c7   :  { %3174 = vmatpush1.bf16.msra.mxu0 %v3075_v24  ;;  %3247 = vmatpush1.bf16.msra.mxu1 %v3077_v54  ;;  %v3041_v24 = vld [vmem:[#allocation4 + $0x1f0] sm:$0xff]  ;;  %v3047_v54 = vld [vmem:[#allocation4 + $0x220] sm:$0xff] }
 0x8c8   :  { %3175 = vmatprep.subr.bf16.mxu0 %v3084_v56  ;;  %3248 = vmatprep.subr.bf16.mxu1 %v3086_v57  ;;  %v3049_v56 = vld [vmem:[#allocation4 + $0x230] sm:$0xff]  ;;  %v3056_v57 = vld [vmem:[#allocation4 + $0x268] sm:$0xff] }
 0x8cb   :  { %3176 = vmatpush1.bf16.msra.mxu0 %v3083_v0  ;;  %3249 = vmatpush1.bf16.msra.mxu1 %v3085_v58  ;;  %v3058_v0 = vld [vmem:[#allocation4 + $0x278] sm:$0xff]  ;;  %v3055_v58 = vld [vmem:[#allocation4 + $0x260] sm:$0xff] }
 0x8cc   :  { %3177 = vmatprep.subr.bf16.mxu0 %v3092_v17  ;;  %3250 = vmatprep.subr.bf16.mxu1 %v3094_v59  ;;  %v3057_v17 = vld [vmem:[#allocation4 + $0x270] sm:$0xff]  ;;  %v3064_v59 = vld [vmem:[#allocation4 + $0x2a8] sm:$0xff] }
 0x8cf   :  { %3178 = vmatpush1.bf16.msra.mxu0 %v3091_v60  ;;  %3251 = vmatpush1.bf16.msra.mxu1 %v3093_v61  ;;  %v3066_v60 = vld [vmem:[#allocation4 + $0x2b8] sm:$0xff]  ;;  %v3065_v61 = vld [vmem:[#allocation4 + $0x2b0] sm:$0xff] }
 0x8d0   :  { %3179 = vmatprep.subr.bf16.mxu0 %v3100_v62  ;;  %3252 = vmatprep.subr.bf16.mxu1 %v3102_v32  ;;  %v3072_v62 = vld [vmem:[#allocation4 + $0x2e8] sm:$0xff]  ;;  %v3074_v32 = vld [vmem:[#allocation4 + $0x2f8] sm:$0xff] }
 0x8d3   :  { %3180 = vmatpush1.bf16.msra.mxu0 %v3099_v22  ;;  %3253 = vmatpush1.bf16.msra.mxu1 %v3101_v11  ;;  %v3071_v22 = vld [vmem:[#allocation4 + $0x2e0] sm:$0xff]  ;;  %v3073_v11 = vld [vmem:[#allocation4 + $0x2f0] sm:$0xff] }
 0x8d4   :  { %3295 = vmatprep.subr.bf16.mxu0 %v2984_v21  ;;  %3368 = vmatprep.subr.bf16.mxu1 %v2986_v39  ;;  %v3080_v21 = vld [vmem:[#allocation4 + $0x328] sm:$0xff]  ;;  %v3082_v39 = vld [vmem:[#allocation4 + $0x338] sm:$0xff] }
 0x8d6   :  { %3182 = vmatmul.mubr.bf16.vlgmr.msra.gmra.mrb[96].mxu0 %v7108_v33  ;;  %3255 = vmatmul.mubr.bf16.vlgmr.msra.gmra.mrb[96].mxu1 %v7108_v33 }
 0x8d7   :  { %3296 = vmatpush1.bf16.msra.mxu0 %v2983_v20  ;;  %3369 = vmatpush1.bf16.msra.mxu1 %v2985_v49  ;;  %v3088_v20 = vld [vmem:[#allocation4 + $0x368] sm:$0xff]  ;;  %v3090_v49 = vld [vmem:[#allocation4 + $0x378] sm:$0xff] }
 0x8d8   :  { %3297 = vmatprep.subr.bf16.mxu0 %v2992_v40  ;;  %3370 = vmatprep.subr.bf16.mxu1 %v2994_v8  ;;  %v3087_v40 = vld [vmem:[#allocation4 + $0x360] sm:$0xff]  ;;  %v3089_v8 = vld [vmem:[#allocation4 + $0x370] sm:$0xff] }
 0x8d9   :  { %3191 = vmatprep.mubr.bf16.mxu0 %v7112_v30  ;;  %3264 = vmatprep.mubr.bf16.mxu1 %v7112_v30 }
 0x8db   :  { %3298 = vmatpush1.bf16.msra.mxu0 %v2991_v16  ;;  %3371 = vmatpush1.bf16.msra.mxu1 %v2993_v36  ;;  %v3096_v16 = vld [vmem:[#allocation4 + $0x3a8] sm:$0xff]  ;;  %v3098_v36 = vld [vmem:[#allocation4 + $0x3b8] sm:$0xff] }
 0x8dc   :  { %3299 = vmatprep.subr.bf16.mxu0 %v3000_v42  ;;  %3372 = vmatprep.subr.bf16.mxu1 %v3002_v43  ;;  %v3095_v42 = vld [vmem:[#allocation4 + $0x3a0] sm:$0xff]  ;;  %v3097_v43 = vld [vmem:[#allocation4 + $0x3b0] sm:$0xff] }
 0x8de   :  { %3192 = vmatmul.mubr.bf16.gmra.mrb[100].mxu0 %v7120_v53  ;;  %3265 = vmatmul.mubr.bf16.gmra.mrb[100].mxu1 %v7120_v53 }
 0x8df   :  { %3300 = vmatpush1.bf16.msra.mxu0 %v2999_v50  ;;  %3373 = vmatpush1.bf16.msra.mxu1 %v3001_v38  ;;  %v3104_v50 = vld [vmem:[#allocation4 + $0x3e8] sm:$0xff]  ;;  %v3106_v38 = vld [vmem:[#allocation4 + $0x3f8] sm:$0xff] }
 0x8e0   :  { %3301 = vmatprep.subr.bf16.mxu0 %v3008_v45  ;;  %3374 = vmatprep.subr.bf16.mxu1 %v3010_v46  ;;  %v7150_v45 = vld [vmem:[#allocation5 + $0x8] sm:$0xff]  ;;  %v7152_v46 = vld [vmem:[#allocation5 + $0x18] sm:$0xff] }
 0x8e1   :  { %3201 = vmatprep.mubr.bf16.mxu0 %v7124_v44  ;;  %3274 = vmatprep.mubr.bf16.mxu1 %v7124_v44 }
 0x8e3   :  { %3302 = vmatpush1.bf16.msra.mxu0 %v3007_v51  ;;  %3375 = vmatpush1.bf16.msra.mxu1 %v3009_v14  ;;  %v7160_v51 = vld [vmem:[#allocation5 + $0x28] sm:$0xff]  ;;  %v7162_v14 = vld [vmem:[#allocation5 + $0x38] sm:$0xff] }
 0x8e4   :  { %3303 = vmatprep.subr.bf16.mxu0 %v3016_v31  ;;  %3376 = vmatprep.subr.bf16.mxu1 %v3018_v9  ;;  %v7170_v31 = vld [vmem:[#allocation5 + $0x20] sm:$0xff]  ;;  %v7172_v9 = vld [vmem:[#allocation5 + $0x30] sm:$0xff] }
 0x8e6   :  { %3202 = vmatmul.mubr.bf16.gmra.mrb[104].mxu0 %v7132_v10  ;;  %3275 = vmatmul.mubr.bf16.gmra.mrb[104].mxu1 %v7132_v10 }
 0x8e7   :  { %3304 = vmatpush1.bf16.msra.mxu0 %v3015_v19  ;;  %3377 = vmatpush1.bf16.msra.mxu1 %v3017_v13  ;;  %v7176_v19 = vld [vmem:[#allocation5 + $0x48] sm:$0xff]  ;;  %v7178_v13 = vld [vmem:[#allocation5 + $0x58] sm:$0xff] }
 0x8e8   :  { %3305 = vmatprep.subr.bf16.mxu0 %v3024_v27  ;;  %3378 = vmatprep.subr.bf16.mxu1 %v3026_v52  ;;  %v7186_v27 = vld [vmem:[#allocation5 + $0x50] sm:$0xff]  ;;  %v7188_v52 = vld [vmem:[#allocation5 + $0x68] sm:$0xff] }
 0x8e9   :  { %3211 = vmatprep.mubr.bf16.mxu0 %v7136_v5  ;;  %3284 = vmatprep.mubr.bf16.mxu1 %v7136_v5 }
 0x8eb   :  { %3306 = vmatpush1.bf16.msra.mxu0 %v3023_v4  ;;  %3379 = vmatpush1.bf16.msra.mxu1 %v3025_v29  ;;  %v7204_v4 = vld [vmem:[#allocation5 + $0x88] sm:$0xff]  ;;  %v7206_v29 = vld [vmem:[#allocation5 + $0x98] sm:$0xff] }
 0x8ec   :  { %3307 = vmatprep.subr.bf16.mxu0 %v3032_v37  ;;  %3380 = vmatprep.subr.bf16.mxu1 %v3034_v3  ;;  %v7214_v37 = vld [vmem:[#allocation5 + $0x90] sm:$0xff]  ;;  %v7216_v3 = vld [vmem:[#allocation5 + $0xa8] sm:$0xff] }
 0x8ee   :  { %3212 = vmatmul.mubr.bf16.gmra.mrb[108].mxu0 %v7144_v18  ;;  %3285 = vmatmul.mubr.bf16.gmra.mrb[108].mxu1 %v7144_v18 }
 0x8ef   :  { %3308 = vmatpush1.bf16.msra.mxu0 %v3031_v35  ;;  %3381 = vmatpush1.bf16.msra.mxu1 %v3033_v26  ;;  %v7218_v35 = vld [vmem:[#allocation5 + $0xb8] sm:$0xff]  ;;  %v7228_v26 = vld [vmem:[#allocation5 + $0xb0] sm:$0xff] }
 0x8f0   :  { %3309 = vmatprep.subr.bf16.mxu0 %v3040_v34  ;;  %3382 = vmatprep.subr.bf16.mxu1 %v3042_v25  ;;  %v7232_v34 = vld [vmem:[#allocation5 + $0xc8] sm:$0xff]  ;;  %v7234_v25 = vld [vmem:[#allocation5 + $0xd8] sm:$0xff] }
 0x8f1   :  { %3327 = vmatprep.mubr.bf16.mxu0 %v7102_v15  ;;  %3400 = vmatprep.mubr.bf16.mxu1 %v7102_v15  ;;  %v3063_v15 = vld [vmem:[#allocation4 + $0x2a0] sm:$0xff] }
 0x8f3   :  { %3310 = vmatpush1.bf16.msra.mxu0 %v3039_v2  ;;  %3383 = vmatpush1.bf16.msra.mxu1 %v3041_v24  ;;  %v7242_v2 = vld [vmem:[#allocation5 + $0xd0] sm:$0xff]  ;;  %v7244_v24 = vld [vmem:[#allocation5 + $0xe8] sm:$0xff] }
 0x8f4   :  { %3311 = vmatprep.subr.bf16.mxu0 %v3048_v55  ;;  %3384 = vmatprep.subr.bf16.mxu1 %v3050_v28  ;;  %v7246_v55 = vld [vmem:[#allocation5 + $0xf8] sm:$0xff]  ;;  %v7256_v28 = vld [vmem:[#allocation5 + $0xf0] sm:$0xff] }
 0x8f7   :  { %3312 = vmatpush1.bf16.msra.mxu0 %v3047_v54  ;;  %3385 = vmatpush1.bf16.msra.mxu1 %v3049_v56  ;;  %v3538_v54 = vld [vmem:[#allocation6 + $0x8] sm:$0xff]  ;;  %v3540_v56 = vld [vmem:[#allocation6 + $0x18] sm:$0xff] }
 0x8f8   :  { %3313 = vmatprep.subr.bf16.mxu0 %v3056_v57  ;;  %3386 = vmatprep.subr.bf16.mxu1 %v3058_v0  ;;  %v3539_v57 = vld [vmem:[#allocation6 + $0x10] sm:$0xff]  ;;  %v3542_v0 = vld [vmem:[#allocation6 + $0x28] sm:$0xff] }
 0x8fb   :  { %3314 = vmatpush1.bf16.msra.mxu0 %v3055_v58  ;;  %3387 = vmatpush1.bf16.msra.mxu1 %v3057_v17  ;;  %v3544_v58 = vld [vmem:[#allocation6 + $0x38] sm:$0xff]  ;;  %v3541_v17 = vld [vmem:[#allocation6 + $0x20] sm:$0xff] }
 0x8fc   :  { %3315 = vmatprep.subr.bf16.mxu0 %v3064_v59  ;;  %3388 = vmatprep.subr.bf16.mxu1 %v3066_v60  ;;  %v3543_v59 = vld [vmem:[#allocation6 + $0x30] sm:$0xff]  ;;  %v3546_v60 = vld [vmem:[#allocation6 + $0x48] sm:$0xff] }
 0x8ff   :  { %3316 = vmatpush1.bf16.msra.mxu0 %v3063_v15  ;;  %3389 = vmatpush1.bf16.msra.mxu1 %v3065_v61  ;;  %v3548_v15 = vld [vmem:[#allocation6 + $0x58] sm:$0xff]  ;;  %v3545_v61 = vld [vmem:[#allocation6 + $0x40] sm:$0xff] }
 0x900   :  { %3317 = vmatprep.subr.bf16.mxu0 %v3072_v62  ;;  %3390 = vmatprep.subr.bf16.mxu1 %v3074_v32  ;;  %v3547_v62 = vld [vmem:[#allocation6 + $0x50] sm:$0xff]  ;;  %v3550_v32 = vld [vmem:[#allocation6 + $0x68] sm:$0xff] }
 0x903   :  { %3318 = vmatpush1.bf16.msra.mxu0 %v3071_v22  ;;  %3391 = vmatpush1.bf16.msra.mxu1 %v3073_v11  ;;  %v3552_v22 = vld [vmem:[#allocation6 + $0x78] sm:$0xff]  ;;  %v3549_v11 = vld [vmem:[#allocation6 + $0x60] sm:$0xff] }
 0x904   :  { %3319 = vmatprep.subr.bf16.mxu0 %v3080_v21  ;;  %3392 = vmatprep.subr.bf16.mxu1 %v3082_v39  ;;  %v3551_v21 = vld [vmem:[#allocation6 + $0x70] sm:$0xff]  ;;  %v3554_v39 = vld [vmem:[#allocation6 + $0x88] sm:$0xff] }
 0x907   :  { %3320 = vmatpush1.bf16.msra.mxu0 %v3079_v1  ;;  %3393 = vmatpush1.bf16.msra.mxu1 %v3081_v7  ;;  %v3556_v1 = vld [vmem:[#allocation6 + $0x98] sm:$0xff]  ;;  %v3553_v7 = vld [vmem:[#allocation6 + $0x80] sm:$0xff] }
 0x908   :  { %3321 = vmatprep.subr.bf16.mxu0 %v3088_v20  ;;  %3394 = vmatprep.subr.bf16.mxu1 %v3090_v49  ;;  %v3555_v20 = vld [vmem:[#allocation6 + $0x90] sm:$0xff]  ;;  %v3558_v49 = vld [vmem:[#allocation6 + $0xa8] sm:$0xff] }
 0x90b   :  { %3322 = vmatpush1.bf16.msra.mxu0 %v3087_v40  ;;  %3395 = vmatpush1.bf16.msra.mxu1 %v3089_v8  ;;  %v3560_v40 = vld [vmem:[#allocation6 + $0xb8] sm:$0xff]  ;;  %v3557_v8 = vld [vmem:[#allocation6 + $0xa0] sm:$0xff] }
 0x90c   :  { %3323 = vmatprep.subr.bf16.mxu0 %v3096_v16  ;;  %3396 = vmatprep.subr.bf16.mxu1 %v3098_v36  ;;  %v3559_v16 = vld [vmem:[#allocation6 + $0xb0] sm:$0xff]  ;;  %v3562_v36 = vld [vmem:[#allocation6 + $0xc8] sm:$0xff] }
 0x90f   :  { %3324 = vmatpush1.bf16.msra.mxu0 %v3095_v42  ;;  %3397 = vmatpush1.bf16.msra.mxu1 %v3097_v43  ;;  %v3564_v42 = vld [vmem:[#allocation6 + $0xd8] sm:$0xff]  ;;  %v3561_v43 = vld [vmem:[#allocation6 + $0xc0] sm:$0xff] }
 0x910   :  { %3325 = vmatprep.subr.bf16.mxu0 %v3104_v50  ;;  %3398 = vmatprep.subr.bf16.mxu1 %v3106_v38  ;;  %v3563_v50 = vld [vmem:[#allocation6 + $0xd0] sm:$0xff]  ;;  %v3566_v38 = vld [vmem:[#allocation6 + $0xe8] sm:$0xff] }
 0x913   :  { %3326 = vmatpush1.bf16.msra.mxu0 %v3103_v23  ;;  %3399 = vmatpush1.bf16.msra.mxu1 %v3105_v41  ;;  %v3568_v23 = vld [vmem:[#allocation6 + $0xf8] sm:$0xff]  ;;  %v3565_v41 = vld [vmem:[#allocation6 + $0xe0] sm:$0xff] }
 0x914   :  { %3577 = vmatprep.subr.bf16.mxu0 %v7150_v45  ;;  %3618 = vmatprep.subr.bf16.mxu1 %v7152_v46 }
 0x916   :  { %3328 = vmatmul.mubr.bf16.vlgmr.msra.gmra.mrb[112].mxu0 %v7108_v33  ;;  %3401 = vmatmul.mubr.bf16.vlgmr.msra.gmra.mrb[112].mxu1 %v7108_v33  ;;  %v7184_v33 = vld [vmem:[#allocation5 + $0x40] sm:$0xff] }
 0x917   :  { %3578 = vmatpush1.bf16.msra.mxu0 %v7156_v48  ;;  %3619 = vmatpush1.bf16.msra.mxu1 %v7158_v47 }
 0x918   :  { %3579 = vmatprep.subr.bf16.mxu0 %v7160_v51  ;;  %3620 = vmatprep.subr.bf16.mxu1 %v7162_v14 }
 0x919   :  { %3337 = vmatprep.mubr.bf16.mxu0 %v7112_v30  ;;  %3410 = vmatprep.mubr.bf16.mxu1 %v7112_v30  ;;  %v7198_v30 = vld [vmem:[#allocation5 + $0x60] sm:$0xff] }
 0x91b   :  { %3580 = vmatpush1.bf16.msra.mxu0 %v7170_v31  ;;  %3621 = vmatpush1.bf16.msra.mxu1 %v7172_v9 }
 0x91c   :  { %3581 = vmatprep.subr.bf16.mxu0 %v7176_v19  ;;  %3622 = vmatprep.subr.bf16.mxu1 %v7178_v13 }
 0x91e   :  { %3338 = vmatmul.mubr.bf16.gmra.mrb[116].mxu0 %v7120_v53  ;;  %3411 = vmatmul.mubr.bf16.gmra.mrb[116].mxu1 %v7120_v53  ;;  %v7212_v53 = vld [vmem:[#allocation5 + $0x80] sm:$0xff] }
 0x91f   :  { %3582 = vmatpush1.bf16.msra.mxu0 %v7184_v33  ;;  %3623 = vmatpush1.bf16.msra.mxu1 %v7186_v27 }
 0x920   :  { %3583 = vmatprep.subr.bf16.mxu0 %v7188_v52  ;;  %3624 = vmatprep.subr.bf16.mxu1 %v7190_v12 }
 0x921   :  { %3347 = vmatprep.mubr.bf16.mxu0 %v7124_v44  ;;  %3420 = vmatprep.mubr.bf16.mxu1 %v7124_v44  ;;  %v7226_v44 = vld [vmem:[#allocation5 + $0xa0] sm:$0xff] }
 0x923   :  { %3584 = vmatpush1.bf16.msra.mxu0 %v7198_v30  ;;  %3625 = vmatpush1.bf16.msra.mxu1 %v7200_v6 }
 0x924   :  { %3585 = vmatprep.subr.bf16.mxu0 %v7204_v4  ;;  %3626 = vmatprep.subr.bf16.mxu1 %v7206_v29 }
 0x926   :  { %3348 = vmatmul.mubr.bf16.gmra.mrb[120].mxu0 %v7132_v10  ;;  %3421 = vmatmul.mubr.bf16.gmra.mrb[120].mxu1 %v7132_v10  ;;  %v7240_v10 = vld [vmem:[#allocation5 + $0xc0] sm:$0xff] }
 0x927   :  { %3586 = vmatpush1.bf16.msra.mxu0 %v7212_v53  ;;  %3627 = vmatpush1.bf16.msra.mxu1 %v7214_v37 }
 0x928   :  { %3587 = vmatprep.subr.bf16.mxu0 %v7216_v3  ;;  %3628 = vmatprep.subr.bf16.mxu1 %v7218_v35 }
 0x929   :  { %3357 = vmatprep.mubr.bf16.mxu0 %v7136_v5  ;;  %3430 = vmatprep.mubr.bf16.mxu1 %v7136_v5  ;;  %v7254_v5 = vld [vmem:[#allocation5 + $0xe0] sm:$0xff] }
 0x92b   :  { %3588 = vmatpush1.bf16.msra.mxu0 %v7226_v44  ;;  %3629 = vmatpush1.bf16.msra.mxu1 %v7228_v26 }
 0x92c   :  { %3589 = vmatprep.subr.bf16.mxu0 %v7232_v34  ;;  %3630 = vmatprep.subr.bf16.mxu1 %v7234_v25 }
 0x92e   :  { %3358 = vmatmul.mubr.bf16.gmra.mrb[124].mxu0 %v7144_v18  ;;  %3431 = vmatmul.mubr.bf16.gmra.mrb[124].mxu1 %v7144_v18  ;;  %v3537_v18 = vld [vmem:[#allocation6] sm:$0xff] }
 0x92f   :  { %3590 = vmatpush1.bf16.msra.mxu0 %v7240_v10  ;;  %3631 = vmatpush1.bf16.msra.mxu1 %v7242_v2 }
 0x930   :  { %3591 = vmatprep.subr.bf16.mxu0 %v7244_v24  ;;  %3632 = vmatprep.subr.bf16.mxu1 %v7246_v55 }
 0x931   :  { %3609 = vmatprep.mubr.bf16.mxu0 %v7988_v63  ;;  %3650 = vmatprep.mubr.bf16.mxu1 %v7988_v63 }
 0x933   :  { %3592 = vmatpush1.bf16.msra.mxu0 %v7254_v5  ;;  %3633 = vmatpush1.bf16.msra.mxu1 %v7256_v28 }
 0x934   :  { %3663 = vmatprep.subr.bf16.mxu0 %v3538_v54  ;;  %3704 = vmatprep.subr.bf16.mxu1 %v3540_v56  ;;  %v3567_v54 = vld [vmem:[#allocation6 + $0xf0] sm:$0xff]  ;;  %v7307_v56 = vld [vmem:[%s7845_s8] sm:$0xff] }
 0x936   :  { %3610 = vmatmul.mubr.bf16.vlgmr.msra.gmra.mrb[128].mxu0 %v7988_v63  ;;  %3651 = vmatmul.mubr.bf16.vlgmr.msra.gmra.mrb[128].mxu1 %v7988_v63 }
 0x937   :  { %3664 = vmatpush1.bf16.msra.mxu0 %v3537_v18  ;;  %3705 = vmatpush1.bf16.msra.mxu1 %v3539_v57  ;;  %v8239_v18 = vld [vmem:[#allocation55_spill] sm:$0xff] }
 0x938   :  { %3665 = vmatprep.subr.bf16.mxu0 %v3542_v0  ;;  %3706 = vmatprep.subr.bf16.mxu1 %v3544_v58  ;;  %v8240_v57 = vsub.s32 0, %v8239_v18  ;;  %v8241_v58 = vsub.s32 2, %v8239_v18 }
 0x939   :  { %3695 = vmatprep.mubr.bf16.mxu0 %v7988_v63  ;;  %3736 = vmatprep.mubr.bf16.mxu1 %v7988_v63 }
 0x93a   :  { %v7312_v0 = vrot.slane %v7307_v56, %v8240_v57 }
 0x93b   :  { %3666 = vmatpush1.bf16.msra.mxu0 %v3541_v17  ;;  %3707 = vmatpush1.bf16.msra.mxu1 %v3543_v59  ;;  %v7317_v17 = vrot.slane %v7307_v56, %v8241_v58 }
 0x93c   :  { %3667 = vmatprep.subr.bf16.mxu0 %v3546_v60  ;;  %3708 = vmatprep.subr.bf16.mxu1 %v3548_v15  ;;  %v8242_v15 = vsub.s32 3, %v8239_v18 }
 0x93f   :  { %3668 = vmatpush1.bf16.msra.mxu0 %v3545_v61  ;;  %3709 = vmatpush1.bf16.msra.mxu1 %v3547_v62  ;;  %v7326_v61 = vrot.slane %v7307_v56, %v8242_v15 }
 0x940   :  { %3669 = vmatprep.subr.bf16.mxu0 %v3550_v32  ;;  %3710 = vmatprep.subr.bf16.mxu1 %v3552_v22  ;;  %v8243_v22 = vsub.s32 1, %v8239_v18 }
 0x943   :  { %3670 = vmatpush1.bf16.msra.mxu0 %v3549_v11  ;;  %3711 = vmatpush1.bf16.msra.mxu1 %v3551_v21  ;;  %v7335_v11 = vrot.slane %v7307_v56, %v8243_v22 }
 0x944   :  { %3671 = vmatprep.subr.bf16.mxu0 %v3554_v39  ;;  %3712 = vmatprep.subr.bf16.mxu1 %v3556_v1 }
 0x947   :  { %3672 = vmatpush1.bf16.msra.mxu0 %v3553_v7  ;;  %3713 = vmatpush1.bf16.msra.mxu1 %v3555_v20 }
 0x948   :  { %3673 = vmatprep.subr.bf16.mxu0 %v3558_v49  ;;  %3714 = vmatprep.subr.bf16.mxu1 %v3560_v40 }
 0x94b   :  { %3674 = vmatpush1.bf16.msra.mxu0 %v3557_v8  ;;  %3715 = vmatpush1.bf16.msra.mxu1 %v3559_v16 }
 0x94c   :  { %3675 = vmatprep.subr.bf16.mxu0 %v3562_v36  ;;  %3716 = vmatprep.subr.bf16.mxu1 %v3564_v42 }
 0x94f   :  { %3676 = vmatpush1.bf16.msra.mxu0 %v3561_v43  ;;  %3717 = vmatpush1.bf16.msra.mxu1 %v3563_v50 }
 0x950   :  { %3677 = vmatprep.subr.bf16.mxu0 %v3566_v38  ;;  %3718 = vmatprep.subr.bf16.mxu1 %v3568_v23 }
 0x953   :  { %3678 = vmatpush1.bf16.msra.mxu0 %v3565_v41  ;;  %3719 = vmatpush1.bf16.msra.mxu1 %v3567_v54 }
 0x954   :  { %3790 = vmatprep.subr.bf16.mxu0 %v7150_v45  ;;  %3831 = vmatprep.subr.bf16.mxu1 %v7152_v46 }
 0x956   :  { %3696 = vmatmul.mubr.bf16.vlgmr.msra.gmra.mrb[132].mxu0 %v7988_v63  ;;  %3737 = vmatmul.mubr.bf16.vlgmr.msra.gmra.mrb[132].mxu1 %v7988_v63 }
 0x957   :  { %3791 = vmatpush1.bf16.msra.mxu0 %v7156_v48  ;;  %3832 = vmatpush1.bf16.msra.mxu1 %v7158_v47 }
 0x958   :  { %3792 = vmatprep.subr.bf16.mxu0 %v7160_v51  ;;  %3833 = vmatprep.subr.bf16.mxu1 %v7162_v14 }
 0x959   :  { %3822 = vmatprep.mubr.bf16.mxu0 %v7988_v63  ;;  %3863 = vmatprep.mubr.bf16.mxu1 %v7988_v63 }
 0x95b   :  { %3793 = vmatpush1.bf16.msra.mxu0 %v7170_v31  ;;  %3834 = vmatpush1.bf16.msra.mxu1 %v7172_v9 }
 0x95c   :  { %3794 = vmatprep.subr.bf16.mxu0 %v7176_v19  ;;  %3835 = vmatprep.subr.bf16.mxu1 %v7178_v13 }
 0x95f   :  { %3795 = vmatpush1.bf16.msra.mxu0 %v7184_v33  ;;  %3836 = vmatpush1.bf16.msra.mxu1 %v7186_v27 }
 0x960   :  { %3796 = vmatprep.subr.bf16.mxu0 %v7188_v52  ;;  %3837 = vmatprep.subr.bf16.mxu1 %v7190_v12 }
 0x963   :  { %3797 = vmatpush1.bf16.msra.mxu0 %v7198_v30  ;;  %3838 = vmatpush1.bf16.msra.mxu1 %v7200_v6 }
 0x964   :  { %3798 = vmatprep.subr.bf16.mxu0 %v7204_v4  ;;  %3839 = vmatprep.subr.bf16.mxu1 %v7206_v29 }
 0x967   :  { %3799 = vmatpush1.bf16.msra.mxu0 %v7212_v53  ;;  %3840 = vmatpush1.bf16.msra.mxu1 %v7214_v37 }
 0x968   :  { %3800 = vmatprep.subr.bf16.mxu0 %v7216_v3  ;;  %3841 = vmatprep.subr.bf16.mxu1 %v7218_v35 }
 0x96b   :  { %3801 = vmatpush1.bf16.msra.mxu0 %v7226_v44  ;;  %3842 = vmatpush1.bf16.msra.mxu1 %v7228_v26 }
 0x96c   :  { %3802 = vmatprep.subr.bf16.mxu0 %v7232_v34  ;;  %3843 = vmatprep.subr.bf16.mxu1 %v7234_v25 }
 0x96f   :  { %3803 = vmatpush1.bf16.msra.mxu0 %v7240_v10  ;;  %3844 = vmatpush1.bf16.msra.mxu1 %v7242_v2 }
 0x970   :  { %3804 = vmatprep.subr.bf16.mxu0 %v7244_v24  ;;  %3845 = vmatprep.subr.bf16.mxu1 %v7246_v55 }
 0x973   :  { %3805 = vmatpush1.bf16.msra.mxu0 %v7254_v5  ;;  %3846 = vmatpush1.bf16.msra.mxu1 %v7256_v28 }
 0x974   :  { %3899 = vmatprep.subr.bf16.mxu0 %v7150_v45  ;;  %3940 = vmatprep.subr.bf16.mxu1 %v7152_v46 }
 0x9a9   :  { %v7319_v59 = vpop.f32.mrb[96].mxu0  ;;  %v7321_v60 = vpop.f32.mrb[96].mxu1 }
 0x9aa   :  { %v7328_v62 = vpop.f32.mrb[97].mxu0  ;;  %v7330_v32 = vpop.f32.mrb[97].mxu1 }
 0x9ab   :  { %v3187_v21 = vpop.f32.mrb[98].mxu0  ;;  %v3260_v39 = vpop.f32.mrb[98].mxu1 }
 0x9ac   :  { %v7338_v1 = vadd.f32 %v3187_v21, %v7312_v0  ;;  %v3189_v7 = vpop.f32.mrb[99].mxu0  ;;  %v7341_v20 = vadd.f32 %v3260_v39, %v7317_v17  ;;  %v3262_v49 = vpop.f32.mrb[99].mxu1 }
 0x9ad   :  { %v7344_v40 = vadd.f32 %v3189_v7, %v7335_v11  ;;  %v7347_v8 = vadd.f32 %v3262_v49, %v7326_v61 }
 0x9ae   :  { %8244 = vst [vmem:[#allocation60_spill] sm:$0xff] %v7341_v20 }
 0x9af   :  { %8245 = vst [vmem:[#allocation62_spill] sm:$0xff] %v7344_v40  ;;  %8246 = vst [vmem:[#allocation61_spill] sm:$0xff] %v7347_v8 }
 0x9b1   :  { %v3193_v16 = vpop.f32.mrb[100].mxu0  ;;  %v3266_v36 = vpop.f32.mrb[100].mxu1 }
 0x9b2   :  { %v7350_v42 = vadd.f32 %v3193_v16, %v7312_v0  ;;  %v3195_v43 = vpop.f32.mrb[101].mxu0  ;;  %v7353_v50 = vadd.f32 %v3266_v36, %v7317_v17  ;;  %v3268_v38 = vpop.f32.mrb[101].mxu1 }
 0x9b3   :  { %v7356_v23 = vadd.f32 %v3195_v43, %v7335_v11  ;;  %v3197_v41 = vpop.f32.mrb[102].mxu0  ;;  %v7359_v54 = vadd.f32 %v3268_v38, %v7326_v61  ;;  %v3270_v57 = vpop.f32.mrb[102].mxu1 }
 0x9b4   :  { %8247 = vst [vmem:[#allocation64_spill] sm:$0xff] %v7350_v42  ;;  %8248 = vst [vmem:[#allocation103_spill] sm:$0xff] %v7353_v50  ;;  %v7362_v58 = vadd.f32 %v3197_v41, %v7312_v0  ;;  %v3199_v15 = vpop.f32.mrb[103].mxu0  ;;  %v7365_v22 = vadd.f32 %v3270_v57, %v7317_v17  ;;  %v3272_v21 = vpop.f32.mrb[103].mxu1 }
 0x9b5   :  { %8249 = vst [vmem:[#allocation106_spill] sm:$0xff] %v7356_v23  ;;  %8250 = vst [vmem:[#allocation105_spill] sm:$0xff] %v7359_v54  ;;  %v7368_v39 = vadd.f32 %v3199_v15, %v7335_v11  ;;  %v7371_v7 = vadd.f32 %v3272_v21, %v7326_v61 }
 0x9b6   :  { %8251 = vst [vmem:[#allocation107_spill] sm:$0xff] %v7362_v58  ;;  %8252 = vst [vmem:[#allocation63_spill] sm:$0xff] %v7365_v22 }
 0x9b7   :  { %8253 = vst [vmem:[#allocation66_spill] sm:$0xff] %v7368_v39  ;;  %8254 = vst [vmem:[#allocation65_spill] sm:$0xff] %v7371_v7 }
 0x9b9   :  { %v3203_v49 = vpop.f32.mrb[104].mxu0  ;;  %v3276_v16 = vpop.f32.mrb[104].mxu1 }
 0x9ba   :  { %v7374_v36 = vadd.f32 %v3203_v49, %v7312_v0  ;;  %v3205_v43 = vpop.f32.mrb[105].mxu0  ;;  %v7377_v38 = vadd.f32 %v3276_v16, %v7317_v17  ;;  %v3278_v41 = vpop.f32.mrb[105].mxu1 }
 0x9bb   :  { %v7380_v57 = vadd.f32 %v3205_v43, %v7335_v11  ;;  %v3207_v22 = vpop.f32.mrb[106].mxu0  ;;  %v7383_v15 = vadd.f32 %v3278_v41, %v7326_v61  ;;  %v3280_v39 = vpop.f32.mrb[106].mxu1 }
 0x9bc   :  { %8255 = vst [vmem:[#allocation67_spill] sm:$0xff] %v7374_v36  ;;  %8256 = vst [vmem:[#allocation100_spill] sm:$0xff] %v7377_v38  ;;  %v7386_v21 = vadd.f32 %v3207_v22, %v7312_v0  ;;  %v3209_v7 = vpop.f32.mrb[107].mxu0  ;;  %v7389_v49 = vadd.f32 %v3280_v39, %v7317_v17  ;;  %v3282_v36 = vpop.f32.mrb[107].mxu1 }
 0x9bd   :  { %8257 = vst [vmem:[#allocation102_spill] sm:$0xff] %v7380_v57  ;;  %8258 = vst [vmem:[#allocation101_spill] sm:$0xff] %v7383_v15  ;;  %v7392_v16 = vadd.f32 %v3209_v7, %v7335_v11  ;;  %v7395_v38 = vadd.f32 %v3282_v36, %v7326_v61 }
 0x9be   :  { %8259 = vst [vmem:[#allocation104_spill] sm:$0xff] %v7386_v21  ;;  %8260 = vst [vmem:[#allocation50_spill] sm:$0xff] %v7389_v49 }
 0x9bf   :  { %8261 = vst [vmem:[#allocation51_spill] sm:$0xff] %v7392_v16  ;;  %8262 = vst [vmem:[#allocation52_spill] sm:$0xff] %v7395_v38 }
 0x9c1   :  { %v3213_v43 = vpop.f32.mrb[108].mxu0  ;;  %v3286_v57 = vpop.f32.mrb[108].mxu1 }
 0x9c2   :  { %v7398_v41 = vadd.f32 %v3213_v43, %v7312_v0  ;;  %v3215_v15 = vpop.f32.mrb[109].mxu0  ;;  %v7401_v22 = vadd.f32 %v3286_v57, %v7317_v17  ;;  %v3288_v21 = vpop.f32.mrb[109].mxu1 }
 0x9c3   :  { %v7404_v39 = vadd.f32 %v3215_v15, %v7335_v11  ;;  %v3217_v49 = vpop.f32.mrb[110].mxu0  ;;  %v7407_v7 = vadd.f32 %v3288_v21, %v7326_v61  ;;  %v3290_v16 = vpop.f32.mrb[110].mxu1 }
 0x9c4   :  { %8263 = vst [vmem:[#allocation53_spill] sm:$0xff] %v7398_v41  ;;  %8264 = vst [vmem:[#allocation56_spill] sm:$0xff] %v7401_v22  ;;  %v7410_v36 = vadd.f32 %v3217_v49, %v7312_v0  ;;  %v3219_v38 = vpop.f32.mrb[111].mxu0  ;;  %v7413_v43 = vadd.f32 %v3290_v16, %v7317_v17  ;;  %v3292_v41 = vpop.f32.mrb[111].mxu1 }
 0x9c5   :  { %8265 = vst [vmem:[#allocation58_spill] sm:$0xff] %v7404_v39  ;;  %8266 = vst [vmem:[#allocation57_spill] sm:$0xff] %v7407_v7  ;;  %v7416_v57 = vadd.f32 %v3219_v38, %v7335_v11  ;;  %v7419_v22 = vadd.f32 %v3292_v41, %v7326_v61 }
 0x9c6   :  { %8267 = vst [vmem:[#allocation68_spill] sm:$0xff] %v7410_v36  ;;  %8268 = vst [vmem:[#allocation70_spill] sm:$0xff] %v7413_v43 }
 0x9c7   :  { %8269 = vst [vmem:[#allocation69_spill] sm:$0xff] %v7416_v57  ;;  %8270 = vst [vmem:[#allocation72_spill] sm:$0xff] %v7419_v22 }
 0x9e9   :  { %v3329_v15 = vpop.f32.mrb[112].mxu0  ;;  %v3402_v39 = vpop.f32.mrb[112].mxu1 }
 0x9ea   :  { %v3331_v58 = vpop.f32.mrb[113].mxu0  ;;  %v3404_v21 = vpop.f32.mrb[113].mxu1 }
 0x9eb   :  { %v3333_v7 = vpop.f32.mrb[114].mxu0  ;;  %v3406_v54 = vpop.f32.mrb[114].mxu1 }
 0x9ec   :  { %v3335_v23 = vpop.f32.mrb[115].mxu0  ;;  %v3408_v49 = vpop.f32.mrb[115].mxu1 }
 0x9f1   :  { %v3339_v36 = vpop.f32.mrb[116].mxu0  ;;  %v3412_v50 = vpop.f32.mrb[116].mxu1 }
 0x9f2   :  { %v3341_v42 = vpop.f32.mrb[117].mxu0  ;;  %v3414_v16 = vpop.f32.mrb[117].mxu1 }
 0x9f3   :  { %v3343_v43 = vpop.f32.mrb[118].mxu0  ;;  %v3416_v8 = vpop.f32.mrb[118].mxu1 }
 0x9f4   :  { %v3345_v40 = vpop.f32.mrb[119].mxu0  ;;  %v3418_v38 = vpop.f32.mrb[119].mxu1  ;;  %v3186_v8 = vadd.f32 %v7328_v62, %v7335_v11 }
 0x9f5   :  { %v3184_v40 = vadd.f32 %v7319_v59, %v7312_v0 }
 0x9f9   :  { %v3349_v57 = vpop.f32.mrb[120].mxu0  ;;  %v3422_v20 = vpop.f32.mrb[120].mxu1 }
 0x9fa   :  { %v3351_v41 = vpop.f32.mrb[121].mxu0  ;;  %v3424_v22 = vpop.f32.mrb[121].mxu1  ;;  %v3257_v20 = vadd.f32 %v7321_v60, %v7317_v17 }
 0x9fb   :  { %v3353_v15 = vpop.f32.mrb[122].mxu0  ;;  %v3426_v39 = vpop.f32.mrb[122].mxu1  ;;  %v3259_v22 = vadd.f32 %v7330_v32, %v7326_v61 }
 0x9fc   :  { %v3355_v58 = vpop.f32.mrb[123].mxu0  ;;  %v3428_v21 = vpop.f32.mrb[123].mxu1 }
 0xa01   :  { %v3359_v7 = vpop.f32.mrb[124].mxu0  ;;  %v3432_v54 = vpop.f32.mrb[124].mxu1 }
 0xa02   :  { %v3361_v23 = vpop.f32.mrb[125].mxu0  ;;  %v3434_v49 = vpop.f32.mrb[125].mxu1 }
 0xa03   :  { %v3363_v36 = vpop.f32.mrb[126].mxu0  ;;  %v3436_v50 = vpop.f32.mrb[126].mxu1 }
 0xa04   :  { %v3365_v42 = vpop.f32.mrb[127].mxu0  ;;  %v3438_v16 = vpop.f32.mrb[127].mxu1 }
 0xa09   :  { %v3611_v43 = vpop.f32.mrb[128].mxu0  ;;  %v3652_v57 = vpop.f32.mrb[128].mxu1 }
 0xa0a   :  { %v3659_v38 = vadd.f32 %v3611_v43, %v3184_v40  ;;  %v3661_v41 = vadd.f32 %v3652_v57, %v3257_v20  ;;  %v3613_v15 = vpop.f32.mrb[129].mxu0  ;;  %v3654_v39 = vpop.f32.mrb[129].mxu1 }
 0xa0b   :  { %v3660_v58 = vadd.f32 %v3613_v15, %v3186_v8  ;;  %v3662_v21 = vadd.f32 %v3654_v39, %v3259_v22  ;;  %v3615_v7 = vpop.f32.mrb[130].mxu0  ;;  %v3656_v54 = vpop.f32.mrb[130].mxu1  ;;  %v8273_v15 = vsub.s32 6, %v8239_v18 }
 0xa0c   :  { %v3749_v0 = vmul.f32 0.5, %v3659_v38  ;;  %v3616_v59 = vpop.f32.mrb[131].mxu0  ;;  %v3657_v23 = vpop.f32.mrb[131].mxu1  ;;  %v8272_v38 = vsub.s32 4, %v8239_v18  ;;  %v8275_v7 = vsub.s32 7, %v8239_v18 }
 0xa0d   :  { %v3753_v17 = vmul.f32 0.5, %v3660_v58  ;;  %v3758_v60 = vmul.f32 0.5, %v3662_v21  ;;  %v3136_v39 = vrot.slane %v7307_v56, %v8273_v15  ;;  %v8274_v58 = vsub.s32 5, %v8239_v18 }
 0xa0e   :  { %5455 = vtanh.f32 %v3749_v0  ;;  %v3140_v54 = vrot.slane %v7307_v56, %v8275_v7 }
 0xa0f   :  { %5457 = vtanh.f32 %v3753_v17  ;;  %v3132_v21 = vrot.slane %v7307_v56, %v8274_v58  ;;  %v3437_v23 = vadd.f32 %v3436_v50, %v3136_v39 }
 0xa10   :  { %5459 = vtanh.f32 %v3661_v41  ;;  %v3128_v41 = vrot.slane %v7307_v56, %v8272_v38 }
 0xa11   :  { %5461 = vtanh.f32 %v3758_v60  ;;  %v3366_v17 = vadd.f32 %v3365_v42, %v3132_v21  ;;  %v3439_v60 = vadd.f32 %v3438_v16, %v3140_v54 }
 0xa12   :  { %v3364_v59 = vadd.f32 %v3363_v36, %v3128_v41 }
 0xa18   :  { %v5456_v62 = vpop.eup %5455 }
 0xa19   :  { %v5458_v61 = vpop.eup %5457  ;;  %v3751_v32 = vadd.f32 1.0, %v5456_v62 }
 0xa1a   :  { %v3755_v11 = vadd.f32 1.0, %v5458_v61  ;;  %v5460_v40 = vpop.eup %5459 }
 0xa1b   :  { %v3752_v49 = vmul.f32 0.5, %v3751_v32  ;;  %v5462_v57 = vpop.eup %5461 }
 0xa1c   :  { %v3756_v20 = vmul.f32 0.5, %v3755_v11  ;;  %v3760_v0 = vadd.f32 1.0, %v5462_v57 }
 0xa1d   :  { %v3776_v8 = vmul.f32 %v5460_v40, %v3752_v49 }
 0xa1e   :  { %v3775_v22 = vmul.f32 0.0, %v3756_v20  ;;  %v3761_v20 = vmul.f32 0.5, %v3760_v0 }
 0xa20   :  { %v7429_v43 = vadd.f32 %v3776_v8, %v3775_v22 }
 0xa22   :  { %8271 = vst [vmem:[#allocation108_spill] sm:$0xff] %v7429_v43  ;;  %5463 = vtanh.f32 %v7429_v43 }
 0xa29   :  { %v3697_v62 = vpop.f32.mrb[132].mxu0  ;;  %v3738_v61 = vpop.f32.mrb[132].mxu1 }
 0xa2a   :  { %v3745_v32 = vadd.f32 %v3697_v62, %v3364_v59  ;;  %v3747_v11 = vadd.f32 %v3738_v61, %v3437_v23  ;;  %v3699_v49 = vpop.f32.mrb[133].mxu0  ;;  %v3740_v40 = vpop.f32.mrb[133].mxu1 }
 0xa2b   :  { %v3746_v8 = vadd.f32 %v3699_v49, %v3366_v17  ;;  %v3748_v22 = vadd.f32 %v3740_v40, %v3439_v60  ;;  %v3701_v38 = vpop.f32.mrb[134].mxu0  ;;  %v3742_v15 = vpop.f32.mrb[134].mxu1 }
 0xa2c   :  { %v5464_v58 = vpop.eup %5463  ;;  %v3762_v18 = vmul.f32 0.5, %v3745_v32  ;;  %v3702_v43 = vpop.f32.mrb[135].mxu0  ;;  %v8277_v15 = vld [vmem:[#allocation62_spill] sm:$0xff] }
 0xa2d   :  { %v3743_v56 = vpop.f32.mrb[135].mxu1  ;;  %v3782_v57 = vmul.f32 %v5464_v58, %v3761_v20  ;;  %v3766_v36 = vmul.f32 0.5, %v3746_v8  ;;  %v3771_v42 = vmul.f32 0.5, %v3748_v22  ;;  %v8276_v20 = vld [vmem:[#allocation60_spill] sm:$0xff] }
 0xa2e   :  { %5465 = vtanh.f32 %v3762_v18  ;;  %v8278_v18 = vld [vmem:[#allocation61_spill] sm:$0xff] }
 0xa2f   :  { %v3789_v50 = vpack.c.bf16 %v3782_v57, %v3782_v57  ;;  %5467 = vtanh.f32 %v3766_v36 }
 0xa30   :  { %5469 = vtanh.f32 %v3747_v11 }
 0xa31   :  { %3823 = vmatmul.mubr.bf16.vlgmr.msra.gmra.mrb[136].mxu0 %v3789_v50  ;;  %3864 = vmatmul.mubr.bf16.vlgmr.msra.gmra.mrb[136].mxu1 %v3789_v50  ;;  %5471 = vtanh.f32 %v3771_v42 }
 0xa32   :  { %3900 = vmatpush1.bf16.msra.mxu0 %v7156_v48  ;;  %3941 = vmatpush1.bf16.msra.mxu1 %v7158_v47 }
 0xa33   :  { %3901 = vmatprep.subr.bf16.mxu0 %v7160_v51  ;;  %3942 = vmatprep.subr.bf16.mxu1 %v7162_v14 }
 0xa34   :  { %3931 = vmatprep.mubr.bf16.mxu0 %v7988_v63  ;;  %3972 = vmatprep.mubr.bf16.mxu1 %v7988_v63 }
 0xa36   :  { %3902 = vmatpush1.bf16.msra.mxu0 %v7170_v31  ;;  %3943 = vmatpush1.bf16.msra.mxu1 %v7172_v9 }
 0xa37   :  { %3903 = vmatprep.subr.bf16.mxu0 %v7176_v19  ;;  %3944 = vmatprep.subr.bf16.mxu1 %v7178_v13 }
 0xa38   :  { %v5466_v16 = vpop.eup %5465 }
 0xa39   :  { %v5468_v43 = vpop.eup %5467  ;;  %v3764_v41 = vadd.f32 1.0, %v5466_v16 }
 0xa3a   :  { %v3768_v39 = vadd.f32 1.0, %v5468_v43  ;;  %3904 = vmatpush1.bf16.msra.mxu0 %v7184_v33  ;;  %3945 = vmatpush1.bf16.msra.mxu1 %v7186_v27  ;;  %v5470_v7 = vpop.eup %5469 }
 0xa3b   :  { %v3765_v21 = vmul.f32 0.5, %v3764_v41  ;;  %3905 = vmatprep.subr.bf16.mxu0 %v7188_v52  ;;  %3946 = vmatprep.subr.bf16.mxu1 %v7190_v12  ;;  %v5472_v17 = vpop.eup %5471 }
 0xa3c   :  { %v3769_v54 = vmul.f32 0.5, %v3768_v39  ;;  %v3773_v60 = vadd.f32 1.0, %v5472_v17  ;;  %v8279_v17 = vld [vmem:[#allocation108_spill] sm:$0xff] }
 0xa3d   :  { %v3779_v0 = vmul.f32 %v5470_v7, %v3765_v21 }
 0xa3e   :  { %v3778_v59 = vmul.f32 0.0, %v3769_v54  ;;  %3906 = vmatpush1.bf16.msra.mxu0 %v7198_v30  ;;  %3947 = vmatpush1.bf16.msra.mxu1 %v7200_v6  ;;  %v3774_v62 = vmul.f32 0.5, %v3773_v60 }
 0xa3f   :  { %3907 = vmatprep.subr.bf16.mxu0 %v7204_v4  ;;  %3948 = vmatprep.subr.bf16.mxu1 %v7206_v29 }
 0xa40   :  { %v3780_v23 = vadd.f32 %v3779_v0, %v3778_v59 }
 0xa42   :  { %5473 = vtanh.f32 %v3780_v23  ;;  %3908 = vmatpush1.bf16.msra.mxu0 %v7212_v53  ;;  %3949 = vmatpush1.bf16.msra.mxu1 %v7214_v37 }
 0xa43   :  { %3909 = vmatprep.subr.bf16.mxu0 %v7216_v3  ;;  %3950 = vmatprep.subr.bf16.mxu1 %v7218_v35 }
 0xa46   :  { %3910 = vmatpush1.bf16.msra.mxu0 %v7226_v44  ;;  %3951 = vmatpush1.bf16.msra.mxu1 %v7228_v26 }
 0xa47   :  { %3911 = vmatprep.subr.bf16.mxu0 %v7232_v34  ;;  %3952 = vmatprep.subr.bf16.mxu1 %v7234_v25 }
 0xa4a   :  { %3912 = vmatpush1.bf16.msra.mxu0 %v7240_v10  ;;  %3953 = vmatpush1.bf16.msra.mxu1 %v7242_v2 }
 0xa4b   :  { %3913 = vmatprep.subr.bf16.mxu0 %v7244_v24  ;;  %3954 = vmatprep.subr.bf16.mxu1 %v7246_v55 }
 0xa4c   :  { %v5474_v61 = vpop.eup %5473 }
 0xa4d   :  { %v7474_v32 = vmul.f32 %v5474_v61, %v3774_v62 }
 0xa4e   :  { %3914 = vmatpush1.bf16.msra.mxu0 %v7254_v5  ;;  %3955 = vmatpush1.bf16.msra.mxu1 %v7256_v28 }
 0xa4f   :  { %4008 = vmatprep.subr.bf16.mxu0 %v7150_v45  ;;  %4049 = vmatprep.subr.bf16.mxu1 %v7152_v46 }
 0xb04   :  { %v3824_v11 = vpop.f32.mrb[136].mxu0  ;;  %v3865_v49 = vpop.f32.mrb[136].mxu1 }
 0xb05   :  { %v3872_v40 = vadd.f32 %v3824_v11, %v7338_v1  ;;  %v3874_v8 = vadd.f32 %v3865_v49, %v8276_v20  ;;  %v3826_v22 = vpop.f32.mrb[137].mxu0  ;;  %v3867_v38 = vpop.f32.mrb[137].mxu1 }
 0xb06   :  { %v3873_v58 = vadd.f32 %v3826_v22, %v8277_v15  ;;  %v3875_v56 = vadd.f32 %v3867_v38, %v8278_v18  ;;  %v3828_v57 = vpop.f32.mrb[138].mxu0  ;;  %v3869_v36 = vpop.f32.mrb[138].mxu1  ;;  %v8280_v15 = vld [vmem:[#allocation64_spill] sm:$0xff]  ;;  %v8281_v18 = vld [vmem:[#allocation103_spill] sm:$0xff] }
 0xb07   :  { %v3876_v50 = vmul.f32 0.5, %v3872_v40  ;;  %v3829_v42 = vpop.f32.mrb[139].mxu0  ;;  %v3870_v16 = vpop.f32.mrb[139].mxu1 }
 0xb08   :  { %v3880_v43 = vmul.f32 0.5, %v3873_v58  ;;  %v3885_v41 = vmul.f32 0.5, %v3875_v56  ;;  %v8283_v16 = vld [vmem:[#allocation105_spill] sm:$0xff] }
 0xb09   :  { %5475 = vtanh.f32 %v3876_v50  ;;  %v8282_v50 = vld [vmem:[#allocation106_spill] sm:$0xff] }
 0xb0a   :  { %5477 = vtanh.f32 %v3880_v43 }
 0xb0b   :  { %5479 = vtanh.f32 %v3874_v8 }
 0xb0c   :  { %5481 = vtanh.f32 %v3885_v41 }
 0xb13   :  { %v5476_v39 = vpop.eup %5475 }
 0xb14   :  { %v5478_v1 = vpop.eup %5477  ;;  %v3878_v21 = vadd.f32 1.0, %v5476_v39 }
 0xb15   :  { %v3882_v7 = vadd.f32 1.0, %v5478_v1  ;;  %v5480_v0 = vpop.eup %5479 }
 0xb16   :  { %v3879_v54 = vmul.f32 0.5, %v3878_v21  ;;  %v5482_v61 = vpop.eup %5481 }
 0xb17   :  { %v3883_v59 = vmul.f32 0.5, %v3882_v7  ;;  %v3887_v11 = vadd.f32 1.0, %v5482_v61 }
 0xb18   :  { %v3890_v23 = vmul.f32 %v5480_v0, %v3879_v54 }
 0xb19   :  { %v3889_v60 = vmul.f32 %v3883_v59, %v8279_v17  ;;  %v3888_v49 = vmul.f32 0.5, %v3887_v11 }
 0xb1b   :  { %v7485_v62 = vadd.f32 %v3890_v23, %v3889_v60 }
 0xb1d   :  { %5483 = vtanh.f32 %v7485_v62 }
 0xb27   :  { %v5484_v40 = vpop.eup %5483 }
 0xb28   :  { %v3893_v20 = vmul.f32 %v5484_v40, %v3888_v49 }
 0xb2a   :  { %v3898_v8 = vpack.c.bf16 %v3893_v20, %v3893_v20 }
 0xb2c   :  { %3932 = vmatmul.mubr.bf16.vlgmr.msra.gmra.mrb[140].mxu0 %v3898_v8  ;;  %3973 = vmatmul.mubr.bf16.vlgmr.msra.gmra.mrb[140].mxu1 %v3898_v8 }
 0xb2d   :  { %4009 = vmatpush1.bf16.msra.mxu0 %v7156_v48  ;;  %4050 = vmatpush1.bf16.msra.mxu1 %v7158_v47 }
 0xb2e   :  { %4010 = vmatprep.subr.bf16.mxu0 %v7160_v51  ;;  %4051 = vmatprep.subr.bf16.mxu1 %v7162_v14 }
 0xb2f   :  { %4040 = vmatprep.mubr.bf16.mxu0 %v7988_v63  ;;  %4081 = vmatprep.mubr.bf16.mxu1 %v7988_v63 }
 0xb31   :  { %4011 = vmatpush1.bf16.msra.mxu0 %v7170_v31  ;;  %4052 = vmatpush1.bf16.msra.mxu1 %v7172_v9 }
 0xb32   :  { %4012 = vmatprep.subr.bf16.mxu0 %v7176_v19  ;;  %4053 = vmatprep.subr.bf16.mxu1 %v7178_v13 }
 0xb35   :  { %4013 = vmatpush1.bf16.msra.mxu0 %v7184_v33  ;;  %4054 = vmatpush1.bf16.msra.mxu1 %v7186_v27 }
 0xb36   :  { %4014 = vmatprep.subr.bf16.mxu0 %v7188_v52  ;;  %4055 = vmatprep.subr.bf16.mxu1 %v7190_v12 }
 0xb39   :  { %4015 = vmatpush1.bf16.msra.mxu0 %v7198_v30  ;;  %4056 = vmatpush1.bf16.msra.mxu1 %v7200_v6 }
 0xb3a   :  { %4016 = vmatprep.subr.bf16.mxu0 %v7204_v4  ;;  %4057 = vmatprep.subr.bf16.mxu1 %v7206_v29 }
 0xb3d   :  { %4017 = vmatpush1.bf16.msra.mxu0 %v7212_v53  ;;  %4058 = vmatpush1.bf16.msra.mxu1 %v7214_v37 }
 0xb3e   :  { %4018 = vmatprep.subr.bf16.mxu0 %v7216_v3  ;;  %4059 = vmatprep.subr.bf16.mxu1 %v7218_v35 }
 0xb41   :  { %4019 = vmatpush1.bf16.msra.mxu0 %v7226_v44  ;;  %4060 = vmatpush1.bf16.msra.mxu1 %v7228_v26 }
 0xb42   :  { %4020 = vmatprep.subr.bf16.mxu0 %v7232_v34  ;;  %4061 = vmatprep.subr.bf16.mxu1 %v7234_v25 }
 0xb45   :  { %4021 = vmatpush1.bf16.msra.mxu0 %v7240_v10  ;;  %4062 = vmatpush1.bf16.msra.mxu1 %v7242_v2 }
 0xb46   :  { %4022 = vmatprep.subr.bf16.mxu0 %v7244_v24  ;;  %4063 = vmatprep.subr.bf16.mxu1 %v7246_v55 }
 0xb49   :  { %4023 = vmatpush1.bf16.msra.mxu0 %v7254_v5  ;;  %4064 = vmatpush1.bf16.msra.mxu1 %v7256_v28 }
 0xb4a   :  { %4117 = vmatprep.subr.bf16.mxu0 %v7150_v45  ;;  %4158 = vmatprep.subr.bf16.mxu1 %v7152_v46 }
 0xbff   :  { %v3933_v22 = vpop.f32.mrb[140].mxu0  ;;  %v3974_v38 = vpop.f32.mrb[140].mxu1 }
 0xc00   :  { %v3981_v58 = vadd.f32 %v3933_v22, %v8280_v15  ;;  %v3983_v56 = vadd.f32 %v3974_v38, %v8281_v18  ;;  %v3935_v57 = vpop.f32.mrb[141].mxu0  ;;  %v3976_v36 = vpop.f32.mrb[141].mxu1 }
 0xc01   :  { %v3982_v42 = vadd.f32 %v3935_v57, %v8282_v50  ;;  %v3984_v43 = vadd.f32 %v3976_v36, %v8283_v16  ;;  %v3937_v41 = vpop.f32.mrb[142].mxu0  ;;  %v3978_v39 = vpop.f32.mrb[142].mxu1  ;;  %v7576_v16 = vld [vmem:[#allocation5] sm:$0xff] }
 0xc02   :  { %v3985_v1 = vmul.f32 0.5, %v3981_v58  ;;  %v3938_v21 = vpop.f32.mrb[143].mxu0  ;;  %v3979_v7 = vpop.f32.mrb[143].mxu1  ;;  %v7582_v41 = vld [vmem:[#allocation5 + $0x28] sm:$0xff]  ;;  %v7585_v39 = vld [vmem:[#allocation5 + $0x38] sm:$0xff] }
 0xc03   :  { %v3989_v45 = vmul.f32 0.5, %v3982_v42  ;;  %v3994_v46 = vmul.f32 0.5, %v3984_v43  ;;  %v7579_v43 = vld [vmem:[#allocation5 + $0x10] sm:$0xff]  ;;  %v7596_v7 = vld [vmem:[#allocation5 + $0x48] sm:$0xff] }
 0xc04   :  { %5485 = vtanh.f32 %v3985_v1  ;;  %v7590_v1 = vld [vmem:[#allocation5 + $0x20] sm:$0xff]  ;;  %v7593_v21 = vld [vmem:[#allocation5 + $0x30] sm:$0xff] }
 0xc05   :  { %5487 = vtanh.f32 %v3989_v45  ;;  %v7599_v45 = vld [vmem:[#allocation5 + $0x58] sm:$0xff] }
 0xc06   :  { %5489 = vtanh.f32 %v3983_v56 }
 0xc07   :  { %5491 = vtanh.f32 %v3994_v46  ;;  %v7602_v46 = vld [vmem:[#allocation5 + $0x40] sm:$0xff] }
 0xc0e   :  { %v5486_v54 = vpop.eup %5485 }
 0xc0f   :  { %v5488_v0 = vpop.eup %5487  ;;  %v3987_v59 = vadd.f32 1.0, %v5486_v54  ;;  %v7605_v54 = vld [vmem:[#allocation5 + $0x50] sm:$0xff] }
 0xc10   :  { %v3991_v23 = vadd.f32 1.0, %v5488_v0  ;;  %v5490_v60 = vpop.eup %5489  ;;  %v7608_v0 = vld [vmem:[#allocation5 + $0x68] sm:$0xff] }
 0xc11   :  { %v3988_v17 = vmul.f32 0.5, %v3987_v59  ;;  %v5492_v20 = vpop.eup %5491  ;;  %v7611_v59 = vld [vmem:[#allocation5 + $0x78] sm:$0xff] }
 0xc12   :  { %v3992_v61 = vmul.f32 0.5, %v3991_v23  ;;  %v3996_v8 = vadd.f32 1.0, %v5492_v20  ;;  %v7614_v23 = vld [vmem:[#allocation5 + $0x60] sm:$0xff]  ;;  %v7635_v20 = vld [vmem:[#allocation5 + $0xb8] sm:$0xff] }
 0xc13   :  { %v3999_v11 = vmul.f32 %v5490_v60, %v3988_v17  ;;  %v7617_v17 = vld [vmem:[#allocation5 + $0x70] sm:$0xff]  ;;  %v7620_v60 = vld [vmem:[#allocation5 + $0x88] sm:$0xff] }
 0xc14   :  { %v3998_v49 = vmul.f32 %v3992_v61, %v7485_v62  ;;  %v3997_v22 = vmul.f32 0.5, %v3996_v8  ;;  %v7623_v61 = vld [vmem:[#allocation5 + $0x98] sm:$0xff]  ;;  %v7638_v8 = vld [vmem:[#allocation5 + $0xa0] sm:$0xff] }
 0xc16   :  { %v7527_v40 = vadd.f32 %v3999_v11, %v3998_v49  ;;  %v7626_v11 = vld [vmem:[#allocation5 + $0x80] sm:$0xff]  ;;  %v7629_v49 = vld [vmem:[#allocation5 + $0x90] sm:$0xff] }
 0xc18   :  { %5493 = vtanh.f32 %v7527_v40 }
 0xc22   :  { %v5494_v38 = vpop.eup %5493 }
 0xc23   :  { %v4002_v15 = vmul.f32 %v5494_v38, %v3997_v22  ;;  %v7641_v22 = vld [vmem:[#allocation5 + $0xb0] sm:$0xff]  ;;  %v7644_v38 = vld [vmem:[#allocation5 + $0xc8] sm:$0xff] }
 0xc25   :  { %v4007_v58 = vpack.c.bf16 %v4002_v15, %v4002_v15  ;;  %v7647_v15 = vld [vmem:[#allocation5 + $0xd8] sm:$0xff] }
 0xc27   :  { %4041 = vmatmul.mubr.bf16.vlgmr.msra.gmra.mrb[144].mxu0 %v4007_v58  ;;  %4082 = vmatmul.mubr.bf16.vlgmr.msra.gmra.mrb[144].mxu1 %v4007_v58  ;;  %v7650_v58 = vld [vmem:[#allocation5 + $0xc0] sm:$0xff] }
 0xc28   :  { %4118 = vmatpush1.bf16.msra.mxu0 %v7156_v48  ;;  %4159 = vmatpush1.bf16.msra.mxu1 %v7158_v47  ;;  %v7562_v48 = vld [vmem:[#allocation5 + $0x8] sm:$0xff]  ;;  %v7565_v47 = vld [vmem:[#allocation5 + $0x18] sm:$0xff] }
 0xc29   :  { %4119 = vmatprep.subr.bf16.mxu0 %v7160_v51  ;;  %4160 = vmatprep.subr.bf16.mxu1 %v7162_v14 }
 0xc2a   :  { %4149 = vmatprep.mubr.bf16.mxu0 %v7988_v63  ;;  %4190 = vmatprep.mubr.bf16.mxu1 %v7988_v63 }
 0xc2c   :  { %4120 = vmatpush1.bf16.msra.mxu0 %v7170_v31  ;;  %4161 = vmatpush1.bf16.msra.mxu1 %v7172_v9  ;;  %v8284_v31 = vld [vmem:[#allocation107_spill] sm:$0xff] }
 0xc2d   :  { %4121 = vmatprep.subr.bf16.mxu0 %v7176_v19  ;;  %4162 = vmatprep.subr.bf16.mxu1 %v7178_v13  ;;  %v8285_v19 = vld [vmem:[#allocation63_spill] sm:$0xff] }
 0xc30   :  { %4122 = vmatpush1.bf16.msra.mxu0 %v7184_v33  ;;  %4163 = vmatpush1.bf16.msra.mxu1 %v7186_v27 }
 0xc31   :  { %4123 = vmatprep.subr.bf16.mxu0 %v7188_v52  ;;  %4164 = vmatprep.subr.bf16.mxu1 %v7190_v12  ;;  %v8286_v52 = vld [vmem:[#allocation66_spill] sm:$0xff] }
 0xc34   :  { %4124 = vmatpush1.bf16.msra.mxu0 %v7198_v30  ;;  %4165 = vmatpush1.bf16.msra.mxu1 %v7200_v6  ;;  %v8287_v30 = vld [vmem:[#allocation65_spill] sm:$0xff] }
 0xc35   :  { %4125 = vmatprep.subr.bf16.mxu0 %v7204_v4  ;;  %4166 = vmatprep.subr.bf16.mxu1 %v7206_v29 }
 0xc38   :  { %4126 = vmatpush1.bf16.msra.mxu0 %v7212_v53  ;;  %4167 = vmatpush1.bf16.msra.mxu1 %v7214_v37 }
 0xc39   :  { %4127 = vmatprep.subr.bf16.mxu0 %v7216_v3  ;;  %4168 = vmatprep.subr.bf16.mxu1 %v7218_v35 }
 0xc3c   :  { %4128 = vmatpush1.bf16.msra.mxu0 %v7226_v44  ;;  %4169 = vmatpush1.bf16.msra.mxu1 %v7228_v26 }
 0xc3d   :  { %4129 = vmatprep.subr.bf16.mxu0 %v7232_v34  ;;  %4170 = vmatprep.subr.bf16.mxu1 %v7234_v25 }
 0xc40   :  { %4130 = vmatpush1.bf16.msra.mxu0 %v7240_v10  ;;  %4171 = vmatpush1.bf16.msra.mxu1 %v7242_v2 }
 0xc41   :  { %4131 = vmatprep.subr.bf16.mxu0 %v7244_v24  ;;  %4172 = vmatprep.subr.bf16.mxu1 %v7246_v55 }
 0xc44   :  { %4132 = vmatpush1.bf16.msra.mxu0 %v7254_v5  ;;  %4173 = vmatpush1.bf16.msra.mxu1 %v7256_v28 }
 0xc45   :  { %4226 = vmatprep.subr.bf16.mxu0 %v7562_v48  ;;  %4267 = vmatprep.subr.bf16.mxu1 %v7565_v47 }
 0xcfa   :  { %v4042_v51 = vpop.f32.mrb[144].mxu0  ;;  %v4083_v14 = vpop.f32.mrb[144].mxu1 }
 0xcfb   :  { %v4090_v9 = vadd.f32 %v4042_v51, %v8284_v31  ;;  %v4092_v13 = vadd.f32 %v4083_v14, %v8285_v19  ;;  %v4044_v33 = vpop.f32.mrb[145].mxu0  ;;  %v4085_v27 = vpop.f32.mrb[145].mxu1  ;;  %v7653_v51 = vld [vmem:[#allocation5 + $0xd0] sm:$0xff]  ;;  %v7656_v14 = vld [vmem:[#allocation5 + $0xe8] sm:$0xff]  ;;  %v7659_v31 = vld [vmem:[#allocation5 + $0xf8] sm:$0xff] }
 0xcfc   :  { %v4091_v12 = vadd.f32 %v4044_v33, %v8286_v52  ;;  %v4093_v6 = vadd.f32 %v4085_v27, %v8287_v30  ;;  %v4046_v4 = vpop.f32.mrb[146].mxu0  ;;  %v4087_v29 = vpop.f32.mrb[146].mxu1  ;;  %v7665_v19 = vld [vmem:[#allocation5 + $0xf0] sm:$0xff]  ;;  %v8288_v27 = vld [vmem:[#allocation67_spill] sm:$0xff] }
 0xcfd   :  { %v4094_v53 = vmul.f32 0.5, %v4090_v9  ;;  %v4047_v37 = vpop.f32.mrb[147].mxu0  ;;  %v4088_v3 = vpop.f32.mrb[147].mxu1  ;;  %v7662_v9 = vld [vmem:[#allocation5 + $0xe0] sm:$0xff]  ;;  %v8290_v29 = vld [vmem:[#allocation102_spill] sm:$0xff] }
 0xcfe   :  { %v4098_v35 = vmul.f32 0.5, %v4091_v12  ;;  %v4103_v44 = vmul.f32 0.5, %v4093_v6  ;;  %v8289_v12 = vld [vmem:[#allocation100_spill] sm:$0xff]  ;;  %v8291_v37 = vld [vmem:[#allocation101_spill] sm:$0xff] }
 0xcff   :  { %5495 = vtanh.f32 %v4094_v53 }
 0xd00   :  { %5497 = vtanh.f32 %v4098_v35 }
 0xd01   :  { %5499 = vtanh.f32 %v4092_v13 }
 0xd02   :  { %5501 = vtanh.f32 %v4103_v44 }
 0xd09   :  { %v5496_v26 = vpop.eup %5495 }
 0xd0a   :  { %v5498_v34 = vpop.eup %5497  ;;  %v4096_v25 = vadd.f32 1.0, %v5496_v26 }
 0xd0b   :  { %v4100_v10 = vadd.f32 1.0, %v5498_v34  ;;  %v5500_v24 = vpop.eup %5499 }
 0xd0c   :  { %v4097_v2 = vmul.f32 0.5, %v4096_v25  ;;  %v5502_v18 = vpop.eup %5501 }
 0xd0d   :  { %v4101_v55 = vmul.f32 0.5, %v4100_v10  ;;  %v4105_v56 = vadd.f32 1.0, %v5502_v18 }
 0xd0e   :  { %v4108_v5 = vmul.f32 %v5500_v24, %v4097_v2 }
 0xd0f   :  { %v4107_v28 = vmul.f32 %v4101_v55, %v7527_v40  ;;  %v4106_v57 = vmul.f32 0.5, %v4105_v56  ;;  %v7632_v40 = vld [vmem:[#allocation5 + $0xa8] sm:$0xff] }
 0xd11   :  { %v7573_v62 = vadd.f32 %v4108_v5, %v4107_v28 }
 0xd13   :  { %5503 = vtanh.f32 %v7573_v62 }
 0xd1d   :  { %v5504_v36 = vpop.eup %5503 }
 0xd1e   :  { %v4111_v50 = vmul.f32 %v5504_v36, %v4106_v57 }
 0xd20   :  { %v4116_v42 = vpack.c.bf16 %v4111_v50, %v4111_v50 }
 0xd22   :  { %4150 = vmatmul.mubr.bf16.vlgmr.msra.gmra.mrb[148].mxu0 %v4116_v42  ;;  %4191 = vmatmul.mubr.bf16.vlgmr.msra.gmra.mrb[148].mxu1 %v4116_v42 }
 0xd23   :  { %4227 = vmatpush1.bf16.msra.mxu0 %v7576_v16  ;;  %4268 = vmatpush1.bf16.msra.mxu1 %v7579_v43 }
 0xd24   :  { %4228 = vmatprep.subr.bf16.mxu0 %v7582_v41  ;;  %4269 = vmatprep.subr.bf16.mxu1 %v7585_v39 }
 0xd25   :  { %4258 = vmatprep.mubr.bf16.mxu0 %v7988_v63  ;;  %4299 = vmatprep.mubr.bf16.mxu1 %v7988_v63 }
 0xd27   :  { %4229 = vmatpush1.bf16.msra.mxu0 %v7590_v1  ;;  %4270 = vmatpush1.bf16.msra.mxu1 %v7593_v21 }
 0xd28   :  { %4230 = vmatprep.subr.bf16.mxu0 %v7596_v7  ;;  %4271 = vmatprep.subr.bf16.mxu1 %v7599_v45 }
 0xd2b   :  { %4231 = vmatpush1.bf16.msra.mxu0 %v7602_v46  ;;  %4272 = vmatpush1.bf16.msra.mxu1 %v7605_v54 }
 0xd2c   :  { %4232 = vmatprep.subr.bf16.mxu0 %v7608_v0  ;;  %4273 = vmatprep.subr.bf16.mxu1 %v7611_v59 }
 0xd2f   :  { %4233 = vmatpush1.bf16.msra.mxu0 %v7614_v23  ;;  %4274 = vmatpush1.bf16.msra.mxu1 %v7617_v17 }
 0xd30   :  { %4234 = vmatprep.subr.bf16.mxu0 %v7620_v60  ;;  %4275 = vmatprep.subr.bf16.mxu1 %v7623_v61 }
 0xd33   :  { %4235 = vmatpush1.bf16.msra.mxu0 %v7626_v11  ;;  %4276 = vmatpush1.bf16.msra.mxu1 %v7629_v49 }
 0xd34   :  { %4236 = vmatprep.subr.bf16.mxu0 %v7632_v40  ;;  %4277 = vmatprep.subr.bf16.mxu1 %v7635_v20 }
 0xd37   :  { %4237 = vmatpush1.bf16.msra.mxu0 %v7638_v8  ;;  %4278 = vmatpush1.bf16.msra.mxu1 %v7641_v22 }
 0xd38   :  { %4238 = vmatprep.subr.bf16.mxu0 %v7644_v38  ;;  %4279 = vmatprep.subr.bf16.mxu1 %v7647_v15 }
 0xd3b   :  { %4239 = vmatpush1.bf16.msra.mxu0 %v7650_v58  ;;  %4280 = vmatpush1.bf16.msra.mxu1 %v7653_v51 }
 0xd3c   :  { %4240 = vmatprep.subr.bf16.mxu0 %v7656_v14  ;;  %4281 = vmatprep.subr.bf16.mxu1 %v7659_v31 }
 0xd3f   :  { %4241 = vmatpush1.bf16.msra.mxu0 %v7662_v9  ;;  %4282 = vmatpush1.bf16.msra.mxu1 %v7665_v19 }
 0xd40   :  { %4335 = vmatprep.subr.bf16.mxu0 %v7562_v48  ;;  %4376 = vmatprep.subr.bf16.mxu1 %v7565_v47 }
 0xdf5   :  { %v4151_v13 = vpop.f32.mrb[148].mxu0  ;;  %v4192_v33 = vpop.f32.mrb[148].mxu1 }
 0xdf6   :  { %v4199_v52 = vadd.f32 %v4151_v13, %v8288_v27  ;;  %v4201_v30 = vadd.f32 %v4192_v33, %v8289_v12  ;;  %v4153_v6 = vpop.f32.mrb[149].mxu0  ;;  %v4194_v4 = vpop.f32.mrb[149].mxu1 }
 0xdf7   :  { %v4200_v53 = vadd.f32 %v4153_v6, %v8290_v29  ;;  %v4202_v3 = vadd.f32 %v4194_v4, %v8291_v37  ;;  %v4155_v35 = vpop.f32.mrb[150].mxu0  ;;  %v4196_v44 = vpop.f32.mrb[150].mxu1  ;;  %v8292_v4 = vld [vmem:[#allocation104_spill] sm:$0xff] }
 0xdf8   :  { %v4203_v26 = vmul.f32 0.5, %v4199_v52  ;;  %v4156_v34 = vpop.f32.mrb[151].mxu0  ;;  %v4197_v25 = vpop.f32.mrb[151].mxu1  ;;  %v8294_v44 = vld [vmem:[#allocation51_spill] sm:$0xff] }
 0xdf9   :  { %v4207_v10 = vmul.f32 0.5, %v4200_v53  ;;  %v4212_v2 = vmul.f32 0.5, %v4202_v3  ;;  %v8293_v53 = vld [vmem:[#allocation50_spill] sm:$0xff]  ;;  %v8295_v34 = vld [vmem:[#allocation52_spill] sm:$0xff] }
 0xdfa   :  { %5505 = vtanh.f32 %v4203_v26 }
 0xdfb   :  { %5507 = vtanh.f32 %v4207_v10 }
 0xdfc   :  { %5509 = vtanh.f32 %v4201_v30 }
 0xdfd   :  { %5511 = vtanh.f32 %v4212_v2 }
 0xe04   :  { %v5506_v24 = vpop.eup %5505 }
 0xe05   :  { %v5508_v55 = vpop.eup %5507  ;;  %v4205_v5 = vadd.f32 1.0, %v5506_v24 }
 0xe06   :  { %v4209_v28 = vadd.f32 1.0, %v5508_v55  ;;  %v5510_v56 = vpop.eup %5509 }
 0xe07   :  { %v4206_v18 = vmul.f32 0.5, %v4205_v5  ;;  %v5512_v13 = vpop.eup %5511 }
 0xe08   :  { %v4210_v57 = vmul.f32 0.5, %v4209_v28  ;;  %v4214_v33 = vadd.f32 1.0, %v5512_v13 }
 0xe09   :  { %v4217_v36 = vmul.f32 %v5510_v56, %v4206_v18 }
 0xe0a   :  { %v4216_v50 = vmul.f32 %v4210_v57, %v7573_v62  ;;  %v4215_v27 = vmul.f32 0.5, %v4214_v33 }
 0xe0c   :  { %v7675_v42 = vadd.f32 %v4217_v36, %v4216_v50 }
 0xe0e   :  { %5513 = vtanh.f32 %v7675_v42 }
 0xe18   :  { %v5514_v52 = vpop.eup %5513 }
 0xe19   :  { %v4220_v12 = vmul.f32 %v5514_v52, %v4215_v27 }
 0xe1b   :  { %v4225_v30 = vpack.c.bf16 %v4220_v12, %v4220_v12 }
 0xe1d   :  { %4259 = vmatmul.mubr.bf16.vlgmr.msra.gmra.mrb[152].mxu0 %v4225_v30  ;;  %4300 = vmatmul.mubr.bf16.vlgmr.msra.gmra.mrb[152].mxu1 %v4225_v30 }
 0xe1e   :  { %4336 = vmatpush1.bf16.msra.mxu0 %v7576_v16  ;;  %4377 = vmatpush1.bf16.msra.mxu1 %v7579_v43 }
 0xe1f   :  { %4337 = vmatprep.subr.bf16.mxu0 %v7582_v41  ;;  %4378 = vmatprep.subr.bf16.mxu1 %v7585_v39 }
 0xe20   :  { %4367 = vmatprep.mubr.bf16.mxu0 %v7988_v63  ;;  %4408 = vmatprep.mubr.bf16.mxu1 %v7988_v63 }
 0xe22   :  { %4338 = vmatpush1.bf16.msra.mxu0 %v7590_v1  ;;  %4379 = vmatpush1.bf16.msra.mxu1 %v7593_v21 }
 0xe23   :  { %4339 = vmatprep.subr.bf16.mxu0 %v7596_v7  ;;  %4380 = vmatprep.subr.bf16.mxu1 %v7599_v45 }
 0xe26   :  { %4340 = vmatpush1.bf16.msra.mxu0 %v7602_v46  ;;  %4381 = vmatpush1.bf16.msra.mxu1 %v7605_v54 }
 0xe27   :  { %4341 = vmatprep.subr.bf16.mxu0 %v7608_v0  ;;  %4382 = vmatprep.subr.bf16.mxu1 %v7611_v59 }
 0xe2a   :  { %4342 = vmatpush1.bf16.msra.mxu0 %v7614_v23  ;;  %4383 = vmatpush1.bf16.msra.mxu1 %v7617_v17 }
 0xe2b   :  { %4343 = vmatprep.subr.bf16.mxu0 %v7620_v60  ;;  %4384 = vmatprep.subr.bf16.mxu1 %v7623_v61 }
 0xe2e   :  { %4344 = vmatpush1.bf16.msra.mxu0 %v7626_v11  ;;  %4385 = vmatpush1.bf16.msra.mxu1 %v7629_v49 }
 0xe2f   :  { %4345 = vmatprep.subr.bf16.mxu0 %v7632_v40  ;;  %4386 = vmatprep.subr.bf16.mxu1 %v7635_v20 }
 0xe32   :  { %4346 = vmatpush1.bf16.msra.mxu0 %v7638_v8  ;;  %4387 = vmatpush1.bf16.msra.mxu1 %v7641_v22 }
 0xe33   :  { %4347 = vmatprep.subr.bf16.mxu0 %v7644_v38  ;;  %4388 = vmatprep.subr.bf16.mxu1 %v7647_v15 }
 0xe36   :  { %4348 = vmatpush1.bf16.msra.mxu0 %v7650_v58  ;;  %4389 = vmatpush1.bf16.msra.mxu1 %v7653_v51 }
 0xe37   :  { %4349 = vmatprep.subr.bf16.mxu0 %v7656_v14  ;;  %4390 = vmatprep.subr.bf16.mxu1 %v7659_v31 }
 0xe3a   :  { %4350 = vmatpush1.bf16.msra.mxu0 %v7662_v9  ;;  %4391 = vmatpush1.bf16.msra.mxu1 %v7665_v19 }
 0xe3b   :  { %4444 = vmatprep.subr.bf16.mxu0 %v7562_v48  ;;  %4485 = vmatprep.subr.bf16.mxu1 %v7565_v47 }
 0xef0   :  { %v4260_v62 = vpop.f32.mrb[152].mxu0  ;;  %v4301_v6 = vpop.f32.mrb[152].mxu1 }
 0xef1   :  { %v4308_v29 = vadd.f32 %v4260_v62, %v8292_v4  ;;  %v4310_v37 = vadd.f32 %v4301_v6, %v8293_v53  ;;  %v4262_v3 = vpop.f32.mrb[153].mxu0  ;;  %v4303_v35 = vpop.f32.mrb[153].mxu1 }
 0xef2   :  { %v4309_v26 = vadd.f32 %v4262_v3, %v8294_v44  ;;  %v4311_v25 = vadd.f32 %v4303_v35, %v8295_v34  ;;  %v4264_v10 = vpop.f32.mrb[154].mxu0  ;;  %v4305_v2 = vpop.f32.mrb[154].mxu1  ;;  %v4549_v35 = vpack.c.bf16 %v7474_v32, %v7474_v32  ;;  %v5435_v44 = vld [vmem:[%s7846_s9 + $0x40] sm:$0xff]   ;;  %v5437_v34 = vld [vmem:[%s7846_s9 + $0x48] sm:$0xff]  }
 0xef3   :  { %v4312_v24 = vmul.f32 0.5, %v4308_v29  ;;  %v4265_v55 = vpop.f32.mrb[155].mxu0  ;;  %v4306_v5 = vpop.f32.mrb[155].mxu1  ;;  %v5438_v32 = vld [vmem:[%s7846_s9 + $0x8] sm:$0xff]   ;;  %v5440_v10 = vld [vmem:[%s7846_s9 + $0x10] sm:$0xff]   ;;  %v5441_v2 = vld [vmem:[%s7846_s9 + $0x58] sm:$0xff]  }
 0xef4   :  { %v4316_v48 = vmul.f32 0.5, %v4309_v26  ;;  %v4321_v47 = vmul.f32 0.5, %v4311_v25  ;;  %v5436_v26 = vld [vmem:[%s7846_s9] sm:$0xff]   ;;  %v5439_v25 = vld [vmem:[%s7846_s9 + $0x50] sm:$0xff]  }
 0xef5   :  { %5515 = vtanh.f32 %v4312_v24  ;;  %v5442_v24 = vld [vmem:[%s7846_s9 + $0x18] sm:$0xff]   ;;  %v5443_v55 = vld [vmem:[%s7846_s9 + $0x60] sm:$0xff]  }
 0xef6   :  { %5517 = vtanh.f32 %v4316_v48  ;;  %v5444_v5 = vld [vmem:[%s7846_s9 + $0x20] sm:$0xff]   ;;  %v5445_v48 = vld [vmem:[%s7846_s9 + $0x68] sm:$0xff]  }
 0xef7   :  { %5519 = vtanh.f32 %v4310_v37 }
 0xef8   :  { %5521 = vtanh.f32 %v4321_v47  ;;  %v5446_v47 = vld [vmem:[%s7846_s9 + $0x28] sm:$0xff]  }
 0xeff   :  { %v5516_v28 = vpop.eup %5515 }
 0xf00   :  { %v5518_v18 = vpop.eup %5517  ;;  %v4314_v56 = vadd.f32 1.0, %v5516_v28  ;;  %v5447_v28 = vld [vmem:[%s7846_s9 + $0x70] sm:$0xff]  }
 0xf01   :  { %v4318_v57 = vadd.f32 1.0, %v5518_v18  ;;  %v5520_v50 = vpop.eup %5519  ;;  %v5448_v18 = vld [vmem:[%s7846_s9 + $0x30] sm:$0xff]  }
 0xf02   :  { %v4315_v36 = vmul.f32 0.5, %v4314_v56  ;;  %v5522_v12 = vpop.eup %5521  ;;  %v5449_v56 = vld [vmem:[%s7846_s9 + $0x78] sm:$0xff]  }
 0xf03   :  { %v4319_v13 = vmul.f32 0.5, %v4318_v57  ;;  %v4323_v30 = vadd.f32 1.0, %v5522_v12  ;;  %v5450_v57 = vld [vmem:[%s7846_s9 + $0x38] sm:$0xff]  }
 0xf04   :  { %v4326_v33 = vmul.f32 %v5520_v50, %v4315_v36  ;;  %v5451_v36 = vld [vmem:[%s7848_s11] sm:$0xff]   ;;  %v5652_v50 = vmov 0.0  }
 0xf05   :  { %v4325_v27 = vmul.f32 %v4319_v13, %v7675_v42  ;;  %v4324_v62 = vmul.f32 0.5, %v4323_v30  ;;  %v5452_v13 = vld [vmem:[%s7848_s11 + $0x8] sm:$0xff]   ;;  %v8301_v30 = vld [vmem:[#allocation70_spill] sm:$0xff] }
 0xf07   :  { %v7717_v52 = vadd.f32 %v4326_v33, %v4325_v27 }
 0xf09   :  { %5523 = vtanh.f32 %v7717_v52 }
 0xf13   :  { %v5524_v6 = vpop.eup %5523 }
 0xf14   :  { %v4329_v4 = vmul.f32 %v5524_v6, %v4324_v62 }
 0xf16   :  { %v4334_v29 = vpack.c.bf16 %v4329_v4, %v4329_v4 }
 0xf18   :  { %4368 = vmatmul.mubr.bf16.vlgmr.msra.gmra.mrb[156].mxu0 %v4334_v29  ;;  %4409 = vmatmul.mubr.bf16.vlgmr.msra.gmra.mrb[156].mxu1 %v4334_v29  ;;  %v8302_v29 = vld [vmem:[#allocation69_spill] sm:$0xff] }
 0xf19   :  { %4445 = vmatpush1.bf16.msra.mxu0 %v7576_v16  ;;  %4486 = vmatpush1.bf16.msra.mxu1 %v7579_v43  ;;  %v8296_v43 = vld [vmem:[#allocation53_spill] sm:$0xff] }
 0xf1a   :  { %4446 = vmatprep.subr.bf16.mxu0 %v7582_v41  ;;  %4487 = vmatprep.subr.bf16.mxu1 %v7585_v39  ;;  %v8297_v39 = vld [vmem:[#allocation56_spill] sm:$0xff] }
 0xf1b   :  { %4476 = vmatprep.mubr.bf16.mxu0 %v7988_v63  ;;  %4517 = vmatprep.mubr.bf16.mxu1 %v7988_v63 }
 0xf1d   :  { %4447 = vmatpush1.bf16.msra.mxu0 %v7590_v1  ;;  %4488 = vmatpush1.bf16.msra.mxu1 %v7593_v21 }
 0xf1e   :  { %4448 = vmatprep.subr.bf16.mxu0 %v7596_v7  ;;  %4489 = vmatprep.subr.bf16.mxu1 %v7599_v45  ;;  %v8298_v45 = vld [vmem:[#allocation58_spill] sm:$0xff] }
 0xf21   :  { %4449 = vmatpush1.bf16.msra.mxu0 %v7602_v46  ;;  %4490 = vmatpush1.bf16.msra.mxu1 %v7605_v54  ;;  %v8299_v54 = vld [vmem:[#allocation57_spill] sm:$0xff] }
 0xf22   :  { %4450 = vmatprep.subr.bf16.mxu0 %v7608_v0  ;;  %4491 = vmatprep.subr.bf16.mxu1 %v7611_v59 }
 0xf25   :  { %4451 = vmatpush1.bf16.msra.mxu0 %v7614_v23  ;;  %4492 = vmatpush1.bf16.msra.mxu1 %v7617_v17 }
 0xf26   :  { %4452 = vmatprep.subr.bf16.mxu0 %v7620_v60  ;;  %4493 = vmatprep.subr.bf16.mxu1 %v7623_v61 }
 0xf29   :  { %4453 = vmatpush1.bf16.msra.mxu0 %v7626_v11  ;;  %4494 = vmatpush1.bf16.msra.mxu1 %v7629_v49 }
 0xf2a   :  { %4454 = vmatprep.subr.bf16.mxu0 %v7632_v40  ;;  %4495 = vmatprep.subr.bf16.mxu1 %v7635_v20 }
 0xf2d   :  { %4455 = vmatpush1.bf16.msra.mxu0 %v7638_v8  ;;  %4496 = vmatpush1.bf16.msra.mxu1 %v7641_v22 }
 0xf2e   :  { %4456 = vmatprep.subr.bf16.mxu0 %v7644_v38  ;;  %4497 = vmatprep.subr.bf16.mxu1 %v7647_v15 }
 0xf31   :  { %4457 = vmatpush1.bf16.msra.mxu0 %v7650_v58  ;;  %4498 = vmatpush1.bf16.msra.mxu1 %v7653_v51 }
 0xf32   :  { %4458 = vmatprep.subr.bf16.mxu0 %v7656_v14  ;;  %4499 = vmatprep.subr.bf16.mxu1 %v7659_v31 }
 0xf35   :  { %4459 = vmatpush1.bf16.msra.mxu0 %v7662_v9  ;;  %4500 = vmatpush1.bf16.msra.mxu1 %v7665_v19 }
 0xf36   :  { %4985 = vmatprep.subr.bf16.mxu0 %v5435_v44  ;;  %5012 = vmatprep.subr.bf16.mxu1 %v5652_v50 }
 0xfeb   :  { %v4369_v63 = vpop.f32.mrb[156].mxu0  ;;  %v4410_v16 = vpop.f32.mrb[156].mxu1 }
 0xfec   :  { %v4417_v41 = vadd.f32 %v4369_v63, %v8296_v43  ;;  %v4419_v1 = vadd.f32 %v4410_v16, %v8297_v39  ;;  %v4371_v21 = vpop.f32.mrb[157].mxu0  ;;  %v4412_v7 = vpop.f32.mrb[157].mxu1  ;;  %v8303_v16 = vld [vmem:[#allocation72_spill] sm:$0xff] }
 0xfed   :  { %v4418_v46 = vadd.f32 %v4371_v21, %v8298_v45  ;;  %v4420_v0 = vadd.f32 %v4412_v7, %v8299_v54  ;;  %v4373_v59 = vpop.f32.mrb[158].mxu0  ;;  %v4414_v23 = vpop.f32.mrb[158].mxu1 }
 0xfee   :  { %v4421_v17 = vmul.f32 0.5, %v4417_v41  ;;  %v4374_v60 = vpop.f32.mrb[159].mxu0  ;;  %v4415_v61 = vpop.f32.mrb[159].mxu1 }
 0xfef   :  { %v4425_v11 = vmul.f32 0.5, %v4418_v46  ;;  %v4430_v49 = vmul.f32 0.5, %v4420_v0 }
 0xff0   :  { %5525 = vtanh.f32 %v4421_v17 }
 0xff1   :  { %5527 = vtanh.f32 %v4425_v11 }
 0xff2   :  { %5529 = vtanh.f32 %v4419_v1 }
 0xff3   :  { %5531 = vtanh.f32 %v4430_v49 }
 0xffa   :  { %v5526_v40 = vpop.eup %5525 }
 0xffb   :  { %v5528_v20 = vpop.eup %5527  ;;  %v4423_v8 = vadd.f32 1.0, %v5526_v40 }
 0xffc   :  { %v4427_v22 = vadd.f32 1.0, %v5528_v20  ;;  %v5530_v15 = vpop.eup %5529 }
 0xffd   :  { %v4424_v38 = vmul.f32 0.5, %v4423_v8  ;;  %v5532_v9 = vpop.eup %5531 }
 0xffe   :  { %v4428_v58 = vmul.f32 0.5, %v4427_v22  ;;  %v4432_v19 = vadd.f32 1.0, %v5532_v9  ;;  %v4959_v9 = vld [vmem:[%s7847_s10] ss:$0 sm:$0xff] }
 0xfff   :  { %v4435_v51 = vmul.f32 %v5530_v15, %v4424_v38 }
0x1000   :  { %v4434_v14 = vmul.f32 %v4428_v58, %v7717_v52  ;;  %v4433_v42 = vmul.f32 0.5, %v4432_v19  ;;  %v8300_v52 = vld [vmem:[#allocation68_spill] sm:$0xff] }
0x1002   :  { %v7757_v31 = vadd.f32 %v4435_v51, %v4434_v14  ;;  %v5453_v51 = vld [vmem:[%s7848_s11 + $0x10] sm:$0xff]   ;;  %v5454_v14 = vld [vmem:[%s7848_s11 + $0x18] sm:$0xff]  }
0x1004   :  { %5533 = vtanh.f32 %v7757_v31 }
0x100e   :  { %v5534_v53 = vpop.eup %5533 }
0x100f   :  { %v4438_v37 = vmul.f32 %v5534_v53, %v4433_v42 }
0x1011   :  { %v4443_v3 = vpack.c.bf16 %v4438_v37, %v4438_v37 }
0x1013   :  { %4477 = vmatmul.mubr.bf16.vlgmr.msra.gmra.mrb[160].mxu0 %v4443_v3  ;;  %4518 = vmatmul.mubr.bf16.vlgmr.msra.gmra.mrb[160].mxu1 %v4443_v3 }
0x1014   :  { %4717 = vmatprep.mubr.bf16.mxu0 %v4549_v35  ;;  %4986 = vmatpush3.bf16.msra.mxu0 %v5436_v26  ;;  %v4976_v26 = vld [vmem:[%s7849_s12] ss:$0 sm:$0xff] }
0x1015   :  { %4987 = vmatprep.subr.bf16.mxu0 %v5437_v34  ;;  %5013 = vmatpush3.bf16.msra.mxu1 %v5451_v36 }
0x1016   :  { %5014 = vmatprep.subr.bf16.mxu1 %v5652_v50  ;;  %5020 = vmatprep.mubr.msk.bf16.mxu1 %vm5653_vm1, %v5652_v50 }
0x1018   :  { %4988 = vmatpush3.bf16.msra.mxu0 %v5438_v32 }
0x1019   :  { %4989 = vmatprep.subr.bf16.mxu0 %v5439_v25  ;;  %5015 = vmatpush3.bf16.msra.mxu1 %v5452_v13 }
0x101a   :  { %5016 = vmatprep.subr.bf16.mxu1 %v5652_v50 }
0x101c   :  { %4990 = vmatpush3.bf16.msra.mxu0 %v5440_v10 }
0x101d   :  { %4991 = vmatprep.subr.bf16.mxu0 %v5441_v2  ;;  %5017 = vmatpush3.bf16.msra.mxu1 %v5453_v51 }
0x101e   :  { %5018 = vmatprep.subr.bf16.mxu1 %v5652_v50 }
0x1020   :  { %4992 = vmatpush3.bf16.msra.mxu0 %v5442_v24 }
0x1021   :  { %4993 = vmatprep.subr.bf16.mxu0 %v5443_v55  ;;  %5019 = vmatpush3.bf16.msra.mxu1 %v5454_v14 }
0x1024   :  { %4994 = vmatpush3.bf16.msra.mxu0 %v5444_v5 }
0x1025   :  { %4995 = vmatprep.subr.bf16.mxu0 %v5445_v48 }
0x1028   :  { %4996 = vmatpush3.bf16.msra.mxu0 %v5446_v47 }
0x1029   :  { %4997 = vmatprep.subr.bf16.mxu0 %v5447_v28 }
0x102c   :  { %4998 = vmatpush3.bf16.msra.mxu0 %v5448_v18 }
0x102d   :  { %4999 = vmatprep.subr.bf16.mxu0 %v5449_v56 }
0x1030   :  { %5000 = vmatpush3.bf16.msra.mxu0 %v5450_v57 }
0x10e6   :  { %v4478_v33 = vpop.f32.mrb[160].mxu0  ;;  %v4519_v27 = vpop.f32.mrb[160].mxu1 }
0x10e7   :  { %v4526_v12 = vadd.f32 %v4478_v33, %v8300_v52  ;;  %v4528_v62 = vadd.f32 %v4519_v27, %v8301_v30  ;;  %v4480_v6 = vpop.f32.mrb[161].mxu0  ;;  %v4521_v4 = vpop.f32.mrb[161].mxu1 }
0x10e8   :  { %v4527_v63 = vadd.f32 %v4480_v6, %v8302_v29  ;;  %v4529_v43 = vadd.f32 %v4521_v4, %v8303_v16  ;;  %v4482_v41 = vpop.f32.mrb[162].mxu0  ;;  %v4523_v39 = vpop.f32.mrb[162].mxu1 }
0x10e9   :  { %v4530_v1 = vmul.f32 0.5, %v4526_v12  ;;  %v4483_v21 = vpop.f32.mrb[163].mxu0  ;;  %v4524_v7 = vpop.f32.mrb[163].mxu1 }
0x10ea   :  { %v4534_v45 = vmul.f32 0.5, %v4527_v63  ;;  %v4539_v46 = vmul.f32 0.5, %v4529_v43 }
0x10eb   :  { %5535 = vtanh.f32 %v4530_v1 }
0x10ec   :  { %5537 = vtanh.f32 %v4534_v45 }
0x10ed   :  { %5539 = vtanh.f32 %v4528_v62 }
0x10ee   :  { %5541 = vtanh.f32 %v4539_v46 }
0x10f5   :  { %v5536_v54 = vpop.eup %5535 }
0x10f6   :  { %v5538_v0 = vpop.eup %5537  ;;  %v4532_v59 = vadd.f32 1.0, %v5536_v54 }
0x10f7   :  { %v4536_v23 = vadd.f32 1.0, %v5538_v0  ;;  %v5540_v60 = vpop.eup %5539 }
0x10f8   :  { %v4533_v17 = vmul.f32 0.5, %v4532_v59  ;;  %v5542_v20 = vpop.eup %5541 }
0x10f9   :  { %v4537_v61 = vmul.f32 0.5, %v4536_v23  ;;  %v4541_v8 = vadd.f32 1.0, %v5542_v20 }
0x10fa   :  { %v4544_v11 = vmul.f32 %v5540_v60, %v4533_v17 }
0x10fb   :  { %v4543_v49 = vmul.f32 %v4537_v61, %v7757_v31  ;;  %v4542_v22 = vmul.f32 0.5, %v4541_v8 }
0x10fd   :  { %v4545_v40 = vadd.f32 %v4544_v11, %v4543_v49 }
0x10ff   :  { %5543 = vtanh.f32 %v4545_v40 }
0x1109   :  { %v5544_v38 = vpop.eup %5543 }
0x110a   :  { %v4547_v15 = vmul.f32 %v5544_v38, %v4542_v22 }
0x110c   :  { %v4548_v58 = vpack.c.bf16 %v4547_v15, %v4547_v15 }
0x110e   :  { %4718 = vmatmul.mubr.bf16.vlgmr.msra.gmra.mrb[164].mxu0 %v4548_v58 }
0x11e1   :  { %v5001_v31 = vpop.f32.mrb[164].mxu0 }
0x11e2   :  { %v5002_v19 = vpop.f32.mrb[165].mxu0 }
0x11e3   :  { %v5003_v42 = vadd.f32 %v5002_v19, %v5001_v31  ;;  %v5004_v53 = vpop.f32.mrb[166].mxu0 }
0x11e4   :  { %v5005_v37 = vpop.f32.mrb[167].mxu0 }
0x11e5   :  { %v4720_v3 = vadd.f32 %v5003_v42, %v4959_v9 }
0x11e7   :  { %v4725_v35 = vmax.f32 %v4720_v3, 0.0 }
0x11e9   :  { %v4726_v44 = vpack.c.bf16 %v4725_v35, %v4725_v35 }
0x11eb   :  { %5021 = vmatmul.mubr.msk.bf16.vlgmr.msra.gmra.mrb[164].mxu1 %vm434_vm0, %v4726_v44 }
0x12be   :  { %v4803_v34 = vpop.f32.mrb[164].mxu1 }
0x12bf   :  { %v4804_v32 = vadd.f32 %v4976_v26, %v4803_v34  ;;  %v5022_v25 = vpop.f32.mrb[165].mxu1 }
0x12c0   :  { %v4806_v10 = vpop.f32.mrb[166].mxu1 }
0x12c1   :  { %4810 = vst.msk [vmem:[%s7850_s13] sm:$0xff] %vm4809_vm2, %v4804_v32  ;;  %v5023_v2 = vpop.f32.mrb[167].mxu1 }
0x12c2   :  { %4815 = vsyncpa [#allocation9], 1 }
0x12c3   :  { %4816 = vsyncpa [#allocation11], 1 }
0x12c4   :  { %4817 = vsyncmov [#allocation7] }
0x12c7   :  { %s4818_s14 = vpop.sfrf %4817 }
0x12c8   :  { %p4982_p2 = scmp.ne.s32.totalorder %s4818_s14, 0 }
0x12ca   :  { %4822 = shalt.err (%p4982_p2)  }
0x12cb   :  { %4824 = vsyncmov [#allocation7 + $0x1] }
0x12ce   :  { %s4825_s1 = vpop.sfrf %4824 }
0x12cf   :  { %p4983_p3 = scmp.ne.s32.totalorder %s4825_s1, 0 }
0x12d1   :  { %4829 = shalt.err (%p4983_p3)  }
0x12d2   :  { %4831 = vsyncmov [#allocation7 + $0x2] }
0x12d5   :  { %s4832_s12 = vpop.sfrf %4831 }
0x12d6   :  { %p4984_p4 = scmp.ne.s32.totalorder %s4832_s12, 0 }
0x12d8   :  { %4836 = shalt.err (%p4984_p4)  }

</bundles_post_ra>
